<compile_context>
chip_gen: v7x
topology: tpu7x:2x2x1
jax: 0.10.0
libtpu: 0.0.40
codegen_flags: <defaults>
</compile_context>

<pallas_src>
import functools

import jax
import jax.numpy as jnp
from jax.experimental import pallas as pl
from jax.experimental.pallas import tpu as pltpu


def _round_up(x, m):
    return ((x + m - 1) // m) * m


def _fit_rows(a, rows):
    """Pad/trim axis 1 of an (N, H, OW, CC) array to exactly `rows` rows."""
    cur = a.shape[1]
    if cur > rows:
        return a[:, :rows]
    if cur < rows:
        return jnp.pad(a, ((0, 0), (0, rows - cur), (0, 0), (0, 0)))
    return a


# ---------------------------------------------------------------------------
# Fused Pallas kernel: Conv2d(4x4) [+ bias] [+ InstanceNorm2d] + activation
# ---------------------------------------------------------------------------

def _conv_block_kernel(x_ref, w_ref, b_ref, o_ref, *, row_starts, m, mode):
    """One (batch image, output-channel tile) of a 4x4 conv with fused epilogue.

    x_ref: (1, HH*OW, 4*C)  kw-unfolded (and row-phase-split for stride 2) activation, bf16
    w_ref: (4, 4*C, tn)     per-kh-tap weight slabs, bf16
    b_ref: (1, tn)          f32 bias (exactly zero for the InstanceNorm layers)
    o_ref: (1, m, tn)       m = OH*OW
    """
    tn = w_ref.shape[-1]
    acc = jnp.zeros((m, tn), jnp.float32)
    # 4 kh taps; each is a contiguous, statically-offset row range of the kw-unfolded
    # activation and contracts the full K = 4*C on the MXU with f32 accumulation.
    for kh, r0 in enumerate(row_starts):
        xs = x_ref[0, r0:r0 + m, :]
        acc = acc + jnp.dot(xs, w_ref[kh], preferred_element_type=jnp.float32)
    y = acc + b_ref[...]
    if mode == "inorm_lrelu":
        # InstanceNorm2d(affine=False, eps=1e-5) fused into the epilogue: the full spatial
        # extent of this image / channel tile is resident, so stats are one sum /
        # sum-of-squares pass in f32.  Padded (all-zero) channels stay exactly zero.
        mu = jnp.mean(y, axis=0, keepdims=True)
        var = jnp.maximum(jnp.mean(y * y, axis=0, keepdims=True) - mu * mu, 0.0)
        y = (y - mu) * jax.lax.rsqrt(var + 1e-5)
        y = jnp.where(y >= 0, y, 0.2 * y)
    elif mode == "lrelu":
        y = jnp.where(y >= 0, y, 0.2 * y)
    elif mode == "sigmoid":
        y = jax.nn.sigmoid(y)
    o_ref[0] = y.astype(o_ref.dtype)


# ---------------------------------------------------------------------------
# Wrapper: reflect pad + kw-unfold glue + one pallas_call per Block
# ---------------------------------------------------------------------------

def conv_block(x, w, b, stride, mode, out_dtype=jnp.bfloat16):
    """Conv2d(4x4, stride, padding=1, reflect) + fused epilogue as a single pallas_call.

    x: (N, H, W, Cf) bf16 NHWC activation; Cf may include trailing zero-padded channels.
    w: (OC, IC, 4, 4) f32 PyTorch-layout weight with IC <= Cf (extra channels get zero rows).
    b: (OC,) f32 bias or None.
    """
    N, H, W, Cf = x.shape
    OC, IC, KH, KW = w.shape
    assert (KH, KW) == (4, 4) and IC <= Cf
    sh, sw = stride
    Hp, Wp = H + 2, W + 2
    OH = (Hp - 4) // sh + 1
    OW = (Wp - 4) // sw + 1
    M = OH * OW
    CC = 4 * Cf

    # Reflect pad (PyTorch padding_mode='reflect', padding=(1, 1)).
    xp = jnp.pad(x, ((0, 0), (1, 1), (1, 1), (0, 0)), mode="reflect")

    # kw-unfold: the last dim becomes (kw, c), kw-major.  This is the only remaining patch
    # duplication (4x, bf16); the kh taps are folded into the kernel's reduction, so the
    # old 16x f32 im2col matrix is never materialized in HBM.
    # TODO(synk): removing this residual 4x copy needs overlapping-window / strided manual
    # DMA (memory_space=pl.ANY) for the stride-2 layers.
    cols = [xp[:, :, kw:kw + sw * (OW - 1) + 1:sw, :] for kw in range(4)]
    xw = jnp.concatenate(cols, axis=-1)                    # (N, Hp, OW, CC) bf16

    if sh == 1:
        xr, HH = xw, Hp
        row_of = lambda kh: kh
    else:
        # stride 2: split rows by parity so every kh tap is a contiguous row window.
        Hq = OH + 1
        xr = jnp.concatenate([_fit_rows(xw[:, p::2], Hq) for p in (0, 1)], axis=1)
        HH = 2 * Hq
        row_of = lambda kh: (kh & 1) * Hq + (kh >> 1)
    row_starts = tuple(row_of(kh) * OW for kh in range(4))
    xk = xr.reshape(N, HH * OW, CC)                        # bf16, flattened (row, ow) axis

    # Weights: OIHW -> (kh, kw, ic, oc); pad ic->Cf per-kw and oc->ocpad, then flatten
    # (kw, ic) kw-major to match the unfolded-activation layout.
    ocpad = _round_up(OC, 128) if OC >= 64 else _round_up(OC, 8)
    wt = jnp.transpose(w, (2, 3, 1, 0))
    wt = jnp.pad(wt, ((0, 0), (0, 0), (0, Cf - IC), (0, ocpad - OC)))
    wt = wt.reshape(4, CC, ocpad).astype(jnp.bfloat16)

    bp = jnp.zeros((1, ocpad), jnp.float32)
    if b is not None:
        bp = bp.at[0, :OC].set(b.astype(jnp.float32))

    # Lane-dense channel tiles: 256 for the wide layers, 128 otherwise; the final OC=1
    # conv pads only to 8 lanes instead of wasting 127/128 MXU columns.
    tn = 256 if ocpad % 256 == 0 else (128 if ocpad % 128 == 0 else ocpad)
    grid = (N, ocpad // tn)

    out_bytes = jnp.dtype(out_dtype).itemsize
    cost = pl.CostEstimate(
        flops=2 * N * M * CC * ocpad,
        transcendentals=(N * M * ocpad if mode == "sigmoid"
                         else (N * ocpad if mode == "inorm_lrelu" else 0)),
        bytes_accessed=xk.size * 2 + wt.size * 2 + bp.size * 4 + N * M * ocpad * out_bytes,
    )

    out = pl.pallas_call(
        functools.partial(_conv_block_kernel, row_starts=row_starts, m=M, mode=mode),
        out_shape=jax.ShapeDtypeStruct((N, M, ocpad), out_dtype),
        grid=grid,
        in_specs=[
            pl.BlockSpec((1, HH * OW, CC), lambda n, j: (n, 0, 0)),
            pl.BlockSpec((4, CC, tn), lambda n, j: (0, 0, j)),
            pl.BlockSpec((1, tn), lambda n, j: (0, j)),
        ],
        out_specs=pl.BlockSpec((1, M, tn), lambda n, j: (n, 0, j)),
        compiler_params=pltpu.CompilerParams(
            dimension_semantics=("parallel", "parallel")),
        cost_estimate=cost,
    )(xk, wt, bp)
    # TODO(synk): at real CycleGAN resolutions add an output-row tile grid axis (halo'd
    # input windows + a cross-tile stats pass for the fused norm) so the per-step block and
    # f32 accumulator stay within v7x's 64 MiB VMEM; at demo sizes whole-plane blocks are tiny.
    return out.reshape(N, OH, OW, ocpad)


# ---------------------------------------------------------------------------
# Discriminator forward (matches the PyTorch Sequential structure)
# ---------------------------------------------------------------------------

def discriminator_forward(x_nchw, params, strides):
    # NCHW (PyTorch) -> NHWC; bf16 activations between layers.
    x = jnp.transpose(x_nchw, (0, 2, 3, 1)).astype(jnp.bfloat16)

    # Block 0: conv + bias + LeakyReLU(0.2), no norm.
    w0, b0 = params[0]
    x = conv_block(x, w0, b0, strides[0], mode="lrelu")

    # Blocks 1..3: conv (bias=False in PyTorch) + InstanceNorm2d + LeakyReLU(0.2),
    # all fused into the single conv kernel's epilogue.
    for li in range(1, 4):
        w, _ = params[li]
        x = conv_block(x, w, None, strides[li], mode="inorm_lrelu")

    # Final: conv to 1 channel + bias + Sigmoid.
    w4, b4 = params[4]
    y = conv_block(x, w4, b4, (1, 1), mode="sigmoid", out_dtype=jnp.float32)
    y = y[..., :1]                       # drop padded output channels
    return jnp.transpose(y, (0, 3, 1, 2))


# ---------------------------------------------------------------------------
# Pure-JAX f32 reference (correctness sanity check)
# ---------------------------------------------------------------------------

def _ref_forward(x, params, strides):
    def conv(x, w, b, s):
        xp = jnp.pad(x, ((0, 0), (0, 0), (1, 1), (1, 1)), mode="reflect")
        y = jax.lax.conv_general_dilated(
            xp, w, window_strides=s, padding="VALID",
            dimension_numbers=("NCHW", "OIHW", "NCHW"))
        if b is not None:
            y = y + b[None, :, None, None]
        return y

    def inorm(x):
        m = jnp.mean(x, axis=(2, 3), keepdims=True)
        v = jnp.mean((x - m) ** 2, axis=(2, 3), keepdims=True)
        return (x - m) * jax.lax.rsqrt(v + 1e-5)

    def lrelu(x):
        return jnp.where(x >= 0, x, 0.2 * x)

    w0, b0 = params[0]
    x = lrelu(conv(x, w0, b0, strides[0]))
    for li in range(1, 4):
        w, _ = params[li]
        x = lrelu(inorm(conv(x, w, None, strides[li])))
    w4, b4 = params[4]
    return jax.nn.sigmoid(conv(x, w4, b4, (1, 1)))


# ---------------------------------------------------------------------------
# main
# ---------------------------------------------------------------------------

if __name__ == "__main__":
    key = jax.random.PRNGKey(0)

    channels = 3
    features = [64, 128, 256, 512]               # module defaults
    strides = [(2, 2), (2, 2), (2, 2), (1, 1)]   # module defaults (final conv is stride 1)

    layer_io = []
    ic = channels
    for f in features:
        layer_io.append((ic, f))
        ic = f
    layer_io.append((ic, 1))                     # final 1-channel conv

    params = []
    for idx, (in_c, out_c) in enumerate(layer_io):
        key, kw_, kb_ = jax.random.split(key, 3)
        w = 0.02 * jax.random.normal(kw_, (out_c, in_c, 4, 4), jnp.float32)
        if idx == 0 or idx == len(layer_io) - 1:
            b = 0.01 * jax.random.normal(kb_, (out_c,), jnp.float32)  # bias=True layers
        else:
            b = None                                                   # bias=False (use_norm)
        params.append((w, b))

    key, kx = jax.random.split(key)
    x = jax.random.normal(kx, (2, channels, 32, 32), jnp.float32)

    fwd = jax.jit(lambda xx, pp: discriminator_forward(xx, pp, strides))
    out = jax.block_until_ready(fwd(x, params))

    ref = jax.block_until_ready(_ref_forward(x, params, strides))
    assert out.shape == ref.shape, (out.shape, ref.shape)
    # bf16 MXU inputs / bf16 inter-layer activations widen the error vs. the f32 reference;
    # InstanceNorm renormalizes between layers so 5e-2 absolute on sigmoid outputs is ample.
    max_err = float(jnp.max(jnp.abs(out - ref)))
    assert max_err < 5e-2, max_err

    print("KERNEL_OK")
</pallas_src>

<mosaic_0001>
module attributes {stable_mosaic.version = 11 : i64} {
  func.func @_conv_block_kernel(%arg0: i32, %arg1: i32, %arg2: memref<1x544x12xbf16, #tpu.memory_space<vmem>>, %arg3: memref<4x12x128xbf16, #tpu.memory_space<vmem>>, %arg4: memref<1x128xf32, #tpu.memory_space<vmem>>, %arg5: memref<1x256x128xbf16, #tpu.memory_space<vmem>>) attributes {dimension_semantics = [#tpu.dimension_semantics<parallel>, #tpu.dimension_semantics<parallel>], iteration_bounds = array<i64: 2, 1>, scalar_prefetch = 0 : i64, scratch_operands = 0 : i64, tpu.core_type = #tpu.core_type<tc>, window_params = [{transform_indices = @transform_0, window_bounds = array<i64: 1, 544, 12>}, {transform_indices = @transform_1, window_bounds = array<i64: 4, 12, 128>}, {transform_indices = @transform_2, window_bounds = array<i64: 1, 128>}, {transform_indices = @transform_3, window_bounds = array<i64: 1, 256, 128>}]} {
    %cst = arith.constant 0.000000e+00 : f32
    %0 = vector.broadcast %cst : f32 to vector<256x128xf32>
    %c0 = arith.constant 0 : index
    %c0_0 = arith.constant 0 : index
    %c0_1 = arith.constant 0 : index
    %1 = vector.load %arg2[%c0, %c0_0, %c0_1] : memref<1x544x12xbf16, #tpu.memory_space<vmem>>, vector<1x256x12xbf16>
    %2 = vector.shape_cast %1 : vector<1x256x12xbf16> to vector<256x12xbf16>
    %c0_2 = arith.constant 0 : index
    %c0_3 = arith.constant 0 : index
    %c0_4 = arith.constant 0 : index
    %3 = vector.load %arg3[%c0_2, %c0_3, %c0_4] : memref<4x12x128xbf16, #tpu.memory_space<vmem>>, vector<1x12x128xbf16>
    %4 = vector.shape_cast %3 : vector<1x12x128xbf16> to vector<12x128xbf16>
    %cst_5 = arith.constant dense<0.000000e+00> : vector<256x128xf32>
    %5 = tpu.matmul %2, %4, %cst_5 {dimension_numbers = #tpu.dot_dimension_numbers<[1], [0], [0], [1], [0, 0, 1, 1], [], []>} : vector<256x12xbf16>, vector<12x128xbf16>, vector<256x128xf32> -> vector<256x128xf32>
    %6 = arith.addf %0, %5 : vector<256x128xf32>
    %c0_6 = arith.constant 0 : index
    %c272 = arith.constant 272 : index
    %c0_7 = arith.constant 0 : index
    %7 = vector.load %arg2[%c0_6, %c272, %c0_7] : memref<1x544x12xbf16, #tpu.memory_space<vmem>>, vector<1x256x12xbf16>
    %8 = vector.shape_cast %7 : vector<1x256x12xbf16> to vector<256x12xbf16>
    %c1 = arith.constant 1 : index
    %c0_8 = arith.constant 0 : index
    %c0_9 = arith.constant 0 : index
    %9 = vector.load %arg3[%c1, %c0_8, %c0_9] : memref<4x12x128xbf16, #tpu.memory_space<vmem>>, vector<1x12x128xbf16>
    %10 = vector.shape_cast %9 : vector<1x12x128xbf16> to vector<12x128xbf16>
    %cst_10 = arith.constant dense<0.000000e+00> : vector<256x128xf32>
    %11 = tpu.matmul %8, %10, %cst_10 {dimension_numbers = #tpu.dot_dimension_numbers<[1], [0], [0], [1], [0, 0, 1, 1], [], []>} : vector<256x12xbf16>, vector<12x128xbf16>, vector<256x128xf32> -> vector<256x128xf32>
    %12 = arith.addf %6, %11 : vector<256x128xf32>
    %c0_11 = arith.constant 0 : index
    %c16 = arith.constant 16 : index
    %c0_12 = arith.constant 0 : index
    %13 = vector.load %arg2[%c0_11, %c16, %c0_12] : memref<1x544x12xbf16, #tpu.memory_space<vmem>>, vector<1x256x12xbf16>
    %14 = vector.shape_cast %13 : vector<1x256x12xbf16> to vector<256x12xbf16>
    %c2 = arith.constant 2 : index
    %c0_13 = arith.constant 0 : index
    %c0_14 = arith.constant 0 : index
    %15 = vector.load %arg3[%c2, %c0_13, %c0_14] : memref<4x12x128xbf16, #tpu.memory_space<vmem>>, vector<1x12x128xbf16>
    %16 = vector.shape_cast %15 : vector<1x12x128xbf16> to vector<12x128xbf16>
    %cst_15 = arith.constant dense<0.000000e+00> : vector<256x128xf32>
    %17 = tpu.matmul %14, %16, %cst_15 {dimension_numbers = #tpu.dot_dimension_numbers<[1], [0], [0], [1], [0, 0, 1, 1], [], []>} : vector<256x12xbf16>, vector<12x128xbf16>, vector<256x128xf32> -> vector<256x128xf32>
    %18 = arith.addf %12, %17 : vector<256x128xf32>
    %c0_16 = arith.constant 0 : index
    %c288 = arith.constant 288 : index
    %c0_17 = arith.constant 0 : index
    %19 = vector.load %arg2[%c0_16, %c288, %c0_17] : memref<1x544x12xbf16, #tpu.memory_space<vmem>>, vector<1x256x12xbf16>
    %20 = vector.shape_cast %19 : vector<1x256x12xbf16> to vector<256x12xbf16>
    %c3 = arith.constant 3 : index
    %c0_18 = arith.constant 0 : index
    %c0_19 = arith.constant 0 : index
    %21 = vector.load %arg3[%c3, %c0_18, %c0_19] : memref<4x12x128xbf16, #tpu.memory_space<vmem>>, vector<1x12x128xbf16>
    %22 = vector.shape_cast %21 : vector<1x12x128xbf16> to vector<12x128xbf16>
    %cst_20 = arith.constant dense<0.000000e+00> : vector<256x128xf32>
    %23 = tpu.matmul %20, %22, %cst_20 {dimension_numbers = #tpu.dot_dimension_numbers<[1], [0], [0], [1], [0, 0, 1, 1], [], []>} : vector<256x12xbf16>, vector<12x128xbf16>, vector<256x128xf32> -> vector<256x128xf32>
    %24 = arith.addf %18, %23 : vector<256x128xf32>
    %c0_21 = arith.constant 0 : index
    %c0_22 = arith.constant 0 : index
    %25 = vector.load %arg4[%c0_21, %c0_22] : memref<1x128xf32, #tpu.memory_space<vmem>>, vector<1x128xf32>
    %26 = vector.broadcast %25 : vector<1x128xf32> to vector<256x128xf32>
    %27 = arith.addf %24, %26 : vector<256x128xf32>
    %cst_23 = arith.constant 0.000000e+00 : f32
    %28 = vector.broadcast %cst_23 : f32 to vector<256x128xf32>
    %29 = arith.cmpf oge, %27, %28 : vector<256x128xf32>
    %cst_24 = arith.constant 2.000000e-01 : f32
    %30 = vector.broadcast %cst_24 : f32 to vector<256x128xf32>
    %31 = arith.mulf %30, %27 : vector<256x128xf32>
    %32 = arith.select %29, %27, %31 : vector<256x128xi1>, vector<256x128xf32>
    %33 = arith.truncf %32 : vector<256x128xf32> to vector<256x128xbf16>
    %c0_25 = arith.constant 0 : index
    %c0_26 = arith.constant 0 : index
    %c0_27 = arith.constant 0 : index
    %34 = vector.load %arg5[%c0_25, %c0_26, %c0_27] : memref<1x256x128xbf16, #tpu.memory_space<vmem>>, vector<1x256x128xbf16>
    %35 = vector.shape_cast %34 : vector<1x256x128xbf16> to vector<256x128xbf16>
    %36 = vector.shape_cast %33 : vector<256x128xbf16> to vector<1x256x128xbf16>
    tpu.vector_store %arg5[%c0_25, %c0_26, %c0_27], %36 {strides = array<i32>} : memref<1x256x128xbf16, #tpu.memory_space<vmem>>, vector<1x256x128xbf16>,
    return
  }
  func.func @transform_0(%arg0: i32, %arg1: i32) -> (i32, i32, i32) {
    %c0_i32 = arith.constant 0 : i32
    %c0_i32_0 = arith.constant 0 : i32
    %c0_i32_1 = arith.constant 0 : i32
    return %arg0, %c0_i32, %c0_i32_0 : i32, i32, i32
  }
  func.func @transform_1(%arg0: i32, %arg1: i32) -> (i32, i32, i32) {
    %c0_i32 = arith.constant 0 : i32
    %c0_i32_0 = arith.constant 0 : i32
    %c0_i32_1 = arith.constant 0 : i32
    return %c0_i32, %c0_i32_0, %arg1 : i32, i32, i32
  }
  func.func @transform_2(%arg0: i32, %arg1: i32) -> (i32, i32) {
    %c0_i32 = arith.constant 0 : i32
    %c0_i32_0 = arith.constant 0 : i32
    return %c0_i32, %arg1 : i32, i32
  }
  func.func @transform_3(%arg0: i32, %arg1: i32) -> (i32, i32, i32) {
    %c0_i32 = arith.constant 0 : i32
    %c0_i32_0 = arith.constant 0 : i32
    return %arg0, %c0_i32, %arg1 : i32, i32, i32
  }
}

module attributes {stable_mosaic.version = 11 : i64} {
  func.func @_conv_block_kernel(%arg0: i32, %arg1: i32, %arg2: memref<1x144x512xbf16, #tpu.memory_space<vmem>>, %arg3: memref<4x512x128xbf16, #tpu.memory_space<vmem>>, %arg4: memref<1x128xf32, #tpu.memory_space<vmem>>, %arg5: memref<1x64x128xbf16, #tpu.memory_space<vmem>>) attributes {dimension_semantics = [#tpu.dimension_semantics<parallel>, #tpu.dimension_semantics<parallel>], iteration_bounds = array<i64: 2, 1>, scalar_prefetch = 0 : i64, scratch_operands = 0 : i64, tpu.core_type = #tpu.core_type<tc>, window_params = [{transform_indices = @transform_0, window_bounds = array<i64: 1, 144, 512>}, {transform_indices = @transform_1, window_bounds = array<i64: 4, 512, 128>}, {transform_indices = @transform_2, window_bounds = array<i64: 1, 128>}, {transform_indices = @transform_3, window_bounds = array<i64: 1, 64, 128>}]} {
    %cst = arith.constant 0.000000e+00 : f32
    %0 = vector.broadcast %cst : f32 to vector<64x128xf32>
    %c0 = arith.constant 0 : index
    %c0_0 = arith.constant 0 : index
    %c0_1 = arith.constant 0 : index
    %1 = vector.load %arg2[%c0, %c0_0, %c0_1] : memref<1x144x512xbf16, #tpu.memory_space<vmem>>, vector<1x64x512xbf16>
    %2 = vector.shape_cast %1 : vector<1x64x512xbf16> to vector<64x512xbf16>
    %c0_2 = arith.constant 0 : index
    %c0_3 = arith.constant 0 : index
    %c0_4 = arith.constant 0 : index
    %3 = vector.load %arg3[%c0_2, %c0_3, %c0_4] : memref<4x512x128xbf16, #tpu.memory_space<vmem>>, vector<1x512x128xbf16>
    %4 = vector.shape_cast %3 : vector<1x512x128xbf16> to vector<512x128xbf16>
    %cst_5 = arith.constant dense<0.000000e+00> : vector<64x128xf32>
    %5 = tpu.matmul %2, %4, %cst_5 {dimension_numbers = #tpu.dot_dimension_numbers<[1], [0], [0], [1], [0, 0, 1, 1], [], []>} : vector<64x512xbf16>, vector<512x128xbf16>, vector<64x128xf32> -> vector<64x128xf32>
    %6 = arith.addf %0, %5 : vector<64x128xf32>
    %c0_6 = arith.constant 0 : index
    %c72 = arith.constant 72 : index
    %c0_7 = arith.constant 0 : index
    %7 = vector.load %arg2[%c0_6, %c72, %c0_7] : memref<1x144x512xbf16, #tpu.memory_space<vmem>>, vector<1x64x512xbf16>
    %8 = vector.shape_cast %7 : vector<1x64x512xbf16> to vector<64x512xbf16>
    %c1 = arith.constant 1 : index
    %c0_8 = arith.constant 0 : index
    %c0_9 = arith.constant 0 : index
    %9 = vector.load %arg3[%c1, %c0_8, %c0_9] : memref<4x512x128xbf16, #tpu.memory_space<vmem>>, vector<1x512x128xbf16>
    %10 = vector.shape_cast %9 : vector<1x512x128xbf16> to vector<512x128xbf16>
    %cst_10 = arith.constant dense<0.000000e+00> : vector<64x128xf32>
    %11 = tpu.matmul %8, %10, %cst_10 {dimension_numbers = #tpu.dot_dimension_numbers<[1], [0], [0], [1], [0, 0, 1, 1], [], []>} : vector<64x512xbf16>, vector<512x128xbf16>, vector<64x128xf32> -> vector<64x128xf32>
    %12 = arith.addf %6, %11 : vector<64x128xf32>
    %c0_11 = arith.constant 0 : index
    %c8 = arith.constant 8 : index
    %c0_12 = arith.constant 0 : index
    %13 = vector.load %arg2[%c0_11, %c8, %c0_12] : memref<1x144x512xbf16, #tpu.memory_space<vmem>>, vector<1x64x512xbf16>
    %14 = vector.shape_cast %13 : vector<1x64x512xbf16> to vector<64x512xbf16>
    %c2 = arith.constant 2 : index
    %c0_13 = arith.constant 0 : index
    %c0_14 = arith.constant 0 : index
    %15 = vector.load %arg3[%c2, %c0_13, %c0_14] : memref<4x512x128xbf16, #tpu.memory_space<vmem>>, vector<1x512x128xbf16>
    %16 = vector.shape_cast %15 : vector<1x512x128xbf16> to vector<512x128xbf16>
    %cst_15 = arith.constant dense<0.000000e+00> : vector<64x128xf32>
    %17 = tpu.matmul %14, %16, %cst_15 {dimension_numbers = #tpu.dot_dimension_numbers<[1], [0], [0], [1], [0, 0, 1, 1], [], []>} : vector<64x512xbf16>, vector<512x128xbf16>, vector<64x128xf32> -> vector<64x128xf32>
    %18 = arith.addf %12, %17 : vector<64x128xf32>
    %c0_16 = arith.constant 0 : index
    %c80 = arith.constant 80 : index
    %c0_17 = arith.constant 0 : index
    %19 = vector.load %arg2[%c0_16, %c80, %c0_17] : memref<1x144x512xbf16, #tpu.memory_space<vmem>>, vector<1x64x512xbf16>
    %20 = vector.shape_cast %19 : vector<1x64x512xbf16> to vector<64x512xbf16>
    %c3 = arith.constant 3 : index
    %c0_18 = arith.constant 0 : index
    %c0_19 = arith.constant 0 : index
    %21 = vector.load %arg3[%c3, %c0_18, %c0_19] : memref<4x512x128xbf16, #tpu.memory_space<vmem>>, vector<1x512x128xbf16>
    %22 = vector.shape_cast %21 : vector<1x512x128xbf16> to vector<512x128xbf16>
    %cst_20 = arith.constant dense<0.000000e+00> : vector<64x128xf32>
    %23 = tpu.matmul %20, %22, %cst_20 {dimension_numbers = #tpu.dot_dimension_numbers<[1], [0], [0], [1], [0, 0, 1, 1], [], []>} : vector<64x512xbf16>, vector<512x128xbf16>, vector<64x128xf32> -> vector<64x128xf32>
    %24 = arith.addf %18, %23 : vector<64x128xf32>
    %c0_21 = arith.constant 0 : index
    %c0_22 = arith.constant 0 : index
    %25 = vector.load %arg4[%c0_21, %c0_22] : memref<1x128xf32, #tpu.memory_space<vmem>>, vector<1x128xf32>
    %26 = vector.broadcast %25 : vector<1x128xf32> to vector<64x128xf32>
    %27 = arith.addf %24, %26 : vector<64x128xf32>
    %cst_23 = arith.constant dense<0.000000e+00> : vector<128xf32>
    %28 = vector.multi_reduction <add>, %27, %cst_23 [0] : vector<64x128xf32> to vector<128xf32>
    %29 = vector.shape_cast %28 : vector<128xf32> to vector<1x128xf32>
    %cst_24 = arith.constant 6.400000e+01 : f32
    %30 = vector.broadcast %cst_24 : f32 to vector<1x128xf32>
    %31 = arith.divf %29, %30 : vector<1x128xf32>
    %32 = arith.mulf %27, %27 : vector<64x128xf32>
    %cst_25 = arith.constant dense<0.000000e+00> : vector<128xf32>
    %33 = vector.multi_reduction <add>, %32, %cst_25 [0] : vector<64x128xf32> to vector<128xf32>
    %34 = vector.shape_cast %33 : vector<128xf32> to vector<1x128xf32>
    %cst_26 = arith.constant 6.400000e+01 : f32
    %35 = vector.broadcast %cst_26 : f32 to vector<1x128xf32>
    %36 = arith.divf %34, %35 : vector<1x128xf32>
    %37 = arith.mulf %31, %31 : vector<1x128xf32>
    %38 = arith.subf %36, %37 : vector<1x128xf32>
    %cst_27 = arith.constant 0.000000e+00 : f32
    %39 = vector.broadcast %cst_27 : f32 to vector<1x128xf32>
    %40 = arith.maximumf %38, %39 : vector<1x128xf32>
    %41 = vector.broadcast %31 : vector<1x128xf32> to vector<64x128xf32>
    %42 = arith.subf %27, %41 : vector<64x128xf32>
    %cst_28 = arith.constant 9.99999974E-6 : f32
    %43 = vector.broadcast %cst_28 : f32 to vector<1x128xf32>
    %44 = arith.addf %40, %43 : vector<1x128xf32>
    %45 = math.rsqrt %44 : vector<1x128xf32>
    %46 = vector.broadcast %45 : vector<1x128xf32> to vector<64x128xf32>
    %47 = arith.mulf %42, %46 : vector<64x128xf32>
    %cst_29 = arith.constant 0.000000e+00 : f32
    %48 = vector.broadcast %cst_29 : f32 to vector<64x128xf32>
    %49 = arith.cmpf oge, %47, %48 : vector<64x128xf32>
    %cst_30 = arith.constant 2.000000e-01 : f32
    %50 = vector.broadcast %cst_30 : f32 to vector<64x128xf32>
    %51 = arith.mulf %50, %47 : vector<64x128xf32>
    %52 = arith.select %49, %47, %51 : vector<64x128xi1>, vector<64x128xf32>
    %53 = arith.truncf %52 : vector<64x128xf32> to vector<64x128xbf16>
    %c0_31 = arith.constant 0 : index
    %c0_32 = arith.constant 0 : index
    %c0_33 = arith.constant 0 : index
    %54 = vector.load %arg5[%c0_31, %c0_32, %c0_33] : memref<1x64x128xbf16, #tpu.memory_space<vmem>>, vector<1x64x128xbf16>
    %55 = vector.shape_cast %54 : vector<1x64x128xbf16> to vector<64x128xbf16>
    %56 = vector.shape_cast %53 : vector<64x128xbf16> to vector<1x64x128xbf16>
    tpu.vector_store %arg5[%c0_31, %c0_32, %c0_33], %56 {strides = array<i32>} : memref<1x64x128xbf16, #tpu.memory_space<vmem>>, vector<1x64x128xbf16>,
    return
  }
  func.func @transform_0(%arg0: i32, %arg1: i32) -> (i32, i32, i32) {
    %c0_i32 = arith.constant 0 : i32
    %c0_i32_0 = arith.constant 0 : i32
    %c0_i32_1 = arith.constant 0 : i32
    return %arg0, %c0_i32, %c0_i32_0 : i32, i32, i32
  }
  func.func @transform_1(%arg0: i32, %arg1: i32) -> (i32, i32, i32) {
    %c0_i32 = arith.constant 0 : i32
    %c0_i32_0 = arith.constant 0 : i32
    %c0_i32_1 = arith.constant 0 : i32
    return %c0_i32, %c0_i32_0, %arg1 : i32, i32, i32
  }
  func.func @transform_2(%arg0: i32, %arg1: i32) -> (i32, i32) {
    %c0_i32 = arith.constant 0 : i32
    %c0_i32_0 = arith.constant 0 : i32
    return %c0_i32, %arg1 : i32, i32
  }
  func.func @transform_3(%arg0: i32, %arg1: i32) -> (i32, i32, i32) {
    %c0_i32 = arith.constant 0 : i32
    %c0_i32_0 = arith.constant 0 : i32
    return %arg0, %c0_i32, %arg1 : i32, i32, i32
  }
}

module attributes {stable_mosaic.version = 11 : i64} {
  func.func @_conv_block_kernel(%arg0: i32, %arg1: i32, %arg2: memref<1x40x512xbf16, #tpu.memory_space<vmem>>, %arg3: memref<4x512x256xbf16, #tpu.memory_space<vmem>>, %arg4: memref<1x256xf32, #tpu.memory_space<vmem>>, %arg5: memref<1x16x256xbf16, #tpu.memory_space<vmem>>) attributes {dimension_semantics = [#tpu.dimension_semantics<parallel>, #tpu.dimension_semantics<parallel>], iteration_bounds = array<i64: 2, 1>, scalar_prefetch = 0 : i64, scratch_operands = 0 : i64, tpu.core_type = #tpu.core_type<tc>, window_params = [{transform_indices = @transform_0, window_bounds = array<i64: 1, 40, 512>}, {transform_indices = @transform_1, window_bounds = array<i64: 4, 512, 256>}, {transform_indices = @transform_2, window_bounds = array<i64: 1, 256>}, {transform_indices = @transform_3, window_bounds = array<i64: 1, 16, 256>}]} {
    %cst = arith.constant 0.000000e+00 : f32
    %0 = vector.broadcast %cst : f32 to vector<16x256xf32>
    %c0 = arith.constant 0 : index
    %c0_0 = arith.constant 0 : index
    %c0_1 = arith.constant 0 : index
    %1 = vector.load %arg2[%c0, %c0_0, %c0_1] : memref<1x40x512xbf16, #tpu.memory_space<vmem>>, vector<1x16x512xbf16>
    %2 = vector.shape_cast %1 : vector<1x16x512xbf16> to vector<16x512xbf16>
    %c0_2 = arith.constant 0 : index
    %c0_3 = arith.constant 0 : index
    %c0_4 = arith.constant 0 : index
    %3 = vector.load %arg3[%c0_2, %c0_3, %c0_4] : memref<4x512x256xbf16, #tpu.memory_space<vmem>>, vector<1x512x256xbf16>
    %4 = vector.shape_cast %3 : vector<1x512x256xbf16> to vector<512x256xbf16>
    %cst_5 = arith.constant dense<0.000000e+00> : vector<16x256xf32>
    %5 = tpu.matmul %2, %4, %cst_5 {dimension_numbers = #tpu.dot_dimension_numbers<[1], [0], [0], [1], [0, 0, 1, 1], [], []>} : vector<16x512xbf16>, vector<512x256xbf16>, vector<16x256xf32> -> vector<16x256xf32>
    %6 = arith.addf %0, %5 : vector<16x256xf32>
    %c0_6 = arith.constant 0 : index
    %c20 = arith.constant 20 : index
    %c0_7 = arith.constant 0 : index
    %7 = vector.load %arg2[%c0_6, %c20, %c0_7] : memref<1x40x512xbf16, #tpu.memory_space<vmem>>, vector<1x16x512xbf16>
    %8 = vector.shape_cast %7 : vector<1x16x512xbf16> to vector<16x512xbf16>
    %c1 = arith.constant 1 : index
    %c0_8 = arith.constant 0 : index
    %c0_9 = arith.constant 0 : index
    %9 = vector.load %arg3[%c1, %c0_8, %c0_9] : memref<4x512x256xbf16, #tpu.memory_space<vmem>>, vector<1x512x256xbf16>
    %10 = vector.shape_cast %9 : vector<1x512x256xbf16> to vector<512x256xbf16>
    %cst_10 = arith.constant dense<0.000000e+00> : vector<16x256xf32>
    %11 = tpu.matmul %8, %10, %cst_10 {dimension_numbers = #tpu.dot_dimension_numbers<[1], [0], [0], [1], [0, 0, 1, 1], [], []>} : vector<16x512xbf16>, vector<512x256xbf16>, vector<16x256xf32> -> vector<16x256xf32>
    %12 = arith.addf %6, %11 : vector<16x256xf32>
    %c0_11 = arith.constant 0 : index
    %c4 = arith.constant 4 : index
    %c0_12 = arith.constant 0 : index
    %13 = vector.load %arg2[%c0_11, %c4, %c0_12] : memref<1x40x512xbf16, #tpu.memory_space<vmem>>, vector<1x16x512xbf16>
    %14 = vector.shape_cast %13 : vector<1x16x512xbf16> to vector<16x512xbf16>
    %c2 = arith.constant 2 : index
    %c0_13 = arith.constant 0 : index
    %c0_14 = arith.constant 0 : index
    %15 = vector.load %arg3[%c2, %c0_13, %c0_14] : memref<4x512x256xbf16, #tpu.memory_space<vmem>>, vector<1x512x256xbf16>
    %16 = vector.shape_cast %15 : vector<1x512x256xbf16> to vector<512x256xbf16>
    %cst_15 = arith.constant dense<0.000000e+00> : vector<16x256xf32>
    %17 = tpu.matmul %14, %16, %cst_15 {dimension_numbers = #tpu.dot_dimension_numbers<[1], [0], [0], [1], [0, 0, 1, 1], [], []>} : vector<16x512xbf16>, vector<512x256xbf16>, vector<16x256xf32> -> vector<16x256xf32>
    %18 = arith.addf %12, %17 : vector<16x256xf32>
    %c0_16 = arith.constant 0 : index
    %c24 = arith.constant 24 : index
    %c0_17 = arith.constant 0 : index
    %19 = vector.load %arg2[%c0_16, %c24, %c0_17] : memref<1x40x512xbf16, #tpu.memory_space<vmem>>, vector<1x16x512xbf16>
    %20 = vector.shape_cast %19 : vector<1x16x512xbf16> to vector<16x512xbf16>
    %c3 = arith.constant 3 : index
    %c0_18 = arith.constant 0 : index
    %c0_19 = arith.constant 0 : index
    %21 = vector.load %arg3[%c3, %c0_18, %c0_19] : memref<4x512x256xbf16, #tpu.memory_space<vmem>>, vector<1x512x256xbf16>
    %22 = vector.shape_cast %21 : vector<1x512x256xbf16> to vector<512x256xbf16>
    %cst_20 = arith.constant dense<0.000000e+00> : vector<16x256xf32>
    %23 = tpu.matmul %20, %22, %cst_20 {dimension_numbers = #tpu.dot_dimension_numbers<[1], [0], [0], [1], [0, 0, 1, 1], [], []>} : vector<16x512xbf16>, vector<512x256xbf16>, vector<16x256xf32> -> vector<16x256xf32>
    %24 = arith.addf %18, %23 : vector<16x256xf32>
    %c0_21 = arith.constant 0 : index
    %c0_22 = arith.constant 0 : index
    %25 = vector.load %arg4[%c0_21, %c0_22] : memref<1x256xf32, #tpu.memory_space<vmem>>, vector<1x256xf32>
    %26 = vector.broadcast %25 : vector<1x256xf32> to vector<16x256xf32>
    %27 = arith.addf %24, %26 : vector<16x256xf32>
    %cst_23 = arith.constant dense<0.000000e+00> : vector<256xf32>
    %28 = vector.multi_reduction <add>, %27, %cst_23 [0] : vector<16x256xf32> to vector<256xf32>
    %29 = vector.shape_cast %28 : vector<256xf32> to vector<1x256xf32>
    %cst_24 = arith.constant 1.600000e+01 : f32
    %30 = vector.broadcast %cst_24 : f32 to vector<1x256xf32>
    %31 = arith.divf %29, %30 : vector<1x256xf32>
    %32 = arith.mulf %27, %27 : vector<16x256xf32>
    %cst_25 = arith.constant dense<0.000000e+00> : vector<256xf32>
    %33 = vector.multi_reduction <add>, %32, %cst_25 [0] : vector<16x256xf32> to vector<256xf32>
    %34 = vector.shape_cast %33 : vector<256xf32> to vector<1x256xf32>
    %cst_26 = arith.constant 1.600000e+01 : f32
    %35 = vector.broadcast %cst_26 : f32 to vector<1x256xf32>
    %36 = arith.divf %34, %35 : vector<1x256xf32>
    %37 = arith.mulf %31, %31 : vector<1x256xf32>
    %38 = arith.subf %36, %37 : vector<1x256xf32>
    %cst_27 = arith.constant 0.000000e+00 : f32
    %39 = vector.broadcast %cst_27 : f32 to vector<1x256xf32>
    %40 = arith.maximumf %38, %39 : vector<1x256xf32>
    %41 = vector.broadcast %31 : vector<1x256xf32> to vector<16x256xf32>
    %42 = arith.subf %27, %41 : vector<16x256xf32>
    %cst_28 = arith.constant 9.99999974E-6 : f32
    %43 = vector.broadcast %cst_28 : f32 to vector<1x256xf32>
    %44 = arith.addf %40, %43 : vector<1x256xf32>
    %45 = math.rsqrt %44 : vector<1x256xf32>
    %46 = vector.broadcast %45 : vector<1x256xf32> to vector<16x256xf32>
    %47 = arith.mulf %42, %46 : vector<16x256xf32>
    %cst_29 = arith.constant 0.000000e+00 : f32
    %48 = vector.broadcast %cst_29 : f32 to vector<16x256xf32>
    %49 = arith.cmpf oge, %47, %48 : vector<16x256xf32>
    %cst_30 = arith.constant 2.000000e-01 : f32
    %50 = vector.broadcast %cst_30 : f32 to vector<16x256xf32>
    %51 = arith.mulf %50, %47 : vector<16x256xf32>
    %52 = arith.select %49, %47, %51 : vector<16x256xi1>, vector<16x256xf32>
    %53 = arith.truncf %52 : vector<16x256xf32> to vector<16x256xbf16>
    %c0_31 = arith.constant 0 : index
    %c0_32 = arith.constant 0 : index
    %c0_33 = arith.constant 0 : index
    %54 = vector.load %arg5[%c0_31, %c0_32, %c0_33] : memref<1x16x256xbf16, #tpu.memory_space<vmem>>, vector<1x16x256xbf16>
    %55 = vector.shape_cast %54 : vector<1x16x256xbf16> to vector<16x256xbf16>
    %56 = vector.shape_cast %53 : vector<16x256xbf16> to vector<1x16x256xbf16>
    tpu.vector_store %arg5[%c0_31, %c0_32, %c0_33], %56 {strides = array<i32>} : memref<1x16x256xbf16, #tpu.memory_space<vmem>>, vector<1x16x256xbf16>,
    return
  }
  func.func @transform_0(%arg0: i32, %arg1: i32) -> (i32, i32, i32) {
    %c0_i32 = arith.constant 0 : i32
    %c0_i32_0 = arith.constant 0 : i32
    %c0_i32_1 = arith.constant 0 : i32
    return %arg0, %c0_i32, %c0_i32_0 : i32, i32, i32
  }
  func.func @transform_1(%arg0: i32, %arg1: i32) -> (i32, i32, i32) {
    %c0_i32 = arith.constant 0 : i32
    %c0_i32_0 = arith.constant 0 : i32
    %c0_i32_1 = arith.constant 0 : i32
    return %c0_i32, %c0_i32_0, %arg1 : i32, i32, i32
  }
  func.func @transform_2(%arg0: i32, %arg1: i32) -> (i32, i32) {
    %c0_i32 = arith.constant 0 : i32
    %c0_i32_0 = arith.constant 0 : i32
    return %c0_i32, %arg1 : i32, i32
  }
  func.func @transform_3(%arg0: i32, %arg1: i32) -> (i32, i32, i32) {
    %c0_i32 = arith.constant 0 : i32
    %c0_i32_0 = arith.constant 0 : i32
    return %arg0, %c0_i32, %arg1 : i32, i32, i32
  }
}

module attributes {stable_mosaic.version = 11 : i64} {
  func.func @_conv_block_kernel(%arg0: i32, %arg1: i32, %arg2: memref<1x18x1024xbf16, #tpu.memory_space<vmem>>, %arg3: memref<4x1024x256xbf16, #tpu.memory_space<vmem>>, %arg4: memref<1x256xf32, #tpu.memory_space<vmem>>, %arg5: memref<1x9x256xbf16, #tpu.memory_space<vmem>>) attributes {dimension_semantics = [#tpu.dimension_semantics<parallel>, #tpu.dimension_semantics<parallel>], iteration_bounds = array<i64: 2, 2>, scalar_prefetch = 0 : i64, scratch_operands = 0 : i64, tpu.core_type = #tpu.core_type<tc>, window_params = [{transform_indices = @transform_0, window_bounds = array<i64: 1, 18, 1024>}, {transform_indices = @transform_1, window_bounds = array<i64: 4, 1024, 256>}, {transform_indices = @transform_2, window_bounds = array<i64: 1, 256>}, {transform_indices = @transform_3, window_bounds = array<i64: 1, 9, 256>}]} {
    %cst = arith.constant 0.000000e+00 : f32
    %0 = vector.broadcast %cst : f32 to vector<9x256xf32>
    %c0 = arith.constant 0 : index
    %c0_0 = arith.constant 0 : index
    %c0_1 = arith.constant 0 : index
    %1 = vector.load %arg2[%c0, %c0_0, %c0_1] : memref<1x18x1024xbf16, #tpu.memory_space<vmem>>, vector<1x9x1024xbf16>
    %2 = vector.shape_cast %1 : vector<1x9x1024xbf16> to vector<9x1024xbf16>
    %c0_2 = arith.constant 0 : index
    %c0_3 = arith.constant 0 : index
    %c0_4 = arith.constant 0 : index
    %3 = vector.load %arg3[%c0_2, %c0_3, %c0_4] : memref<4x1024x256xbf16, #tpu.memory_space<vmem>>, vector<1x1024x256xbf16>
    %4 = vector.shape_cast %3 : vector<1x1024x256xbf16> to vector<1024x256xbf16>
    %cst_5 = arith.constant dense<0.000000e+00> : vector<9x256xf32>
    %5 = tpu.matmul %2, %4, %cst_5 {dimension_numbers = #tpu.dot_dimension_numbers<[1], [0], [0], [1], [0, 0, 1, 1], [], []>} : vector<9x1024xbf16>, vector<1024x256xbf16>, vector<9x256xf32> -> vector<9x256xf32>
    %6 = arith.addf %0, %5 : vector<9x256xf32>
    %c0_6 = arith.constant 0 : index
    %c3 = arith.constant 3 : index
    %c0_7 = arith.constant 0 : index
    %7 = vector.load %arg2[%c0_6, %c3, %c0_7] : memref<1x18x1024xbf16, #tpu.memory_space<vmem>>, vector<1x9x1024xbf16>
    %8 = vector.shape_cast %7 : vector<1x9x1024xbf16> to vector<9x1024xbf16>
    %c1 = arith.constant 1 : index
    %c0_8 = arith.constant 0 : index
    %c0_9 = arith.constant 0 : index
    %9 = vector.load %arg3[%c1, %c0_8, %c0_9] : memref<4x1024x256xbf16, #tpu.memory_space<vmem>>, vector<1x1024x256xbf16>
    %10 = vector.shape_cast %9 : vector<1x1024x256xbf16> to vector<1024x256xbf16>
    %cst_10 = arith.constant dense<0.000000e+00> : vector<9x256xf32>
    %11 = tpu.matmul %8, %10, %cst_10 {dimension_numbers = #tpu.dot_dimension_numbers<[1], [0], [0], [1], [0, 0, 1, 1], [], []>} : vector<9x1024xbf16>, vector<1024x256xbf16>, vector<9x256xf32> -> vector<9x256xf32>
    %12 = arith.addf %6, %11 : vector<9x256xf32>
    %c0_11 = arith.constant 0 : index
    %c6 = arith.constant 6 : index
    %c0_12 = arith.constant 0 : index
    %13 = vector.load %arg2[%c0_11, %c6, %c0_12] : memref<1x18x1024xbf16, #tpu.memory_space<vmem>>, vector<1x9x1024xbf16>
    %14 = vector.shape_cast %13 : vector<1x9x1024xbf16> to vector<9x1024xbf16>
    %c2 = arith.constant 2 : index
    %c0_13 = arith.constant 0 : index
    %c0_14 = arith.constant 0 : index
    %15 = vector.load %arg3[%c2, %c0_13, %c0_14] : memref<4x1024x256xbf16, #tpu.memory_space<vmem>>, vector<1x1024x256xbf16>
    %16 = vector.shape_cast %15 : vector<1x1024x256xbf16> to vector<1024x256xbf16>
    %cst_15 = arith.constant dense<0.000000e+00> : vector<9x256xf32>
    %17 = tpu.matmul %14, %16, %cst_15 {dimension_numbers = #tpu.dot_dimension_numbers<[1], [0], [0], [1], [0, 0, 1, 1], [], []>} : vector<9x1024xbf16>, vector<1024x256xbf16>, vector<9x256xf32> -> vector<9x256xf32>
    %18 = arith.addf %12, %17 : vector<9x256xf32>
    %c0_16 = arith.constant 0 : index
    %c9 = arith.constant 9 : index
    %c0_17 = arith.constant 0 : index
    %19 = vector.load %arg2[%c0_16, %c9, %c0_17] : memref<1x18x1024xbf16, #tpu.memory_space<vmem>>, vector<1x9x1024xbf16>
    %20 = vector.shape_cast %19 : vector<1x9x1024xbf16> to vector<9x1024xbf16>
    %c3_18 = arith.constant 3 : index
    %c0_19 = arith.constant 0 : index
    %c0_20 = arith.constant 0 : index
    %21 = vector.load %arg3[%c3_18, %c0_19, %c0_20] : memref<4x1024x256xbf16, #tpu.memory_space<vmem>>, vector<1x1024x256xbf16>
    %22 = vector.shape_cast %21 : vector<1x1024x256xbf16> to vector<1024x256xbf16>
    %cst_21 = arith.constant dense<0.000000e+00> : vector<9x256xf32>
    %23 = tpu.matmul %20, %22, %cst_21 {dimension_numbers = #tpu.dot_dimension_numbers<[1], [0], [0], [1], [0, 0, 1, 1], [], []>} : vector<9x1024xbf16>, vector<1024x256xbf16>, vector<9x256xf32> -> vector<9x256xf32>
    %24 = arith.addf %18, %23 : vector<9x256xf32>
    %c0_22 = arith.constant 0 : index
    %c0_23 = arith.constant 0 : index
    %25 = vector.load %arg4[%c0_22, %c0_23] : memref<1x256xf32, #tpu.memory_space<vmem>>, vector<1x256xf32>
    %26 = vector.broadcast %25 : vector<1x256xf32> to vector<9x256xf32>
    %27 = arith.addf %24, %26 : vector<9x256xf32>
    %cst_24 = arith.constant dense<0.000000e+00> : vector<256xf32>
    %28 = vector.multi_reduction <add>, %27, %cst_24 [0] : vector<9x256xf32> to vector<256xf32>
    %29 = vector.shape_cast %28 : vector<256xf32> to vector<1x256xf32>
    %cst_25 = arith.constant 9.000000e+00 : f32
    %30 = vector.broadcast %cst_25 : f32 to vector<1x256xf32>
    %31 = arith.divf %29, %30 : vector<1x256xf32>
    %32 = arith.mulf %27, %27 : vector<9x256xf32>
    %cst_26 = arith.constant dense<0.000000e+00> : vector<256xf32>
    %33 = vector.multi_reduction <add>, %32, %cst_26 [0] : vector<9x256xf32> to vector<256xf32>
    %34 = vector.shape_cast %33 : vector<256xf32> to vector<1x256xf32>
    %cst_27 = arith.constant 9.000000e+00 : f32
    %35 = vector.broadcast %cst_27 : f32 to vector<1x256xf32>
    %36 = arith.divf %34, %35 : vector<1x256xf32>
    %37 = arith.mulf %31, %31 : vector<1x256xf32>
    %38 = arith.subf %36, %37 : vector<1x256xf32>
    %cst_28 = arith.constant 0.000000e+00 : f32
    %39 = vector.broadcast %cst_28 : f32 to vector<1x256xf32>
    %40 = arith.maximumf %38, %39 : vector<1x256xf32>
    %41 = vector.broadcast %31 : vector<1x256xf32> to vector<9x256xf32>
    %42 = arith.subf %27, %41 : vector<9x256xf32>
    %cst_29 = arith.constant 9.99999974E-6 : f32
    %43 = vector.broadcast %cst_29 : f32 to vector<1x256xf32>
    %44 = arith.addf %40, %43 : vector<1x256xf32>
    %45 = math.rsqrt %44 : vector<1x256xf32>
    %46 = vector.broadcast %45 : vector<1x256xf32> to vector<9x256xf32>
    %47 = arith.mulf %42, %46 : vector<9x256xf32>
    %cst_30 = arith.constant 0.000000e+00 : f32
    %48 = vector.broadcast %cst_30 : f32 to vector<9x256xf32>
    %49 = arith.cmpf oge, %47, %48 : vector<9x256xf32>
    %cst_31 = arith.constant 2.000000e-01 : f32
    %50 = vector.broadcast %cst_31 : f32 to vector<9x256xf32>
    %51 = arith.mulf %50, %47 : vector<9x256xf32>
    %52 = arith.select %49, %47, %51 : vector<9x256xi1>, vector<9x256xf32>
    %53 = arith.truncf %52 : vector<9x256xf32> to vector<9x256xbf16>
    %c0_32 = arith.constant 0 : index
    %c0_33 = arith.constant 0 : index
    %c0_34 = arith.constant 0 : index
    %54 = vector.load %arg5[%c0_32, %c0_33, %c0_34] : memref<1x9x256xbf16, #tpu.memory_space<vmem>>, vector<1x9x256xbf16>
    %55 = vector.shape_cast %54 : vector<1x9x256xbf16> to vector<9x256xbf16>
    %56 = vector.shape_cast %53 : vector<9x256xbf16> to vector<1x9x256xbf16>
    tpu.vector_store %arg5[%c0_32, %c0_33, %c0_34], %56 {strides = array<i32>} : memref<1x9x256xbf16, #tpu.memory_space<vmem>>, vector<1x9x256xbf16>,
    return
  }
  func.func @transform_0(%arg0: i32, %arg1: i32) -> (i32, i32, i32) {
    %c0_i32 = arith.constant 0 : i32
    %c0_i32_0 = arith.constant 0 : i32
    %c0_i32_1 = arith.constant 0 : i32
    return %arg0, %c0_i32, %c0_i32_0 : i32, i32, i32
  }
  func.func @transform_1(%arg0: i32, %arg1: i32) -> (i32, i32, i32) {
    %c0_i32 = arith.constant 0 : i32
    %c0_i32_0 = arith.constant 0 : i32
    %c0_i32_1 = arith.constant 0 : i32
    return %c0_i32, %c0_i32_0, %arg1 : i32, i32, i32
  }
  func.func @transform_2(%arg0: i32, %arg1: i32) -> (i32, i32) {
    %c0_i32 = arith.constant 0 : i32
    %c0_i32_0 = arith.constant 0 : i32
    return %c0_i32, %arg1 : i32, i32
  }
  func.func @transform_3(%arg0: i32, %arg1: i32) -> (i32, i32, i32) {
    %c0_i32 = arith.constant 0 : i32
    %c0_i32_0 = arith.constant 0 : i32
    return %arg0, %c0_i32, %arg1 : i32, i32, i32
  }
}

module attributes {stable_mosaic.version = 11 : i64} {
  func.func @_conv_block_kernel(%arg0: i32, %arg1: i32, %arg2: memref<1x10x2048xbf16, #tpu.memory_space<vmem>>, %arg3: memref<4x2048x8xbf16, #tpu.memory_space<vmem>>, %arg4: memref<1x8xf32, #tpu.memory_space<vmem>>, %arg5: memref<1x4x8xf32, #tpu.memory_space<vmem>>) attributes {dimension_semantics = [#tpu.dimension_semantics<parallel>, #tpu.dimension_semantics<parallel>], iteration_bounds = array<i64: 2, 1>, scalar_prefetch = 0 : i64, scratch_operands = 0 : i64, tpu.core_type = #tpu.core_type<tc>, window_params = [{transform_indices = @transform_0, window_bounds = array<i64: 1, 10, 2048>}, {transform_indices = @transform_1, window_bounds = array<i64: 4, 2048, 8>}, {transform_indices = @transform_2, window_bounds = array<i64: 1, 8>}, {transform_indices = @transform_3, window_bounds = array<i64: 1, 4, 8>}]} {
    %cst = arith.constant 0.000000e+00 : f32
    %0 = vector.broadcast %cst : f32 to vector<4x8xf32>
    %c0 = arith.constant 0 : index
    %c0_0 = arith.constant 0 : index
    %c0_1 = arith.constant 0 : index
    %1 = vector.load %arg2[%c0, %c0_0, %c0_1] : memref<1x10x2048xbf16, #tpu.memory_space<vmem>>, vector<1x4x2048xbf16>
    %2 = vector.shape_cast %1 : vector<1x4x2048xbf16> to vector<4x2048xbf16>
    %c0_2 = arith.constant 0 : index
    %c0_3 = arith.constant 0 : index
    %c0_4 = arith.constant 0 : index
    %3 = vector.load %arg3[%c0_2, %c0_3, %c0_4] : memref<4x2048x8xbf16, #tpu.memory_space<vmem>>, vector<1x2048x8xbf16>
    %4 = vector.shape_cast %3 : vector<1x2048x8xbf16> to vector<2048x8xbf16>
    %cst_5 = arith.constant dense<0.000000e+00> : vector<4x8xf32>
    %5 = tpu.matmul %2, %4, %cst_5 {dimension_numbers = #tpu.dot_dimension_numbers<[1], [0], [0], [1], [0, 0, 1, 1], [], []>} : vector<4x2048xbf16>, vector<2048x8xbf16>, vector<4x8xf32> -> vector<4x8xf32>
    %6 = arith.addf %0, %5 : vector<4x8xf32>
    %c0_6 = arith.constant 0 : index
    %c2 = arith.constant 2 : index
    %c0_7 = arith.constant 0 : index
    %7 = vector.load %arg2[%c0_6, %c2, %c0_7] : memref<1x10x2048xbf16, #tpu.memory_space<vmem>>, vector<1x4x2048xbf16>
    %8 = vector.shape_cast %7 : vector<1x4x2048xbf16> to vector<4x2048xbf16>
    %c1 = arith.constant 1 : index
    %c0_8 = arith.constant 0 : index
    %c0_9 = arith.constant 0 : index
    %9 = vector.load %arg3[%c1, %c0_8, %c0_9] : memref<4x2048x8xbf16, #tpu.memory_space<vmem>>, vector<1x2048x8xbf16>
    %10 = vector.shape_cast %9 : vector<1x2048x8xbf16> to vector<2048x8xbf16>
    %cst_10 = arith.constant dense<0.000000e+00> : vector<4x8xf32>
    %11 = tpu.matmul %8, %10, %cst_10 {dimension_numbers = #tpu.dot_dimension_numbers<[1], [0], [0], [1], [0, 0, 1, 1], [], []>} : vector<4x2048xbf16>, vector<2048x8xbf16>, vector<4x8xf32> -> vector<4x8xf32>
    %12 = arith.addf %6, %11 : vector<4x8xf32>
    %c0_11 = arith.constant 0 : index
    %c4 = arith.constant 4 : index
    %c0_12 = arith.constant 0 : index
    %13 = vector.load %arg2[%c0_11, %c4, %c0_12] : memref<1x10x2048xbf16, #tpu.memory_space<vmem>>, vector<1x4x2048xbf16>
    %14 = vector.shape_cast %13 : vector<1x4x2048xbf16> to vector<4x2048xbf16>
    %c2_13 = arith.constant 2 : index
    %c0_14 = arith.constant 0 : index
    %c0_15 = arith.constant 0 : index
    %15 = vector.load %arg3[%c2_13, %c0_14, %c0_15] : memref<4x2048x8xbf16, #tpu.memory_space<vmem>>, vector<1x2048x8xbf16>
    %16 = vector.shape_cast %15 : vector<1x2048x8xbf16> to vector<2048x8xbf16>
    %cst_16 = arith.constant dense<0.000000e+00> : vector<4x8xf32>
    %17 = tpu.matmul %14, %16, %cst_16 {dimension_numbers = #tpu.dot_dimension_numbers<[1], [0], [0], [1], [0, 0, 1, 1], [], []>} : vector<4x2048xbf16>, vector<2048x8xbf16>, vector<4x8xf32> -> vector<4x8xf32>
    %18 = arith.addf %12, %17 : vector<4x8xf32>
    %c0_17 = arith.constant 0 : index
    %c6 = arith.constant 6 : index
    %c0_18 = arith.constant 0 : index
    %19 = vector.load %arg2[%c0_17, %c6, %c0_18] : memref<1x10x2048xbf16, #tpu.memory_space<vmem>>, vector<1x4x2048xbf16>
    %20 = vector.shape_cast %19 : vector<1x4x2048xbf16> to vector<4x2048xbf16>
    %c3 = arith.constant 3 : index
    %c0_19 = arith.constant 0 : index
    %c0_20 = arith.constant 0 : index
    %21 = vector.load %arg3[%c3, %c0_19, %c0_20] : memref<4x2048x8xbf16, #tpu.memory_space<vmem>>, vector<1x2048x8xbf16>
    %22 = vector.shape_cast %21 : vector<1x2048x8xbf16> to vector<2048x8xbf16>
    %cst_21 = arith.constant dense<0.000000e+00> : vector<4x8xf32>
    %23 = tpu.matmul %20, %22, %cst_21 {dimension_numbers = #tpu.dot_dimension_numbers<[1], [0], [0], [1], [0, 0, 1, 1], [], []>} : vector<4x2048xbf16>, vector<2048x8xbf16>, vector<4x8xf32> -> vector<4x8xf32>
    %24 = arith.addf %18, %23 : vector<4x8xf32>
    %c0_22 = arith.constant 0 : index
    %c0_23 = arith.constant 0 : index
    %25 = vector.load %arg4[%c0_22, %c0_23] : memref<1x8xf32, #tpu.memory_space<vmem>>, vector<1x8xf32>
    %26 = vector.broadcast %25 : vector<1x8xf32> to vector<4x8xf32>
    %27 = arith.addf %24, %26 : vector<4x8xf32>
    %28 = arith.negf %27 : vector<4x8xf32>
    %29 = math.exp %28 : vector<4x8xf32>
    %cst_24 = arith.constant 1.000000e+00 : f32
    %30 = vector.broadcast %cst_24 : f32 to vector<4x8xf32>
    %31 = arith.addf %30, %29 : vector<4x8xf32>
    %32 = arith.divf %30, %31 : vector<4x8xf32>
    %c0_25 = arith.constant 0 : index
    %c0_26 = arith.constant 0 : index
    %c0_27 = arith.constant 0 : index
    %33 = vector.load %arg5[%c0_25, %c0_26, %c0_27] : memref<1x4x8xf32, #tpu.memory_space<vmem>>, vector<1x4x8xf32>
    %34 = vector.shape_cast %33 : vector<1x4x8xf32> to vector<4x8xf32>
    %35 = vector.shape_cast %32 : vector<4x8xf32> to vector<1x4x8xf32>
    tpu.vector_store %arg5[%c0_25, %c0_26, %c0_27], %35 {strides = array<i32>} : memref<1x4x8xf32, #tpu.memory_space<vmem>>, vector<1x4x8xf32>,
    return
  }
  func.func @transform_0(%arg0: i32, %arg1: i32) -> (i32, i32, i32) {
    %c0_i32 = arith.constant 0 : i32
    %c0_i32_0 = arith.constant 0 : i32
    %c0_i32_1 = arith.constant 0 : i32
    return %arg0, %c0_i32, %c0_i32_0 : i32, i32, i32
  }
  func.func @transform_1(%arg0: i32, %arg1: i32) -> (i32, i32, i32) {
    %c0_i32 = arith.constant 0 : i32
    %c0_i32_0 = arith.constant 0 : i32
    %c0_i32_1 = arith.constant 0 : i32
    return %c0_i32, %c0_i32_0, %arg1 : i32, i32, i32
  }
  func.func @transform_2(%arg0: i32, %arg1: i32) -> (i32, i32) {
    %c0_i32 = arith.constant 0 : i32
    %c0_i32_0 = arith.constant 0 : i32
    return %c0_i32, %arg1 : i32, i32
  }
  func.func @transform_3(%arg0: i32, %arg1: i32) -> (i32, i32, i32) {
    %c0_i32 = arith.constant 0 : i32
    %c0_i32_0 = arith.constant 0 : i32
    return %arg0, %c0_i32, %arg1 : i32, i32, i32
  }
}

</mosaic_0001>

<bundles_post_ra>
// kernel: _lambda_.5
= control target key start
LH: loop header
LB: loop body
LE: loop exit
PB: predicated region body
PF: predicated region fallthrough
CT: control target
= control target key end

     0   :  { %s2768_s12 = smov 0   ;;  %s2770_s13 = smov 0   ;;  %s3010_s0 = inlined_call_operand.vmem [shape: bf16[2,544,12], index: 0, kind: input, shape index: {}]   ;;  %s3011_s1 = inlined_call_operand.vmem [shape: bf16[4,12,128], index: 1, kind: input, shape index: {}]   ;;  %s3012_s2 = inlined_call_operand.vmem [shape: f32[1,128], index: 2, kind: input, shape index: {}]   ;;  %s3013_s3 = inlined_call_operand.vmem [shape: bf16[2,256,128], index: 3, kind: output, shape index: {}]  }
   0x1   :  { %s2772_s14 = smov 0  }
   0x2 LB: > { %s25_s15 = sadd.s32 1, %s2742_s13  ;;  %p2022_p0 = scmp.ge.s32.totalorder %s2746_s14, 1  ;;  %s2746_s14 = sphi %s2772_s14, %s13_s14   ;;  %s2742_s13 = sphi %s2770_s13, %s3015_s13   ;;  %s2738_s12 = sphi %s2768_s12, %s3014_s12  }
   0x3   : > { %p27_p1 = scmp.ge.s32.totalorder %s25_s15, 2  ;;  %p168_p2 = scmp.lt.s32.totalorder %s2746_s14, 3 }
   0x5   : > { %s3017_s15 = smov (%p27_p1, %s25_s15), 0  ;;  %p169_p3 = pnand %p2022_p0, %p168_p2 }
   0x6   : > { %v2656_v0 = vld [vmem:[%s3011_s1 + $0x8] sm:$0x3f] (!%p169_p3)   ;;  %vm426_vm0 = vcmask (!%p169_p3), 1045504   ;;  %p202_p4 = scmp.lt.s32.totalorder (!%p169_p3), %s2738_s12, 1  ;;  %v2657_v1 = vld [vmem:[%s3011_s1 + $0x10] sm:$0x3f] (!%p169_p3)  }
   0x7   : > { %172 = sbr.rel (%p169_p3) target bundleno = 366 (0x16e), region = 32  ;;  %2627 = vmatprep.subr.msk.bf16.mxu1 (!%p169_p3), %vm426_vm0, %v2656_v0  ;;  %v428_v2 = vsel (!%p169_p3), %vm426_vm0, %v2656_v0, 0  ;;  %v2659_v3 = vld [vmem:[%s3011_s1] sm:$0x3f] (!%p169_p3)   ;;  %2629 = vmatprep.subr.msk.bf16.mxu0 (!%p169_p3), %vm426_vm0, %v2657_v1  ;;  %v1057_v4 = vsel (!%p169_p3), %vm426_vm0, %v2657_v1, 0  ;;  %vm377_vm1 = vcmask (!%p169_p3), 97280  }
   0x8   : > { %2396 = vmatpush3.bf16.msra.mxu1 (!%p169_p3), %v428_v2  ;;  %2464 = vmatpush3.bf16.msra.mxu0 (!%p169_p3), %v1057_v4  ;;  %v2661_v5 = vld [vmem:[%s3011_s1 + $0x18] sm:$0x3f] (!%p169_p3)   ;;  %v725_v9 = vsel (!%p169_p3), %vm426_vm0, %v2659_v3, 0 }
   0x9   : > { %2628 = vmatprep.subr.msk.bf16.mxu1 (!%p169_p3), %vm426_vm0, %v2659_v3  ;;  %2630 = vmatprep.subr.msk.bf16.mxu0 (!%p169_p3), %vm426_vm0, %v2661_v5  ;;  %v1421_v11 = vsel (!%p169_p3), %vm426_vm0, %v2661_v5, 0 }
   0xe   : > { %s3019_s12 = smov (!%p202_p4, %s2738_s12), 1 }
   0xf   : > { %s2631_s22 = smul.u32 272, %s3019_s12  ;;  %s2199_s30 = sshll.u32 %s3019_s12, 7 }
  0x10   : > { %s2955_s6 = scalar_lea.vmem %s3013_s3, %s2199_s30 }
  0x11   : > { %s2809_s27 = scalar_lea.vmem %s3010_s0, %s2631_s22 }
  0x12   : > { %v2658_v6 = vld [vmem:[%s2809_s27 + $0x88] sm:$0xff]   ;;  %v2662_v8 = vld [vmem:[%s2809_s27 + $0x90] sm:$0xff]   ;;  %v2664_v12 = vld [vmem:[%s2809_s27 + $0x98] sm:$0xff]  }
  0x13   : > { %v2660_v7 = vld [vmem:[%s2809_s27 + $0x8] sm:$0xff]   ;;  %2397 = vmatprep.mubr.msk.bf16.mxu1 %vm377_vm1, %v2658_v6  ;;  %v2663_v10 = vld [vmem:[%s2809_s27 + $0x10] sm:$0xff]   ;;  %v2665_v13 = vld [vmem:[%s2809_s27 + $0x18] sm:$0xff]  }
  0x14   : > { %2465 = vmatprep.mubr.msk.bf16.mxu0 %vm377_vm1, %v2660_v7  ;;  %2398 = vmatmul.mubr.msk.bf16.vlgmr.msra.gmra.mrb[0].mxu1 %vm377_vm1, %v2662_v8  ;;  %v2666_v14 = vld [vmem:[%s2809_s27 + $0xa0] sm:$0xff]   ;;  %v2668_v16 = vld [vmem:[%s2809_s27 + $0xa8] sm:$0xff]   ;;  %v2670_v18 = vld [vmem:[%s2809_s27 + $0xb0] sm:$0xff]  }
  0x15   : > { %2430 = vmatpush3.bf16.msra.mxu1 %v725_v9  ;;  %2466 = vmatmul.mubr.msk.bf16.vlgmr.msra.gmra.mrb[0].mxu0 %vm377_vm1, %v2663_v10  ;;  %v2667_v15 = vld [vmem:[%s2809_s27 + $0x20] sm:$0xff]   ;;  %v2669_v17 = vld [vmem:[%s2809_s27 + $0x28] sm:$0xff]   ;;  %v2671_v19 = vld [vmem:[%s2809_s27 + $0x30] sm:$0xff]  }
  0x16   : > { %2498 = vmatpush3.bf16.msra.mxu0 %v1421_v11  ;;  %2401 = vmatprep.mubr.msk.bf16.mxu1 %vm377_vm1, %v2664_v12  ;;  %v2672_v20 = vld [vmem:[%s2809_s27 + $0xb8] sm:$0xff]   ;;  %v2674_v22 = vld [vmem:[%s2809_s27 + $0xc0] sm:$0xff]   ;;  %v2676_v24 = vld [vmem:[%s2809_s27 + $0xc8] sm:$0xff]  }
  0x17   : > { %2469 = vmatprep.mubr.msk.bf16.mxu0 %vm377_vm1, %v2665_v13  ;;  %v2673_v21 = vld [vmem:[%s2809_s27 + $0x38] sm:$0xff]   ;;  %v2675_v23 = vld [vmem:[%s2809_s27 + $0x40] sm:$0xff]   ;;  %v2677_v25 = vld [vmem:[%s2809_s27 + $0x48] sm:$0xff]  }
  0x18   : > { %v2678_v26 = vld [vmem:[%s2809_s27 + $0xd0] sm:$0xff]   ;;  %v2680_v28 = vld [vmem:[%s2809_s27 + $0xd8] sm:$0xff]   ;;  %v2682_v30 = vld [vmem:[%s2809_s27 + $0xe0] sm:$0xff]  }
  0x19   : > { %v2679_v27 = vld [vmem:[%s2809_s27 + $0x50] sm:$0xff]   ;;  %v2681_v29 = vld [vmem:[%s2809_s27 + $0x58] sm:$0xff]   ;;  %v2683_v31 = vld [vmem:[%s2809_s27 + $0x60] sm:$0xff]  }
  0x1a   : > { %v2684_v32 = vld [vmem:[%s2809_s27 + $0xe8] sm:$0xff]   ;;  %v2686_v34 = vld [vmem:[%s2809_s27 + $0xf0] sm:$0xff]   ;;  %v2688_v36 = vld [vmem:[%s2809_s27 + $0xf8] sm:$0xff]  }
  0x1b   : > { %v2685_v33 = vld [vmem:[%s2809_s27 + $0x68] sm:$0xff]   ;;  %v2687_v35 = vld [vmem:[%s2809_s27 + $0x70] sm:$0xff]   ;;  %v2689_v37 = vld [vmem:[%s2809_s27 + $0x78] sm:$0xff]  }
  0x1c   : > { %2402 = vmatmul.mubr.msk.bf16.gmra.mrb[4].mxu1 %vm377_vm1, %v2666_v14  ;;  %v2690_v38 = vld [vmem:[%s2809_s27 + $0x100] sm:$0xff]   ;;  %v2693_v41 = vld [vmem:[%s2809_s27 + $0x90] sm:$0xff]   ;;  %v2694_v42 = vld [vmem:[%s2809_s27 + $0x8] sm:$0xff]  }
  0x1d   : > { %2470 = vmatmul.mubr.msk.bf16.gmra.mrb[4].mxu0 %vm377_vm1, %v2667_v15  ;;  %2405 = vmatprep.mubr.msk.bf16.mxu1 %vm377_vm1, %v2668_v16  ;;  %v2691_v39 = vld [vmem:[%s2809_s27 + $0x80] sm:$0xff]   ;;  %v2695_v43 = vld [vmem:[%s2809_s27 + $0x98] sm:$0xff]   ;;  %v2696_v44 = vld [vmem:[%s2809_s27 + $0x10] sm:$0xff]  }
  0x1e   : > { %2473 = vmatprep.mubr.msk.bf16.mxu0 %vm377_vm1, %v2669_v17  ;;  %v2692_v40 = vld [vmem:[%s2809_s27] sm:$0xff]   ;;  %v2698_v46 = vld [vmem:[%s2809_s27 + $0x18] sm:$0xff]   ;;  %v2699_v47 = vld [vmem:[%s2809_s27 + $0xa8] sm:$0xff]  }
  0x1f   : > { %v2697_v45 = vld [vmem:[%s2809_s27 + $0xa0] sm:$0xff]   ;;  %v2701_v49 = vld [vmem:[%s2809_s27 + $0xb0] sm:$0xff]   ;;  %v2702_v50 = vld [vmem:[%s2809_s27 + $0x28] sm:$0xff]  }
  0x20   : > { %v2700_v48 = vld [vmem:[%s2809_s27 + $0x20] sm:$0xff]   ;;  %v2703_v51 = vld [vmem:[%s2809_s27 + $0xb8] sm:$0xff]   ;;  %v2704_v52 = vld [vmem:[%s2809_s27 + $0x30] sm:$0xff]  }
  0x21   : > { %v2705_v53 = vld [vmem:[%s2809_s27 + $0xc0] sm:$0xff]   ;;  %v2706_v54 = vld [vmem:[%s2809_s27 + $0x38] sm:$0xff]   ;;  %v2707_v55 = vld [vmem:[%s2809_s27 + $0xc8] sm:$0xff]  }
  0x22   : > { %v2708_v56 = vld [vmem:[%s2809_s27 + $0x40] sm:$0xff]   ;;  %v2709_v57 = vld [vmem:[%s2809_s27 + $0xd0] sm:$0xff]   ;;  %v2710_v58 = vld [vmem:[%s2809_s27 + $0x48] sm:$0xff]  }
  0x23   : > { %v2711_v59 = vld [vmem:[%s2809_s27 + $0xd8] sm:$0xff]   ;;  %v2712_v60 = vld [vmem:[%s2809_s27 + $0x50] sm:$0xff]   ;;  %v2713_v61 = vld [vmem:[%s2809_s27 + $0xe0] sm:$0xff]  }
  0x24   : > { %2406 = vmatmul.mubr.msk.bf16.gmra.mrb[8].mxu1 %vm377_vm1, %v2670_v18  ;;  %v2714_v62 = vld [vmem:[%s2809_s27 + $0x58] sm:$0xff]   ;;  %v2715_v63 = vld [vmem:[%s2809_s27 + $0xe8] sm:$0xff]   ;;  %v2716_v0 = vld [vmem:[%s2809_s27 + $0x60] sm:$0xff]  }
  0x25   : > { %2474 = vmatmul.mubr.msk.bf16.gmra.mrb[8].mxu0 %vm377_vm1, %v2671_v19  ;;  %2409 = vmatprep.mubr.msk.bf16.mxu1 %vm377_vm1, %v2672_v20  ;;  %v2717_v1 = vld [vmem:[%s2809_s27 + $0xf0] sm:$0xff]   ;;  %v2718_v2 = vld [vmem:[%s2809_s27 + $0x68] sm:$0xff]   ;;  %v2719_v3 = vld [vmem:[%s2809_s27 + $0xf8] sm:$0xff]  }
  0x26   : > { %2477 = vmatprep.mubr.msk.bf16.mxu0 %vm377_vm1, %v2673_v21  ;;  %v2720_v4 = vld [vmem:[%s2809_s27 + $0x70] sm:$0xff]   ;;  %v2721_v5 = vld [vmem:[%s2809_s27 + $0x100] sm:$0xff]   ;;  %v2722_v6 = vld [vmem:[%s2809_s27 + $0x78] sm:$0xff]  }
  0x27   : > { %v2723_v7 = vld [vmem:[%s2809_s27 + $0x108] sm:$0xff]   ;;  %v2945_v10 = vld [vmem:[%s3012_s2] ss:$0 sm:$0xff] }
  0x2c   : > { %2410 = vmatmul.mubr.msk.bf16.gmra.mrb[12].mxu1 %vm377_vm1, %v2674_v22 }
  0x2d   : > { %2478 = vmatmul.mubr.msk.bf16.gmra.mrb[12].mxu0 %vm377_vm1, %v2675_v23  ;;  %2413 = vmatprep.mubr.msk.bf16.mxu1 %vm377_vm1, %v2676_v24 }
  0x2e   : > { %2481 = vmatprep.mubr.msk.bf16.mxu0 %vm377_vm1, %v2677_v25 }
  0x34   : > { %2414 = vmatmul.mubr.msk.bf16.gmra.mrb[16].mxu1 %vm377_vm1, %v2678_v26 }
  0x35   : > { %2482 = vmatmul.mubr.msk.bf16.gmra.mrb[16].mxu0 %vm377_vm1, %v2679_v27  ;;  %2417 = vmatprep.mubr.msk.bf16.mxu1 %vm377_vm1, %v2680_v28 }
  0x36   : > { %2485 = vmatprep.mubr.msk.bf16.mxu0 %vm377_vm1, %v2681_v29 }
  0x3c   : > { %2418 = vmatmul.mubr.msk.bf16.gmra.mrb[20].mxu1 %vm377_vm1, %v2682_v30 }
  0x3d   : > { %2486 = vmatmul.mubr.msk.bf16.gmra.mrb[20].mxu0 %vm377_vm1, %v2683_v31  ;;  %2421 = vmatprep.mubr.msk.bf16.mxu1 %vm377_vm1, %v2684_v32 }
  0x3e   : > { %2489 = vmatprep.mubr.msk.bf16.mxu0 %vm377_vm1, %v2685_v33 }
  0x44   : > { %2422 = vmatmul.mubr.msk.bf16.gmra.mrb[24].mxu1 %vm377_vm1, %v2686_v34 }
  0x45   : > { %2490 = vmatmul.mubr.msk.bf16.gmra.mrb[24].mxu0 %vm377_vm1, %v2687_v35  ;;  %2425 = vmatprep.mubr.msk.bf16.mxu1 %vm377_vm1, %v2688_v36 }
  0x46   : > { %2493 = vmatprep.mubr.msk.bf16.mxu0 %vm377_vm1, %v2689_v37 }
  0x4c   : > { %2426 = vmatmul.mubr.msk.bf16.gmra.mrb[28].mxu1 %vm377_vm1, %v2690_v38 }
  0x4d   : > { %2494 = vmatmul.mubr.msk.bf16.gmra.mrb[28].mxu0 %vm377_vm1, %v2691_v39  ;;  %2431 = vmatprep.mubr.msk.bf16.mxu1 %vm377_vm1, %v2692_v40 }
  0x4e   : > { %2499 = vmatprep.mubr.msk.bf16.mxu0 %vm377_vm1, %v2693_v41 }
  0x54   : > { %2432 = vmatmul.mubr.msk.bf16.vlgmr.msra.gmra.mrb[0].mxu1 %vm377_vm1, %v2694_v42 }
  0x55   : > { %2500 = vmatmul.mubr.msk.bf16.vlgmr.msra.gmra.mrb[0].mxu0 %vm377_vm1, %v2695_v43  ;;  %2435 = vmatprep.mubr.msk.bf16.mxu1 %vm377_vm1, %v2696_v44 }
  0x56   : > { %2503 = vmatprep.mubr.msk.bf16.mxu0 %vm377_vm1, %v2697_v45 }
  0x5c   : > { %2436 = vmatmul.mubr.msk.bf16.gmra.mrb[4].mxu1 %vm377_vm1, %v2698_v46 }
  0x5d   : > { %2504 = vmatmul.mubr.msk.bf16.gmra.mrb[4].mxu0 %vm377_vm1, %v2699_v47  ;;  %2439 = vmatprep.mubr.msk.bf16.mxu1 %vm377_vm1, %v2700_v48 }
  0x5e   : > { %2507 = vmatprep.mubr.msk.bf16.mxu0 %vm377_vm1, %v2701_v49 }
  0x64   : > { %2440 = vmatmul.mubr.msk.bf16.gmra.mrb[8].mxu1 %vm377_vm1, %v2702_v50 }
  0x65   : > { %2508 = vmatmul.mubr.msk.bf16.gmra.mrb[8].mxu0 %vm377_vm1, %v2703_v51  ;;  %2443 = vmatprep.mubr.msk.bf16.mxu1 %vm377_vm1, %v2704_v52 }
  0x66   : > { %2511 = vmatprep.mubr.msk.bf16.mxu0 %vm377_vm1, %v2705_v53 }
  0x6c   : > { %2444 = vmatmul.mubr.msk.bf16.gmra.mrb[12].mxu1 %vm377_vm1, %v2706_v54 }
  0x6d   : > { %2512 = vmatmul.mubr.msk.bf16.gmra.mrb[12].mxu0 %vm377_vm1, %v2707_v55  ;;  %2447 = vmatprep.mubr.msk.bf16.mxu1 %vm377_vm1, %v2708_v56 }
  0x6e   : > { %2515 = vmatprep.mubr.msk.bf16.mxu0 %vm377_vm1, %v2709_v57 }
  0x74   : > { %2448 = vmatmul.mubr.msk.bf16.gmra.mrb[16].mxu1 %vm377_vm1, %v2710_v58 }
  0x75   : > { %2516 = vmatmul.mubr.msk.bf16.gmra.mrb[16].mxu0 %vm377_vm1, %v2711_v59  ;;  %2451 = vmatprep.mubr.msk.bf16.mxu1 %vm377_vm1, %v2712_v60 }
  0x76   : > { %2519 = vmatprep.mubr.msk.bf16.mxu0 %vm377_vm1, %v2713_v61 }
  0x7c   : > { %2452 = vmatmul.mubr.msk.bf16.gmra.mrb[20].mxu1 %vm377_vm1, %v2714_v62 }
  0x7d   : > { %2520 = vmatmul.mubr.msk.bf16.gmra.mrb[20].mxu0 %vm377_vm1, %v2715_v63  ;;  %2455 = vmatprep.mubr.msk.bf16.mxu1 %vm377_vm1, %v2716_v0 }
  0x7e   : > { %2523 = vmatprep.mubr.msk.bf16.mxu0 %vm377_vm1, %v2717_v1 }
  0x84   : > { %2456 = vmatmul.mubr.msk.bf16.gmra.mrb[24].mxu1 %vm377_vm1, %v2718_v2 }
  0x85   : > { %2524 = vmatmul.mubr.msk.bf16.gmra.mrb[24].mxu0 %vm377_vm1, %v2719_v3  ;;  %2459 = vmatprep.mubr.msk.bf16.mxu1 %vm377_vm1, %v2720_v4 }
  0x86   : > { %2527 = vmatprep.mubr.msk.bf16.mxu0 %vm377_vm1, %v2721_v5 }
  0x8c   : > { %2460 = vmatmul.mubr.msk.bf16.gmra.mrb[28].mxu1 %vm377_vm1, %v2722_v6 }
  0x8d   : > { %2528 = vmatmul.mubr.msk.bf16.gmra.mrb[28].mxu0 %vm377_vm1, %v2723_v7 }
 0x127   : > { %v2433_v8 = vpop.f32.mrb[0].mxu1 }
 0x128   : > { %v2501_v9 = vpop.f32.mrb[0].mxu0  ;;  %v761_v11 = vpop.f32.mrb[1].mxu1 }
 0x129   : > { %v2531_v12 = vadd.f32 %v2501_v9, %v2433_v8  ;;  %v1457_v13 = vpop.f32.mrb[1].mxu0  ;;  %v2434_v14 = vpop.f32.mrb[2].mxu1 }
 0x12a   : > { %v2532_v15 = vadd.f32 %v1457_v13, %v761_v11  ;;  %v2502_v16 = vpop.f32.mrb[2].mxu0  ;;  %v764_v17 = vpop.f32.mrb[3].mxu1 }
 0x12b   : > { %v1625_v18 = vadd.f32 %v2531_v12, %v2945_v10  ;;  %v2533_v19 = vadd.f32 %v2502_v16, %v2434_v14  ;;  %v1460_v20 = vpop.f32.mrb[3].mxu0 }
 0x12c   : > { %v1623_v21 = vadd.f32 %v2532_v15, %v2945_v10  ;;  %v2534_v22 = vadd.f32 %v1460_v20, %v764_v17 }
 0x12d   : > { %v1689_v23 = vmul.f32 0.2, %v1625_v18  ;;  %v1626_v24 = vadd.f32 %v2533_v19, %v2945_v10  ;;  %vm1657_vm2 = vcmp.ge.f32.partialorder %v1625_v18, 0.0 }
 0x12e   : > { %v1687_v25 = vmul.f32 0.2, %v1623_v21  ;;  %v1624_v26 = vadd.f32 %v2534_v22, %v2945_v10  ;;  %vm1655_vm3 = vcmp.ge.f32.partialorder %v1623_v21, 0.0 }
 0x12f   : > { %vm1658_vm4 = vcmp.ge.f32.partialorder %v1626_v24, 0.0  ;;  %v1690_v27 = vmul.f32 0.2, %v1626_v24  ;;  %v2437_v28 = vpop.f32.mrb[4].mxu1  ;;  %v1721_v32 = vsel %vm1657_vm2, %v1625_v18, %v1689_v23 }
 0x130   : > { %vm1656_vm5 = vcmp.ge.f32.partialorder %v1624_v26, 0.0  ;;  %v1688_v29 = vmul.f32 0.2, %v1624_v26  ;;  %v2505_v30 = vpop.f32.mrb[4].mxu0  ;;  %v777_v31 = vpop.f32.mrb[5].mxu1  ;;  %v1719_v37 = vsel %vm1655_vm3, %v1623_v21, %v1687_v25 }
 0x131   : > { %v1722_v33 = vsel %vm1658_vm4, %v1626_v24, %v1690_v27  ;;  %v2535_v34 = vadd.f32 %v2505_v30, %v2437_v28  ;;  %v1473_v35 = vpop.f32.mrb[5].mxu0  ;;  %v2438_v36 = vpop.f32.mrb[6].mxu1 }
 0x132   : > { %v2240_v38 = vpack.c.bf16 %v1722_v33, %v1721_v32  ;;  %v1720_v39 = vsel %vm1656_vm5, %v1624_v26, %v1688_v29  ;;  %v2536_v40 = vadd.f32 %v1473_v35, %v777_v31  ;;  %v2506_v41 = vpop.f32.mrb[6].mxu0  ;;  %v780_v42 = vpop.f32.mrb[7].mxu1 }
 0x133   : > { %v2235_v43 = vpack.c.bf16 %v1720_v39, %v1719_v37  ;;  %v1629_v44 = vadd.f32 %v2535_v34, %v2945_v10  ;;  %v2537_v45 = vadd.f32 %v2506_v41, %v2438_v36  ;;  %v1476_v46 = vpop.f32.mrb[7].mxu0 }
 0x134   : > { %2312 = vst [vmem:[%s2955_s6 + $0x8] sm:$0xff] %v2240_v38   ;;  %v1627_v47 = vadd.f32 %v2536_v40, %v2945_v10  ;;  %v2538_v48 = vadd.f32 %v1476_v46, %v780_v42 }
 0x135   : > { %2236 = vst [vmem:[%s2955_s6] sm:$0xff] %v2235_v43   ;;  %v1693_v49 = vmul.f32 0.2, %v1629_v44  ;;  %v1630_v50 = vadd.f32 %v2537_v45, %v2945_v10  ;;  %vm1661_vm6 = vcmp.ge.f32.partialorder %v1629_v44, 0.0 }
 0x136   : > { %v1691_v51 = vmul.f32 0.2, %v1627_v47  ;;  %v1628_v52 = vadd.f32 %v2538_v48, %v2945_v10  ;;  %vm1659_vm7 = vcmp.ge.f32.partialorder %v1627_v47, 0.0 }
 0x137   : > { %vm1662_vm8 = vcmp.ge.f32.partialorder %v1630_v50, 0.0  ;;  %v1694_v53 = vmul.f32 0.2, %v1630_v50  ;;  %v2441_v54 = vpop.f32.mrb[8].mxu1  ;;  %v1725_v58 = vsel %vm1661_vm6, %v1629_v44, %v1693_v49 }
 0x138   : > { %vm1660_vm9 = vcmp.ge.f32.partialorder %v1628_v52, 0.0  ;;  %v1692_v55 = vmul.f32 0.2, %v1628_v52  ;;  %v2509_v56 = vpop.f32.mrb[8].mxu0  ;;  %v793_v57 = vpop.f32.mrb[9].mxu1  ;;  %v1723_v63 = vsel %vm1659_vm7, %v1627_v47, %v1691_v51 }
 0x139   : > { %v1726_v59 = vsel %vm1662_vm8, %v1630_v50, %v1694_v53  ;;  %v2539_v60 = vadd.f32 %v2509_v56, %v2441_v54  ;;  %v1489_v61 = vpop.f32.mrb[9].mxu0  ;;  %v2442_v62 = vpop.f32.mrb[10].mxu1 }
 0x13a   : > { %v2250_v0 = vpack.c.bf16 %v1726_v59, %v1725_v58  ;;  %v1724_v1 = vsel %vm1660_vm9, %v1628_v52, %v1692_v55  ;;  %v2540_v2 = vadd.f32 %v1489_v61, %v793_v57  ;;  %v2510_v3 = vpop.f32.mrb[10].mxu0  ;;  %v796_v4 = vpop.f32.mrb[11].mxu1 }
 0x13b   : > { %v2245_v5 = vpack.c.bf16 %v1724_v1, %v1723_v63  ;;  %v1633_v6 = vadd.f32 %v2539_v60, %v2945_v10  ;;  %v2541_v7 = vadd.f32 %v2510_v3, %v2442_v62  ;;  %v1492_v8 = vpop.f32.mrb[11].mxu0 }
 0x13c   : > { %2314 = vst [vmem:[%s2955_s6 + $0x18] sm:$0xff] %v2250_v0   ;;  %v1631_v9 = vadd.f32 %v2540_v2, %v2945_v10  ;;  %v2542_v11 = vadd.f32 %v1492_v8, %v796_v4 }
 0x13d   : > { %2313 = vst [vmem:[%s2955_s6 + $0x10] sm:$0xff] %v2245_v5   ;;  %v1697_v12 = vmul.f32 0.2, %v1633_v6  ;;  %v1634_v13 = vadd.f32 %v2541_v7, %v2945_v10  ;;  %vm1665_vm10 = vcmp.ge.f32.partialorder %v1633_v6, 0.0 }
 0x13e   : > { %v1695_v14 = vmul.f32 0.2, %v1631_v9  ;;  %v1632_v15 = vadd.f32 %v2542_v11, %v2945_v10  ;;  %vm1663_vm11 = vcmp.ge.f32.partialorder %v1631_v9, 0.0 }
 0x13f   : > { %vm1666_vm12 = vcmp.ge.f32.partialorder %v1634_v13, 0.0  ;;  %v1698_v16 = vmul.f32 0.2, %v1634_v13  ;;  %v2445_v17 = vpop.f32.mrb[12].mxu1  ;;  %v1729_v21 = vsel %vm1665_vm10, %v1633_v6, %v1697_v12 }
 0x140   : > { %vm1664_vm13 = vcmp.ge.f32.partialorder %v1632_v15, 0.0  ;;  %v1696_v18 = vmul.f32 0.2, %v1632_v15  ;;  %v2513_v19 = vpop.f32.mrb[12].mxu0  ;;  %v809_v20 = vpop.f32.mrb[13].mxu1  ;;  %v1727_v26 = vsel %vm1663_vm11, %v1631_v9, %v1695_v14 }
 0x141   : > { %v1730_v22 = vsel %vm1666_vm12, %v1634_v13, %v1698_v16  ;;  %v2543_v23 = vadd.f32 %v2513_v19, %v2445_v17  ;;  %v1505_v24 = vpop.f32.mrb[13].mxu0  ;;  %v2446_v25 = vpop.f32.mrb[14].mxu1 }
 0x142   : > { %v2260_v27 = vpack.c.bf16 %v1730_v22, %v1729_v21  ;;  %v1728_v28 = vsel %vm1664_vm13, %v1632_v15, %v1696_v18  ;;  %v2544_v29 = vadd.f32 %v1505_v24, %v809_v20  ;;  %v2514_v30 = vpop.f32.mrb[14].mxu0  ;;  %v812_v31 = vpop.f32.mrb[15].mxu1 }
 0x143   : > { %v2255_v32 = vpack.c.bf16 %v1728_v28, %v1727_v26  ;;  %v1637_v33 = vadd.f32 %v2543_v23, %v2945_v10  ;;  %v2545_v34 = vadd.f32 %v2514_v30, %v2446_v25  ;;  %v1508_v35 = vpop.f32.mrb[15].mxu0 }
 0x144   : > { %2316 = vst [vmem:[%s2955_s6 + $0x28] sm:$0xff] %v2260_v27   ;;  %v1635_v36 = vadd.f32 %v2544_v29, %v2945_v10  ;;  %v2546_v37 = vadd.f32 %v1508_v35, %v812_v31 }
 0x145   : > { %2315 = vst [vmem:[%s2955_s6 + $0x20] sm:$0xff] %v2255_v32   ;;  %v1701_v38 = vmul.f32 0.2, %v1637_v33  ;;  %v1638_v39 = vadd.f32 %v2545_v34, %v2945_v10  ;;  %vm1669_vm14 = vcmp.ge.f32.partialorder %v1637_v33, 0.0 }
 0x146   : > { %v1699_v40 = vmul.f32 0.2, %v1635_v36  ;;  %v1636_v41 = vadd.f32 %v2546_v37, %v2945_v10  ;;  %vm1667_vm15 = vcmp.ge.f32.partialorder %v1635_v36, 0.0 }
 0x147   : > { %vm1670_vm0 = vcmp.ge.f32.partialorder %v1638_v39, 0.0  ;;  %v1702_v42 = vmul.f32 0.2, %v1638_v39  ;;  %v2449_v43 = vpop.f32.mrb[16].mxu1  ;;  %v1733_v47 = vsel %vm1669_vm14, %v1637_v33, %v1701_v38 }
 0x148   : > { %vm1668_vm1 = vcmp.ge.f32.partialorder %v1636_v41, 0.0  ;;  %v1700_v44 = vmul.f32 0.2, %v1636_v41  ;;  %v2517_v45 = vpop.f32.mrb[16].mxu0  ;;  %v825_v46 = vpop.f32.mrb[17].mxu1  ;;  %v1731_v52 = vsel %vm1667_vm15, %v1635_v36, %v1699_v40 }
 0x149   : > { %v1734_v48 = vsel %vm1670_vm0, %v1638_v39, %v1702_v42  ;;  %v2547_v49 = vadd.f32 %v2517_v45, %v2449_v43  ;;  %v1521_v50 = vpop.f32.mrb[17].mxu0  ;;  %v2450_v51 = vpop.f32.mrb[18].mxu1 }
 0x14a   : > { %v2270_v53 = vpack.c.bf16 %v1734_v48, %v1733_v47  ;;  %v1732_v54 = vsel %vm1668_vm1, %v1636_v41, %v1700_v44  ;;  %v2548_v55 = vadd.f32 %v1521_v50, %v825_v46  ;;  %v2518_v56 = vpop.f32.mrb[18].mxu0  ;;  %v828_v57 = vpop.f32.mrb[19].mxu1 }
 0x14b   : > { %v2265_v58 = vpack.c.bf16 %v1732_v54, %v1731_v52  ;;  %v1641_v59 = vadd.f32 %v2547_v49, %v2945_v10  ;;  %v2549_v60 = vadd.f32 %v2518_v56, %v2450_v51  ;;  %v1524_v61 = vpop.f32.mrb[19].mxu0 }
 0x14c   : > { %2318 = vst [vmem:[%s2955_s6 + $0x38] sm:$0xff] %v2270_v53   ;;  %v1639_v62 = vadd.f32 %v2548_v55, %v2945_v10  ;;  %v2550_v63 = vadd.f32 %v1524_v61, %v828_v57 }
 0x14d   : > { %2317 = vst [vmem:[%s2955_s6 + $0x30] sm:$0xff] %v2265_v58   ;;  %v1705_v0 = vmul.f32 0.2, %v1641_v59  ;;  %v1642_v1 = vadd.f32 %v2549_v60, %v2945_v10  ;;  %vm1673_vm2 = vcmp.ge.f32.partialorder %v1641_v59, 0.0 }
 0x14e   : > { %v1703_v2 = vmul.f32 0.2, %v1639_v62  ;;  %v1640_v3 = vadd.f32 %v2550_v63, %v2945_v10  ;;  %vm1671_vm3 = vcmp.ge.f32.partialorder %v1639_v62, 0.0 }
 0x14f   : > { %vm1674_vm4 = vcmp.ge.f32.partialorder %v1642_v1, 0.0  ;;  %v1706_v4 = vmul.f32 0.2, %v1642_v1  ;;  %v2453_v5 = vpop.f32.mrb[20].mxu1  ;;  %v1737_v9 = vsel %vm1673_vm2, %v1641_v59, %v1705_v0 }
 0x150   : > { %vm1672_vm5 = vcmp.ge.f32.partialorder %v1640_v3, 0.0  ;;  %v1704_v6 = vmul.f32 0.2, %v1640_v3  ;;  %v2521_v7 = vpop.f32.mrb[20].mxu0  ;;  %v841_v8 = vpop.f32.mrb[21].mxu1  ;;  %v1735_v15 = vsel %vm1671_vm3, %v1639_v62, %v1703_v2 }
 0x151   : > { %v1738_v11 = vsel %vm1674_vm4, %v1642_v1, %v1706_v4  ;;  %v2551_v12 = vadd.f32 %v2521_v7, %v2453_v5  ;;  %v1537_v13 = vpop.f32.mrb[21].mxu0  ;;  %v2454_v14 = vpop.f32.mrb[22].mxu1 }
 0x152   : > { %v2280_v16 = vpack.c.bf16 %v1738_v11, %v1737_v9  ;;  %v1736_v17 = vsel %vm1672_vm5, %v1640_v3, %v1704_v6  ;;  %v2552_v18 = vadd.f32 %v1537_v13, %v841_v8  ;;  %v2522_v19 = vpop.f32.mrb[22].mxu0  ;;  %v844_v20 = vpop.f32.mrb[23].mxu1 }
 0x153   : > { %v2275_v21 = vpack.c.bf16 %v1736_v17, %v1735_v15  ;;  %v1645_v22 = vadd.f32 %v2551_v12, %v2945_v10  ;;  %v2553_v23 = vadd.f32 %v2522_v19, %v2454_v14  ;;  %v1540_v24 = vpop.f32.mrb[23].mxu0 }
 0x154   : > { %2320 = vst [vmem:[%s2955_s6 + $0x48] sm:$0xff] %v2280_v16   ;;  %v1643_v25 = vadd.f32 %v2552_v18, %v2945_v10  ;;  %v2554_v26 = vadd.f32 %v1540_v24, %v844_v20 }
 0x155   : > { %2319 = vst [vmem:[%s2955_s6 + $0x40] sm:$0xff] %v2275_v21   ;;  %v1709_v27 = vmul.f32 0.2, %v1645_v22  ;;  %v1646_v28 = vadd.f32 %v2553_v23, %v2945_v10  ;;  %vm1677_vm6 = vcmp.ge.f32.partialorder %v1645_v22, 0.0 }
 0x156   : > { %v1707_v29 = vmul.f32 0.2, %v1643_v25  ;;  %v1644_v30 = vadd.f32 %v2554_v26, %v2945_v10  ;;  %vm1675_vm7 = vcmp.ge.f32.partialorder %v1643_v25, 0.0 }
 0x157   : > { %vm1678_vm8 = vcmp.ge.f32.partialorder %v1646_v28, 0.0  ;;  %v1710_v31 = vmul.f32 0.2, %v1646_v28  ;;  %v2457_v32 = vpop.f32.mrb[24].mxu1  ;;  %v1741_v36 = vsel %vm1677_vm6, %v1645_v22, %v1709_v27 }
 0x158   : > { %vm1676_vm9 = vcmp.ge.f32.partialorder %v1644_v30, 0.0  ;;  %v1708_v33 = vmul.f32 0.2, %v1644_v30  ;;  %v2525_v34 = vpop.f32.mrb[24].mxu0  ;;  %v857_v35 = vpop.f32.mrb[25].mxu1  ;;  %v1739_v41 = vsel %vm1675_vm7, %v1643_v25, %v1707_v29 }
 0x159   : > { %v1742_v37 = vsel %vm1678_vm8, %v1646_v28, %v1710_v31  ;;  %v2555_v38 = vadd.f32 %v2525_v34, %v2457_v32  ;;  %v1553_v39 = vpop.f32.mrb[25].mxu0  ;;  %v2458_v40 = vpop.f32.mrb[26].mxu1 }
 0x15a   : > { %v2290_v42 = vpack.c.bf16 %v1742_v37, %v1741_v36  ;;  %v1740_v43 = vsel %vm1676_vm9, %v1644_v30, %v1708_v33  ;;  %v2556_v44 = vadd.f32 %v1553_v39, %v857_v35  ;;  %v2526_v45 = vpop.f32.mrb[26].mxu0  ;;  %v860_v46 = vpop.f32.mrb[27].mxu1 }
 0x15b   : > { %v2285_v47 = vpack.c.bf16 %v1740_v43, %v1739_v41  ;;  %v1649_v48 = vadd.f32 %v2555_v38, %v2945_v10  ;;  %v2557_v49 = vadd.f32 %v2526_v45, %v2458_v40  ;;  %v1556_v50 = vpop.f32.mrb[27].mxu0 }
 0x15c   : > { %2322 = vst [vmem:[%s2955_s6 + $0x58] sm:$0xff] %v2290_v42   ;;  %v1647_v51 = vadd.f32 %v2556_v44, %v2945_v10  ;;  %v2558_v52 = vadd.f32 %v1556_v50, %v860_v46 }
 0x15d   : > { %2321 = vst [vmem:[%s2955_s6 + $0x50] sm:$0xff] %v2285_v47   ;;  %v1713_v53 = vmul.f32 0.2, %v1649_v48  ;;  %v1650_v54 = vadd.f32 %v2557_v49, %v2945_v10  ;;  %vm1681_vm10 = vcmp.ge.f32.partialorder %v1649_v48, 0.0 }
 0x15e   : > { %v1711_v55 = vmul.f32 0.2, %v1647_v51  ;;  %v1648_v56 = vadd.f32 %v2558_v52, %v2945_v10  ;;  %vm1679_vm11 = vcmp.ge.f32.partialorder %v1647_v51, 0.0 }
 0x15f   : > { %vm1682_vm12 = vcmp.ge.f32.partialorder %v1650_v54, 0.0  ;;  %v1714_v57 = vmul.f32 0.2, %v1650_v54  ;;  %v2461_v58 = vpop.f32.mrb[28].mxu1  ;;  %v1745_v62 = vsel %vm1681_vm10, %v1649_v48, %v1713_v53 }
 0x160   : > { %vm1680_vm13 = vcmp.ge.f32.partialorder %v1648_v56, 0.0  ;;  %v1712_v59 = vmul.f32 0.2, %v1648_v56  ;;  %v2529_v60 = vpop.f32.mrb[28].mxu0  ;;  %v873_v61 = vpop.f32.mrb[29].mxu1  ;;  %v1743_v3 = vsel %vm1679_vm11, %v1647_v51, %v1711_v55 }
 0x161   : > { %v1746_v63 = vsel %vm1682_vm12, %v1650_v54, %v1714_v57  ;;  %v2559_v0 = vadd.f32 %v2529_v60, %v2461_v58  ;;  %v1569_v1 = vpop.f32.mrb[29].mxu0  ;;  %v2462_v2 = vpop.f32.mrb[30].mxu1 }
 0x162   : > { %v2300_v4 = vpack.c.bf16 %v1746_v63, %v1745_v62  ;;  %v1744_v5 = vsel %vm1680_vm13, %v1648_v56, %v1712_v59  ;;  %v2560_v6 = vadd.f32 %v1569_v1, %v873_v61  ;;  %v2530_v7 = vpop.f32.mrb[30].mxu0  ;;  %v876_v8 = vpop.f32.mrb[31].mxu1 }
 0x163   : > { %v2295_v9 = vpack.c.bf16 %v1744_v5, %v1743_v3  ;;  %v1653_v11 = vadd.f32 %v2559_v0, %v2945_v10  ;;  %v2561_v12 = vadd.f32 %v2530_v7, %v2462_v2  ;;  %v1572_v13 = vpop.f32.mrb[31].mxu0 }
 0x164   : > { %2324 = vst [vmem:[%s2955_s6 + $0x68] sm:$0xff] %v2300_v4   ;;  %v1651_v14 = vadd.f32 %v2560_v6, %v2945_v10  ;;  %v2562_v15 = vadd.f32 %v1572_v13, %v876_v8 }
 0x165   : > { %2323 = vst [vmem:[%s2955_s6 + $0x60] sm:$0xff] %v2295_v9   ;;  %v1717_v16 = vmul.f32 0.2, %v1653_v11  ;;  %v1654_v17 = vadd.f32 %v2561_v12, %v2945_v10  ;;  %vm1685_vm14 = vcmp.ge.f32.partialorder %v1653_v11, 0.0 }
 0x166   : > { %v1715_v18 = vmul.f32 0.2, %v1651_v14  ;;  %v1652_v19 = vadd.f32 %v2562_v15, %v2945_v10  ;;  %vm1683_vm15 = vcmp.ge.f32.partialorder %v1651_v14, 0.0 }
 0x167   : > { %vm1686_vm0 = vcmp.ge.f32.partialorder %v1654_v17, 0.0  ;;  %v1718_v20 = vmul.f32 0.2, %v1654_v17  ;;  %v1749_v22 = vsel %vm1685_vm14, %v1653_v11, %v1717_v16 }
 0x168   : > { %vm1684_vm1 = vcmp.ge.f32.partialorder %v1652_v19, 0.0  ;;  %v1716_v21 = vmul.f32 0.2, %v1652_v19  ;;  %v1747_v24 = vsel %vm1683_vm15, %v1651_v14, %v1715_v18 }
 0x169   : > { %v1750_v23 = vsel %vm1686_vm0, %v1654_v17, %v1718_v20 }
 0x16a   : > { %v2310_v25 = vpack.c.bf16 %v1750_v23, %v1749_v22  ;;  %v1748_v26 = vsel %vm1684_vm1, %v1652_v19, %v1716_v21 }
 0x16b   : > { %v2305_v27 = vpack.c.bf16 %v1748_v26, %v1747_v24 }
 0x16c   : > { %2326 = vst [vmem:[%s2955_s6 + $0x78] sm:$0xff] %v2310_v25  }
 0x16d   : > { %2325 = vst [vmem:[%s2955_s6 + $0x70] sm:$0xff] %v2305_v27  }
 0x16e PF: > { %s13_s14 = sadd.s32 1, %s2746_s14   ;;  %s3014_s12 = smov %s2742_s13 }
 0x16f   : > { %p10_p5 = scmp.ge.s32.totalorder %s13_s14, 4   ;;  %s3015_s13 = smov %s3017_s15 }
 0x171   :  { %12 = sbr.rel (!%p10_p5) target bundleno = 2 (0x2), region = 71 }

// kernel: _lambda_.6
= control target key start
LH: loop header
LB: loop body
LE: loop exit
PB: predicated region body
PF: predicated region fallthrough
CT: control target
= control target key end

     0   :  { %s3434_s12 = smov 0   ;;  %s3436_s13 = smov 0   ;;  %s4181_s0 = inlined_call_operand.vmem [shape: bf16[2,144,512], index: 0, kind: input, shape index: {}]   ;;  %s4182_s1 = inlined_call_operand.vmem [shape: bf16[4,512,128], index: 1, kind: input, shape index: {}]   ;;  %s4183_s2 = inlined_call_operand.vmem [shape: f32[1,128], index: 2, kind: input, shape index: {}]   ;;  %s4184_s3 = inlined_call_operand.vmem [shape: bf16[2,64,128], index: 3, kind: output, shape index: {}]  }
   0x1   :  { %s3438_s14 = smov 0  }
   0x2 LB: > { %s25_s15 = sadd.s32 1, %s3408_s13  ;;  %p2418_p0 = scmp.ge.s32.totalorder %s3412_s14, 1  ;;  %s3412_s14 = sphi %s3438_s14, %s13_s14   ;;  %s3408_s13 = sphi %s3436_s13, %s4186_s13   ;;  %s3404_s12 = sphi %s3434_s12, %s4185_s12  }
   0x3   : > { %p27_p1 = scmp.ge.s32.totalorder %s25_s15, 2  ;;  %p168_p2 = scmp.lt.s32.totalorder %s3412_s14, 3 }
   0x5   : > { %s4188_s15 = smov (%p27_p1, %s25_s15), 0  ;;  %p169_p3 = pnand %p2418_p0, %p168_p2 }
   0x6   : > { %v3194_v0 = vld [vmem:[%s4182_s1 + $0x140] sm:$0xff] (!%p169_p3)   ;;  %v3198_v4 = vld [vmem:[%s4182_s1 + $0x148] sm:$0xff] (!%p169_p3)   ;;  %v3202_v8 = vld [vmem:[%s4182_s1 + $0x150] sm:$0xff] (!%p169_p3)   ;;  %p202_p4 = scmp.lt.s32.totalorder (!%p169_p3), %s3404_s12, 1 }
   0x7   : > { %172 = sbr.rel (%p169_p3) target bundleno = 432 (0x1b0), region = 32  ;;  %v3195_v1 = vld [vmem:[%s4182_s1 + $0x1c0] sm:$0xff] (!%p169_p3)   ;;  %2849 = vmatprep.subr.bf16.mxu0 (!%p169_p3), %v3194_v0  ;;  %v3199_v5 = vld [vmem:[%s4182_s1 + $0x1c8] sm:$0xff] (!%p169_p3)   ;;  %v3203_v9 = vld [vmem:[%s4182_s1 + $0x1d0] sm:$0xff] (!%p169_p3)  }
   0x8   : > { %v3196_v2 = vld [vmem:[%s4182_s1 + $0x100] sm:$0xff] (!%p169_p3)   ;;  %2889 = vmatprep.subr.bf16.mxu1 (!%p169_p3), %v3195_v1  ;;  %v3200_v6 = vld [vmem:[%s4182_s1 + $0x108] sm:$0xff] (!%p169_p3)   ;;  %v3204_v10 = vld [vmem:[%s4182_s1 + $0x110] sm:$0xff] (!%p169_p3)  }
   0x9   : > { %v3197_v3 = vld [vmem:[%s4182_s1 + $0x180] sm:$0xff] (!%p169_p3)   ;;  %2850 = vmatpush3.bf16.msra.mxu0 (!%p169_p3), %v3196_v2  ;;  %v3201_v7 = vld [vmem:[%s4182_s1 + $0x188] sm:$0xff] (!%p169_p3)   ;;  %v3205_v11 = vld [vmem:[%s4182_s1 + $0x190] sm:$0xff] (!%p169_p3)  }
   0xa   : > { %2890 = vmatpush3.bf16.msra.mxu1 (!%p169_p3), %v3197_v3  ;;  %2851 = vmatprep.subr.bf16.mxu0 (!%p169_p3), %v3198_v4  ;;  %v3206_v12 = vld [vmem:[%s4182_s1 + $0x158] sm:$0xff] (!%p169_p3)   ;;  %v3210_v16 = vld [vmem:[%s4182_s1 + $0x160] sm:$0xff] (!%p169_p3)   ;;  %v3214_v20 = vld [vmem:[%s4182_s1 + $0x168] sm:$0xff] (!%p169_p3)  }
   0xb   : > { %2891 = vmatprep.subr.bf16.mxu1 (!%p169_p3), %v3199_v5  ;;  %v3207_v13 = vld [vmem:[%s4182_s1 + $0x1d8] sm:$0xff] (!%p169_p3)   ;;  %v3211_v17 = vld [vmem:[%s4182_s1 + $0x1e0] sm:$0xff] (!%p169_p3)   ;;  %v3215_v21 = vld [vmem:[%s4182_s1 + $0x1e8] sm:$0xff] (!%p169_p3)  }
   0xc   : > { %v3208_v14 = vld [vmem:[%s4182_s1 + $0x118] sm:$0xff] (!%p169_p3)   ;;  %v3212_v18 = vld [vmem:[%s4182_s1 + $0x120] sm:$0xff] (!%p169_p3)   ;;  %v3216_v22 = vld [vmem:[%s4182_s1 + $0x128] sm:$0xff] (!%p169_p3)  }
   0xd   : > { %2852 = vmatpush3.bf16.msra.mxu0 (!%p169_p3), %v3200_v6  ;;  %v3209_v15 = vld [vmem:[%s4182_s1 + $0x198] sm:$0xff] (!%p169_p3)   ;;  %v3213_v19 = vld [vmem:[%s4182_s1 + $0x1a0] sm:$0xff] (!%p169_p3)   ;;  %v3217_v23 = vld [vmem:[%s4182_s1 + $0x1a8] sm:$0xff] (!%p169_p3)  }
   0xe   : > { %2892 = vmatpush3.bf16.msra.mxu1 %v3201_v7  ;;  %2853 = vmatprep.subr.bf16.mxu0 %v3202_v8  ;;  %s4190_s12 = smov (!%p202_p4, %s3404_s12), 1  ;;  %v3218_v24 = vld [vmem:[%s4182_s1 + $0x170] sm:$0xff]   ;;  %v3222_v28 = vld [vmem:[%s4182_s1 + $0x178] sm:$0xff]   ;;  %v3232_v36 = vld [vmem:[%s4182_s1 + $0x40] sm:$0xff]  }
   0xf   : > { %2893 = vmatprep.subr.bf16.mxu1 %v3203_v9  ;;  %v3219_v25 = vld [vmem:[%s4182_s1 + $0x1f0] sm:$0xff]   ;;  %s3169_s22 = smul.u32 288, %s4190_s12  ;;  %v3223_v29 = vld [vmem:[%s4182_s1 + $0x1f8] sm:$0xff]   ;;  %v3233_v37 = vld [vmem:[%s4182_s1 + $0xc0] sm:$0xff]   ;;  %s2817_s5 = sshll.u32 %s4190_s12, 5 }
  0x10   : > { %v3220_v26 = vld [vmem:[%s4182_s1 + $0x130] sm:$0xff]   ;;  %v3224_v30 = vld [vmem:[%s4182_s1 + $0x138] sm:$0xff]   ;;  %v3234_v38 = vld [vmem:[%s4182_s1] sm:$0xff]   ;;  %s221_s12 = scalar_lea.vmem %s4184_s3, %s2817_s5 }
  0x11   : > { %2854 = vmatpush3.bf16.msra.mxu0 %v3204_v10  ;;  %v3221_v27 = vld [vmem:[%s4182_s1 + $0x1b0] sm:$0xff]   ;;  %s3552_s6 = scalar_lea.vmem %s4181_s0, %s3169_s22  ;;  %v3225_v31 = vld [vmem:[%s4182_s1 + $0x1b8] sm:$0xff]   ;;  %v3235_v39 = vld [vmem:[%s4182_s1 + $0x80] sm:$0xff]  }
  0x12   : > { %2894 = vmatpush3.bf16.msra.mxu1 %v3205_v11  ;;  %2855 = vmatprep.subr.bf16.mxu0 %v3206_v12  ;;  %v3226_v32 = vld [vmem:[%s3552_s6 + $0x90] ss:$16 sps:$4 sm:$0xff]   ;;  %v3228_v33 = vld [vmem:[%s3552_s6 + $0x94] ss:$16 sps:$4 sm:$0xff]   ;;  %v3229_v34 = vld [vmem:[%s3552_s6 + $0x98] ss:$16 sps:$4 sm:$0xff]  }
  0x13   : > { %2895 = vmatprep.subr.bf16.mxu1 %v3207_v13  ;;  %v3231_v35 = vld [vmem:[%s3552_s6 + $0x9c] ss:$16 sps:$4 sm:$0xff]   ;;  %688 = vmatprep.mubr.bf16.mxu0 %v3228_v33  ;;  %v3589_v44 = vld [vmem:[%s3552_s6 + $0xb0] sm:$0xff]  ;;  %v3592_v45 = vld [vmem:[%s3552_s6 + $0xc0] sm:$0xff] }
  0x14   : > { %753 = vmatprep.mubr.bf16.mxu1 %v3231_v35  ;;  %v3236_v40 = vld [vmem:[%s4182_s1 + $0x48] sm:$0xff]   ;;  %v3595_v46 = vld [vmem:[%s3552_s6 + $0xb8] sm:$0xff]  ;;  %v2491_v48 = vcombine.high %v3589_v44, %v3592_v45  ;;  %v2490_v50 = vcombine.low %v3589_v44, %v3592_v45  ;;  %v3244_v52 = vld [vmem:[%s4182_s1 + $0x50] sm:$0xff]  }
  0x15   : > { %2856 = vmatpush3.bf16.msra.mxu0 %v3208_v14  ;;  %v3237_v41 = vld [vmem:[%s4182_s1 + $0xc8] sm:$0xff]   ;;  %v3245_v53 = vld [vmem:[%s4182_s1 + $0xd0] sm:$0xff]   ;;  %v3248_v56 = vld [vmem:[%s4182_s1 + $0x58] sm:$0xff]  }
  0x16   : > { %2896 = vmatpush3.bf16.msra.mxu1 %v3209_v15  ;;  %2857 = vmatprep.subr.bf16.mxu0 %v3210_v16  ;;  %v3238_v42 = vld [vmem:[%s4182_s1 + $0x8] sm:$0xff]   ;;  %v3246_v54 = vld [vmem:[%s4182_s1 + $0x10] sm:$0xff]   ;;  %v3249_v57 = vld [vmem:[%s4182_s1 + $0xd8] sm:$0xff]  }
  0x17   : > { %2897 = vmatprep.subr.bf16.mxu1 %v3211_v17  ;;  %v3239_v43 = vld [vmem:[%s4182_s1 + $0x88] sm:$0xff]   ;;  %v3247_v55 = vld [vmem:[%s4182_s1 + $0x90] sm:$0xff]   ;;  %v3250_v58 = vld [vmem:[%s4182_s1 + $0x18] sm:$0xff]  }
  0x18   : > { %v3598_v47 = vld [vmem:[%s3552_s6 + $0xc8] sm:$0xff]  ;;  %v3251_v59 = vld [vmem:[%s4182_s1 + $0x98] sm:$0xff]   ;;  %v3633_v60 = vld [vmem:[%s3552_s6 + $0xd0] sm:$0xff] }
  0x19   : > { %2858 = vmatpush3.bf16.msra.mxu0 %v3212_v18  ;;  %v2493_v49 = vcombine.high %v3595_v46, %v3598_v47  ;;  %v2492_v51 = vcombine.low %v3595_v46, %v3598_v47  ;;  %v3636_v61 = vld [vmem:[%s3552_s6 + $0xe0] sm:$0xff]  ;;  %v3639_v62 = vld [vmem:[%s3552_s6 + $0xd8] sm:$0xff]  ;;  %v3644_v0 = vld [vmem:[%s3552_s6 + $0xe8] sm:$0xff]  ;;  %v2763_v2 = vcombine.high %v3592_v45, %v3633_v60  ;;  %v2762_v7 = vcombine.low %v3592_v45, %v3633_v60 }
  0x1a   : > { %2898 = vmatpush3.bf16.msra.mxu1 %v3213_v19  ;;  %2859 = vmatprep.subr.bf16.mxu0 %v3214_v20  ;;  %v2495_v63 = vcombine.high %v3633_v60, %v3636_v61  ;;  %v2494_v1 = vcombine.low %v3633_v60, %v3636_v61  ;;  %v2497_v3 = vcombine.high %v3639_v62, %v3644_v0  ;;  %v3256_v5 = vld [vmem:[%s4182_s1 + $0x60] sm:$0xff]   ;;  %v3260_v12 = vld [vmem:[%s4182_s1 + $0x68] sm:$0xff]   ;;  %v3685_v16 = vld [vmem:[%s3552_s6 + $0xf0] sm:$0xff] }
  0x1b   : > { %2899 = vmatprep.subr.bf16.mxu1 %v3215_v21  ;;  %v2496_v4 = vcombine.low %v3639_v62, %v3644_v0  ;;  %v2765_v6 = vcombine.high %v3598_v47, %v3639_v62  ;;  %v3257_v8 = vld [vmem:[%s4182_s1 + $0xe0] sm:$0xff]   ;;  %v2764_v9 = vcombine.low %v3598_v47, %v3639_v62  ;;  %v3261_v13 = vld [vmem:[%s4182_s1 + $0xe8] sm:$0xff]   ;;  %v3693_v19 = vld [vmem:[%s3552_s6 + $0xf8] sm:$0xff] }
  0x1c   : > { %v3258_v10 = vld [vmem:[%s4182_s1 + $0x20] sm:$0xff]   ;;  %v3262_v14 = vld [vmem:[%s4182_s1 + $0x28] sm:$0xff]   ;;  %v3273_v33 = vld [vmem:[%s4182_s1 + $0xf8] sm:$0xff]  }
  0x1d   : > { %2860 = vmatpush3.bf16.msra.mxu0 %v3216_v22  ;;  %v3259_v11 = vld [vmem:[%s4182_s1 + $0xa0] sm:$0xff]   ;;  %v3263_v15 = vld [vmem:[%s4182_s1 + $0xa8] sm:$0xff]   ;;  %v2767_v22 = vcombine.high %v3636_v61, %v3685_v16  ;;  %v3275_v35 = vld [vmem:[%s4182_s1 + $0xb8] sm:$0xff]  }
  0x1e   : > { %2900 = vmatpush3.bf16.msra.mxu1 %v3217_v23  ;;  %2861 = vmatprep.subr.bf16.mxu0 %v3218_v24  ;;  %v3688_v17 = vld [vmem:[%s3552_s6 + $0x100] sm:$0xff]  ;;  %v3696_v20 = vld [vmem:[%s3552_s6 + $0x108] sm:$0xff]  ;;  %v2766_v23 = vcombine.low %v3636_v61, %v3685_v16 }
  0x1f   : > { %2901 = vmatprep.subr.bf16.mxu1 %v3219_v25  ;;  %v2499_v18 = vcombine.high %v3685_v16, %v3688_v17  ;;  %v2498_v21 = vcombine.low %v3685_v16, %v3688_v17  ;;  %v2501_v24 = vcombine.high %v3693_v19, %v3696_v20  ;;  %v2500_v25 = vcombine.low %v3693_v19, %v3696_v20 }
  0x21   : > { %2862 = vmatpush3.bf16.msra.mxu0 %v3220_v26  ;;  %v3268_v26 = vld [vmem:[%s4182_s1 + $0x70] sm:$0xff]  }
  0x22   : > { %2902 = vmatpush3.bf16.msra.mxu1 %v3221_v27  ;;  %2863 = vmatprep.subr.bf16.mxu0 %v3222_v28  ;;  %v2769_v27 = vcombine.high %v3644_v0, %v3693_v19  ;;  %v2768_v28 = vcombine.low %v3644_v0, %v3693_v19 }
  0x23   : > { %2903 = vmatprep.subr.bf16.mxu1 %v3223_v29  ;;  %v3269_v29 = vld [vmem:[%s4182_s1 + $0xf0] sm:$0xff]  }
  0x25   : > { %2864 = vmatpush3.bf16.msra.mxu0 %v3224_v30  ;;  %v3270_v30 = vld [vmem:[%s4182_s1 + $0x30] sm:$0xff]  }
  0x26   : > { %2904 = vmatpush3.bf16.msra.mxu1 %v3225_v31  ;;  %2929 = vmatprep.subr.bf16.mxu0 %v3232_v36  ;;  %v3271_v31 = vld [vmem:[%s4182_s1 + $0xb0] sm:$0xff]   ;;  %v223_v36 = vld [vmem:[%s3552_s6] sm:$0xff] }
  0x27   : > { %2969 = vmatprep.subr.bf16.mxu1 %v3233_v37  ;;  %v3738_v37 = vld [vmem:[%s3552_s6 + $0x10] sm:$0xff] }
  0x28   : > { %689 = vmatmul.mubr.bf16.vlgmr.msra.gmra.mrb[0].mxu0 %v3226_v32  ;;  %v3272_v32 = vld [vmem:[%s4182_s1 + $0x78] sm:$0xff]  }
  0x29   : > { %754 = vmatmul.mubr.bf16.vlgmr.msra.gmra.mrb[0].mxu1 %v3229_v34  ;;  %2930 = vmatpush3.bf16.msra.mxu0 %v3234_v38  ;;  %v3274_v34 = vld [vmem:[%s4182_s1 + $0x38] sm:$0xff]   ;;  %v224_v38 = vld [vmem:[%s3552_s6 + $0x8] sm:$0xff] }
  0x2a   : > { %2970 = vmatpush3.bf16.msra.mxu1 %v3235_v39  ;;  %2931 = vmatprep.subr.bf16.mxu0 %v3236_v40  ;;  %v3742_v39 = vld [vmem:[%s3552_s6 + $0x18] sm:$0xff]  ;;  %v2534_v40 = vcombine.low %v223_v36, %v3738_v37 }
  0x2b   : > { %2971 = vmatprep.subr.bf16.mxu1 %v3237_v41  ;;  %696 = vmatprep.mubr.bf16.mxu0 %v2491_v48  ;;  %v2535_v41 = vcombine.high %v223_v36, %v3738_v37  ;;  %v3280_v48 = vld [vmem:[%s4182_s1 + $0x240] sm:$0xff]   ;;  %v3308_v36 = vld [vmem:[%s4182_s1 + $0x268] sm:$0xff]  }
  0x2c   : > { %761 = vmatprep.mubr.bf16.mxu1 %v2493_v49  ;;  %v3281_v49 = vld [vmem:[%s4182_s1 + $0x2c0] sm:$0xff]  }
  0x2d   : > { %2932 = vmatpush3.bf16.msra.mxu0 %v3238_v42  ;;  %v2536_v42 = vcombine.low %v224_v38, %v3742_v39 }
  0x2e   : > { %2972 = vmatpush3.bf16.msra.mxu1 %v3239_v43  ;;  %2933 = vmatprep.subr.bf16.mxu0 %v3244_v52  ;;  %v2537_v43 = vcombine.high %v224_v38, %v3742_v39  ;;  %v3284_v52 = vld [vmem:[%s4182_s1 + $0x248] sm:$0xff]  }
  0x2f   : > { %2973 = vmatprep.subr.bf16.mxu1 %v3245_v53  ;;  %v3285_v53 = vld [vmem:[%s4182_s1 + $0x2c8] sm:$0xff]  }
  0x30   : > { %697 = vmatmul.mubr.bf16.gmra.mrb[4].mxu0 %v2490_v50  ;;  %v3282_v50 = vld [vmem:[%s4182_s1 + $0x200] sm:$0xff]   ;;  %v3309_v38 = vld [vmem:[%s4182_s1 + $0x2e8] sm:$0xff]  }
  0x31   : > { %762 = vmatmul.mubr.bf16.gmra.mrb[4].mxu1 %v2492_v51  ;;  %2934 = vmatpush3.bf16.msra.mxu0 %v3246_v54  ;;  %v3283_v51 = vld [vmem:[%s4182_s1 + $0x280] sm:$0xff]   ;;  %v3286_v54 = vld [vmem:[%s4182_s1 + $0x208] sm:$0xff]  }
  0x32   : > { %2974 = vmatpush3.bf16.msra.mxu1 %v3247_v55  ;;  %2935 = vmatprep.subr.bf16.mxu0 %v3248_v56  ;;  %v3287_v55 = vld [vmem:[%s4182_s1 + $0x288] sm:$0xff]   ;;  %v3773_v56 = vld [vmem:[%s3552_s6 + $0x20] sm:$0xff] }
  0x33   : > { %2975 = vmatprep.subr.bf16.mxu1 %v3249_v57  ;;  %704 = vmatprep.mubr.bf16.mxu0 %v2495_v63  ;;  %v3776_v57 = vld [vmem:[%s3552_s6 + $0x30] sm:$0xff]  ;;  %v3784_v63 = vld [vmem:[%s3552_s6 + $0x38] sm:$0xff] }
  0x34   : > { %769 = vmatprep.mubr.bf16.mxu1 %v2497_v3 }
  0x35   : > { %2936 = vmatpush3.bf16.msra.mxu0 %v3250_v58  ;;  %v3779_v58 = vld [vmem:[%s3552_s6 + $0x28] sm:$0xff] }
  0x36   : > { %2976 = vmatpush3.bf16.msra.mxu1 %v3251_v59  ;;  %2937 = vmatprep.subr.bf16.mxu0 %v3256_v5  ;;  %v2539_v59 = vcombine.high %v3773_v56, %v3776_v57  ;;  %v2541_v3 = vcombine.high %v3779_v58, %v3784_v63  ;;  %v3292_v5 = vld [vmem:[%s4182_s1 + $0x250] sm:$0xff]  }
  0x37   : > { %2977 = vmatprep.subr.bf16.mxu1 %v3257_v8  ;;  %v3293_v8 = vld [vmem:[%s4182_s1 + $0x2d0] sm:$0xff]  }
  0x38   : > { %705 = vmatmul.mubr.bf16.gmra.mrb[8].mxu0 %v2494_v1  ;;  %v2538_v1 = vcombine.low %v3773_v56, %v3776_v57 }
  0x39   : > { %770 = vmatmul.mubr.bf16.gmra.mrb[8].mxu1 %v2496_v4  ;;  %2938 = vmatpush3.bf16.msra.mxu0 %v3258_v10  ;;  %v2540_v4 = vcombine.low %v3779_v58, %v3784_v63  ;;  %v3294_v10 = vld [vmem:[%s4182_s1 + $0x210] sm:$0xff]  }
  0x3a   : > { %2978 = vmatpush3.bf16.msra.mxu1 %v3259_v11  ;;  %2939 = vmatprep.subr.bf16.mxu0 %v3260_v12  ;;  %v3295_v11 = vld [vmem:[%s4182_s1 + $0x290] sm:$0xff]   ;;  %v3296_v12 = vld [vmem:[%s4182_s1 + $0x258] sm:$0xff]  }
  0x3b   : > { %2979 = vmatprep.subr.bf16.mxu1 %v3261_v13  ;;  %712 = vmatprep.mubr.bf16.mxu0 %v2499_v18  ;;  %v3297_v13 = vld [vmem:[%s4182_s1 + $0x2d8] sm:$0xff]   ;;  %v3817_v18 = vld [vmem:[%s3552_s6 + $0x40] sm:$0xff] }
  0x3c   : > { %777 = vmatprep.mubr.bf16.mxu1 %v2501_v24 }
  0x3d   : > { %2940 = vmatpush3.bf16.msra.mxu0 %v3262_v14  ;;  %v3298_v14 = vld [vmem:[%s4182_s1 + $0x218] sm:$0xff]  }
  0x3e   : > { %2980 = vmatpush3.bf16.msra.mxu1 %v3263_v15  ;;  %2941 = vmatprep.subr.bf16.mxu0 %v3268_v26  ;;  %v3299_v15 = vld [vmem:[%s4182_s1 + $0x298] sm:$0xff]  }
  0x3f   : > { %2981 = vmatprep.subr.bf16.mxu1 %v3269_v29  ;;  %v3828_v26 = vld [vmem:[%s3552_s6 + $0x58] sm:$0xff] }
  0x40   : > { %713 = vmatmul.mubr.bf16.gmra.mrb[12].mxu0 %v2498_v21  ;;  %v3820_v21 = vld [vmem:[%s3552_s6 + $0x50] sm:$0xff] }
  0x41   : > { %778 = vmatmul.mubr.bf16.gmra.mrb[12].mxu1 %v2500_v25  ;;  %2942 = vmatpush3.bf16.msra.mxu0 %v3270_v30  ;;  %v2543_v24 = vcombine.high %v3817_v18, %v3820_v21  ;;  %v3825_v25 = vld [vmem:[%s3552_s6 + $0x48] sm:$0xff]  ;;  %v2542_v29 = vcombine.low %v3817_v18, %v3820_v21 }
  0x42   : > { %2982 = vmatpush3.bf16.msra.mxu1 %v3271_v31  ;;  %2943 = vmatprep.subr.bf16.mxu0 %v3272_v32  ;;  %v2545_v30 = vcombine.high %v3825_v25, %v3828_v26  ;;  %v2544_v31 = vcombine.low %v3825_v25, %v3828_v26  ;;  %v3304_v32 = vld [vmem:[%s4182_s1 + $0x260] sm:$0xff]  }
  0x43   : > { %2983 = vmatprep.subr.bf16.mxu1 %v3273_v33  ;;  %1090 = vmatprep.mubr.bf16.mxu0 %v2535_v41  ;;  %v3305_v33 = vld [vmem:[%s4182_s1 + $0x2e0] sm:$0xff]   ;;  %v3311_v41 = vld [vmem:[%s4182_s1 + $0x2a8] sm:$0xff]  }
  0x44   : > { %1155 = vmatprep.mubr.bf16.mxu1 %v2537_v43  ;;  %v3864_v43 = vld [vmem:[%s3552_s6 + $0x70] sm:$0xff] }
  0x45   : > { %2944 = vmatpush3.bf16.msra.mxu0 %v3274_v34  ;;  %v3306_v34 = vld [vmem:[%s4182_s1 + $0x220] sm:$0xff]  }
  0x46   : > { %2984 = vmatpush3.bf16.msra.mxu1 %v3275_v35  ;;  %3009 = vmatprep.subr.bf16.mxu0 %v3280_v48  ;;  %v3307_v35 = vld [vmem:[%s4182_s1 + $0x2a0] sm:$0xff]   ;;  %v3867_v48 = vld [vmem:[%s3552_s6 + $0x68] sm:$0xff] }
  0x47   : > { %3049 = vmatprep.subr.bf16.mxu1 %v3281_v49  ;;  %v3870_v49 = vld [vmem:[%s3552_s6 + $0x78] sm:$0xff] }
  0x48   : > { %1091 = vmatmul.mubr.bf16.vlgmr.msra.gmra.mrb[16].mxu0 %v2534_v40  ;;  %v3310_v40 = vld [vmem:[%s4182_s1 + $0x228] sm:$0xff]  }
  0x49   : > { %1156 = vmatmul.mubr.bf16.vlgmr.msra.gmra.mrb[16].mxu1 %v2536_v42  ;;  %3010 = vmatpush3.bf16.msra.mxu0 %v3282_v50  ;;  %v3861_v42 = vld [vmem:[%s3552_s6 + $0x60] sm:$0xff] }
  0x4a   : > { %3050 = vmatpush3.bf16.msra.mxu1 %v3283_v51  ;;  %3011 = vmatprep.subr.bf16.mxu0 %v3284_v52  ;;  %v2547_v50 = vcombine.high %v3861_v42, %v3864_v43  ;;  %v2549_v51 = vcombine.high %v3867_v48, %v3870_v49  ;;  %v2546_v52 = vcombine.low %v3861_v42, %v3864_v43 }
  0x4b   : > { %3051 = vmatprep.subr.bf16.mxu1 %v3285_v53  ;;  %1098 = vmatprep.mubr.bf16.mxu0 %v2539_v59  ;;  %v2548_v53 = vcombine.low %v3867_v48, %v3870_v49  ;;  %v3318_v59 = vld [vmem:[%s4182_s1 + $0x230] sm:$0xff]  }
  0x4c   : > { %1163 = vmatprep.mubr.bf16.mxu1 %v2541_v3  ;;  %v3319_v3 = vld [vmem:[%s4182_s1 + $0x2b0] sm:$0xff]  }
  0x4d   : > { %3012 = vmatpush3.bf16.msra.mxu0 %v3286_v54  ;;  %v3316_v54 = vld [vmem:[%s4182_s1 + $0x270] sm:$0xff]  }
  0x4e   : > { %3052 = vmatpush3.bf16.msra.mxu1 %v3287_v55  ;;  %3013 = vmatprep.subr.bf16.mxu0 %v3292_v5  ;;  %v3317_v55 = vld [vmem:[%s4182_s1 + $0x2f0] sm:$0xff]   ;;  %v3320_v5 = vld [vmem:[%s4182_s1 + $0x278] sm:$0xff]  }
  0x4f   : > { %3053 = vmatprep.subr.bf16.mxu1 %v3293_v8  ;;  %v3321_v8 = vld [vmem:[%s4182_s1 + $0x2f8] sm:$0xff]  }
  0x50   : > { %1099 = vmatmul.mubr.bf16.gmra.mrb[20].mxu0 %v2538_v1  ;;  %v2647_v1 = vcombine.high %v3738_v37, %v3773_v56 }
  0x51   : > { %1164 = vmatmul.mubr.bf16.gmra.mrb[20].mxu1 %v2540_v4  ;;  %3014 = vmatpush3.bf16.msra.mxu0 %v3294_v10  ;;  %v2649_v4 = vcombine.high %v3742_v39, %v3779_v58  ;;  %v3322_v10 = vld [vmem:[%s4182_s1 + $0x238] sm:$0xff]  }
  0x52   : > { %3054 = vmatpush3.bf16.msra.mxu1 %v3295_v11  ;;  %3015 = vmatprep.subr.bf16.mxu0 %v3296_v12  ;;  %v3323_v11 = vld [vmem:[%s4182_s1 + $0x2b8] sm:$0xff]   ;;  %v2646_v12 = vcombine.low %v3738_v37, %v3773_v56  ;;  %v2651_v37 = vcombine.high %v3776_v57, %v3817_v18  ;;  %v2653_v56 = vcombine.high %v3784_v63, %v3825_v25 }
  0x53   : > { %3055 = vmatprep.subr.bf16.mxu1 %v3297_v13  ;;  %1106 = vmatprep.mubr.bf16.mxu0 %v2543_v24  ;;  %v2648_v13 = vcombine.low %v3742_v39, %v3779_v58  ;;  %v3330_v24 = vld [vmem:[%s4182_s1 + $0x300] sm:$0xff]   ;;  %v3332_v58 = vld [vmem:[%s4182_s1 + $0x348] sm:$0xff]  }
  0x54   : > { %1171 = vmatprep.mubr.bf16.mxu1 %v2545_v30  ;;  %v3331_v39 = vld [vmem:[%s4182_s1 + $0x380] sm:$0xff]   ;;  %v3334_v30 = vld [vmem:[%s4182_s1 + $0x308] sm:$0xff]  }
  0x55   : > { %3016 = vmatpush3.bf16.msra.mxu0 %v3298_v14  ;;  %v3328_v14 = vld [vmem:[%s4182_s1 + $0x340] sm:$0xff]  }
  0x56   : > { %3056 = vmatpush3.bf16.msra.mxu1 %v3299_v15  ;;  %3017 = vmatprep.subr.bf16.mxu0 %v3304_v32  ;;  %v3329_v15 = vld [vmem:[%s4182_s1 + $0x3c0] sm:$0xff]   ;;  %v2650_v32 = vcombine.low %v3776_v57, %v3817_v18  ;;  %v2655_v57 = vcombine.high %v3820_v21, %v3861_v42  ;;  %v2657_v18 = vcombine.high %v3828_v26, %v3867_v48 }
  0x57   : > { %3057 = vmatprep.subr.bf16.mxu1 %v3305_v33  ;;  %v2652_v33 = vcombine.low %v3784_v63, %v3825_v25  ;;  %v3343_v63 = vld [vmem:[%s4182_s1 + $0x390] sm:$0xff]   ;;  %v3344_v25 = vld [vmem:[%s4182_s1 + $0x358] sm:$0xff]  }
  0x58   : > { %1107 = vmatmul.mubr.bf16.gmra.mrb[24].mxu0 %v2542_v29  ;;  %v3333_v29 = vld [vmem:[%s4182_s1 + $0x3c8] sm:$0xff]  }
  0x59   : > { %1172 = vmatmul.mubr.bf16.gmra.mrb[24].mxu1 %v2544_v31  ;;  %3018 = vmatpush3.bf16.msra.mxu0 %v3306_v34  ;;  %v3335_v31 = vld [vmem:[%s4182_s1 + $0x388] sm:$0xff]   ;;  %v3340_v34 = vld [vmem:[%s4182_s1 + $0x350] sm:$0xff]  }
  0x5a   : > { %3058 = vmatpush3.bf16.msra.mxu1 %v3307_v35  ;;  %3019 = vmatprep.subr.bf16.mxu0 %v3308_v36  ;;  %v3341_v35 = vld [vmem:[%s4182_s1 + $0x3d0] sm:$0xff]  }
  0x5b   : > { %3059 = vmatprep.subr.bf16.mxu1 %v3309_v38  ;;  %1114 = vmatprep.mubr.bf16.mxu0 %v2547_v50  ;;  %v3342_v36 = vld [vmem:[%s4182_s1 + $0x310] sm:$0xff]   ;;  %v3345_v38 = vld [vmem:[%s4182_s1 + $0x3d8] sm:$0xff]   ;;  %v2654_v50 = vcombine.low %v3820_v21, %v3861_v42  ;;  %v3354_v21 = vld [vmem:[%s4182_s1 + $0x320] sm:$0xff]  }
  0x5c   : > { %1179 = vmatprep.mubr.bf16.mxu1 %v2549_v51  ;;  %v2656_v51 = vcombine.low %v3828_v26, %v3867_v48  ;;  %v3355_v26 = vld [vmem:[%s4182_s1 + $0x3a0] sm:$0xff]   ;;  %v3356_v42 = vld [vmem:[%s4182_s1 + $0x368] sm:$0xff]  }
  0x5d   : > { %3020 = vmatpush3.bf16.msra.mxu0 %v3310_v40  ;;  %v3346_v40 = vld [vmem:[%s4182_s1 + $0x318] sm:$0xff]   ;;  %v3357_v48 = vld [vmem:[%s4182_s1 + $0x3e8] sm:$0xff]  }
  0x5e   : > { %3060 = vmatpush3.bf16.msra.mxu1 %v3311_v41  ;;  %3021 = vmatprep.subr.bf16.mxu0 %v3316_v54  ;;  %v3347_v41 = vld [vmem:[%s4182_s1 + $0x398] sm:$0xff]   ;;  %v3358_v54 = vld [vmem:[%s4182_s1 + $0x328] sm:$0xff]  }
  0x5f   : > { %3061 = vmatprep.subr.bf16.mxu1 %v3317_v55  ;;  %v3359_v55 = vld [vmem:[%s4182_s1 + $0x3a8] sm:$0xff]  }
  0x60   : > { %1115 = vmatmul.mubr.bf16.gmra.mrb[28].mxu0 %v2546_v52  ;;  %v3352_v52 = vld [vmem:[%s4182_s1 + $0x360] sm:$0xff]  }
  0x61   : > { %1180 = vmatmul.mubr.bf16.gmra.mrb[28].mxu1 %v2548_v53  ;;  %3022 = vmatpush3.bf16.msra.mxu0 %v3318_v59  ;;  %v3353_v53 = vld [vmem:[%s4182_s1 + $0x3e0] sm:$0xff]  }
  0x62   : > { %3062 = vmatpush3.bf16.msra.mxu1 %v3319_v3  ;;  %3023 = vmatprep.subr.bf16.mxu0 %v3320_v5  ;;  %v1202_v59 = vld [vmem:[%s3552_s6 + $0x80] sm:$0xff] }
  0x63   : > { %1573 = vmatprep.mubr.bf16.mxu0 %v2647_v1  ;;  %3063 = vmatprep.subr.bf16.mxu1 %v3321_v8  ;;  %v1203_v1 = vld [vmem:[%s3552_s6 + $0x88] sm:$0xff]  ;;  %v2659_v3 = vcombine.high %v3864_v43, %v1202_v59  ;;  %v2658_v5 = vcombine.low %v3864_v43, %v1202_v59  ;;  %v3364_v8 = vld [vmem:[%s4182_s1 + $0x370] sm:$0xff]  }
  0x64   : > { %1638 = vmatprep.mubr.bf16.mxu1 %v2649_v4  ;;  %v2661_v4 = vcombine.high %v3870_v49, %v1203_v1  ;;  %v3367_v43 = vld [vmem:[%s4182_s1 + $0x3b0] sm:$0xff]  }
  0x65   : > { %3024 = vmatpush3.bf16.msra.mxu0 %v3322_v10  ;;  %v2660_v10 = vcombine.low %v3870_v49, %v1203_v1  ;;  %v3368_v49 = vld [vmem:[%s4182_s1 + $0x378] sm:$0xff]  }
  0x66   : > { %3064 = vmatpush3.bf16.msra.mxu1 %v3323_v11  ;;  %3089 = vmatprep.subr.bf16.mxu0 %v3328_v14  ;;  %v3365_v11 = vld [vmem:[%s4182_s1 + $0x3f0] sm:$0xff]   ;;  %v3370_v14 = vld [vmem:[%s4182_s1 + $0x338] sm:$0xff]  }
  0x67   : > { %3129 = vmatprep.subr.bf16.mxu1 %v3329_v15  ;;  %v3371_v15 = vld [vmem:[%s4182_s1 + $0x3b8] sm:$0xff]  }
  0x68   : > { %1574 = vmatmul.mubr.bf16.vlgmr.msra.gmra.mrb[32].mxu0 %v2646_v12  ;;  %v3366_v12 = vld [vmem:[%s4182_s1 + $0x330] sm:$0xff]  }
  0x69   : > { %1639 = vmatmul.mubr.bf16.vlgmr.msra.gmra.mrb[32].mxu1 %v2648_v13  ;;  %3090 = vmatpush3.bf16.msra.mxu0 %v3330_v24  ;;  %v3369_v13 = vld [vmem:[%s4182_s1 + $0x3f8] sm:$0xff]   ;;  %v1679_v24 = vld [vmem:[%s3552_s6 + $0xa0] sm:$0xff] }
  0x6a   : > { %3130 = vmatpush3.bf16.msra.mxu1 %v3331_v39  ;;  %3091 = vmatprep.subr.bf16.mxu0 %v3332_v58  ;;  %v2759_v39 = vcombine.high %v1679_v24, %v3589_v44 }
  0x6b   : > { %1581 = vmatprep.mubr.bf16.mxu0 %v2651_v37  ;;  %3131 = vmatprep.subr.bf16.mxu1 %v3333_v29  ;;  %v2758_v37 = vcombine.low %v1679_v24, %v3589_v44  ;;  %v1693_v44 = vld [vmem:[%s3552_s6 + $0x110] sm:$0xff] }
  0x6c   : > { %1646 = vmatprep.mubr.bf16.mxu1 %v2653_v56  ;;  %v1680_v56 = vld [vmem:[%s3552_s6 + $0xa8] sm:$0xff]  ;;  %v2770_v45 = vcombine.low %v3688_v17, %v1693_v44 }
  0x6d   : > { %3092 = vmatpush3.bf16.msra.mxu0 %v3334_v30  ;;  %v2760_v58 = vcombine.low %v1680_v56, %v3595_v46  ;;  %v2761_v29 = vcombine.high %v1680_v56, %v3595_v46  ;;  %v1694_v46 = vld [vmem:[%s3552_s6 + $0x118] sm:$0xff] }
  0x6e   : > { %3132 = vmatpush3.bf16.msra.mxu1 %v3335_v31  ;;  %3093 = vmatprep.subr.bf16.mxu0 %v3340_v34  ;;  %v2772_v47 = vcombine.low %v3696_v20, %v1694_v46 }
  0x6f   : > { %3133 = vmatprep.subr.bf16.mxu1 %v3341_v35 }
  0x70   : > { %1582 = vmatmul.mubr.bf16.gmra.mrb[36].mxu0 %v2650_v32 }
  0x71   : > { %1647 = vmatmul.mubr.bf16.gmra.mrb[36].mxu1 %v2652_v33  ;;  %3094 = vmatpush3.bf16.msra.mxu0 %v3342_v36 }
  0x72   : > { %3134 = vmatpush3.bf16.msra.mxu1 %v3343_v63  ;;  %3095 = vmatprep.subr.bf16.mxu0 %v3344_v25 }
  0x73   : > { %1589 = vmatprep.mubr.bf16.mxu0 %v2655_v57  ;;  %3135 = vmatprep.subr.bf16.mxu1 %v3345_v38 }
  0x74   : > { %1654 = vmatprep.mubr.bf16.mxu1 %v2657_v18 }
  0x75   : > { %3096 = vmatpush3.bf16.msra.mxu0 %v3346_v40 }
  0x76   : > { %3136 = vmatpush3.bf16.msra.mxu1 %v3347_v41  ;;  %3097 = vmatprep.subr.bf16.mxu0 %v3352_v52 }
  0x77   : > { %3137 = vmatprep.subr.bf16.mxu1 %v3353_v53 }
  0x78   : > { %1590 = vmatmul.mubr.bf16.gmra.mrb[40].mxu0 %v2654_v50 }
  0x79   : > { %1655 = vmatmul.mubr.bf16.gmra.mrb[40].mxu1 %v2656_v51  ;;  %3098 = vmatpush3.bf16.msra.mxu0 %v3354_v21 }
  0x7a   : > { %3138 = vmatpush3.bf16.msra.mxu1 %v3355_v26  ;;  %3099 = vmatprep.subr.bf16.mxu0 %v3356_v42 }
  0x7b   : > { %3139 = vmatprep.subr.bf16.mxu1 %v3357_v48  ;;  %1597 = vmatprep.mubr.bf16.mxu0 %v2659_v3 }
  0x7c   : > { %1662 = vmatprep.mubr.bf16.mxu1 %v2661_v4 }
  0x7d   : > { %3100 = vmatpush3.bf16.msra.mxu0 %v3358_v54 }
  0x7e   : > { %3140 = vmatpush3.bf16.msra.mxu1 %v3359_v55  ;;  %3101 = vmatprep.subr.bf16.mxu0 %v3364_v8 }
  0x7f   : > { %3141 = vmatprep.subr.bf16.mxu1 %v3365_v11 }
  0x80   : > { %1598 = vmatmul.mubr.bf16.gmra.mrb[44].mxu0 %v2658_v5 }
  0x81   : > { %1663 = vmatmul.mubr.bf16.gmra.mrb[44].mxu1 %v2660_v10  ;;  %3102 = vmatpush3.bf16.msra.mxu0 %v3366_v12 }
  0x82   : > { %3142 = vmatpush3.bf16.msra.mxu1 %v3367_v43  ;;  %3103 = vmatprep.subr.bf16.mxu0 %v3368_v49 }
  0x83   : > { %3143 = vmatprep.subr.bf16.mxu1 %v3369_v13  ;;  %2064 = vmatprep.mubr.bf16.mxu0 %v2759_v39 }
  0x84   : > { %2129 = vmatprep.mubr.bf16.mxu1 %v2761_v29 }
  0x85   : > { %3104 = vmatpush3.bf16.msra.mxu0 %v3370_v14 }
  0x86   : > { %3144 = vmatpush3.bf16.msra.mxu1 %v3371_v15 }
  0x88   : > { %2065 = vmatmul.mubr.bf16.vlgmr.msra.gmra.mrb[48].mxu0 %v2758_v37 }
  0x89   : > { %2130 = vmatmul.mubr.bf16.vlgmr.msra.gmra.mrb[48].mxu1 %v2760_v58  ;;  %2072 = vmatprep.mubr.bf16.mxu0 %v2763_v2  ;;  %v2771_v2 = vcombine.high %v3688_v17, %v1693_v44 }
  0x8a   : > { %2137 = vmatprep.mubr.bf16.mxu1 %v2765_v6  ;;  %v2773_v6 = vcombine.high %v3696_v20, %v1694_v46 }
  0x90   : > { %2073 = vmatmul.mubr.bf16.gmra.mrb[52].mxu0 %v2762_v7 }
  0x91   : > { %2138 = vmatmul.mubr.bf16.gmra.mrb[52].mxu1 %v2764_v9  ;;  %2080 = vmatprep.mubr.bf16.mxu0 %v2767_v22 }
  0x92   : > { %2145 = vmatprep.mubr.bf16.mxu1 %v2769_v27 }
  0x98   : > { %2081 = vmatmul.mubr.bf16.gmra.mrb[56].mxu0 %v2766_v23 }
  0x99   : > { %2146 = vmatmul.mubr.bf16.gmra.mrb[56].mxu1 %v2768_v28  ;;  %2088 = vmatprep.mubr.bf16.mxu0 %v2771_v2 }
  0x9a   : > { %2153 = vmatprep.mubr.bf16.mxu1 %v2773_v6 }
  0xa0   : > { %2089 = vmatmul.mubr.bf16.gmra.mrb[60].mxu0 %v2770_v45 }
  0xa1   : > { %2154 = vmatmul.mubr.bf16.gmra.mrb[60].mxu1 %v2772_v47 }
  0xfb   : > { %v2865_v60 = vpop.f32.mrb[0].mxu0 }
  0xfc   : > { %v2905_v62 = vpop.f32.mrb[0].mxu1  ;;  %v2866_v7 = vpop.f32.mrb[1].mxu0 }
  0xfd   : > { %v2867_v9 = vadd.f32 %v2866_v7, %v2865_v60  ;;  %v2906_v22 = vpop.f32.mrb[1].mxu1  ;;  %v2868_v27 = vpop.f32.mrb[2].mxu0 }
  0xfe   : > { %v2907_v61 = vadd.f32 %v2906_v22, %v2905_v62  ;;  %v2908_v16 = vpop.f32.mrb[2].mxu1  ;;  %v2869_v23 = vpop.f32.mrb[3].mxu0 }
  0xff   : > { %v2870_v30 = vadd.f32 %v2869_v23, %v2868_v27  ;;  %v2909_v0 = vpop.f32.mrb[3].mxu1 }
 0x100   : > { %v756_v19 = vadd.f32 %v2907_v61, %v2867_v9  ;;  %v2910_v28 = vadd.f32 %v2909_v0, %v2908_v16 }
 0x102   : > { %v759_v31 = vadd.f32 %v2910_v28, %v2870_v30 }
 0x103   : > { %v2871_v32 = vpop.f32.mrb[4].mxu0 }
 0x104   : > { %v2911_v17 = vpop.f32.mrb[4].mxu1  ;;  %v2872_v33 = vpop.f32.mrb[5].mxu0 }
 0x105   : > { %v2912_v20 = vpop.f32.mrb[5].mxu1  ;;  %v2873_v34 = vadd.f32 %v2872_v33, %v2871_v32  ;;  %v2874_v36 = vpop.f32.mrb[6].mxu0 }
 0x106   : > { %v2913_v35 = vadd.f32 %v2912_v20, %v2911_v17  ;;  %v2914_v57 = vpop.f32.mrb[6].mxu1  ;;  %v2875_v63 = vpop.f32.mrb[7].mxu0 }
 0x107   : > { %v2915_v18 = vpop.f32.mrb[7].mxu1  ;;  %v2876_v38 = vadd.f32 %v2875_v63, %v2874_v36 }
 0x108   : > { %v764_v25 = vadd.f32 %v2913_v35, %v2873_v34  ;;  %v2916_v40 = vadd.f32 %v2915_v18, %v2914_v57 }
 0x10a   : > { %v767_v41 = vadd.f32 %v2916_v40, %v2876_v38 }
 0x10b   : > { %v2877_v50 = vpop.f32.mrb[8].mxu0 }
 0x10c   : > { %v2917_v51 = vpop.f32.mrb[8].mxu1  ;;  %v2878_v52 = vpop.f32.mrb[9].mxu0 }
 0x10d   : > { %v2879_v53 = vadd.f32 %v2878_v52, %v2877_v50  ;;  %v2918_v21 = vpop.f32.mrb[9].mxu1  ;;  %v2880_v26 = vpop.f32.mrb[10].mxu0 }
 0x10e   : > { %v2919_v42 = vadd.f32 %v2918_v21, %v2917_v51  ;;  %v2920_v48 = vpop.f32.mrb[10].mxu1  ;;  %v2881_v54 = vpop.f32.mrb[11].mxu0 }
 0x10f   : > { %v2882_v55 = vadd.f32 %v2881_v54, %v2880_v26  ;;  %v2921_v59 = vpop.f32.mrb[11].mxu1 }
 0x110   : > { %v772_v1 = vadd.f32 %v2919_v42, %v2879_v53  ;;  %v2922_v3 = vadd.f32 %v2921_v59, %v2920_v48 }
 0x112   : > { %v775_v4 = vadd.f32 %v2922_v3, %v2882_v55 }
 0x113   : > { %v2883_v5 = vpop.f32.mrb[12].mxu0 }
 0x114   : > { %v2923_v8 = vpop.f32.mrb[12].mxu1  ;;  %v2884_v10 = vpop.f32.mrb[13].mxu0 }
 0x115   : > { %v2885_v11 = vadd.f32 %v2884_v10, %v2883_v5  ;;  %v2924_v12 = vpop.f32.mrb[13].mxu1  ;;  %v2886_v43 = vpop.f32.mrb[14].mxu0 }
 0x116   : > { %v2925_v49 = vadd.f32 %v2924_v12, %v2923_v8  ;;  %v2926_v13 = vpop.f32.mrb[14].mxu1  ;;  %v2887_v14 = vpop.f32.mrb[15].mxu0 }
 0x117   : > { %v2888_v15 = vadd.f32 %v2887_v14, %v2886_v43  ;;  %v2927_v24 = vpop.f32.mrb[15].mxu1 }
 0x118   : > { %v780_v37 = vadd.f32 %v2925_v49, %v2885_v11  ;;  %v2928_v39 = vadd.f32 %v2927_v24, %v2926_v13 }
 0x11a   : > { %v4066_v56 = vadd.f32 %v2928_v39, %v2888_v15 }
 0x11b   : > { %v2945_v58 = vpop.f32.mrb[16].mxu0 }
 0x11c   : > { %v2985_v29 = vpop.f32.mrb[16].mxu1  ;;  %v2946_v44 = vpop.f32.mrb[17].mxu0 }
 0x11d   : > { %v2986_v46 = vpop.f32.mrb[17].mxu1  ;;  %v2947_v2 = vadd.f32 %v2946_v44, %v2945_v58  ;;  %v2948_v45 = vpop.f32.mrb[18].mxu0 }
 0x11e   : > { %v2987_v6 = vadd.f32 %v2986_v46, %v2985_v29  ;;  %v2988_v47 = vpop.f32.mrb[18].mxu1  ;;  %v2949_v60 = vpop.f32.mrb[19].mxu0 }
 0x11f   : > { %v2989_v62 = vpop.f32.mrb[19].mxu1  ;;  %v1093_v7 = vadd.f32 %v2947_v2, %v756_v19  ;;  %v2950_v9 = vadd.f32 %v2949_v60, %v2948_v45 }
 0x120   : > { %v2990_v22 = vadd.f32 %v2989_v62, %v2988_v47 }
 0x121   : > { %v4068_v27 = vadd.f32 %v2987_v6, %v1093_v7  ;;  %v1096_v61 = vadd.f32 %v2950_v9, %v759_v31 }
 0x123   : > { %v4070_v16 = vadd.f32 %v2990_v22, %v1096_v61  ;;  %v2951_v23 = vpop.f32.mrb[20].mxu0 }
 0x124   : > { %v2991_v30 = vpop.f32.mrb[20].mxu1  ;;  %v2952_v0 = vpop.f32.mrb[21].mxu0 }
 0x125   : > { %v2953_v28 = vadd.f32 %v2952_v0, %v2951_v23  ;;  %v2992_v32 = vpop.f32.mrb[21].mxu1  ;;  %v2954_v17 = vpop.f32.mrb[22].mxu0 }
 0x126   : > { %v2993_v33 = vadd.f32 %v2992_v32, %v2991_v30  ;;  %v2994_v20 = vpop.f32.mrb[22].mxu1  ;;  %v2955_v34 = vpop.f32.mrb[23].mxu0 }
 0x127   : > { %v1101_v35 = vadd.f32 %v2953_v28, %v764_v25  ;;  %v2956_v36 = vadd.f32 %v2955_v34, %v2954_v17  ;;  %v2995_v57 = vpop.f32.mrb[23].mxu1 }
 0x128   : > { %v2996_v19 = vadd.f32 %v2995_v57, %v2994_v20 }
 0x129   : > { %v4072_v63 = vadd.f32 %v2993_v33, %v1101_v35  ;;  %v1104_v18 = vadd.f32 %v2956_v36, %v767_v41 }
 0x12b   : > { %v4074_v38 = vadd.f32 %v2996_v19, %v1104_v18  ;;  %v2957_v31 = vpop.f32.mrb[24].mxu0 }
 0x12c   : > { %v2997_v40 = vpop.f32.mrb[24].mxu1  ;;  %v2958_v50 = vpop.f32.mrb[25].mxu0 }
 0x12d   : > { %v2959_v51 = vadd.f32 %v2958_v50, %v2957_v31  ;;  %v2998_v52 = vpop.f32.mrb[25].mxu1  ;;  %v2960_v53 = vpop.f32.mrb[26].mxu0 }
 0x12e   : > { %v2999_v21 = vadd.f32 %v2998_v52, %v2997_v40  ;;  %v3000_v26 = vpop.f32.mrb[26].mxu1  ;;  %v2961_v42 = vpop.f32.mrb[27].mxu0 }
 0x12f   : > { %v1109_v48 = vadd.f32 %v2959_v51, %v772_v1  ;;  %v2962_v54 = vadd.f32 %v2961_v42, %v2960_v53  ;;  %v3001_v25 = vpop.f32.mrb[27].mxu1 }
 0x130   : > { %v3002_v55 = vadd.f32 %v3001_v25, %v3000_v26 }
 0x131   : > { %v4076_v59 = vadd.f32 %v2999_v21, %v1109_v48  ;;  %v1112_v3 = vadd.f32 %v2962_v54, %v775_v4 }
 0x133   : > { %v4078_v5 = vadd.f32 %v3002_v55, %v1112_v3  ;;  %v2963_v41 = vpop.f32.mrb[28].mxu0 }
 0x134   : > { %v3003_v8 = vpop.f32.mrb[28].mxu1  ;;  %v2964_v10 = vpop.f32.mrb[29].mxu0 }
 0x135   : > { %v3004_v11 = vpop.f32.mrb[29].mxu1  ;;  %v2965_v12 = vadd.f32 %v2964_v10, %v2963_v41  ;;  %v2966_v49 = vpop.f32.mrb[30].mxu0 }
 0x136   : > { %v3005_v43 = vadd.f32 %v3004_v11, %v3003_v8  ;;  %v3006_v13 = vpop.f32.mrb[30].mxu1  ;;  %v2967_v14 = vpop.f32.mrb[31].mxu0 }
 0x137   : > { %v3007_v15 = vpop.f32.mrb[31].mxu1  ;;  %v1117_v24 = vadd.f32 %v2965_v12, %v780_v37  ;;  %v2968_v1 = vadd.f32 %v2967_v14, %v2966_v49 }
 0x138   : > { %v3008_v39 = vadd.f32 %v3007_v15, %v3006_v13 }
 0x139   : > { %v4080_v58 = vadd.f32 %v3005_v43, %v1117_v24  ;;  %v1120_v29 = vadd.f32 %v2968_v1, %v4066_v56 }
 0x13b   : > { %v4083_v4 = vadd.f32 %v3008_v39, %v1120_v29  ;;  %v3025_v44 = vpop.f32.mrb[32].mxu0 }
 0x13c   : > { %v3065_v46 = vpop.f32.mrb[32].mxu1  ;;  %v3026_v2 = vpop.f32.mrb[33].mxu0 }
 0x13d   : > { %v3066_v6 = vpop.f32.mrb[33].mxu1  ;;  %v3027_v45 = vadd.f32 %v3026_v2, %v3025_v44  ;;  %v3028_v60 = vpop.f32.mrb[34].mxu0 }
 0x13e   : > { %v3067_v47 = vadd.f32 %v3066_v6, %v3065_v46  ;;  %v3068_v62 = vpop.f32.mrb[34].mxu1  ;;  %v3029_v7 = vpop.f32.mrb[35].mxu0 }
 0x13f   : > { %v3069_v9 = vpop.f32.mrb[35].mxu1  ;;  %v3030_v37 = vadd.f32 %v3029_v7, %v3028_v60 }
 0x140   : > { %v1641_v22 = vadd.f32 %v3067_v47, %v3027_v45  ;;  %v3070_v61 = vadd.f32 %v3069_v9, %v3068_v62 }
 0x142   : > { %v4086_v23 = vadd.f32 %v1641_v22, %v4068_v27  ;;  %v1644_v30 = vadd.f32 %v3070_v61, %v3030_v37 }
 0x143   : > { %v3031_v0 = vpop.f32.mrb[36].mxu0 }
 0x144   : > { %v4089_v56 = vadd.f32 %v1644_v30, %v4070_v16  ;;  %v3071_v28 = vpop.f32.mrb[36].mxu1  ;;  %v3032_v32 = vpop.f32.mrb[37].mxu0 }
 0x145   : > { %v3072_v17 = vpop.f32.mrb[37].mxu1  ;;  %v3033_v33 = vadd.f32 %v3032_v32, %v3031_v0  ;;  %v3034_v34 = vpop.f32.mrb[38].mxu0 }
 0x146   : > { %v3073_v20 = vadd.f32 %v3072_v17, %v3071_v28  ;;  %v3074_v35 = vpop.f32.mrb[38].mxu1  ;;  %v3035_v36 = vpop.f32.mrb[39].mxu0 }
 0x147   : > { %v3075_v57 = vpop.f32.mrb[39].mxu1  ;;  %v3036_v18 = vadd.f32 %v3035_v36, %v3034_v34 }
 0x148   : > { %v1649_v19 = vadd.f32 %v3073_v20, %v3033_v33  ;;  %v3076_v31 = vadd.f32 %v3075_v57, %v3074_v35 }
 0x14a   : > { %v4092_v27 = vadd.f32 %v1649_v19, %v4072_v63  ;;  %v1652_v40 = vadd.f32 %v3076_v31, %v3036_v18 }
 0x14b   : > { %v3037_v50 = vpop.f32.mrb[40].mxu0 }
 0x14c   : > { %v4095_v16 = vadd.f32 %v1652_v40, %v4074_v38  ;;  %v3077_v51 = vpop.f32.mrb[40].mxu1  ;;  %v3038_v52 = vpop.f32.mrb[41].mxu0 }
 0x14d   : > { %v3078_v53 = vpop.f32.mrb[41].mxu1  ;;  %v3039_v21 = vadd.f32 %v3038_v52, %v3037_v50  ;;  %v3040_v42 = vpop.f32.mrb[42].mxu0 }
 0x14e   : > { %v3079_v26 = vadd.f32 %v3078_v53, %v3077_v51  ;;  %v3080_v48 = vpop.f32.mrb[42].mxu1  ;;  %v3041_v54 = vpop.f32.mrb[43].mxu0 }
 0x14f   : > { %v3081_v25 = vpop.f32.mrb[43].mxu1  ;;  %v3042_v3 = vadd.f32 %v3041_v54, %v3040_v42 }
 0x150   : > { %v1657_v55 = vadd.f32 %v3079_v26, %v3039_v21  ;;  %v3082_v41 = vadd.f32 %v3081_v25, %v3080_v48 }
 0x152   : > { %v4098_v63 = vadd.f32 %v1657_v55, %v4076_v59  ;;  %v1660_v8 = vadd.f32 %v3082_v41, %v3042_v3 }
 0x153   : > { %v3043_v10 = vpop.f32.mrb[44].mxu0 }
 0x154   : > { %v4101_v38 = vadd.f32 %v1660_v8, %v4078_v5  ;;  %v3083_v11 = vpop.f32.mrb[44].mxu1  ;;  %v3044_v12 = vpop.f32.mrb[45].mxu0 }
 0x155   : > { %v3084_v43 = vpop.f32.mrb[45].mxu1  ;;  %v3045_v49 = vadd.f32 %v3044_v12, %v3043_v10  ;;  %v3046_v14 = vpop.f32.mrb[46].mxu0 }
 0x156   : > { %v3085_v13 = vadd.f32 %v3084_v43, %v3083_v11  ;;  %v3086_v15 = vpop.f32.mrb[46].mxu1  ;;  %v3047_v24 = vpop.f32.mrb[47].mxu0 }
 0x157   : > { %v3087_v1 = vpop.f32.mrb[47].mxu1  ;;  %v3048_v29 = vadd.f32 %v3047_v24, %v3046_v14 }
 0x158   : > { %v1665_v39 = vadd.f32 %v3085_v13, %v3045_v49  ;;  %v3088_v44 = vadd.f32 %v3087_v1, %v3086_v15 }
 0x15a   : > { %v4104_v59 = vadd.f32 %v1665_v39, %v4080_v58  ;;  %v1668_v46 = vadd.f32 %v3088_v44, %v3048_v29  ;;  %v4112_v58 = vld [vmem:[%s4183_s2] ss:$0 sm:$0xff] }
 0x15b   : > { %v3105_v2 = vpop.f32.mrb[48].mxu0 }
 0x15c   : > { %v4107_v5 = vadd.f32 %v1668_v46, %v4083_v4  ;;  %v3145_v6 = vpop.f32.mrb[48].mxu1  ;;  %v3106_v45 = vpop.f32.mrb[49].mxu0 }
 0x15d   : > { %v3146_v47 = vpop.f32.mrb[49].mxu1  ;;  %v3107_v60 = vadd.f32 %v3106_v45, %v3105_v2  ;;  %v3108_v7 = vpop.f32.mrb[50].mxu0 }
 0x15e   : > { %v3147_v62 = vadd.f32 %v3146_v47, %v3145_v6  ;;  %v3148_v9 = vpop.f32.mrb[50].mxu1  ;;  %v3109_v22 = vpop.f32.mrb[51].mxu0 }
 0x15f   : > { %v3149_v37 = vpop.f32.mrb[51].mxu1  ;;  %v3110_v30 = vadd.f32 %v3109_v22, %v3108_v7 }
 0x160   : > { %v2132_v61 = vadd.f32 %v3147_v62, %v3107_v60  ;;  %v3150_v0 = vadd.f32 %v3149_v37, %v3148_v9 }
 0x162   : > { %v2162_v4 = vadd.f32 %v2132_v61, %v4086_v23  ;;  %v2135_v28 = vadd.f32 %v3150_v0, %v3110_v30 }
 0x163   : > { %v3111_v33 = vpop.f32.mrb[52].mxu0 }
 0x164   : > { %v4116_v32 = vadd.f32 %v4112_v58, %v2162_v4  ;;  %v2163_v17 = vadd.f32 %v2135_v28, %v4089_v56  ;;  %v3151_v20 = vpop.f32.mrb[52].mxu1  ;;  %v3112_v34 = vpop.f32.mrb[53].mxu0 }
 0x165   : > { %v3152_v35 = vpop.f32.mrb[53].mxu1  ;;  %v3113_v57 = vadd.f32 %v3112_v34, %v3111_v33  ;;  %v3114_v18 = vpop.f32.mrb[54].mxu0 }
 0x166   : > { %v4120_v36 = vadd.f32 %v4112_v58, %v2163_v17  ;;  %v3153_v19 = vadd.f32 %v3152_v35, %v3151_v20  ;;  %v3154_v31 = vpop.f32.mrb[54].mxu1  ;;  %v2200_v23 = vmul.f32 %v4116_v32, %v4116_v32  ;;  %v3115_v40 = vpop.f32.mrb[55].mxu0 }
 0x167   : > { %v3155_v50 = vpop.f32.mrb[55].mxu1  ;;  %v3116_v53 = vadd.f32 %v3115_v40, %v3114_v18 }
 0x168   : > { %v2185_v51 = vadd.f32 %v4120_v36, %v4116_v32  ;;  %v2201_v56 = vmul.f32 %v4120_v36, %v4120_v36  ;;  %v2140_v52 = vadd.f32 %v3153_v19, %v3113_v57  ;;  %v3156_v21 = vadd.f32 %v3155_v50, %v3154_v31 }
 0x16a   : > { %v2208_v26 = vadd.f32 %v2201_v56, %v2200_v23  ;;  %v2164_v42 = vadd.f32 %v2140_v52, %v4092_v27  ;;  %v2143_v48 = vadd.f32 %v3156_v21, %v3116_v53 }
 0x16b   : > { %v3117_v25 = vpop.f32.mrb[56].mxu0 }
 0x16c   : > { %v4130_v54 = vadd.f32 %v4112_v58, %v2164_v42  ;;  %v3157_v55 = vpop.f32.mrb[56].mxu1  ;;  %v2165_v3 = vadd.f32 %v2143_v48, %v4095_v16  ;;  %v3118_v41 = vpop.f32.mrb[57].mxu0 }
 0x16d   : > { %v3158_v8 = vpop.f32.mrb[57].mxu1  ;;  %v3119_v12 = vadd.f32 %v3118_v41, %v3117_v25  ;;  %v3120_v49 = vpop.f32.mrb[58].mxu0 }
 0x16e   : > { %v2186_v10 = vadd.f32 %v2185_v51, %v4130_v54  ;;  %v2202_v11 = vmul.f32 %v4130_v54, %v4130_v54  ;;  %v3159_v43 = vadd.f32 %v3158_v8, %v3157_v55  ;;  %v3160_v13 = vpop.f32.mrb[58].mxu1  ;;  %v4137_v27 = vadd.f32 %v4112_v58, %v2165_v3  ;;  %v3121_v14 = vpop.f32.mrb[59].mxu0 }
 0x16f   : > { %v3161_v15 = vpop.f32.mrb[59].mxu1  ;;  %v3122_v39 = vadd.f32 %v3121_v14, %v3120_v49 }
 0x170   : > { %v2209_v24 = vadd.f32 %v2208_v26, %v2202_v11  ;;  %v2148_v1 = vadd.f32 %v3159_v43, %v3119_v12  ;;  %v3162_v16 = vadd.f32 %v3161_v15, %v3160_v13  ;;  %v2187_v29 = vadd.f32 %v2186_v10, %v4137_v27 }
 0x171   : > { %v2203_v44 = vmul.f32 %v4137_v27, %v4137_v27 }
 0x172   : > { %v2166_v46 = vadd.f32 %v2148_v1, %v4098_v63  ;;  %v2151_v2 = vadd.f32 %v3162_v16, %v3122_v39 }
 0x173   : > { %v2210_v6 = vadd.f32 %v2209_v24, %v2203_v44  ;;  %v3123_v60 = vpop.f32.mrb[60].mxu0 }
 0x174   : > { %v4144_v45 = vadd.f32 %v4112_v58, %v2166_v46  ;;  %v2167_v47 = vadd.f32 %v2151_v2, %v4101_v38  ;;  %v3163_v62 = vpop.f32.mrb[60].mxu1  ;;  %v3124_v7 = vpop.f32.mrb[61].mxu0 }
 0x175   : > { %v3164_v9 = vpop.f32.mrb[61].mxu1  ;;  %v3125_v30 = vadd.f32 %v3124_v7, %v3123_v60  ;;  %v3126_v63 = vpop.f32.mrb[62].mxu0 }
 0x176   : > { %v2188_v22 = vadd.f32 %v2187_v29, %v4144_v45  ;;  %v2204_v37 = vmul.f32 %v4144_v45, %v4144_v45  ;;  %v2182_v61 = vadd.f32 %v4112_v58, %v2167_v47  ;;  %v3166_v0 = vpop.f32.mrb[62].mxu1  ;;  %v3165_v4 = vadd.f32 %v3164_v9, %v3163_v62  ;;  %v3127_v28 = vpop.f32.mrb[63].mxu0 }
 0x177   : > { %v3167_v17 = vpop.f32.mrb[63].mxu1  ;;  %v3128_v34 = vadd.f32 %v3127_v28, %v3126_v63 }
 0x178   : > { %v2211_v33 = vadd.f32 %v2210_v6, %v2204_v37  ;;  %v2189_v20 = vadd.f32 %v2188_v22, %v2182_v61  ;;  %v2205_v38 = vmul.f32 %v2182_v61, %v2182_v61  ;;  %v2156_v35 = vadd.f32 %v3165_v4, %v3125_v30 }
 0x179   : > { %v3168_v57 = vadd.f32 %v3167_v17, %v3166_v0 }
 0x17a   : > { %v2212_v19 = vadd.f32 %v2211_v33, %v2205_v38  ;;  %v2168_v18 = vadd.f32 %v2156_v35, %v4104_v59 }
 0x17b   : > { %v2159_v31 = vadd.f32 %v3168_v57, %v3128_v34 }
 0x17c   : > { %v2183_v23 = vadd.f32 %v4112_v58, %v2168_v18 }
 0x17d   : > { %v2169_v40 = vadd.f32 %v2159_v31, %v4107_v5 }
 0x17e   : > { %v2190_v50 = vadd.f32 %v2189_v20, %v2183_v23  ;;  %v2206_v51 = vmul.f32 %v2183_v23, %v2183_v23 }
 0x17f   : > { %v2184_v56 = vadd.f32 %v4112_v58, %v2169_v40 }
 0x180   : > { %v2213_v52 = vadd.f32 %v2212_v19, %v2206_v51 }
 0x181   : > { %v2191_v53 = vadd.f32 %v2190_v50, %v2184_v56  ;;  %v2207_v21 = vmul.f32 %v2184_v56, %v2184_v56 }
 0x183   : > { %v2192_v26 = vrot.slane %v2191_v53, 4  ;;  %v2214_v42 = vadd.f32 %v2213_v52, %v2207_v21 }
 0x185   : > { %v2193_v48 = vadd.f32 %v2192_v26, %v2191_v53  ;;  %v2215_v25 = vrot.slane %v2214_v42, 4 }
 0x187   : > { %v2194_v55 = vrot.slane %v2193_v48, 2  ;;  %v2216_v3 = vadd.f32 %v2215_v25, %v2214_v42 }
 0x189   : > { %v2195_v41 = vadd.f32 %v2194_v55, %v2193_v48  ;;  %v2217_v59 = vrot.slane %v2216_v3, 2 }
 0x18b   : > { %v2196_v8 = vrot.slane %v2195_v41, 1  ;;  %v2218_v10 = vadd.f32 %v2217_v59, %v2216_v3 }
 0x18d   : > { %v2197_v11 = vadd.f32 %v2196_v8, %v2195_v41  ;;  %v2219_v12 = vrot.slane %v2218_v10, 1 }
 0x18f   : > { %v2199_v5 = vmul.f32 0.015625, %v2197_v11  ;;  %v2220_v43 = vadd.f32 %v2219_v12, %v2218_v10 }
 0x191   : > { %v2221_v49 = vmul.f32 0.015625, %v2220_v43  ;;  %v2222_v13 = vmul.f32 %v2199_v5, %v2199_v5  ;;  %v2225_v58 = vsub.f32 %v4116_v32, %v2199_v5  ;;  %v2226_v14 = vsub.f32 %v4120_v36, %v2199_v5 }
 0x192   : > { %v2227_v15 = vsub.f32 %v4130_v54, %v2199_v5  ;;  %v2228_v24 = vsub.f32 %v4137_v27, %v2199_v5  ;;  %v2229_v1 = vsub.f32 %v4144_v45, %v2199_v5  ;;  %v2230_v39 = vsub.f32 %v2182_v61, %v2199_v5 }
 0x193   : > { %v2223_v16 = vsub.f32 %v2221_v49, %v2222_v13  ;;  %v2231_v29 = vsub.f32 %v2183_v23, %v2199_v5  ;;  %v2232_v44 = vsub.f32 %v2184_v56, %v2199_v5 }
 0x195   : > { %v2224_v46 = vmax.f32 %v2223_v16, 0.0 }
 0x197   : > { %v2233_v2 = vadd.f32 1e-05, %v2224_v46 }
 0x199   : > { %3388 = vrsqrt.f32 %v2233_v2 }
 0x1a3   : > { %v3389_v6 = vpop.eup %3388 }
 0x1a4   : > { %v2235_v47 = vmul.f32 %v3389_v6, %v2225_v58  ;;  %v2236_v60 = vmul.f32 %v3389_v6, %v2226_v14  ;;  %v2237_v32 = vmul.f32 %v3389_v6, %v2227_v15  ;;  %v2238_v62 = vmul.f32 %v3389_v6, %v2228_v24 }
 0x1a5   : > { %v2239_v36 = vmul.f32 %v3389_v6, %v2229_v1  ;;  %v2240_v7 = vmul.f32 %v3389_v6, %v2230_v39  ;;  %v2241_v54 = vmul.f32 %v3389_v6, %v2231_v29  ;;  %v2242_v9 = vmul.f32 %v3389_v6, %v2232_v44 }
 0x1a6   : > { %vm2243_vm0 = vcmp.ge.f32.partialorder %v2235_v47, 0.0  ;;  %vm2244_vm1 = vcmp.ge.f32.partialorder %v2236_v60, 0.0  ;;  %vm2245_vm2 = vcmp.ge.f32.partialorder %v2237_v32, 0.0  ;;  %vm2246_vm3 = vcmp.ge.f32.partialorder %v2238_v62, 0.0 }
 0x1a7   : > { %vm2247_vm4 = vcmp.ge.f32.partialorder %v2239_v36, 0.0  ;;  %vm2248_vm5 = vcmp.ge.f32.partialorder %v2240_v7, 0.0  ;;  %vm2249_vm6 = vcmp.ge.f32.partialorder %v2241_v54, 0.0  ;;  %vm2250_vm7 = vcmp.ge.f32.partialorder %v2242_v9, 0.0 }
 0x1a8   : > { %v2251_v27 = vmul.f32 0.2, %v2235_v47  ;;  %v2252_v45 = vmul.f32 0.2, %v2236_v60  ;;  %v2253_v22 = vmul.f32 0.2, %v2237_v32 }
 0x1a9   : > { %v2254_v37 = vmul.f32 0.2, %v2238_v62  ;;  %v2255_v61 = vmul.f32 0.2, %v2239_v36  ;;  %v2256_v30 = vmul.f32 0.2, %v2240_v7 }
 0x1aa   : > { %v2257_v63 = vmul.f32 0.2, %v2241_v54  ;;  %v2258_v0 = vmul.f32 0.2, %v2242_v9  ;;  %v2259_v4 = vsel %vm2243_vm0, %v2235_v47, %v2251_v27  ;;  %v2260_v28 = vsel %vm2244_vm1, %v2236_v60, %v2252_v45 }
 0x1ab   : > { %v2261_v17 = vsel %vm2245_vm2, %v2237_v32, %v2253_v22  ;;  %v2262_v33 = vsel %vm2246_vm3, %v2238_v62, %v2254_v37  ;;  %v2263_v20 = vsel %vm2247_vm4, %v2239_v36, %v2255_v61  ;;  %v2264_v38 = vsel %vm2248_vm5, %v2240_v7, %v2256_v30 }
 0x1ac   : > { %v2265_v34 = vsel %vm2249_vm6, %v2241_v54, %v2257_v63  ;;  %v2266_v35 = vsel %vm2250_vm7, %v2242_v9, %v2258_v0  ;;  %v2829_v57 = vpack.c.bf16 %v2260_v28, %v2259_v4  ;;  %v2834_v19 = vpack.c.bf16 %v2262_v33, %v2261_v17 }
 0x1ad   : > { %v2839_v18 = vpack.c.bf16 %v2264_v38, %v2263_v20  ;;  %v2844_v31 = vpack.c.bf16 %v2266_v35, %v2265_v34 }
 0x1ae   : > { %2830 = vst [vmem:[%s221_s12] sm:$0xff] %v2829_v57   ;;  %2846 = vst [vmem:[%s221_s12 + $0x8] sm:$0xff] %v2834_v19  }
 0x1af   : > { %2847 = vst [vmem:[%s221_s12 + $0x10] sm:$0xff] %v2839_v18   ;;  %2848 = vst [vmem:[%s221_s12 + $0x18] sm:$0xff] %v2844_v31  }
 0x1b0 PF: > { %s13_s14 = sadd.s32 1, %s3412_s14   ;;  %s4185_s12 = smov %s3408_s13 }
 0x1b1   : > { %p10_p5 = scmp.ge.s32.totalorder %s13_s14, 4   ;;  %s4186_s13 = smov %s4188_s15 }
 0x1b3   :  { %12 = sbr.rel (!%p10_p5) target bundleno = 2 (0x2), region = 71 }

// kernel: _lambda_.7
= control target key start
LH: loop header
LB: loop body
LE: loop exit
PB: predicated region body
PF: predicated region fallthrough
CT: control target
= control target key end

     0   :  { %s3468_s12 = smov 0   ;;  %s3470_s13 = smov 0   ;;  %s4366_s0 = inlined_call_operand.vmem [shape: bf16[2,40,512], index: 0, kind: input, shape index: {}]   ;;  %s4367_s1 = inlined_call_operand.vmem [shape: bf16[4,512,256], index: 1, kind: input, shape index: {}]   ;;  %s4368_s2 = inlined_call_operand.vmem [shape: f32[1,256], index: 2, kind: input, shape index: {}]   ;;  %s4369_s3 = inlined_call_operand.vmem [shape: bf16[2,16,256], index: 3, kind: output, shape index: {}]  }
   0x1   :  { %s3472_s14 = smov 0  }
   0x2 LB: > { %s25_s15 = sadd.s32 1, %s3442_s13  ;;  %p2474_p0 = scmp.ge.s32.totalorder %s3446_s14, 1  ;;  %s3446_s14 = sphi %s3472_s14, %s13_s14   ;;  %s3442_s13 = sphi %s3470_s13, %s4371_s13   ;;  %s3438_s12 = sphi %s3468_s12, %s4370_s12  }
   0x3   : > { %p27_p1 = scmp.ge.s32.totalorder %s25_s15, 2  ;;  %p172_p2 = scmp.lt.s32.totalorder %s3446_s14, 3 }
   0x5   : > { %s4373_s15 = smov (%p27_p1, %s25_s15), 0  ;;  %p173_p3 = pnand %p2474_p0, %p172_p2 }
   0x6   : > { %v3010_v0 = vld [vmem:[%s4367_s1 + $0x204] ss:$8 sps:$4 sm:$0xff] (!%p173_p3)   ;;  %v3014_v2 = vld [vmem:[%s4367_s1 + $0x200] ss:$8 sps:$4 sm:$0xff] (!%p173_p3)   ;;  %v3016_v4 = vld [vmem:[%s4367_s1 + $0x214] ss:$8 sps:$4 sm:$0xff] (!%p173_p3)  }
   0x7   : > { %176 = sbr.rel (%p173_p3) target bundleno = 526 (0x20e), region = 32  ;;  %v3012_v1 = vld [vmem:[%s4367_s1 + $0x404] ss:$8 sps:$4 sm:$0xff] (!%p173_p3)   ;;  %737 = vmatprep.subr.bf16.mxu1 (!%p173_p3), %v3010_v0  ;;  %v3015_v3 = vld [vmem:[%s4367_s1 + $0x400] ss:$8 sps:$4 sm:$0xff] (!%p173_p3)   ;;  %p209_p4 = scmp.lt.s32.totalorder (!%p173_p3), %s3438_s12, 1 }
   0x8   : > { %1682 = vmatprep.subr.bf16.mxu0 (!%p173_p3), %v3012_v1  ;;  %738 = vmatpush1.bf16.msra.mxu1 (!%p173_p3), %v3014_v2  ;;  %v3018_v5 = vld [vmem:[%s4367_s1 + $0x414] ss:$8 sps:$4 sm:$0xff] (!%p173_p3)   ;;  %v3020_v6 = vld [vmem:[%s4367_s1 + $0x210] ss:$8 sps:$4 sm:$0xff] (!%p173_p3)   ;;  %v3022_v8 = vld [vmem:[%s4367_s1 + $0x224] ss:$8 sps:$4 sm:$0xff] (!%p173_p3)  }
   0x9   : > { %1683 = vmatpush1.bf16.msra.mxu0 (!%p173_p3), %v3015_v3  ;;  %739 = vmatprep.subr.bf16.mxu1 (!%p173_p3), %v3016_v4  ;;  %v3021_v7 = vld [vmem:[%s4367_s1 + $0x410] ss:$8 sps:$4 sm:$0xff] (!%p173_p3)   ;;  %v3024_v9 = vld [vmem:[%s4367_s1 + $0x424] ss:$8 sps:$4 sm:$0xff] (!%p173_p3)   ;;  %v3026_v10 = vld [vmem:[%s4367_s1 + $0x220] ss:$8 sps:$4 sm:$0xff] (!%p173_p3)  }
   0xa   : > { %1684 = vmatprep.subr.bf16.mxu0 (!%p173_p3), %v3018_v5  ;;  %v3027_v11 = vld [vmem:[%s4367_s1 + $0x420] ss:$8 sps:$4 sm:$0xff] (!%p173_p3)   ;;  %v3028_v12 = vld [vmem:[%s4367_s1 + $0x234] ss:$8 sps:$4 sm:$0xff] (!%p173_p3)   ;;  %v3032_v14 = vld [vmem:[%s4367_s1 + $0x230] ss:$8 sps:$4 sm:$0xff] (!%p173_p3)  }
   0xb   : > { %v3030_v13 = vld [vmem:[%s4367_s1 + $0x434] ss:$8 sps:$4 sm:$0xff] (!%p173_p3)   ;;  %v3033_v15 = vld [vmem:[%s4367_s1 + $0x430] ss:$8 sps:$4 sm:$0xff] (!%p173_p3)   ;;  %v3034_v16 = vld [vmem:[%s4367_s1 + $0x244] ss:$8 sps:$4 sm:$0xff] (!%p173_p3)  }
   0xc   : > { %740 = vmatpush1.bf16.msra.mxu1 (!%p173_p3), %v3020_v6  ;;  %v3036_v17 = vld [vmem:[%s4367_s1 + $0x444] ss:$8 sps:$4 sm:$0xff] (!%p173_p3)   ;;  %v3038_v18 = vld [vmem:[%s4367_s1 + $0x240] ss:$8 sps:$4 sm:$0xff] (!%p173_p3)   ;;  %v3040_v20 = vld [vmem:[%s4367_s1 + $0x254] ss:$8 sps:$4 sm:$0xff] (!%p173_p3)  }
   0xd   : > { %1685 = vmatpush1.bf16.msra.mxu0 (!%p173_p3), %v3021_v7  ;;  %741 = vmatprep.subr.bf16.mxu1 (!%p173_p3), %v3022_v8  ;;  %v3039_v19 = vld [vmem:[%s4367_s1 + $0x440] ss:$8 sps:$4 sm:$0xff] (!%p173_p3)   ;;  %v3042_v21 = vld [vmem:[%s4367_s1 + $0x454] ss:$8 sps:$4 sm:$0xff] (!%p173_p3)   ;;  %v3044_v22 = vld [vmem:[%s4367_s1 + $0x250] ss:$8 sps:$4 sm:$0xff] (!%p173_p3)  }
   0xe   : > { %1686 = vmatprep.subr.bf16.mxu0 %v3024_v9  ;;  %v3045_v23 = vld [vmem:[%s4367_s1 + $0x450] ss:$8 sps:$4 sm:$0xff]   ;;  %v3046_v24 = vld [vmem:[%s4367_s1 + $0x264] ss:$8 sps:$4 sm:$0xff]   ;;  %v3050_v26 = vld [vmem:[%s4367_s1 + $0x260] ss:$8 sps:$4 sm:$0xff]  }
   0xf   : > { %v3048_v25 = vld [vmem:[%s4367_s1 + $0x464] ss:$8 sps:$4 sm:$0xff]   ;;  %v3051_v27 = vld [vmem:[%s4367_s1 + $0x460] ss:$8 sps:$4 sm:$0xff]   ;;  %v3052_v28 = vld [vmem:[%s4367_s1 + $0x274] ss:$8 sps:$4 sm:$0xff]  }
  0x10   : > { %742 = vmatpush1.bf16.msra.mxu1 %v3026_v10  ;;  %v3054_v29 = vld [vmem:[%s4367_s1 + $0x474] ss:$8 sps:$4 sm:$0xff]   ;;  %v3056_v30 = vld [vmem:[%s4367_s1 + $0x270] ss:$8 sps:$4 sm:$0xff]   ;;  %v3058_v32 = vld [vmem:[%s4367_s1 + $0x284] ss:$8 sps:$4 sm:$0xff]  }
  0x11   : > { %1687 = vmatpush1.bf16.msra.mxu0 %v3027_v11  ;;  %743 = vmatprep.subr.bf16.mxu1 %v3028_v12  ;;  %v3057_v31 = vld [vmem:[%s4367_s1 + $0x470] ss:$8 sps:$4 sm:$0xff]   ;;  %v3060_v33 = vld [vmem:[%s4367_s1 + $0x484] ss:$8 sps:$4 sm:$0xff]   ;;  %v3062_v34 = vld [vmem:[%s4367_s1 + $0x280] ss:$8 sps:$4 sm:$0xff]  }
  0x12   : > { %1688 = vmatprep.subr.bf16.mxu0 %v3030_v13  ;;  %v3063_v35 = vld [vmem:[%s4367_s1 + $0x480] ss:$8 sps:$4 sm:$0xff]   ;;  %s4375_s12 = smov (!%p209_p4, %s3438_s12), 1  ;;  %v3064_v36 = vld [vmem:[%s4367_s1 + $0x294] ss:$8 sps:$4 sm:$0xff]   ;;  %vm400_vm0 = vcmask 1045504  }
  0x13   : > { %v3066_v37 = vld [vmem:[%s4367_s1 + $0x494] ss:$8 sps:$4 sm:$0xff]   ;;  %v3068_v38 = vld [vmem:[%s4367_s1 + $0x290] ss:$8 sps:$4 sm:$0xff]   ;;  %s2985_s25 = smul.u32 80, %s4375_s12  ;;  %s2954_s18 = sshll.u32 %s4375_s12, 4 }
  0x14   : > { %744 = vmatpush1.bf16.msra.mxu1 %v3032_v14  ;;  %v3069_v39 = vld [vmem:[%s4367_s1 + $0x490] ss:$8 sps:$4 sm:$0xff]   ;;  %v3070_v40 = vld [vmem:[%s4367_s1 + $0x2a4] ss:$8 sps:$4 sm:$0xff]   ;;  %v3074_v42 = vld [vmem:[%s4367_s1 + $0x2a0] ss:$8 sps:$4 sm:$0xff]   ;;  %s233_s21 = scalar_lea.vmem %s4369_s3, %s2954_s18 }
  0x15   : > { %1689 = vmatpush1.bf16.msra.mxu0 %v3033_v15  ;;  %745 = vmatprep.subr.bf16.mxu1 %v3034_v16  ;;  %v3072_v41 = vld [vmem:[%s4367_s1 + $0x4a4] ss:$8 sps:$4 sm:$0xff]   ;;  %v3075_v43 = vld [vmem:[%s4367_s1 + $0x4a0] ss:$8 sps:$4 sm:$0xff]   ;;  %s3628_s11 = scalar_lea.vmem %s4366_s0, %s2985_s25  ;;  %v3076_v44 = vld [vmem:[%s4367_s1 + $0x2b4] ss:$8 sps:$4 sm:$0xff]  }
  0x16   : > { %1690 = vmatprep.subr.bf16.mxu0 %v3036_v17  ;;  %v3078_v45 = vld [vmem:[%s4367_s1 + $0x4b4] ss:$8 sps:$4 sm:$0xff]   ;;  %v3080_v46 = vld [vmem:[%s4367_s1 + $0x2b0] ss:$8 sps:$4 sm:$0xff]   ;;  %v303_v48 = vld [vmem:[%s3628_s11 + $0x20] sm:$0xcc] }
  0x17   : > { %v3081_v47 = vld [vmem:[%s4367_s1 + $0x4b0] ss:$8 sps:$4 sm:$0xff]   ;;  %v307_v50 = vld [vmem:[%s3628_s11 + $0x40] sm:$0x33]  ;;  %v1249_v55 = vld [vmem:[%s3628_s11] sm:$0xcc] }
  0x18   : > { %746 = vmatpush1.bf16.msra.mxu1 %v3038_v18  ;;  %v3644_v49 = vld [vmem:[%s3628_s11 + $0x30] sm:$0xff]  ;;  %v3082_v51 = vld [vmem:[%s4367_s1 + $0x2c4] ss:$8 sps:$4 sm:$0xff]   ;;  %v2547_v54 = vcombine.high %v307_v50, %v307_v50  ;;  %v3086_v62 = vld [vmem:[%s4367_s1 + $0x2c0] ss:$8 sps:$4 sm:$0xff]   ;;  %v2546_v14 = vcombine.low %v307_v50, %v307_v50 }
  0x19   : > { %1691 = vmatpush1.bf16.msra.mxu0 %v3039_v19  ;;  %747 = vmatprep.subr.bf16.mxu1 %v3040_v20  ;;  %v3084_v52 = vld [vmem:[%s4367_s1 + $0x4c4] ss:$8 sps:$4 sm:$0xff]   ;;  %v2543_v53 = vcombine.high %v303_v48, %v3644_v49  ;;  %v3656_v56 = vld [vmem:[%s3628_s11 + $0x10] sm:$0xff]  ;;  %v3087_v63 = vld [vmem:[%s4367_s1 + $0x4c0] ss:$8 sps:$4 sm:$0xff]   ;;  %v2542_v11 = vcombine.low %v303_v48, %v3644_v49 }
  0x1a   : > { %1692 = vmatprep.subr.bf16.mxu0 %v3042_v21  ;;  %v1253_v57 = vld [vmem:[%s3628_s11 + $0x20] sm:$0x33]  ;;  %v405_v59 = vrot.slane %v2547_v54, 2  ;;  %v2747_v60 = vcombine.high %v1249_v55, %v3656_v56  ;;  %v3088_v0 = vld [vmem:[%s4367_s1 + $0x2d4] ss:$8 sps:$4 sm:$0xff]   ;;  %v2746_v15 = vcombine.low %v1249_v55, %v3656_v56 }
  0x1b   : > { %v404_v58 = vrot.slane %v2543_v53, 2  ;;  %v2751_v61 = vcombine.high %v1253_v57, %v1253_v57  ;;  %v3090_v4 = vld [vmem:[%s4367_s1 + $0x4d4] ss:$8 sps:$4 sm:$0xff]   ;;  %v3092_v6 = vld [vmem:[%s4367_s1 + $0x2d0] ss:$8 sps:$4 sm:$0xff]   ;;  %v2750_v16 = vcombine.low %v1253_v57, %v1253_v57  ;;  %v401_v21 = vrot.slane %v2542_v11, 2 }
  0x1c   : > { %748 = vmatpush1.bf16.msra.mxu1 %v3044_v22  ;;  %v1349_v2 = vrot.slane %v2747_v60, 2  ;;  %v3093_v7 = vld [vmem:[%s4367_s1 + $0x4d0] ss:$8 sps:$4 sm:$0xff]   ;;  %v3094_v8 = vld [vmem:[%s4367_s1 + $0x2e4] ss:$8 sps:$4 sm:$0xff]   ;;  %v402_v22 = vrot.slane %v2546_v14, 2 }
  0x1d   : > { %1693 = vmatpush1.bf16.msra.mxu0 %v3045_v23  ;;  %749 = vmatprep.subr.bf16.mxu1 %v3046_v24  ;;  %v406_v1 = vsel %vm400_vm0, %v404_v58, %v405_v59  ;;  %v1350_v3 = vrot.slane %v2751_v61, 2  ;;  %v3096_v9 = vld [vmem:[%s4367_s1 + $0x4e4] ss:$8 sps:$4 sm:$0xff]   ;;  %v3098_v10 = vld [vmem:[%s4367_s1 + $0x2e0] ss:$8 sps:$4 sm:$0xff]   ;;  %v1346_v23 = vrot.slane %v2746_v15, 2 }
  0x1e   : > { %1694 = vmatprep.subr.bf16.mxu0 %v3048_v25  ;;  %769 = vmatprep.mubr.bf16.mxu1 %v406_v1  ;;  %v3099_v12 = vld [vmem:[%s4367_s1 + $0x4e0] ss:$8 sps:$4 sm:$0xff]   ;;  %v3100_v13 = vld [vmem:[%s4367_s1 + $0x2f4] ss:$8 sps:$4 sm:$0xff]   ;;  %v3104_v18 = vld [vmem:[%s4367_s1 + $0x2f0] ss:$8 sps:$4 sm:$0xff]  }
  0x1f   : > { %v1351_v5 = vsel %vm400_vm0, %v1349_v2, %v1350_v3  ;;  %v3102_v17 = vld [vmem:[%s4367_s1 + $0x4f4] ss:$8 sps:$4 sm:$0xff]   ;;  %v3105_v19 = vld [vmem:[%s4367_s1 + $0x4f0] ss:$8 sps:$4 sm:$0xff]   ;;  %v3110_v20 = vld [vmem:[%s4367_s1 + $0x304] ss:$8 sps:$4 sm:$0xff]  }
  0x20   : > { %750 = vmatpush1.bf16.msra.mxu1 %v3050_v26  ;;  %1714 = vmatprep.mubr.bf16.mxu0 %v1351_v5  ;;  %v1347_v24 = vrot.slane %v2750_v16, 2  ;;  %v3115_v25 = vld [vmem:[%s4367_s1 + $0x504] ss:$8 sps:$4 sm:$0xff]   ;;  %v3108_v26 = vld [vmem:[%s4367_s1 + $0x300] ss:$8 sps:$4 sm:$0xff]   ;;  %v3796_v57 = vld [vmem:[%s3628_s11 + $0x38] sm:$0xff] }
  0x21   : > { %1695 = vmatpush1.bf16.msra.mxu0 %v3051_v27  ;;  %751 = vmatprep.subr.bf16.mxu1 %v3052_v28  ;;  %v3113_v27 = vld [vmem:[%s4367_s1 + $0x500] ss:$8 sps:$4 sm:$0xff]   ;;  %v403_v28 = vsel %vm400_vm0, %v401_v21, %v402_v22  ;;  %v3144_v48 = vld [vmem:[%s4367_s1 + $0x350] ss:$8 sps:$4 sm:$0xff]   ;;  %v3158_v59 = vld [vmem:[%s4367_s1 + $0x374] ss:$8 sps:$4 sm:$0xff]  }
  0x22   : > { %1696 = vmatprep.subr.bf16.mxu0 %v3054_v29  ;;  %v1348_v29 = vsel %vm400_vm0, %v1346_v23, %v1347_v24  ;;  %v3147_v50 = vld [vmem:[%s4367_s1 + $0x550] ss:$8 sps:$4 sm:$0xff]   ;;  %v3150_v53 = vld [vmem:[%s4367_s1 + $0x360] ss:$8 sps:$4 sm:$0xff]   ;;  %v3161_v60 = vld [vmem:[%s4367_s1 + $0x574] ss:$8 sps:$4 sm:$0xff]  }
  0x23   : > { %v3153_v54 = vld [vmem:[%s4367_s1 + $0x560] ss:$8 sps:$4 sm:$0xff]   ;;  %v3156_v2 = vld [vmem:[%s4367_s1 + $0x370] ss:$8 sps:$4 sm:$0xff]   ;;  %v3170_v16 = vld [vmem:[%s4367_s1 + $0x394] ss:$8 sps:$4 sm:$0xff]  }
  0x24   : > { %752 = vmatpush1.bf16.msra.mxu1 %v3056_v30  ;;  %v3122_v30 = vld [vmem:[%s4367_s1 + $0x314] ss:$8 sps:$4 sm:$0xff]   ;;  %v3793_v55 = vld [vmem:[%s3628_s11 + $0x28] sm:$0xcc]  ;;  %v3799_v58 = vld [vmem:[%s3628_s11 + $0x48] sm:$0x33] }
  0x25   : > { %1697 = vmatpush1.bf16.msra.mxu0 %v3057_v31  ;;  %753 = vmatprep.subr.bf16.mxu1 %v3058_v32  ;;  %v3125_v31 = vld [vmem:[%s4367_s1 + $0x514] ss:$8 sps:$4 sm:$0xff]   ;;  %v3120_v32 = vld [vmem:[%s4367_s1 + $0x310] ss:$8 sps:$4 sm:$0xff]   ;;  %v2545_v61 = vcombine.high %v3793_v55, %v3796_v57  ;;  %v3818_v1 = vld [vmem:[%s3628_s11 + $0x28] sm:$0x33] }
  0x26   : > { %1698 = vmatprep.subr.bf16.mxu0 %v3060_v33  ;;  %v3123_v33 = vld [vmem:[%s4367_s1 + $0x510] ss:$8 sps:$4 sm:$0xff]   ;;  %v3162_v14 = vld [vmem:[%s4367_s1 + $0x380] ss:$8 sps:$4 sm:$0xff]   ;;  %v3179_v21 = vld [vmem:[%s4367_s1 + $0x5a4] ss:$8 sps:$4 sm:$0xff]  }
  0x27   : > { %v410_v3 = vrot.slane %v2545_v61, 2  ;;  %v3165_v15 = vld [vmem:[%s4367_s1 + $0x580] ss:$8 sps:$4 sm:$0xff]   ;;  %v3182_v24 = vld [vmem:[%s4367_s1 + $0x3b4] ss:$8 sps:$4 sm:$0xff]  }
  0x28   : > { %754 = vmatpush1.bf16.msra.mxu1 %v3062_v34  ;;  %v3128_v34 = vld [vmem:[%s4367_s1 + $0x324] ss:$8 sps:$4 sm:$0xff]   ;;  %v3174_v22 = vld [vmem:[%s4367_s1 + $0x3a0] ss:$8 sps:$4 sm:$0xff]   ;;  %v3226_v61 = vld [vmem:[%s4367_s1 + $0x14] ss:$8 sps:$4 sm:$0xff]  }
  0x29   : > { %1699 = vmatpush1.bf16.msra.mxu0 %v3063_v35  ;;  %755 = vmatprep.subr.bf16.mxu1 %v3064_v36  ;;  %v3131_v35 = vld [vmem:[%s4367_s1 + $0x524] ss:$8 sps:$4 sm:$0xff]   ;;  %v3126_v36 = vld [vmem:[%s4367_s1 + $0x320] ss:$8 sps:$4 sm:$0xff]  }
  0x2a   : > { %1700 = vmatprep.subr.bf16.mxu0 %v3066_v37  ;;  %v3129_v37 = vld [vmem:[%s4367_s1 + $0x520] ss:$8 sps:$4 sm:$0xff]  }
  0x2b   : > { %v3177_v23 = vld [vmem:[%s4367_s1 + $0x5a0] ss:$8 sps:$4 sm:$0xff]  }
  0x2c   : > { %756 = vmatpush1.bf16.msra.mxu1 %v3068_v38  ;;  %v3134_v38 = vld [vmem:[%s4367_s1 + $0x334] ss:$8 sps:$4 sm:$0xff]  }
  0x2d   : > { %1701 = vmatpush1.bf16.msra.mxu0 %v3069_v39  ;;  %757 = vmatprep.subr.bf16.mxu1 %v3070_v40  ;;  %v3137_v39 = vld [vmem:[%s4367_s1 + $0x534] ss:$8 sps:$4 sm:$0xff]   ;;  %v3132_v40 = vld [vmem:[%s4367_s1 + $0x330] ss:$8 sps:$4 sm:$0xff]  }
  0x2e   : > { %1702 = vmatprep.subr.bf16.mxu0 %v3072_v41  ;;  %v3135_v41 = vld [vmem:[%s4367_s1 + $0x530] ss:$8 sps:$4 sm:$0xff]  }
  0x30   : > { %758 = vmatpush1.bf16.msra.mxu1 %v3074_v42  ;;  %v3140_v42 = vld [vmem:[%s4367_s1 + $0x344] ss:$8 sps:$4 sm:$0xff]  }
  0x31   : > { %1703 = vmatpush1.bf16.msra.mxu0 %v3075_v43  ;;  %759 = vmatprep.subr.bf16.mxu1 %v3076_v44  ;;  %v3143_v43 = vld [vmem:[%s4367_s1 + $0x544] ss:$8 sps:$4 sm:$0xff]   ;;  %v3138_v44 = vld [vmem:[%s4367_s1 + $0x340] ss:$8 sps:$4 sm:$0xff]  }
  0x32   : > { %1704 = vmatprep.subr.bf16.mxu0 %v3078_v45  ;;  %v3141_v45 = vld [vmem:[%s4367_s1 + $0x540] ss:$8 sps:$4 sm:$0xff]  }
  0x34   : > { %760 = vmatpush1.bf16.msra.mxu1 %v3080_v46  ;;  %v3146_v46 = vld [vmem:[%s4367_s1 + $0x354] ss:$8 sps:$4 sm:$0xff]  }
  0x35   : > { %1705 = vmatpush1.bf16.msra.mxu0 %v3081_v47  ;;  %761 = vmatprep.subr.bf16.mxu1 %v3082_v51  ;;  %v3149_v47 = vld [vmem:[%s4367_s1 + $0x554] ss:$8 sps:$4 sm:$0xff]   ;;  %v3152_v51 = vld [vmem:[%s4367_s1 + $0x364] ss:$8 sps:$4 sm:$0xff]  }
  0x36   : > { %1706 = vmatprep.subr.bf16.mxu0 %v3084_v52  ;;  %v3155_v52 = vld [vmem:[%s4367_s1 + $0x564] ss:$8 sps:$4 sm:$0xff]  }
  0x38   : > { %762 = vmatpush1.bf16.msra.mxu1 %v3086_v62  ;;  %v2549_v62 = vcombine.high %v3799_v58, %v3799_v58 }
  0x39   : > { %1707 = vmatpush1.bf16.msra.mxu0 %v3087_v63  ;;  %763 = vmatprep.subr.bf16.mxu1 %v3088_v0  ;;  %v3812_v63 = vld [vmem:[%s3628_s11 + $0x8] sm:$0xcc]  ;;  %v3815_v0 = vld [vmem:[%s3628_s11 + $0x18] sm:$0xff] }
  0x3a   : > { %1708 = vmatprep.subr.bf16.mxu0 %v3090_v4  ;;  %v411_v4 = vrot.slane %v2549_v62, 2  ;;  %v2749_v5 = vcombine.high %v3812_v63, %v3815_v0  ;;  %v3229_v62 = vld [vmem:[%s4367_s1 + $0x614] ss:$8 sps:$4 sm:$0xff]  }
  0x3c   : > { %764 = vmatpush1.bf16.msra.mxu1 %v3092_v6  ;;  %v2753_v6 = vcombine.high %v3818_v1, %v3818_v1  ;;  %v1355_v11 = vrot.slane %v2749_v5, 2 }
  0x3d   : > { %1709 = vmatpush1.bf16.msra.mxu0 %v3093_v7  ;;  %765 = vmatprep.subr.bf16.mxu1 %v3094_v8  ;;  %v3159_v7 = vld [vmem:[%s4367_s1 + $0x570] ss:$8 sps:$4 sm:$0xff]   ;;  %v3164_v8 = vld [vmem:[%s4367_s1 + $0x384] ss:$8 sps:$4 sm:$0xff]  }
  0x3e   : > { %1710 = vmatprep.subr.bf16.mxu0 %v3096_v9  ;;  %v3167_v9 = vld [vmem:[%s4367_s1 + $0x584] ss:$8 sps:$4 sm:$0xff]  }
  0x40   : > { %766 = vmatpush1.bf16.msra.mxu1 %v3098_v10  ;;  %v412_v10 = vsel %vm400_vm0, %v410_v3, %v411_v4  ;;  %v3966_v3 = vld [vmem:[%s3628_s11] sm:$0xff] }
  0x41   : > { %1711 = vmatpush1.bf16.msra.mxu0 %v3099_v12  ;;  %767 = vmatprep.subr.bf16.mxu1 %v3100_v13  ;;  %v1356_v12 = vrot.slane %v2753_v6, 2  ;;  %v3235_v4 = vld [vmem:[%s4367_s1 + $0x624] ss:$8 sps:$4 sm:$0xff]   ;;  %v2615_v5 = vcombine.high %v3966_v3, %v3656_v56  ;;  %v3238_v56 = vld [vmem:[%s4367_s1 + $0x34] ss:$8 sps:$4 sm:$0xff]  }
  0x42   : > { %1712 = vmatprep.subr.bf16.mxu0 %v3102_v17  ;;  %v3173_v17 = vld [vmem:[%s4367_s1 + $0x594] ss:$8 sps:$4 sm:$0xff]   ;;  %v3974_v6 = vld [vmem:[%s3628_s11 + $0x40] sm:$0xff] }
  0x43   : > { %v1357_v13 = vsel %vm400_vm0, %v1355_v11, %v1356_v12  ;;  %v3236_v11 = vld [vmem:[%s4367_s1 + $0x30] ss:$8 sps:$4 sm:$0xff]   ;;  %v3244_v12 = vld [vmem:[%s4367_s1 + $0x44] ss:$8 sps:$4 sm:$0xff]  }
  0x44   : > { %768 = vmatpush1.bf16.msra.mxu1 %v3104_v18  ;;  %v3168_v18 = vld [vmem:[%s4367_s1 + $0x390] ss:$8 sps:$4 sm:$0xff]  }
  0x45   : > { %1713 = vmatpush1.bf16.msra.mxu0 %v3105_v19  ;;  %780 = vmatprep.subr.bf16.mxu1 %v3110_v20  ;;  %v3171_v19 = vld [vmem:[%s4367_s1 + $0x590] ss:$8 sps:$4 sm:$0xff]   ;;  %v3176_v20 = vld [vmem:[%s4367_s1 + $0x3a4] ss:$8 sps:$4 sm:$0xff]  }
  0x46   : > { %1725 = vmatprep.subr.bf16.mxu0 %v3115_v25  ;;  %v3185_v25 = vld [vmem:[%s4367_s1 + $0x5b4] ss:$8 sps:$4 sm:$0xff]  }
  0x47   : > { %770 = vmatmul.mubr.bf16.vlgmr.msra.gmra.mrb[0].mxu1 %v403_v28  ;;  %v3188_v28 = vld [vmem:[%s4367_s1 + $0x3c4] ss:$8 sps:$4 sm:$0xff]  }
  0x48   : > { %1715 = vmatmul.mubr.bf16.vlgmr.msra.gmra.mrb[0].mxu0 %v1348_v29  ;;  %781 = vmatpush1.bf16.msra.mxu1 %v3108_v26  ;;  %v3180_v26 = vld [vmem:[%s4367_s1 + $0x3b0] ss:$8 sps:$4 sm:$0xff]   ;;  %v3191_v29 = vld [vmem:[%s4367_s1 + $0x5c4] ss:$8 sps:$4 sm:$0xff]  }
  0x49   : > { %1726 = vmatpush1.bf16.msra.mxu0 %v3113_v27  ;;  %782 = vmatprep.subr.bf16.mxu1 %v3122_v30  ;;  %v3183_v27 = vld [vmem:[%s4367_s1 + $0x5b0] ss:$8 sps:$4 sm:$0xff]   ;;  %v3186_v30 = vld [vmem:[%s4367_s1 + $0x3c0] ss:$8 sps:$4 sm:$0xff]  }
  0x4a   : > { %1727 = vmatprep.subr.bf16.mxu0 %v3125_v31  ;;  %812 = vmatprep.mubr.bf16.mxu1 %v412_v10  ;;  %v3189_v31 = vld [vmem:[%s4367_s1 + $0x5c0] ss:$8 sps:$4 sm:$0xff]   ;;  %v3241_v10 = vld [vmem:[%s4367_s1 + $0x634] ss:$8 sps:$4 sm:$0xff]  }
  0x4b   : > { %1757 = vmatprep.mubr.bf16.mxu0 %v1357_v13  ;;  %v3247_v13 = vld [vmem:[%s4367_s1 + $0x644] ss:$8 sps:$4 sm:$0xff]  }
  0x4c   : > { %783 = vmatpush1.bf16.msra.mxu1 %v3120_v32  ;;  %v3194_v32 = vld [vmem:[%s4367_s1 + $0x3d4] ss:$8 sps:$4 sm:$0xff]  }
  0x4d   : > { %1728 = vmatpush1.bf16.msra.mxu0 %v3123_v33  ;;  %784 = vmatprep.subr.bf16.mxu1 %v3128_v34  ;;  %v3197_v33 = vld [vmem:[%s4367_s1 + $0x5d4] ss:$8 sps:$4 sm:$0xff]   ;;  %v3192_v34 = vld [vmem:[%s4367_s1 + $0x3d0] ss:$8 sps:$4 sm:$0xff]  }
  0x4e   : > { %1729 = vmatprep.subr.bf16.mxu0 %v3131_v35  ;;  %v3195_v35 = vld [vmem:[%s4367_s1 + $0x5d0] ss:$8 sps:$4 sm:$0xff]  }
  0x50   : > { %785 = vmatpush1.bf16.msra.mxu1 %v3126_v36  ;;  %v3200_v36 = vld [vmem:[%s4367_s1 + $0x3e4] ss:$8 sps:$4 sm:$0xff]  }
  0x51   : > { %1730 = vmatpush1.bf16.msra.mxu0 %v3129_v37  ;;  %786 = vmatprep.subr.bf16.mxu1 %v3134_v38  ;;  %v3203_v37 = vld [vmem:[%s4367_s1 + $0x5e4] ss:$8 sps:$4 sm:$0xff]   ;;  %v2544_v38 = vcombine.low %v3793_v55, %v3796_v57  ;;  %v3212_v55 = vld [vmem:[%s4367_s1] ss:$8 sps:$4 sm:$0xff]  }
  0x52   : > { %1731 = vmatprep.subr.bf16.mxu0 %v3137_v39  ;;  %v3198_v39 = vld [vmem:[%s4367_s1 + $0x3e0] ss:$8 sps:$4 sm:$0xff]  }
  0x54   : > { %787 = vmatpush1.bf16.msra.mxu1 %v3132_v40  ;;  %v3201_v40 = vld [vmem:[%s4367_s1 + $0x5e0] ss:$8 sps:$4 sm:$0xff]  }
  0x55   : > { %1732 = vmatpush1.bf16.msra.mxu0 %v3135_v41  ;;  %788 = vmatprep.subr.bf16.mxu1 %v3140_v42  ;;  %v2548_v41 = vcombine.low %v3799_v58, %v3799_v58  ;;  %v2748_v42 = vcombine.low %v3812_v63, %v3815_v0  ;;  %v3217_v58 = vld [vmem:[%s4367_s1 + $0x600] ss:$8 sps:$4 sm:$0xff]   ;;  %v3224_v63 = vld [vmem:[%s4367_s1 + $0x10] ss:$8 sps:$4 sm:$0xff]  }
  0x56   : > { %1733 = vmatprep.subr.bf16.mxu0 %v3143_v43  ;;  %v2752_v43 = vcombine.low %v3818_v1, %v3818_v1  ;;  %v3227_v1 = vld [vmem:[%s4367_s1 + $0x610] ss:$8 sps:$4 sm:$0xff]  }
  0x58   : > { %789 = vmatpush1.bf16.msra.mxu1 %v3138_v44  ;;  %v3206_v44 = vld [vmem:[%s4367_s1 + $0x3f4] ss:$8 sps:$4 sm:$0xff]  }
  0x59   : > { %1734 = vmatpush1.bf16.msra.mxu0 %v3141_v45  ;;  %790 = vmatprep.subr.bf16.mxu1 %v3146_v46  ;;  %v3209_v45 = vld [vmem:[%s4367_s1 + $0x5f4] ss:$8 sps:$4 sm:$0xff]   ;;  %v3204_v46 = vld [vmem:[%s4367_s1 + $0x3f0] ss:$8 sps:$4 sm:$0xff]  }
  0x5a   : > { %1735 = vmatprep.subr.bf16.mxu0 %v3149_v47  ;;  %v3207_v47 = vld [vmem:[%s4367_s1 + $0x5f0] ss:$8 sps:$4 sm:$0xff]  }
  0x5c   : > { %791 = vmatpush1.bf16.msra.mxu1 %v3144_v48  ;;  %v407_v48 = vrot.slane %v2544_v38, 2  ;;  %v3278_v38 = vld [vmem:[%s4367_s1 + $0xa0] ss:$8 sps:$4 sm:$0xff]  }
  0x5d   : > { %1736 = vmatpush1.bf16.msra.mxu0 %v3147_v50  ;;  %792 = vmatprep.subr.bf16.mxu1 %v3152_v51  ;;  %v408_v50 = vrot.slane %v2548_v41, 2  ;;  %v1352_v51 = vrot.slane %v2748_v42, 2  ;;  %v3289_v41 = vld [vmem:[%s4367_s1 + $0x6b4] ss:$8 sps:$4 sm:$0xff]   ;;  %v3284_v42 = vld [vmem:[%s4367_s1 + $0xb0] ss:$8 sps:$4 sm:$0xff]  }
  0x5e   : > { %1737 = vmatprep.subr.bf16.mxu0 %v3155_v52  ;;  %v1353_v52 = vrot.slane %v2752_v43, 2  ;;  %v3287_v43 = vld [vmem:[%s4367_s1 + $0x6b0] ss:$8 sps:$4 sm:$0xff]  }
  0x60   : > { %793 = vmatpush1.bf16.msra.mxu1 %v3150_v53  ;;  %v3214_v53 = vld [vmem:[%s4367_s1 + $0x4] ss:$8 sps:$4 sm:$0xff]  }
  0x61   : > { %1738 = vmatpush1.bf16.msra.mxu0 %v3153_v54  ;;  %794 = vmatprep.subr.bf16.mxu1 %v3158_v59  ;;  %v3219_v54 = vld [vmem:[%s4367_s1 + $0x604] ss:$8 sps:$4 sm:$0xff]   ;;  %v409_v59 = vsel %vm400_vm0, %v407_v48, %v408_v50  ;;  %v3298_v48 = vld [vmem:[%s4367_s1 + $0xd4] ss:$8 sps:$4 sm:$0xff]  }
  0x62   : > { %1739 = vmatprep.subr.bf16.mxu0 %v3161_v60  ;;  %v1354_v60 = vsel %vm400_vm0, %v1352_v51, %v1353_v52  ;;  %v3301_v50 = vld [vmem:[%s4367_s1 + $0x6d4] ss:$8 sps:$4 sm:$0xff]   ;;  %v3296_v51 = vld [vmem:[%s4367_s1 + $0xd0] ss:$8 sps:$4 sm:$0xff]  }
  0x63   : > { %v3299_v52 = vld [vmem:[%s4367_s1 + $0x6d0] ss:$8 sps:$4 sm:$0xff]  }
  0x64   : > { %795 = vmatpush1.bf16.msra.mxu1 %v3156_v2  ;;  %v3232_v2 = vld [vmem:[%s4367_s1 + $0x24] ss:$8 sps:$4 sm:$0xff]  }
  0x65   : > { %1740 = vmatpush1.bf16.msra.mxu0 %v3159_v7  ;;  %796 = vmatprep.subr.bf16.mxu1 %v3164_v8  ;;  %v3230_v7 = vld [vmem:[%s4367_s1 + $0x20] ss:$8 sps:$4 sm:$0xff]  }
  0x66   : > { %1741 = vmatprep.subr.bf16.mxu0 %v3167_v9  ;;  %v3233_v8 = vld [vmem:[%s4367_s1 + $0x620] ss:$8 sps:$4 sm:$0xff]   ;;  %v2883_v9 = vcombine.high %v3644_v49, %v3974_v6  ;;  %v3239_v49 = vld [vmem:[%s4367_s1 + $0x630] ss:$8 sps:$4 sm:$0xff]  }
  0x68   : > { %797 = vmatpush1.bf16.msra.mxu1 %v3162_v14  ;;  %v3242_v14 = vld [vmem:[%s4367_s1 + $0x40] ss:$8 sps:$4 sm:$0xff]  }
  0x69   : > { %1742 = vmatpush1.bf16.msra.mxu0 %v3165_v15  ;;  %798 = vmatprep.subr.bf16.mxu1 %v3170_v16  ;;  %v3245_v15 = vld [vmem:[%s4367_s1 + $0x640] ss:$8 sps:$4 sm:$0xff]   ;;  %v3250_v16 = vld [vmem:[%s4367_s1 + $0x54] ss:$8 sps:$4 sm:$0xff]  }
  0x6a   : > { %1743 = vmatprep.subr.bf16.mxu0 %v3173_v17  ;;  %v3253_v17 = vld [vmem:[%s4367_s1 + $0x654] ss:$8 sps:$4 sm:$0xff]  }
  0x6c   : > { %799 = vmatpush1.bf16.msra.mxu1 %v3168_v18  ;;  %v3248_v18 = vld [vmem:[%s4367_s1 + $0x50] ss:$8 sps:$4 sm:$0xff]  }
  0x6d   : > { %1744 = vmatpush1.bf16.msra.mxu0 %v3171_v19  ;;  %800 = vmatprep.subr.bf16.mxu1 %v3176_v20  ;;  %v3251_v19 = vld [vmem:[%s4367_s1 + $0x650] ss:$8 sps:$4 sm:$0xff]   ;;  %v3256_v20 = vld [vmem:[%s4367_s1 + $0x64] ss:$8 sps:$4 sm:$0xff]  }
  0x6e   : > { %1745 = vmatprep.subr.bf16.mxu0 %v3179_v21  ;;  %v3259_v21 = vld [vmem:[%s4367_s1 + $0x664] ss:$8 sps:$4 sm:$0xff]  }
  0x70   : > { %801 = vmatpush1.bf16.msra.mxu1 %v3174_v22  ;;  %v3254_v22 = vld [vmem:[%s4367_s1 + $0x60] ss:$8 sps:$4 sm:$0xff]  }
  0x71   : > { %1746 = vmatpush1.bf16.msra.mxu0 %v3177_v23  ;;  %802 = vmatprep.subr.bf16.mxu1 %v3182_v24  ;;  %v3257_v23 = vld [vmem:[%s4367_s1 + $0x660] ss:$8 sps:$4 sm:$0xff]   ;;  %v3262_v24 = vld [vmem:[%s4367_s1 + $0x74] ss:$8 sps:$4 sm:$0xff]  }
  0x72   : > { %1747 = vmatprep.subr.bf16.mxu0 %v3185_v25  ;;  %v3265_v25 = vld [vmem:[%s4367_s1 + $0x674] ss:$8 sps:$4 sm:$0xff]  }
  0x74   : > { %803 = vmatpush1.bf16.msra.mxu1 %v3180_v26  ;;  %v3260_v26 = vld [vmem:[%s4367_s1 + $0x70] ss:$8 sps:$4 sm:$0xff]  }
  0x75   : > { %1748 = vmatpush1.bf16.msra.mxu0 %v3183_v27  ;;  %804 = vmatprep.subr.bf16.mxu1 %v3188_v28  ;;  %v3263_v27 = vld [vmem:[%s4367_s1 + $0x670] ss:$8 sps:$4 sm:$0xff]   ;;  %v3268_v28 = vld [vmem:[%s4367_s1 + $0x84] ss:$8 sps:$4 sm:$0xff]  }
  0x76   : > { %1749 = vmatprep.subr.bf16.mxu0 %v3191_v29  ;;  %v3271_v29 = vld [vmem:[%s4367_s1 + $0x684] ss:$8 sps:$4 sm:$0xff]  }
  0x78   : > { %805 = vmatpush1.bf16.msra.mxu1 %v3186_v30  ;;  %v3266_v30 = vld [vmem:[%s4367_s1 + $0x80] ss:$8 sps:$4 sm:$0xff]  }
  0x79   : > { %1750 = vmatpush1.bf16.msra.mxu0 %v3189_v31  ;;  %806 = vmatprep.subr.bf16.mxu1 %v3194_v32  ;;  %v3269_v31 = vld [vmem:[%s4367_s1 + $0x680] ss:$8 sps:$4 sm:$0xff]   ;;  %v3274_v32 = vld [vmem:[%s4367_s1 + $0x94] ss:$8 sps:$4 sm:$0xff]  }
  0x7a   : > { %1751 = vmatprep.subr.bf16.mxu0 %v3197_v33  ;;  %v3277_v33 = vld [vmem:[%s4367_s1 + $0x694] ss:$8 sps:$4 sm:$0xff]  }
  0x7c   : > { %807 = vmatpush1.bf16.msra.mxu1 %v3192_v34  ;;  %v3272_v34 = vld [vmem:[%s4367_s1 + $0x90] ss:$8 sps:$4 sm:$0xff]  }
  0x7d   : > { %1752 = vmatpush1.bf16.msra.mxu0 %v3195_v35  ;;  %808 = vmatprep.subr.bf16.mxu1 %v3200_v36  ;;  %v3275_v35 = vld [vmem:[%s4367_s1 + $0x690] ss:$8 sps:$4 sm:$0xff]   ;;  %v3280_v36 = vld [vmem:[%s4367_s1 + $0xa4] ss:$8 sps:$4 sm:$0xff]  }
  0x7e   : > { %1753 = vmatprep.subr.bf16.mxu0 %v3203_v37  ;;  %v3283_v37 = vld [vmem:[%s4367_s1 + $0x6a4] ss:$8 sps:$4 sm:$0xff]  }
  0x80   : > { %809 = vmatpush1.bf16.msra.mxu1 %v3198_v39  ;;  %v3281_v39 = vld [vmem:[%s4367_s1 + $0x6a0] ss:$8 sps:$4 sm:$0xff]  }
  0x81   : > { %1754 = vmatpush1.bf16.msra.mxu0 %v3201_v40  ;;  %810 = vmatprep.subr.bf16.mxu1 %v3206_v44  ;;  %v3286_v40 = vld [vmem:[%s4367_s1 + $0xb4] ss:$8 sps:$4 sm:$0xff]   ;;  %v3292_v44 = vld [vmem:[%s4367_s1 + $0xc4] ss:$8 sps:$4 sm:$0xff]  }
  0x82   : > { %1755 = vmatprep.subr.bf16.mxu0 %v3209_v45  ;;  %v3295_v45 = vld [vmem:[%s4367_s1 + $0x6c4] ss:$8 sps:$4 sm:$0xff]  }
  0x84   : > { %811 = vmatpush1.bf16.msra.mxu1 %v3204_v46  ;;  %v3290_v46 = vld [vmem:[%s4367_s1 + $0xc0] ss:$8 sps:$4 sm:$0xff]  }
  0x85   : > { %1756 = vmatpush1.bf16.msra.mxu0 %v3207_v47  ;;  %1163 = vmatprep.subr.bf16.mxu1 %v3214_v53  ;;  %v3293_v47 = vld [vmem:[%s4367_s1 + $0x6c0] ss:$8 sps:$4 sm:$0xff]   ;;  %v3304_v53 = vld [vmem:[%s4367_s1 + $0xe4] ss:$8 sps:$4 sm:$0xff]  }
  0x86   : > { %2173 = vmatprep.subr.bf16.mxu0 %v3219_v54  ;;  %v3307_v54 = vld [vmem:[%s4367_s1 + $0x6e4] ss:$8 sps:$4 sm:$0xff]  }
  0x87   : > { %813 = vmatmul.mubr.bf16.vlgmr.msra.gmra.mrb[0].mxu1 %v409_v59  ;;  %v3310_v59 = vld [vmem:[%s4367_s1 + $0xf4] ss:$8 sps:$4 sm:$0xff]  }
  0x88   : > { %1758 = vmatmul.mubr.bf16.vlgmr.msra.gmra.mrb[0].mxu0 %v1354_v60  ;;  %1164 = vmatpush1.bf16.msra.mxu1 %v3212_v55  ;;  %v3302_v55 = vld [vmem:[%s4367_s1 + $0xe0] ss:$8 sps:$4 sm:$0xff]   ;;  %v3313_v60 = vld [vmem:[%s4367_s1 + $0x6f4] ss:$8 sps:$4 sm:$0xff]  }
  0x89   : > { %2174 = vmatpush1.bf16.msra.mxu0 %v3217_v58  ;;  %1165 = vmatprep.subr.bf16.mxu1 %v3226_v61  ;;  %v3305_v58 = vld [vmem:[%s4367_s1 + $0x6e0] ss:$8 sps:$4 sm:$0xff]   ;;  %v3308_v61 = vld [vmem:[%s4367_s1 + $0xf0] ss:$8 sps:$4 sm:$0xff]  }
  0x8a   : > { %2175 = vmatprep.subr.bf16.mxu0 %v3229_v62  ;;  %1195 = vmatprep.mubr.bf16.mxu1 %v2615_v5  ;;  %v3311_v62 = vld [vmem:[%s4367_s1 + $0x6f0] ss:$8 sps:$4 sm:$0xff]  }
  0x8b   : > { %2205 = vmatprep.mubr.bf16.mxu0 %v2883_v9  ;;  %v3423_v5 = vld [vmem:[%s3628_s11 + $0x30] sm:$0xff]  ;;  %v4154_v9 = vld [vmem:[%s3628_s11 + $0x48] sm:$0xff] }
  0x8c   : > { %1166 = vmatpush1.bf16.msra.mxu1 %v3224_v63  ;;  %v3318_v63 = vld [vmem:[%s4367_s1 + $0x104] ss:$8 sps:$4 sm:$0xff]  }
  0x8d   : > { %2176 = vmatpush1.bf16.msra.mxu0 %v3227_v1  ;;  %1167 = vmatprep.subr.bf16.mxu1 %v3232_v2  ;;  %v3323_v1 = vld [vmem:[%s4367_s1 + $0x704] ss:$8 sps:$4 sm:$0xff]   ;;  %v3422_v2 = vld [vmem:[%s3628_s11 + $0x10] sm:$0xff] }
  0x8e   : > { %2177 = vmatprep.subr.bf16.mxu0 %v3235_v4  ;;  %v2614_v4 = vcombine.low %v3966_v3, %v3422_v2  ;;  %v3326_v3 = vld [vmem:[%s4367_s1 + $0x114] ss:$8 sps:$4 sm:$0xff]   ;;  %v3404_v2 = vld [vmem:[%s4367_s1 + $0x1e4] ss:$8 sps:$4 sm:$0xff]  }
  0x90   : > { %1168 = vmatpush1.bf16.msra.mxu1 %v3230_v7  ;;  %v2882_v7 = vcombine.low %v3423_v5, %v3974_v6  ;;  %v3329_v6 = vld [vmem:[%s4367_s1 + $0x714] ss:$8 sps:$4 sm:$0xff]   ;;  %v3402_v5 = vld [vmem:[%s4367_s1 + $0x1e0] ss:$8 sps:$4 sm:$0xff]  }
  0x91   : > { %2178 = vmatpush1.bf16.msra.mxu0 %v3233_v8  ;;  %1169 = vmatprep.subr.bf16.mxu1 %v3238_v56  ;;  %v4151_v8 = vld [vmem:[%s3628_s11 + $0x8] sm:$0xff] }
  0x92   : > { %2179 = vmatprep.subr.bf16.mxu0 %v3241_v10  ;;  %v3316_v56 = vld [vmem:[%s4367_s1 + $0x100] ss:$8 sps:$4 sm:$0xff]  }
  0x93   : > { %v3321_v10 = vld [vmem:[%s4367_s1 + $0x700] ss:$8 sps:$4 sm:$0xff]  }
  0x94   : > { %1170 = vmatpush1.bf16.msra.mxu1 %v3236_v11  ;;  %v2617_v11 = vcombine.high %v4151_v8, %v3815_v0 }
  0x95   : > { %2180 = vmatpush1.bf16.msra.mxu0 %v3239_v49  ;;  %1171 = vmatprep.subr.bf16.mxu1 %v3244_v12  ;;  %v2885_v49 = vcombine.high %v3796_v57, %v4154_v9  ;;  %v3324_v12 = vld [vmem:[%s4367_s1 + $0x110] ss:$8 sps:$4 sm:$0xff]  }
  0x96   : > { %2181 = vmatprep.subr.bf16.mxu0 %v3247_v13  ;;  %v3327_v13 = vld [vmem:[%s4367_s1 + $0x710] ss:$8 sps:$4 sm:$0xff]  }
  0x98   : > { %1172 = vmatpush1.bf16.msra.mxu1 %v3242_v14  ;;  %v3332_v14 = vld [vmem:[%s4367_s1 + $0x124] ss:$8 sps:$4 sm:$0xff]  }
  0x99   : > { %2182 = vmatpush1.bf16.msra.mxu0 %v3245_v15  ;;  %1173 = vmatprep.subr.bf16.mxu1 %v3250_v16  ;;  %v3335_v15 = vld [vmem:[%s4367_s1 + $0x724] ss:$8 sps:$4 sm:$0xff]   ;;  %v3330_v16 = vld [vmem:[%s4367_s1 + $0x120] ss:$8 sps:$4 sm:$0xff]  }
  0x9a   : > { %2183 = vmatprep.subr.bf16.mxu0 %v3253_v17  ;;  %v3333_v17 = vld [vmem:[%s4367_s1 + $0x720] ss:$8 sps:$4 sm:$0xff]  }
  0x9c   : > { %1174 = vmatpush1.bf16.msra.mxu1 %v3248_v18  ;;  %v3338_v18 = vld [vmem:[%s4367_s1 + $0x134] ss:$8 sps:$4 sm:$0xff]  }
  0x9d   : > { %2184 = vmatpush1.bf16.msra.mxu0 %v3251_v19  ;;  %1175 = vmatprep.subr.bf16.mxu1 %v3256_v20  ;;  %v3341_v19 = vld [vmem:[%s4367_s1 + $0x734] ss:$8 sps:$4 sm:$0xff]   ;;  %v3336_v20 = vld [vmem:[%s4367_s1 + $0x130] ss:$8 sps:$4 sm:$0xff]  }
  0x9e   : > { %2185 = vmatprep.subr.bf16.mxu0 %v3259_v21  ;;  %v3339_v21 = vld [vmem:[%s4367_s1 + $0x730] ss:$8 sps:$4 sm:$0xff]  }
  0xa0   : > { %1176 = vmatpush1.bf16.msra.mxu1 %v3254_v22  ;;  %v3344_v22 = vld [vmem:[%s4367_s1 + $0x144] ss:$8 sps:$4 sm:$0xff]  }
  0xa1   : > { %2186 = vmatpush1.bf16.msra.mxu0 %v3257_v23  ;;  %1177 = vmatprep.subr.bf16.mxu1 %v3262_v24  ;;  %v3347_v23 = vld [vmem:[%s4367_s1 + $0x744] ss:$8 sps:$4 sm:$0xff]   ;;  %v3342_v24 = vld [vmem:[%s4367_s1 + $0x140] ss:$8 sps:$4 sm:$0xff]  }
  0xa2   : > { %2187 = vmatprep.subr.bf16.mxu0 %v3265_v25  ;;  %v3345_v25 = vld [vmem:[%s4367_s1 + $0x740] ss:$8 sps:$4 sm:$0xff]  }
  0xa4   : > { %1178 = vmatpush1.bf16.msra.mxu1 %v3260_v26  ;;  %v3350_v26 = vld [vmem:[%s4367_s1 + $0x154] ss:$8 sps:$4 sm:$0xff]  }
  0xa5   : > { %2188 = vmatpush1.bf16.msra.mxu0 %v3263_v27  ;;  %1179 = vmatprep.subr.bf16.mxu1 %v3268_v28  ;;  %v3353_v27 = vld [vmem:[%s4367_s1 + $0x754] ss:$8 sps:$4 sm:$0xff]   ;;  %v3348_v28 = vld [vmem:[%s4367_s1 + $0x150] ss:$8 sps:$4 sm:$0xff]  }
  0xa6   : > { %2189 = vmatprep.subr.bf16.mxu0 %v3271_v29  ;;  %v3351_v29 = vld [vmem:[%s4367_s1 + $0x750] ss:$8 sps:$4 sm:$0xff]  }
  0xa8   : > { %1180 = vmatpush1.bf16.msra.mxu1 %v3266_v30  ;;  %v3356_v30 = vld [vmem:[%s4367_s1 + $0x164] ss:$8 sps:$4 sm:$0xff]  }
  0xa9   : > { %2190 = vmatpush1.bf16.msra.mxu0 %v3269_v31  ;;  %1181 = vmatprep.subr.bf16.mxu1 %v3274_v32  ;;  %v3359_v31 = vld [vmem:[%s4367_s1 + $0x764] ss:$8 sps:$4 sm:$0xff]   ;;  %v3354_v32 = vld [vmem:[%s4367_s1 + $0x160] ss:$8 sps:$4 sm:$0xff]  }
  0xaa   : > { %2191 = vmatprep.subr.bf16.mxu0 %v3277_v33  ;;  %v3357_v33 = vld [vmem:[%s4367_s1 + $0x760] ss:$8 sps:$4 sm:$0xff]  }
  0xac   : > { %1182 = vmatpush1.bf16.msra.mxu1 %v3272_v34  ;;  %v3362_v34 = vld [vmem:[%s4367_s1 + $0x174] ss:$8 sps:$4 sm:$0xff]  }
  0xad   : > { %2192 = vmatpush1.bf16.msra.mxu0 %v3275_v35  ;;  %1183 = vmatprep.subr.bf16.mxu1 %v3280_v36  ;;  %v3365_v35 = vld [vmem:[%s4367_s1 + $0x774] ss:$8 sps:$4 sm:$0xff]   ;;  %v3360_v36 = vld [vmem:[%s4367_s1 + $0x170] ss:$8 sps:$4 sm:$0xff]  }
  0xae   : > { %2193 = vmatprep.subr.bf16.mxu0 %v3283_v37  ;;  %v3363_v37 = vld [vmem:[%s4367_s1 + $0x770] ss:$8 sps:$4 sm:$0xff]  }
  0xb0   : > { %1184 = vmatpush1.bf16.msra.mxu1 %v3278_v38  ;;  %v3368_v38 = vld [vmem:[%s4367_s1 + $0x184] ss:$8 sps:$4 sm:$0xff]  }
  0xb1   : > { %2194 = vmatpush1.bf16.msra.mxu0 %v3281_v39  ;;  %1185 = vmatprep.subr.bf16.mxu1 %v3286_v40  ;;  %v3371_v39 = vld [vmem:[%s4367_s1 + $0x784] ss:$8 sps:$4 sm:$0xff]   ;;  %v3366_v40 = vld [vmem:[%s4367_s1 + $0x180] ss:$8 sps:$4 sm:$0xff]  }
  0xb2   : > { %2195 = vmatprep.subr.bf16.mxu0 %v3289_v41  ;;  %v3369_v41 = vld [vmem:[%s4367_s1 + $0x780] ss:$8 sps:$4 sm:$0xff]  }
  0xb4   : > { %1186 = vmatpush1.bf16.msra.mxu1 %v3284_v42  ;;  %v3374_v42 = vld [vmem:[%s4367_s1 + $0x194] ss:$8 sps:$4 sm:$0xff]  }
  0xb5   : > { %2196 = vmatpush1.bf16.msra.mxu0 %v3287_v43  ;;  %1187 = vmatprep.subr.bf16.mxu1 %v3292_v44  ;;  %v3377_v43 = vld [vmem:[%s4367_s1 + $0x794] ss:$8 sps:$4 sm:$0xff]   ;;  %v3372_v44 = vld [vmem:[%s4367_s1 + $0x190] ss:$8 sps:$4 sm:$0xff]  }
  0xb6   : > { %2197 = vmatprep.subr.bf16.mxu0 %v3295_v45  ;;  %v3375_v45 = vld [vmem:[%s4367_s1 + $0x790] ss:$8 sps:$4 sm:$0xff]  }
  0xb8   : > { %1188 = vmatpush1.bf16.msra.mxu1 %v3290_v46  ;;  %v3380_v46 = vld [vmem:[%s4367_s1 + $0x1a4] ss:$8 sps:$4 sm:$0xff]  }
  0xb9   : > { %2198 = vmatpush1.bf16.msra.mxu0 %v3293_v47  ;;  %1189 = vmatprep.subr.bf16.mxu1 %v3298_v48  ;;  %v3383_v47 = vld [vmem:[%s4367_s1 + $0x7a4] ss:$8 sps:$4 sm:$0xff]   ;;  %v3378_v48 = vld [vmem:[%s4367_s1 + $0x1a0] ss:$8 sps:$4 sm:$0xff]  }
  0xba   : > { %2199 = vmatprep.subr.bf16.mxu0 %v3301_v50  ;;  %v3381_v50 = vld [vmem:[%s4367_s1 + $0x7a0] ss:$8 sps:$4 sm:$0xff]  }
  0xbc   : > { %1190 = vmatpush1.bf16.msra.mxu1 %v3296_v51  ;;  %v3386_v51 = vld [vmem:[%s4367_s1 + $0x1b4] ss:$8 sps:$4 sm:$0xff]  }
  0xbd   : > { %2200 = vmatpush1.bf16.msra.mxu0 %v3299_v52  ;;  %1191 = vmatprep.subr.bf16.mxu1 %v3304_v53  ;;  %v3389_v52 = vld [vmem:[%s4367_s1 + $0x7b4] ss:$8 sps:$4 sm:$0xff]   ;;  %v3384_v53 = vld [vmem:[%s4367_s1 + $0x1b0] ss:$8 sps:$4 sm:$0xff]  }
  0xbe   : > { %2201 = vmatprep.subr.bf16.mxu0 %v3307_v54  ;;  %v3387_v54 = vld [vmem:[%s4367_s1 + $0x7b0] ss:$8 sps:$4 sm:$0xff]  }
  0xc0   : > { %1192 = vmatpush1.bf16.msra.mxu1 %v3302_v55  ;;  %v3392_v55 = vld [vmem:[%s4367_s1 + $0x1c4] ss:$8 sps:$4 sm:$0xff]  }
  0xc1   : > { %2202 = vmatpush1.bf16.msra.mxu0 %v3305_v58  ;;  %1193 = vmatprep.subr.bf16.mxu1 %v3310_v59  ;;  %v3395_v58 = vld [vmem:[%s4367_s1 + $0x7c4] ss:$8 sps:$4 sm:$0xff]   ;;  %v3390_v59 = vld [vmem:[%s4367_s1 + $0x1c0] ss:$8 sps:$4 sm:$0xff]  }
  0xc2   : > { %2203 = vmatprep.subr.bf16.mxu0 %v3313_v60  ;;  %v3393_v60 = vld [vmem:[%s4367_s1 + $0x7c0] ss:$8 sps:$4 sm:$0xff]  }
  0xc4   : > { %1194 = vmatpush1.bf16.msra.mxu1 %v3308_v61  ;;  %v3398_v61 = vld [vmem:[%s4367_s1 + $0x1d4] ss:$8 sps:$4 sm:$0xff]  }
  0xc5   : > { %2204 = vmatpush1.bf16.msra.mxu0 %v3311_v62  ;;  %1206 = vmatprep.subr.bf16.mxu1 %v3318_v63  ;;  %v3401_v62 = vld [vmem:[%s4367_s1 + $0x7d4] ss:$8 sps:$4 sm:$0xff]   ;;  %v3396_v63 = vld [vmem:[%s4367_s1 + $0x1d0] ss:$8 sps:$4 sm:$0xff]  }
  0xc6   : > { %2216 = vmatprep.subr.bf16.mxu0 %v3323_v1  ;;  %v3399_v1 = vld [vmem:[%s4367_s1 + $0x7d0] ss:$8 sps:$4 sm:$0xff]  }
  0xc7   : > { %1196 = vmatmul.mubr.bf16.vlgmr.msra.gmra.mrb[0].mxu1 %v2614_v4  ;;  %v3407_v4 = vld [vmem:[%s4367_s1 + $0x7e4] ss:$8 sps:$4 sm:$0xff]  }
  0xc8   : > { %2206 = vmatmul.mubr.bf16.vlgmr.msra.gmra.mrb[0].mxu0 %v2882_v7  ;;  %1207 = vmatpush1.bf16.msra.mxu1 %v3316_v56  ;;  %v3405_v7 = vld [vmem:[%s4367_s1 + $0x7e0] ss:$8 sps:$4 sm:$0xff]   ;;  %v3410_v56 = vld [vmem:[%s4367_s1 + $0x1f4] ss:$8 sps:$4 sm:$0xff]  }
  0xc9   : > { %2217 = vmatpush1.bf16.msra.mxu0 %v3321_v10  ;;  %1208 = vmatprep.subr.bf16.mxu1 %v3326_v3  ;;  %v3413_v10 = vld [vmem:[%s4367_s1 + $0x7f4] ss:$8 sps:$4 sm:$0xff]   ;;  %v3408_v3 = vld [vmem:[%s4367_s1 + $0x1f0] ss:$8 sps:$4 sm:$0xff]  }
  0xca   : > { %2218 = vmatprep.subr.bf16.mxu0 %v3329_v6  ;;  %1238 = vmatprep.mubr.bf16.mxu1 %v2617_v11  ;;  %v3411_v6 = vld [vmem:[%s4367_s1 + $0x7f0] ss:$8 sps:$4 sm:$0xff]   ;;  %v2616_v11 = vcombine.low %v4151_v8, %v3815_v0 }
  0xcb   : > { %2248 = vmatprep.mubr.bf16.mxu0 %v2885_v49  ;;  %v2884_v49 = vcombine.low %v3796_v57, %v4154_v9 }
  0xcc   : > { %1209 = vmatpush1.bf16.msra.mxu1 %v3324_v12  ;;  %v2265_v12 = vlaneseq }
  0xcd   : > { %2219 = vmatpush1.bf16.msra.mxu0 %v3327_v13  ;;  %1210 = vmatprep.subr.bf16.mxu1 %v3332_v14 }
  0xce   : > { %2220 = vmatprep.subr.bf16.mxu0 %v3335_v15  ;;  %v2266_v13 = vshrl.u32 %v2265_v12, 7  ;;  %v2263_v15 = vld [vmem:[%s4368_s2] sm:$0x3] }
  0xd0   : > { %1211 = vmatpush1.bf16.msra.mxu1 %v3330_v16  ;;  %v2267_v14 = vsub.s32 0, %v2266_v13  ;;  %v2271_v16 = vsub.s32 1, %v2266_v13 }
  0xd1   : > { %2221 = vmatpush1.bf16.msra.mxu0 %v3333_v17  ;;  %1212 = vmatprep.subr.bf16.mxu1 %v3338_v18 }
  0xd2   : > { %2222 = vmatprep.subr.bf16.mxu0 %v3341_v19  ;;  %v2268_v17 = vrot.slane %v2263_v15, %v2267_v14 }
  0xd4   : > { %1213 = vmatpush1.bf16.msra.mxu1 %v3336_v20  ;;  %v2272_v20 = vrot.slane %v2263_v15, %v2271_v16 }
  0xd5   : > { %2223 = vmatpush1.bf16.msra.mxu0 %v3339_v21  ;;  %1214 = vmatprep.subr.bf16.mxu1 %v3344_v22 }
  0xd6   : > { %2224 = vmatprep.subr.bf16.mxu0 %v3347_v23 }
  0xd8   : > { %1215 = vmatpush1.bf16.msra.mxu1 %v3342_v24 }
  0xd9   : > { %2225 = vmatpush1.bf16.msra.mxu0 %v3345_v25  ;;  %1216 = vmatprep.subr.bf16.mxu1 %v3350_v26 }
  0xda   : > { %2226 = vmatprep.subr.bf16.mxu0 %v3353_v27 }
  0xdc   : > { %1217 = vmatpush1.bf16.msra.mxu1 %v3348_v28 }
  0xdd   : > { %2227 = vmatpush1.bf16.msra.mxu0 %v3351_v29  ;;  %1218 = vmatprep.subr.bf16.mxu1 %v3356_v30 }
  0xde   : > { %2228 = vmatprep.subr.bf16.mxu0 %v3359_v31 }
  0xe0   : > { %1219 = vmatpush1.bf16.msra.mxu1 %v3354_v32 }
  0xe1   : > { %2229 = vmatpush1.bf16.msra.mxu0 %v3357_v33  ;;  %1220 = vmatprep.subr.bf16.mxu1 %v3362_v34 }
  0xe2   : > { %2230 = vmatprep.subr.bf16.mxu0 %v3365_v35 }
  0xe4   : > { %1221 = vmatpush1.bf16.msra.mxu1 %v3360_v36 }
  0xe5   : > { %2231 = vmatpush1.bf16.msra.mxu0 %v3363_v37  ;;  %1222 = vmatprep.subr.bf16.mxu1 %v3368_v38 }
  0xe6   : > { %2232 = vmatprep.subr.bf16.mxu0 %v3371_v39 }
  0xe8   : > { %1223 = vmatpush1.bf16.msra.mxu1 %v3366_v40 }
  0xe9   : > { %2233 = vmatpush1.bf16.msra.mxu0 %v3369_v41  ;;  %1224 = vmatprep.subr.bf16.mxu1 %v3374_v42 }
  0xea   : > { %2234 = vmatprep.subr.bf16.mxu0 %v3377_v43 }
  0xec   : > { %1225 = vmatpush1.bf16.msra.mxu1 %v3372_v44 }
  0xed   : > { %2235 = vmatpush1.bf16.msra.mxu0 %v3375_v45  ;;  %1226 = vmatprep.subr.bf16.mxu1 %v3380_v46 }
  0xee   : > { %2236 = vmatprep.subr.bf16.mxu0 %v3383_v47 }
  0xf0   : > { %1227 = vmatpush1.bf16.msra.mxu1 %v3378_v48 }
  0xf1   : > { %2237 = vmatpush1.bf16.msra.mxu0 %v3381_v50  ;;  %1228 = vmatprep.subr.bf16.mxu1 %v3386_v51 }
  0xf2   : > { %2238 = vmatprep.subr.bf16.mxu0 %v3389_v52 }
  0xf4   : > { %1229 = vmatpush1.bf16.msra.mxu1 %v3384_v53 }
  0xf5   : > { %2239 = vmatpush1.bf16.msra.mxu0 %v3387_v54  ;;  %1230 = vmatprep.subr.bf16.mxu1 %v3392_v55 }
  0xf6   : > { %2240 = vmatprep.subr.bf16.mxu0 %v3395_v58 }
  0xf8   : > { %1231 = vmatpush1.bf16.msra.mxu1 %v3390_v59 }
  0xf9   : > { %2241 = vmatpush1.bf16.msra.mxu0 %v3393_v60  ;;  %1232 = vmatprep.subr.bf16.mxu1 %v3398_v61 }
  0xfa   : > { %2242 = vmatprep.subr.bf16.mxu0 %v3401_v62 }
  0xfc   : > { %1233 = vmatpush1.bf16.msra.mxu1 %v3396_v63 }
  0xfd   : > { %2243 = vmatpush1.bf16.msra.mxu0 %v3399_v1  ;;  %1234 = vmatprep.subr.bf16.mxu1 %v3404_v2 }
  0xfe   : > { %2244 = vmatprep.subr.bf16.mxu0 %v3407_v4 }
 0x100   : > { %1235 = vmatpush1.bf16.msra.mxu1 %v3402_v5 }
 0x101   : > { %2245 = vmatpush1.bf16.msra.mxu0 %v3405_v7  ;;  %1236 = vmatprep.subr.bf16.mxu1 %v3410_v56 }
 0x102   : > { %2246 = vmatprep.subr.bf16.mxu0 %v3413_v10 }
 0x104   : > { %1237 = vmatpush1.bf16.msra.mxu1 %v3408_v3 }
 0x105   : > { %2247 = vmatpush1.bf16.msra.mxu0 %v3411_v6 }
 0x107   : > { %1239 = vmatmul.mubr.bf16.vlgmr.msra.gmra.mrb[0].mxu1 %v2616_v11 }
 0x108   : > { %2249 = vmatmul.mubr.bf16.vlgmr.msra.gmra.mrb[0].mxu0 %v2884_v49 }
 0x1da   : > { %v1240_v18 = vpop.f32.mrb[0].mxu1 }
 0x1db   : > { %v2250_v19 = vpop.f32.mrb[0].mxu0  ;;  %v1242_v8 = vpop.f32.mrb[1].mxu1 }
 0x1dc   : > { %v2957_v0 = vadd.f32 %v2250_v19, %v1240_v18  ;;  %v2252_v21 = vpop.f32.mrb[1].mxu0  ;;  %v1244_v9 = vpop.f32.mrb[2].mxu1 }
 0x1dd   : > { %v2958_v57 = vadd.f32 %v2252_v21, %v1242_v8  ;;  %v2254_v22 = vpop.f32.mrb[2].mxu0  ;;  %v1246_v25 = vpop.f32.mrb[3].mxu1 }
 0x1de   : > { %v2275_v23 = vadd.f32 %v2957_v0, %v2268_v17  ;;  %v2959_v24 = vadd.f32 %v2254_v22, %v1244_v9  ;;  %v2256_v26 = vpop.f32.mrb[3].mxu0 }
 0x1df   : > { %v2276_v27 = vadd.f32 %v2958_v57, %v2272_v20  ;;  %v2960_v28 = vadd.f32 %v2256_v26, %v1246_v25 }
 0x1e0   : > { %v2277_v29 = vadd.f32 %v2959_v24, %v2268_v17  ;;  %v2296_v31 = vmul.f32 %v2275_v23, %v2275_v23 }
 0x1e1   : > { %v2278_v30 = vadd.f32 %v2960_v28, %v2272_v20  ;;  %v2297_v34 = vmul.f32 %v2276_v27, %v2276_v27 }
 0x1e2   : > { %v2279_v32 = vadd.f32 %v2277_v29, %v2275_v23  ;;  %v2298_v33 = vmul.f32 %v2277_v29, %v2277_v29 }
 0x1e3   : > { %v2286_v35 = vadd.f32 %v2278_v30, %v2276_v27  ;;  %v2299_v36 = vmul.f32 %v2278_v30, %v2278_v30 }
 0x1e4   : > { %v2280_v37 = vrot.slane %v2279_v32, 4  ;;  %v2300_v38 = vadd.f32 %v2298_v33, %v2296_v31 }
 0x1e5   : > { %v2287_v39 = vrot.slane %v2286_v35, 4  ;;  %v2307_v40 = vadd.f32 %v2299_v36, %v2297_v34 }
 0x1e6   : > { %v2281_v41 = vadd.f32 %v2280_v37, %v2279_v32  ;;  %v2301_v42 = vrot.slane %v2300_v38, 4 }
 0x1e7   : > { %v2288_v43 = vadd.f32 %v2287_v39, %v2286_v35  ;;  %v2308_v44 = vrot.slane %v2307_v40, 4 }
 0x1e8   : > { %v2282_v45 = vrot.slane %v2281_v41, 2  ;;  %v2302_v46 = vadd.f32 %v2301_v42, %v2300_v38 }
 0x1e9   : > { %v2289_v47 = vrot.slane %v2288_v43, 2  ;;  %v2309_v48 = vadd.f32 %v2308_v44, %v2307_v40 }
 0x1ea   : > { %v2283_v50 = vadd.f32 %v2282_v45, %v2281_v41  ;;  %v2303_v51 = vrot.slane %v2302_v46, 2 }
 0x1eb   : > { %v2290_v52 = vadd.f32 %v2289_v47, %v2288_v43  ;;  %v2310_v53 = vrot.slane %v2309_v48, 2 }
 0x1ec   : > { %v2284_v54 = vrot.slane %v2283_v50, 1  ;;  %v2304_v55 = vadd.f32 %v2303_v51, %v2302_v46 }
 0x1ed   : > { %v2291_v58 = vrot.slane %v2290_v52, 1  ;;  %v2311_v59 = vadd.f32 %v2310_v53, %v2309_v48 }
 0x1ee   : > { %v2285_v60 = vadd.f32 %v2284_v54, %v2283_v50  ;;  %v2305_v61 = vrot.slane %v2304_v55, 1 }
 0x1ef   : > { %v2292_v62 = vadd.f32 %v2291_v58, %v2290_v52  ;;  %v2312_v63 = vrot.slane %v2311_v59, 1 }
 0x1f0   : > { %v2294_v1 = vmul.f32 0.0625, %v2285_v60  ;;  %v2306_v2 = vadd.f32 %v2305_v61, %v2304_v55 }
 0x1f1   : > { %v2295_v4 = vmul.f32 0.0625, %v2292_v62  ;;  %v2313_v5 = vadd.f32 %v2312_v63, %v2311_v59 }
 0x1f2   : > { %v2314_v7 = vmul.f32 0.0625, %v2306_v2  ;;  %v2316_v56 = vmul.f32 %v2294_v1, %v2294_v1  ;;  %v2322_v10 = vsub.f32 %v2275_v23, %v2294_v1  ;;  %v2324_v3 = vsub.f32 %v2277_v29, %v2294_v1 }
 0x1f3   : > { %v2315_v6 = vmul.f32 0.0625, %v2313_v5  ;;  %v2317_v11 = vmul.f32 %v2295_v4, %v2295_v4  ;;  %v2323_v49 = vsub.f32 %v2276_v27, %v2295_v4  ;;  %v2325_v12 = vsub.f32 %v2278_v30, %v2295_v4 }
 0x1f4   : > { %v2318_v13 = vsub.f32 %v2314_v7, %v2316_v56 }
 0x1f5   : > { %v2319_v14 = vsub.f32 %v2315_v6, %v2317_v11 }
 0x1f6   : > { %v2320_v15 = vmax.f32 %v2318_v13, 0.0 }
 0x1f7   : > { %v2321_v16 = vmax.f32 %v2319_v14, 0.0 }
 0x1f8   : > { %v2326_v17 = vadd.f32 1e-05, %v2320_v15 }
 0x1f9   : > { %v2327_v18 = vadd.f32 1e-05, %v2321_v16 }
 0x1fa   : > { %3418 = vrsqrt.f32 %v2326_v17 }
 0x1fb   : > { %3420 = vrsqrt.f32 %v2327_v18 }
 0x204   : > { %v3419_v19 = vpop.eup %3418 }
 0x205   : > { %v3421_v20 = vpop.eup %3420  ;;  %v2330_v0 = vmul.f32 %v3419_v19, %v2322_v10  ;;  %v2332_v8 = vmul.f32 %v3419_v19, %v2324_v3 }
 0x206   : > { %v2331_v21 = vmul.f32 %v3421_v20, %v2323_v49  ;;  %v2333_v57 = vmul.f32 %v3421_v20, %v2325_v12 }
 0x207   : > { %vm2334_vm1 = vcmp.ge.f32.partialorder %v2330_v0, 0.0  ;;  %vm2336_vm2 = vcmp.ge.f32.partialorder %v2332_v8, 0.0  ;;  %v2338_v9 = vmul.f32 0.2, %v2330_v0  ;;  %v2340_v22 = vmul.f32 0.2, %v2332_v8 }
 0x208   : > { %vm2335_vm3 = vcmp.ge.f32.partialorder %v2331_v21, 0.0  ;;  %vm2337_vm4 = vcmp.ge.f32.partialorder %v2333_v57, 0.0  ;;  %v2339_v23 = vmul.f32 0.2, %v2331_v21  ;;  %v2341_v24 = vmul.f32 0.2, %v2333_v57 }
 0x209   : > { %v2344_v25 = vsel %vm2336_vm2, %v2332_v8, %v2340_v22  ;;  %v2342_v26 = vsel %vm2334_vm1, %v2330_v0, %v2338_v9 }
 0x20a   : > { %v2343_v27 = vsel %vm2335_vm3, %v2331_v21, %v2339_v23  ;;  %v2345_v28 = vsel %vm2337_vm4, %v2333_v57, %v2341_v24 }
 0x20b   : > { %v2955_v29 = vpack.c.bf16 %v2343_v27, %v2342_v26  ;;  %v2956_v30 = vpack.c.bf16 %v2345_v28, %v2344_v25 }
 0x20d   : > { %2358 = vst [vmem:[%s233_s21] sm:$0xff] %v2955_v29  ;;  %2359 = vst [vmem:[%s233_s21 + $0x8] sm:$0xff] %v2956_v30 }
 0x20e PF: > { %s13_s14 = sadd.s32 1, %s3446_s14   ;;  %s4370_s12 = smov %s3442_s13 }
 0x20f   : > { %p10_p5 = scmp.ge.s32.totalorder %s13_s14, 4   ;;  %s4371_s13 = smov %s4373_s15 }
 0x211   :  { %12 = sbr.rel (!%p10_p5) target bundleno = 2 (0x2), region = 71 }

// kernel: _lambda_.8
= control target key start
LH: loop header
LB: loop body
LE: loop exit
PB: predicated region body
PF: predicated region fallthrough
CT: control target
= control target key end

     0   :  { %s10685_s12 = smov 0   ;;  %s10687_s13 = smov 0   ;;  %s12545_s0 = inlined_call_operand.vmem [shape: bf16[2,18,1024], index: 0, kind: input, shape index: {}]   ;;  %s12546_s1 = inlined_call_operand.vmem [shape: bf16[4,1024,512], index: 1, kind: input, shape index: {}]   ;;  %s12547_s2 = inlined_call_operand.vmem [shape: f32[1,512], index: 2, kind: input, shape index: {}]   ;;  %s12548_s3 = inlined_call_operand.vmem [shape: bf16[2,9,512], index: 3, kind: output, shape index: {}]  }
   0x1   :  { %s10689_s14 = smov 0   ;;  %s10691_s15 = smov 0  }
   0x2   :  { %s10693_s16 = smov 0   ;;  %s10695_s17 = smov 0  }
   0x3   :  { %s10697_s18 = smov 0   ;;  %s10699_s19 = smov 0  }
   0x4   :  { %s10701_s20 = smov 0  }
   0x5 LB: > { %s8737_s21 = sadd.s32 4294967295, %s10663_s20   ;;  %s22_s22 = sadd.s32 1, %s10655_s18  ;;  %s10663_s20 = sphi %s10701_s20, %s13_s20   ;;  %s10659_s19 = sphi %s10699_s19, %s12561_s19   ;;  %s10655_s18 = sphi %s10697_s18, %s12560_s18   ;;  %s10651_s17 = sphi %s10695_s17, %s12559_s17   ;;  %s10647_s16 = sphi %s10693_s16, %s12558_s16   ;;  %s10643_s15 = sphi %s10691_s15, %s12557_s15   ;;  %s10639_s14 = sphi %s10689_s14, %s12556_s14   ;;  %s10635_s13 = sphi %s10687_s13, %s12555_s13   ;;  %s10631_s12 = sphi %s10685_s12, %s12554_s12  }
   0x6   : > { %p23_p0 = scmp.ge.s32.totalorder %s22_s22, 2  ;;  %s25_s23 = sadd.s32 1, %s10659_s19 }
   0x7   : > { %s58_s24 = sadd.s32 1, %s10643_s15  ;;  %p65_p1 = scmp.ne.s32.totalorder %s10643_s15, %s10639_s14 }
   0x8   : > { %s12563_s22 = smov (%p23_p0, %s22_s22), 0  ;;  %s12565_s23 = smov (!%p23_p0, %s25_s23), %s10659_s19 }
   0x9   : > { %s55_s25 = ssub.s32 %s10655_s18, %s12563_s22  ;;  %p66_p2 = scmp.eq.s32.totalorder %s10663_s20, 0 }
   0xa   : > { %p27_p3 = scmp.ge.s32.totalorder %s12565_s23, 2  ;;  %p56_p4 = scmp.eq.s32.totalorder %s55_s25, 0 }
   0xb   : > { %p67_p5 = por %p66_p2, %p65_p1  ;;  %s112_s26 = sadd.s32 1, %s10635_s13 }
   0xc   : > { %s12567_s23 = smov (%p27_p3, %s12565_s23), 0  ;;  %p122_p6 = scmp.ne.s32.totalorder %s10635_s13, %s10631_s12 }
   0xd   : > { %s10746_s27 = scalar_select %p56_p4, %s10643_s15, %s58_s24  }
   0xe   : > { %s107_s28 = ssub.s32 %s10659_s19, %s12567_s23  ;;  %p123_p7 = scmp.eq.s32.totalorder %s8737_s21, 3 }
   0xf   : > { %s109_s29 = sor.u32 %s107_s28, %s55_s25  ;;  %p8740_p10 = scmp.ge.s32.totalorder %s10663_s20, 4 }
  0x10   : > { %p110_p8 = scmp.eq.s32.totalorder %s109_s29, 0  ;;  %p10752_p9 = por %p123_p7, %p122_p6 }
  0x11   : > { %145 = sbr.rel (%p8740_p10) target bundleno = 284 (0x11c), region = 16 }
  0x12   : > { %s10757_s4 = scalar_select %p110_p8, %s10635_s13, %s112_s26  }
  0x18   : > { %156 = sbr.rel (!%p67_p5) target bundleno = 284 (0x11c), region = 24  ;;  %s158_s5 = sand.u32 (%p67_p5), 1, %s10643_s15  }
  0x19   : > { %s9685_s6 = sshll.u32 (%p67_p5), %s10655_s18, 3  ;;  %s8741_s7 = sshll.u32 (%p67_p5), %s158_s5, 12 }
  0x1a   : > { %s10765_s10 = scalar_lea.vmem (%p67_p5), %s12546_s1, %s9685_s6  ;;  %s10770_s11 = scalar_lea.vmem (%p67_p5), [#allocation2], %s8741_s7 }
  0x1b   : > { %v1216_v0 = vld [vmem:[%s10765_s10] sm:$0xff] (%p67_p5)  ;;  %v1218_v1 = vld [vmem:[%s10765_s10 + $0x10] sm:$0xff] (%p67_p5) }
  0x1c   : > { %v1220_v2 = vld [vmem:[%s10765_s10 + $0x20] sm:$0xff] (%p67_p5)  ;;  %1217 = vst [vmem:[%s10770_s11] sm:$0xff] (%p67_p5), %v1216_v0  ;;  %1219 = vst [vmem:[%s10770_s11 + $0x8] sm:$0xff] (%p67_p5), %v1218_v1  ;;  %v1222_v3 = vld [vmem:[%s10765_s10 + $0x30] sm:$0xff] (%p67_p5) }
  0x1d   : > { %1221 = vst [vmem:[%s10770_s11 + $0x10] sm:$0xff] (%p67_p5), %v1220_v2  ;;  %v1224_v4 = vld [vmem:[%s10765_s10 + $0x40] sm:$0xff] (%p67_p5)  ;;  %v1226_v5 = vld [vmem:[%s10765_s10 + $0x50] sm:$0xff] (%p67_p5)  ;;  %1223 = vst [vmem:[%s10770_s11 + $0x18] sm:$0xff] (%p67_p5), %v1222_v3 }
  0x1e   : > { %1225 = vst [vmem:[%s10770_s11 + $0x20] sm:$0xff] (%p67_p5), %v1224_v4  ;;  %1227 = vst [vmem:[%s10770_s11 + $0x28] sm:$0xff] (%p67_p5), %v1226_v5  ;;  %v1228_v6 = vld [vmem:[%s10765_s10 + $0x60] sm:$0xff] (%p67_p5)  ;;  %v1230_v7 = vld [vmem:[%s10765_s10 + $0x70] sm:$0xff] (%p67_p5) }
  0x1f   : > { %v1232_v8 = vld [vmem:[%s10765_s10 + $0x80] sm:$0xff]  ;;  %1229 = vst [vmem:[%s10770_s11 + $0x30] sm:$0xff] %v1228_v6  ;;  %1231 = vst [vmem:[%s10770_s11 + $0x38] sm:$0xff] %v1230_v7  ;;  %v1234_v9 = vld [vmem:[%s10765_s10 + $0x90] sm:$0xff] }
  0x20   : > { %1233 = vst [vmem:[%s10770_s11 + $0x40] sm:$0xff] %v1232_v8  ;;  %v1236_v10 = vld [vmem:[%s10765_s10 + $0xa0] sm:$0xff]  ;;  %v1238_v11 = vld [vmem:[%s10765_s10 + $0xb0] sm:$0xff]  ;;  %1235 = vst [vmem:[%s10770_s11 + $0x48] sm:$0xff] %v1234_v9 }
  0x21   : > { %1237 = vst [vmem:[%s10770_s11 + $0x50] sm:$0xff] %v1236_v10  ;;  %1239 = vst [vmem:[%s10770_s11 + $0x58] sm:$0xff] %v1238_v11  ;;  %v1240_v12 = vld [vmem:[%s10765_s10 + $0xc0] sm:$0xff]  ;;  %v1242_v13 = vld [vmem:[%s10765_s10 + $0xd0] sm:$0xff] }
  0x22   : > { %v1244_v14 = vld [vmem:[%s10765_s10 + $0xe0] sm:$0xff]  ;;  %1241 = vst [vmem:[%s10770_s11 + $0x60] sm:$0xff] %v1240_v12  ;;  %1243 = vst [vmem:[%s10770_s11 + $0x68] sm:$0xff] %v1242_v13  ;;  %v1246_v15 = vld [vmem:[%s10765_s10 + $0xf0] sm:$0xff] }
  0x23   : > { %1245 = vst [vmem:[%s10770_s11 + $0x70] sm:$0xff] %v1244_v14  ;;  %v1248_v16 = vld [vmem:[%s10765_s10 + $0x100] sm:$0xff]  ;;  %v1250_v17 = vld [vmem:[%s10765_s10 + $0x110] sm:$0xff]  ;;  %1247 = vst [vmem:[%s10770_s11 + $0x78] sm:$0xff] %v1246_v15 }
  0x24   : > { %1249 = vst [vmem:[%s10770_s11 + $0x80] sm:$0xff] %v1248_v16  ;;  %1251 = vst [vmem:[%s10770_s11 + $0x88] sm:$0xff] %v1250_v17  ;;  %v1252_v18 = vld [vmem:[%s10765_s10 + $0x120] sm:$0xff]  ;;  %v1254_v19 = vld [vmem:[%s10765_s10 + $0x130] sm:$0xff] }
  0x25   : > { %v1256_v20 = vld [vmem:[%s10765_s10 + $0x140] sm:$0xff]  ;;  %1253 = vst [vmem:[%s10770_s11 + $0x90] sm:$0xff] %v1252_v18  ;;  %1255 = vst [vmem:[%s10770_s11 + $0x98] sm:$0xff] %v1254_v19  ;;  %v1258_v21 = vld [vmem:[%s10765_s10 + $0x150] sm:$0xff] }
  0x26   : > { %1257 = vst [vmem:[%s10770_s11 + $0xa0] sm:$0xff] %v1256_v20  ;;  %v1260_v22 = vld [vmem:[%s10765_s10 + $0x160] sm:$0xff]  ;;  %v1262_v23 = vld [vmem:[%s10765_s10 + $0x170] sm:$0xff]  ;;  %1259 = vst [vmem:[%s10770_s11 + $0xa8] sm:$0xff] %v1258_v21 }
  0x27   : > { %1261 = vst [vmem:[%s10770_s11 + $0xb0] sm:$0xff] %v1260_v22  ;;  %1263 = vst [vmem:[%s10770_s11 + $0xb8] sm:$0xff] %v1262_v23  ;;  %v1264_v24 = vld [vmem:[%s10765_s10 + $0x180] sm:$0xff]  ;;  %v1266_v25 = vld [vmem:[%s10765_s10 + $0x190] sm:$0xff] }
  0x28   : > { %v1268_v26 = vld [vmem:[%s10765_s10 + $0x1a0] sm:$0xff]  ;;  %1265 = vst [vmem:[%s10770_s11 + $0xc0] sm:$0xff] %v1264_v24  ;;  %1267 = vst [vmem:[%s10770_s11 + $0xc8] sm:$0xff] %v1266_v25  ;;  %v1270_v27 = vld [vmem:[%s10765_s10 + $0x1b0] sm:$0xff] }
  0x29   : > { %1269 = vst [vmem:[%s10770_s11 + $0xd0] sm:$0xff] %v1268_v26  ;;  %v1272_v28 = vld [vmem:[%s10765_s10 + $0x1c0] sm:$0xff]  ;;  %v1274_v29 = vld [vmem:[%s10765_s10 + $0x1d0] sm:$0xff]  ;;  %1271 = vst [vmem:[%s10770_s11 + $0xd8] sm:$0xff] %v1270_v27 }
  0x2a   : > { %1273 = vst [vmem:[%s10770_s11 + $0xe0] sm:$0xff] %v1272_v28  ;;  %1275 = vst [vmem:[%s10770_s11 + $0xe8] sm:$0xff] %v1274_v29  ;;  %v1276_v30 = vld [vmem:[%s10765_s10 + $0x1e0] sm:$0xff]  ;;  %v1278_v31 = vld [vmem:[%s10765_s10 + $0x1f0] sm:$0xff] }
  0x2b   : > { %v1280_v32 = vld [vmem:[%s10765_s10 + $0x200] sm:$0xff]  ;;  %1277 = vst [vmem:[%s10770_s11 + $0xf0] sm:$0xff] %v1276_v30  ;;  %1279 = vst [vmem:[%s10770_s11 + $0xf8] sm:$0xff] %v1278_v31  ;;  %v1282_v33 = vld [vmem:[%s10765_s10 + $0x210] sm:$0xff] }
  0x2c   : > { %1281 = vst [vmem:[%s10770_s11 + $0x100] sm:$0xff] %v1280_v32  ;;  %v1284_v34 = vld [vmem:[%s10765_s10 + $0x220] sm:$0xff]  ;;  %v1286_v35 = vld [vmem:[%s10765_s10 + $0x230] sm:$0xff]  ;;  %1283 = vst [vmem:[%s10770_s11 + $0x108] sm:$0xff] %v1282_v33 }
  0x2d   : > { %1285 = vst [vmem:[%s10770_s11 + $0x110] sm:$0xff] %v1284_v34  ;;  %1287 = vst [vmem:[%s10770_s11 + $0x118] sm:$0xff] %v1286_v35  ;;  %v1288_v36 = vld [vmem:[%s10765_s10 + $0x240] sm:$0xff]  ;;  %v1290_v37 = vld [vmem:[%s10765_s10 + $0x250] sm:$0xff] }
  0x2e   : > { %v1292_v38 = vld [vmem:[%s10765_s10 + $0x260] sm:$0xff]  ;;  %1289 = vst [vmem:[%s10770_s11 + $0x120] sm:$0xff] %v1288_v36  ;;  %1291 = vst [vmem:[%s10770_s11 + $0x128] sm:$0xff] %v1290_v37  ;;  %v1294_v39 = vld [vmem:[%s10765_s10 + $0x270] sm:$0xff] }
  0x2f   : > { %1293 = vst [vmem:[%s10770_s11 + $0x130] sm:$0xff] %v1292_v38  ;;  %v1296_v40 = vld [vmem:[%s10765_s10 + $0x280] sm:$0xff]  ;;  %v1298_v41 = vld [vmem:[%s10765_s10 + $0x290] sm:$0xff]  ;;  %1295 = vst [vmem:[%s10770_s11 + $0x138] sm:$0xff] %v1294_v39 }
  0x30   : > { %1297 = vst [vmem:[%s10770_s11 + $0x140] sm:$0xff] %v1296_v40  ;;  %1299 = vst [vmem:[%s10770_s11 + $0x148] sm:$0xff] %v1298_v41  ;;  %v1300_v42 = vld [vmem:[%s10765_s10 + $0x2a0] sm:$0xff]  ;;  %v1302_v43 = vld [vmem:[%s10765_s10 + $0x2b0] sm:$0xff] }
  0x31   : > { %v1304_v44 = vld [vmem:[%s10765_s10 + $0x2c0] sm:$0xff]  ;;  %1301 = vst [vmem:[%s10770_s11 + $0x150] sm:$0xff] %v1300_v42  ;;  %1303 = vst [vmem:[%s10770_s11 + $0x158] sm:$0xff] %v1302_v43  ;;  %v1306_v45 = vld [vmem:[%s10765_s10 + $0x2d0] sm:$0xff] }
  0x32   : > { %1305 = vst [vmem:[%s10770_s11 + $0x160] sm:$0xff] %v1304_v44  ;;  %v1308_v46 = vld [vmem:[%s10765_s10 + $0x2e0] sm:$0xff]  ;;  %v1310_v47 = vld [vmem:[%s10765_s10 + $0x2f0] sm:$0xff]  ;;  %1307 = vst [vmem:[%s10770_s11 + $0x168] sm:$0xff] %v1306_v45 }
  0x33   : > { %1309 = vst [vmem:[%s10770_s11 + $0x170] sm:$0xff] %v1308_v46  ;;  %1311 = vst [vmem:[%s10770_s11 + $0x178] sm:$0xff] %v1310_v47  ;;  %v1312_v48 = vld [vmem:[%s10765_s10 + $0x300] sm:$0xff]  ;;  %v1314_v49 = vld [vmem:[%s10765_s10 + $0x310] sm:$0xff] }
  0x34   : > { %v1316_v50 = vld [vmem:[%s10765_s10 + $0x320] sm:$0xff]  ;;  %1313 = vst [vmem:[%s10770_s11 + $0x180] sm:$0xff] %v1312_v48  ;;  %1315 = vst [vmem:[%s10770_s11 + $0x188] sm:$0xff] %v1314_v49  ;;  %v1318_v51 = vld [vmem:[%s10765_s10 + $0x330] sm:$0xff] }
  0x35   : > { %1317 = vst [vmem:[%s10770_s11 + $0x190] sm:$0xff] %v1316_v50  ;;  %v1320_v52 = vld [vmem:[%s10765_s10 + $0x340] sm:$0xff]  ;;  %v1322_v53 = vld [vmem:[%s10765_s10 + $0x350] sm:$0xff]  ;;  %1319 = vst [vmem:[%s10770_s11 + $0x198] sm:$0xff] %v1318_v51 }
  0x36   : > { %1321 = vst [vmem:[%s10770_s11 + $0x1a0] sm:$0xff] %v1320_v52  ;;  %1323 = vst [vmem:[%s10770_s11 + $0x1a8] sm:$0xff] %v1322_v53  ;;  %v1324_v54 = vld [vmem:[%s10765_s10 + $0x360] sm:$0xff]  ;;  %v1326_v55 = vld [vmem:[%s10765_s10 + $0x370] sm:$0xff] }
  0x37   : > { %v1328_v56 = vld [vmem:[%s10765_s10 + $0x380] sm:$0xff]  ;;  %1325 = vst [vmem:[%s10770_s11 + $0x1b0] sm:$0xff] %v1324_v54  ;;  %1327 = vst [vmem:[%s10770_s11 + $0x1b8] sm:$0xff] %v1326_v55  ;;  %v1330_v57 = vld [vmem:[%s10765_s10 + $0x390] sm:$0xff] }
  0x38   : > { %1329 = vst [vmem:[%s10770_s11 + $0x1c0] sm:$0xff] %v1328_v56  ;;  %v1332_v58 = vld [vmem:[%s10765_s10 + $0x3a0] sm:$0xff]  ;;  %v1334_v59 = vld [vmem:[%s10765_s10 + $0x3b0] sm:$0xff]  ;;  %1331 = vst [vmem:[%s10770_s11 + $0x1c8] sm:$0xff] %v1330_v57 }
  0x39   : > { %1333 = vst [vmem:[%s10770_s11 + $0x1d0] sm:$0xff] %v1332_v58  ;;  %1335 = vst [vmem:[%s10770_s11 + $0x1d8] sm:$0xff] %v1334_v59  ;;  %v1336_v60 = vld [vmem:[%s10765_s10 + $0x3c0] sm:$0xff]  ;;  %v1338_v61 = vld [vmem:[%s10765_s10 + $0x3d0] sm:$0xff] }
  0x3a   : > { %v1340_v62 = vld [vmem:[%s10765_s10 + $0x3e0] sm:$0xff]  ;;  %1337 = vst [vmem:[%s10770_s11 + $0x1e0] sm:$0xff] %v1336_v60  ;;  %1339 = vst [vmem:[%s10770_s11 + $0x1e8] sm:$0xff] %v1338_v61  ;;  %v1342_v63 = vld [vmem:[%s10765_s10 + $0x3f0] sm:$0xff] }
  0x3b   : > { %1341 = vst [vmem:[%s10770_s11 + $0x1f0] sm:$0xff] %v1340_v62  ;;  %v1344_v0 = vld [vmem:[%s10765_s10 + $0x400] sm:$0xff]  ;;  %v1346_v1 = vld [vmem:[%s10765_s10 + $0x410] sm:$0xff]  ;;  %1343 = vst [vmem:[%s10770_s11 + $0x1f8] sm:$0xff] %v1342_v63 }
  0x3c   : > { %1345 = vst [vmem:[%s10770_s11 + $0x200] sm:$0xff] %v1344_v0  ;;  %1347 = vst [vmem:[%s10770_s11 + $0x208] sm:$0xff] %v1346_v1  ;;  %v1348_v2 = vld [vmem:[%s10765_s10 + $0x420] sm:$0xff]  ;;  %v1350_v3 = vld [vmem:[%s10765_s10 + $0x430] sm:$0xff] }
  0x3d   : > { %v1352_v4 = vld [vmem:[%s10765_s10 + $0x440] sm:$0xff]  ;;  %1349 = vst [vmem:[%s10770_s11 + $0x210] sm:$0xff] %v1348_v2  ;;  %1351 = vst [vmem:[%s10770_s11 + $0x218] sm:$0xff] %v1350_v3  ;;  %v1354_v5 = vld [vmem:[%s10765_s10 + $0x450] sm:$0xff] }
  0x3e   : > { %1353 = vst [vmem:[%s10770_s11 + $0x220] sm:$0xff] %v1352_v4  ;;  %v1356_v6 = vld [vmem:[%s10765_s10 + $0x460] sm:$0xff]  ;;  %v1358_v7 = vld [vmem:[%s10765_s10 + $0x470] sm:$0xff]  ;;  %1355 = vst [vmem:[%s10770_s11 + $0x228] sm:$0xff] %v1354_v5 }
  0x3f   : > { %1357 = vst [vmem:[%s10770_s11 + $0x230] sm:$0xff] %v1356_v6  ;;  %1359 = vst [vmem:[%s10770_s11 + $0x238] sm:$0xff] %v1358_v7  ;;  %v1360_v8 = vld [vmem:[%s10765_s10 + $0x480] sm:$0xff]  ;;  %v1362_v9 = vld [vmem:[%s10765_s10 + $0x490] sm:$0xff] }
  0x40   : > { %v1364_v10 = vld [vmem:[%s10765_s10 + $0x4a0] sm:$0xff]  ;;  %1361 = vst [vmem:[%s10770_s11 + $0x240] sm:$0xff] %v1360_v8  ;;  %1363 = vst [vmem:[%s10770_s11 + $0x248] sm:$0xff] %v1362_v9  ;;  %v1366_v11 = vld [vmem:[%s10765_s10 + $0x4b0] sm:$0xff] }
  0x41   : > { %1365 = vst [vmem:[%s10770_s11 + $0x250] sm:$0xff] %v1364_v10  ;;  %v1368_v12 = vld [vmem:[%s10765_s10 + $0x4c0] sm:$0xff]  ;;  %v1370_v13 = vld [vmem:[%s10765_s10 + $0x4d0] sm:$0xff]  ;;  %1367 = vst [vmem:[%s10770_s11 + $0x258] sm:$0xff] %v1366_v11 }
  0x42   : > { %1369 = vst [vmem:[%s10770_s11 + $0x260] sm:$0xff] %v1368_v12  ;;  %1371 = vst [vmem:[%s10770_s11 + $0x268] sm:$0xff] %v1370_v13  ;;  %v1372_v14 = vld [vmem:[%s10765_s10 + $0x4e0] sm:$0xff]  ;;  %v1374_v15 = vld [vmem:[%s10765_s10 + $0x4f0] sm:$0xff] }
  0x43   : > { %v1376_v16 = vld [vmem:[%s10765_s10 + $0x500] sm:$0xff]  ;;  %1373 = vst [vmem:[%s10770_s11 + $0x270] sm:$0xff] %v1372_v14  ;;  %1375 = vst [vmem:[%s10770_s11 + $0x278] sm:$0xff] %v1374_v15  ;;  %v1378_v17 = vld [vmem:[%s10765_s10 + $0x510] sm:$0xff] }
  0x44   : > { %1377 = vst [vmem:[%s10770_s11 + $0x280] sm:$0xff] %v1376_v16  ;;  %v1380_v18 = vld [vmem:[%s10765_s10 + $0x520] sm:$0xff]  ;;  %v1382_v19 = vld [vmem:[%s10765_s10 + $0x530] sm:$0xff]  ;;  %1379 = vst [vmem:[%s10770_s11 + $0x288] sm:$0xff] %v1378_v17 }
  0x45   : > { %1381 = vst [vmem:[%s10770_s11 + $0x290] sm:$0xff] %v1380_v18  ;;  %1383 = vst [vmem:[%s10770_s11 + $0x298] sm:$0xff] %v1382_v19  ;;  %v1384_v20 = vld [vmem:[%s10765_s10 + $0x540] sm:$0xff]  ;;  %v1386_v21 = vld [vmem:[%s10765_s10 + $0x550] sm:$0xff] }
  0x46   : > { %v1388_v22 = vld [vmem:[%s10765_s10 + $0x560] sm:$0xff]  ;;  %1385 = vst [vmem:[%s10770_s11 + $0x2a0] sm:$0xff] %v1384_v20  ;;  %1387 = vst [vmem:[%s10770_s11 + $0x2a8] sm:$0xff] %v1386_v21  ;;  %v1390_v23 = vld [vmem:[%s10765_s10 + $0x570] sm:$0xff] }
  0x47   : > { %1389 = vst [vmem:[%s10770_s11 + $0x2b0] sm:$0xff] %v1388_v22  ;;  %v1392_v24 = vld [vmem:[%s10765_s10 + $0x580] sm:$0xff]  ;;  %v1394_v25 = vld [vmem:[%s10765_s10 + $0x590] sm:$0xff]  ;;  %1391 = vst [vmem:[%s10770_s11 + $0x2b8] sm:$0xff] %v1390_v23 }
  0x48   : > { %1393 = vst [vmem:[%s10770_s11 + $0x2c0] sm:$0xff] %v1392_v24  ;;  %1395 = vst [vmem:[%s10770_s11 + $0x2c8] sm:$0xff] %v1394_v25  ;;  %v1396_v26 = vld [vmem:[%s10765_s10 + $0x5a0] sm:$0xff]  ;;  %v1398_v27 = vld [vmem:[%s10765_s10 + $0x5b0] sm:$0xff] }
  0x49   : > { %v1400_v28 = vld [vmem:[%s10765_s10 + $0x5c0] sm:$0xff]  ;;  %1397 = vst [vmem:[%s10770_s11 + $0x2d0] sm:$0xff] %v1396_v26  ;;  %1399 = vst [vmem:[%s10770_s11 + $0x2d8] sm:$0xff] %v1398_v27  ;;  %v1402_v29 = vld [vmem:[%s10765_s10 + $0x5d0] sm:$0xff] }
  0x4a   : > { %1401 = vst [vmem:[%s10770_s11 + $0x2e0] sm:$0xff] %v1400_v28  ;;  %v1404_v30 = vld [vmem:[%s10765_s10 + $0x5e0] sm:$0xff]  ;;  %v1406_v31 = vld [vmem:[%s10765_s10 + $0x5f0] sm:$0xff]  ;;  %1403 = vst [vmem:[%s10770_s11 + $0x2e8] sm:$0xff] %v1402_v29 }
  0x4b   : > { %1405 = vst [vmem:[%s10770_s11 + $0x2f0] sm:$0xff] %v1404_v30  ;;  %1407 = vst [vmem:[%s10770_s11 + $0x2f8] sm:$0xff] %v1406_v31  ;;  %v1408_v32 = vld [vmem:[%s10765_s10 + $0x600] sm:$0xff]  ;;  %v1410_v33 = vld [vmem:[%s10765_s10 + $0x610] sm:$0xff] }
  0x4c   : > { %v1412_v34 = vld [vmem:[%s10765_s10 + $0x620] sm:$0xff]  ;;  %1409 = vst [vmem:[%s10770_s11 + $0x300] sm:$0xff] %v1408_v32  ;;  %1411 = vst [vmem:[%s10770_s11 + $0x308] sm:$0xff] %v1410_v33  ;;  %v1414_v35 = vld [vmem:[%s10765_s10 + $0x630] sm:$0xff] }
  0x4d   : > { %1413 = vst [vmem:[%s10770_s11 + $0x310] sm:$0xff] %v1412_v34  ;;  %v1416_v36 = vld [vmem:[%s10765_s10 + $0x640] sm:$0xff]  ;;  %v1418_v37 = vld [vmem:[%s10765_s10 + $0x650] sm:$0xff]  ;;  %1415 = vst [vmem:[%s10770_s11 + $0x318] sm:$0xff] %v1414_v35 }
  0x4e   : > { %1417 = vst [vmem:[%s10770_s11 + $0x320] sm:$0xff] %v1416_v36  ;;  %1419 = vst [vmem:[%s10770_s11 + $0x328] sm:$0xff] %v1418_v37  ;;  %v1420_v38 = vld [vmem:[%s10765_s10 + $0x660] sm:$0xff]  ;;  %v1422_v39 = vld [vmem:[%s10765_s10 + $0x670] sm:$0xff] }
  0x4f   : > { %v1424_v40 = vld [vmem:[%s10765_s10 + $0x680] sm:$0xff]  ;;  %1421 = vst [vmem:[%s10770_s11 + $0x330] sm:$0xff] %v1420_v38  ;;  %1423 = vst [vmem:[%s10770_s11 + $0x338] sm:$0xff] %v1422_v39  ;;  %v1426_v41 = vld [vmem:[%s10765_s10 + $0x690] sm:$0xff] }
  0x50   : > { %1425 = vst [vmem:[%s10770_s11 + $0x340] sm:$0xff] %v1424_v40  ;;  %v1428_v42 = vld [vmem:[%s10765_s10 + $0x6a0] sm:$0xff]  ;;  %v1430_v43 = vld [vmem:[%s10765_s10 + $0x6b0] sm:$0xff]  ;;  %1427 = vst [vmem:[%s10770_s11 + $0x348] sm:$0xff] %v1426_v41 }
  0x51   : > { %1429 = vst [vmem:[%s10770_s11 + $0x350] sm:$0xff] %v1428_v42  ;;  %1431 = vst [vmem:[%s10770_s11 + $0x358] sm:$0xff] %v1430_v43  ;;  %v1432_v44 = vld [vmem:[%s10765_s10 + $0x6c0] sm:$0xff]  ;;  %v1434_v45 = vld [vmem:[%s10765_s10 + $0x6d0] sm:$0xff] }
  0x52   : > { %v1436_v46 = vld [vmem:[%s10765_s10 + $0x6e0] sm:$0xff]  ;;  %1433 = vst [vmem:[%s10770_s11 + $0x360] sm:$0xff] %v1432_v44  ;;  %1435 = vst [vmem:[%s10770_s11 + $0x368] sm:$0xff] %v1434_v45  ;;  %v1438_v47 = vld [vmem:[%s10765_s10 + $0x6f0] sm:$0xff] }
  0x53   : > { %1437 = vst [vmem:[%s10770_s11 + $0x370] sm:$0xff] %v1436_v46  ;;  %v1440_v48 = vld [vmem:[%s10765_s10 + $0x700] sm:$0xff]  ;;  %v1442_v49 = vld [vmem:[%s10765_s10 + $0x710] sm:$0xff]  ;;  %1439 = vst [vmem:[%s10770_s11 + $0x378] sm:$0xff] %v1438_v47 }
  0x54   : > { %1441 = vst [vmem:[%s10770_s11 + $0x380] sm:$0xff] %v1440_v48  ;;  %1443 = vst [vmem:[%s10770_s11 + $0x388] sm:$0xff] %v1442_v49  ;;  %v1444_v50 = vld [vmem:[%s10765_s10 + $0x720] sm:$0xff]  ;;  %v1446_v51 = vld [vmem:[%s10765_s10 + $0x730] sm:$0xff] }
  0x55   : > { %v1448_v52 = vld [vmem:[%s10765_s10 + $0x740] sm:$0xff]  ;;  %1445 = vst [vmem:[%s10770_s11 + $0x390] sm:$0xff] %v1444_v50  ;;  %1447 = vst [vmem:[%s10770_s11 + $0x398] sm:$0xff] %v1446_v51  ;;  %v1450_v53 = vld [vmem:[%s10765_s10 + $0x750] sm:$0xff] }
  0x56   : > { %1449 = vst [vmem:[%s10770_s11 + $0x3a0] sm:$0xff] %v1448_v52  ;;  %v1452_v54 = vld [vmem:[%s10765_s10 + $0x760] sm:$0xff]  ;;  %v1454_v55 = vld [vmem:[%s10765_s10 + $0x770] sm:$0xff]  ;;  %1451 = vst [vmem:[%s10770_s11 + $0x3a8] sm:$0xff] %v1450_v53 }
  0x57   : > { %1453 = vst [vmem:[%s10770_s11 + $0x3b0] sm:$0xff] %v1452_v54  ;;  %1455 = vst [vmem:[%s10770_s11 + $0x3b8] sm:$0xff] %v1454_v55  ;;  %v1456_v56 = vld [vmem:[%s10765_s10 + $0x780] sm:$0xff]  ;;  %v1458_v57 = vld [vmem:[%s10765_s10 + $0x790] sm:$0xff] }
  0x58   : > { %v1460_v58 = vld [vmem:[%s10765_s10 + $0x7a0] sm:$0xff]  ;;  %1457 = vst [vmem:[%s10770_s11 + $0x3c0] sm:$0xff] %v1456_v56  ;;  %1459 = vst [vmem:[%s10770_s11 + $0x3c8] sm:$0xff] %v1458_v57  ;;  %v1462_v59 = vld [vmem:[%s10765_s10 + $0x7b0] sm:$0xff] }
  0x59   : > { %1461 = vst [vmem:[%s10770_s11 + $0x3d0] sm:$0xff] %v1460_v58  ;;  %v1464_v60 = vld [vmem:[%s10765_s10 + $0x7c0] sm:$0xff]  ;;  %v1466_v61 = vld [vmem:[%s10765_s10 + $0x7d0] sm:$0xff]  ;;  %1463 = vst [vmem:[%s10770_s11 + $0x3d8] sm:$0xff] %v1462_v59 }
  0x5a   : > { %1465 = vst [vmem:[%s10770_s11 + $0x3e0] sm:$0xff] %v1464_v60  ;;  %1467 = vst [vmem:[%s10770_s11 + $0x3e8] sm:$0xff] %v1466_v61  ;;  %v1468_v62 = vld [vmem:[%s10765_s10 + $0x7e0] sm:$0xff]  ;;  %v1470_v63 = vld [vmem:[%s10765_s10 + $0x7f0] sm:$0xff] }
  0x5b   : > { %v1472_v0 = vld [vmem:[%s10765_s10 + $0x800] sm:$0xff]  ;;  %1469 = vst [vmem:[%s10770_s11 + $0x3f0] sm:$0xff] %v1468_v62  ;;  %1471 = vst [vmem:[%s10770_s11 + $0x3f8] sm:$0xff] %v1470_v63  ;;  %v1474_v1 = vld [vmem:[%s10765_s10 + $0x810] sm:$0xff] }
  0x5c   : > { %1473 = vst [vmem:[%s10770_s11 + $0x400] sm:$0xff] %v1472_v0  ;;  %v1476_v2 = vld [vmem:[%s10765_s10 + $0x820] sm:$0xff]  ;;  %v1478_v3 = vld [vmem:[%s10765_s10 + $0x830] sm:$0xff]  ;;  %1475 = vst [vmem:[%s10770_s11 + $0x408] sm:$0xff] %v1474_v1 }
  0x5d   : > { %1477 = vst [vmem:[%s10770_s11 + $0x410] sm:$0xff] %v1476_v2  ;;  %1479 = vst [vmem:[%s10770_s11 + $0x418] sm:$0xff] %v1478_v3  ;;  %v1480_v4 = vld [vmem:[%s10765_s10 + $0x840] sm:$0xff]  ;;  %v1482_v5 = vld [vmem:[%s10765_s10 + $0x850] sm:$0xff] }
  0x5e   : > { %v1484_v6 = vld [vmem:[%s10765_s10 + $0x860] sm:$0xff]  ;;  %1481 = vst [vmem:[%s10770_s11 + $0x420] sm:$0xff] %v1480_v4  ;;  %1483 = vst [vmem:[%s10770_s11 + $0x428] sm:$0xff] %v1482_v5  ;;  %v1486_v7 = vld [vmem:[%s10765_s10 + $0x870] sm:$0xff] }
  0x5f   : > { %1485 = vst [vmem:[%s10770_s11 + $0x430] sm:$0xff] %v1484_v6  ;;  %v1488_v8 = vld [vmem:[%s10765_s10 + $0x880] sm:$0xff]  ;;  %v1490_v9 = vld [vmem:[%s10765_s10 + $0x890] sm:$0xff]  ;;  %1487 = vst [vmem:[%s10770_s11 + $0x438] sm:$0xff] %v1486_v7 }
  0x60   : > { %1489 = vst [vmem:[%s10770_s11 + $0x440] sm:$0xff] %v1488_v8  ;;  %1491 = vst [vmem:[%s10770_s11 + $0x448] sm:$0xff] %v1490_v9  ;;  %v1492_v10 = vld [vmem:[%s10765_s10 + $0x8a0] sm:$0xff]  ;;  %v1494_v11 = vld [vmem:[%s10765_s10 + $0x8b0] sm:$0xff] }
  0x61   : > { %v1496_v12 = vld [vmem:[%s10765_s10 + $0x8c0] sm:$0xff]  ;;  %1493 = vst [vmem:[%s10770_s11 + $0x450] sm:$0xff] %v1492_v10  ;;  %1495 = vst [vmem:[%s10770_s11 + $0x458] sm:$0xff] %v1494_v11  ;;  %v1498_v13 = vld [vmem:[%s10765_s10 + $0x8d0] sm:$0xff] }
  0x62   : > { %1497 = vst [vmem:[%s10770_s11 + $0x460] sm:$0xff] %v1496_v12  ;;  %v1500_v14 = vld [vmem:[%s10765_s10 + $0x8e0] sm:$0xff]  ;;  %v1502_v15 = vld [vmem:[%s10765_s10 + $0x8f0] sm:$0xff]  ;;  %1499 = vst [vmem:[%s10770_s11 + $0x468] sm:$0xff] %v1498_v13 }
  0x63   : > { %1501 = vst [vmem:[%s10770_s11 + $0x470] sm:$0xff] %v1500_v14  ;;  %1503 = vst [vmem:[%s10770_s11 + $0x478] sm:$0xff] %v1502_v15  ;;  %v1504_v16 = vld [vmem:[%s10765_s10 + $0x900] sm:$0xff]  ;;  %v1506_v17 = vld [vmem:[%s10765_s10 + $0x910] sm:$0xff] }
  0x64   : > { %v1508_v18 = vld [vmem:[%s10765_s10 + $0x920] sm:$0xff]  ;;  %1505 = vst [vmem:[%s10770_s11 + $0x480] sm:$0xff] %v1504_v16  ;;  %1507 = vst [vmem:[%s10770_s11 + $0x488] sm:$0xff] %v1506_v17  ;;  %v1510_v19 = vld [vmem:[%s10765_s10 + $0x930] sm:$0xff] }
  0x65   : > { %1509 = vst [vmem:[%s10770_s11 + $0x490] sm:$0xff] %v1508_v18  ;;  %v1512_v20 = vld [vmem:[%s10765_s10 + $0x940] sm:$0xff]  ;;  %v1514_v21 = vld [vmem:[%s10765_s10 + $0x950] sm:$0xff]  ;;  %1511 = vst [vmem:[%s10770_s11 + $0x498] sm:$0xff] %v1510_v19 }
  0x66   : > { %1513 = vst [vmem:[%s10770_s11 + $0x4a0] sm:$0xff] %v1512_v20  ;;  %1515 = vst [vmem:[%s10770_s11 + $0x4a8] sm:$0xff] %v1514_v21  ;;  %v1516_v22 = vld [vmem:[%s10765_s10 + $0x960] sm:$0xff]  ;;  %v1518_v23 = vld [vmem:[%s10765_s10 + $0x970] sm:$0xff] }
  0x67   : > { %v1520_v24 = vld [vmem:[%s10765_s10 + $0x980] sm:$0xff]  ;;  %1517 = vst [vmem:[%s10770_s11 + $0x4b0] sm:$0xff] %v1516_v22  ;;  %1519 = vst [vmem:[%s10770_s11 + $0x4b8] sm:$0xff] %v1518_v23  ;;  %v1522_v25 = vld [vmem:[%s10765_s10 + $0x990] sm:$0xff] }
  0x68   : > { %1521 = vst [vmem:[%s10770_s11 + $0x4c0] sm:$0xff] %v1520_v24  ;;  %v1524_v26 = vld [vmem:[%s10765_s10 + $0x9a0] sm:$0xff]  ;;  %v1526_v27 = vld [vmem:[%s10765_s10 + $0x9b0] sm:$0xff]  ;;  %1523 = vst [vmem:[%s10770_s11 + $0x4c8] sm:$0xff] %v1522_v25 }
  0x69   : > { %1525 = vst [vmem:[%s10770_s11 + $0x4d0] sm:$0xff] %v1524_v26  ;;  %1527 = vst [vmem:[%s10770_s11 + $0x4d8] sm:$0xff] %v1526_v27  ;;  %v1528_v28 = vld [vmem:[%s10765_s10 + $0x9c0] sm:$0xff]  ;;  %v1530_v29 = vld [vmem:[%s10765_s10 + $0x9d0] sm:$0xff] }
  0x6a   : > { %v1532_v30 = vld [vmem:[%s10765_s10 + $0x9e0] sm:$0xff]  ;;  %1529 = vst [vmem:[%s10770_s11 + $0x4e0] sm:$0xff] %v1528_v28  ;;  %1531 = vst [vmem:[%s10770_s11 + $0x4e8] sm:$0xff] %v1530_v29  ;;  %v1534_v31 = vld [vmem:[%s10765_s10 + $0x9f0] sm:$0xff] }
  0x6b   : > { %1533 = vst [vmem:[%s10770_s11 + $0x4f0] sm:$0xff] %v1532_v30  ;;  %v1536_v32 = vld [vmem:[%s10765_s10 + $0xa00] sm:$0xff]  ;;  %v1538_v33 = vld [vmem:[%s10765_s10 + $0xa10] sm:$0xff]  ;;  %1535 = vst [vmem:[%s10770_s11 + $0x4f8] sm:$0xff] %v1534_v31 }
  0x6c   : > { %1537 = vst [vmem:[%s10770_s11 + $0x500] sm:$0xff] %v1536_v32  ;;  %1539 = vst [vmem:[%s10770_s11 + $0x508] sm:$0xff] %v1538_v33  ;;  %v1540_v34 = vld [vmem:[%s10765_s10 + $0xa20] sm:$0xff]  ;;  %v1542_v35 = vld [vmem:[%s10765_s10 + $0xa30] sm:$0xff] }
  0x6d   : > { %v1544_v36 = vld [vmem:[%s10765_s10 + $0xa40] sm:$0xff]  ;;  %1541 = vst [vmem:[%s10770_s11 + $0x510] sm:$0xff] %v1540_v34  ;;  %1543 = vst [vmem:[%s10770_s11 + $0x518] sm:$0xff] %v1542_v35  ;;  %v1546_v37 = vld [vmem:[%s10765_s10 + $0xa50] sm:$0xff] }
  0x6e   : > { %1545 = vst [vmem:[%s10770_s11 + $0x520] sm:$0xff] %v1544_v36  ;;  %v1548_v38 = vld [vmem:[%s10765_s10 + $0xa60] sm:$0xff]  ;;  %v1550_v39 = vld [vmem:[%s10765_s10 + $0xa70] sm:$0xff]  ;;  %1547 = vst [vmem:[%s10770_s11 + $0x528] sm:$0xff] %v1546_v37 }
  0x6f   : > { %1549 = vst [vmem:[%s10770_s11 + $0x530] sm:$0xff] %v1548_v38  ;;  %1551 = vst [vmem:[%s10770_s11 + $0x538] sm:$0xff] %v1550_v39  ;;  %v1552_v40 = vld [vmem:[%s10765_s10 + $0xa80] sm:$0xff]  ;;  %v1554_v41 = vld [vmem:[%s10765_s10 + $0xa90] sm:$0xff] }
  0x70   : > { %v1556_v42 = vld [vmem:[%s10765_s10 + $0xaa0] sm:$0xff]  ;;  %1553 = vst [vmem:[%s10770_s11 + $0x540] sm:$0xff] %v1552_v40  ;;  %1555 = vst [vmem:[%s10770_s11 + $0x548] sm:$0xff] %v1554_v41  ;;  %v1558_v43 = vld [vmem:[%s10765_s10 + $0xab0] sm:$0xff] }
  0x71   : > { %1557 = vst [vmem:[%s10770_s11 + $0x550] sm:$0xff] %v1556_v42  ;;  %v1560_v44 = vld [vmem:[%s10765_s10 + $0xac0] sm:$0xff]  ;;  %v1562_v45 = vld [vmem:[%s10765_s10 + $0xad0] sm:$0xff]  ;;  %1559 = vst [vmem:[%s10770_s11 + $0x558] sm:$0xff] %v1558_v43 }
  0x72   : > { %1561 = vst [vmem:[%s10770_s11 + $0x560] sm:$0xff] %v1560_v44  ;;  %1563 = vst [vmem:[%s10770_s11 + $0x568] sm:$0xff] %v1562_v45  ;;  %v1564_v46 = vld [vmem:[%s10765_s10 + $0xae0] sm:$0xff]  ;;  %v1566_v47 = vld [vmem:[%s10765_s10 + $0xaf0] sm:$0xff] }
  0x73   : > { %v1568_v48 = vld [vmem:[%s10765_s10 + $0xb00] sm:$0xff]  ;;  %1565 = vst [vmem:[%s10770_s11 + $0x570] sm:$0xff] %v1564_v46  ;;  %1567 = vst [vmem:[%s10770_s11 + $0x578] sm:$0xff] %v1566_v47  ;;  %v1570_v49 = vld [vmem:[%s10765_s10 + $0xb10] sm:$0xff] }
  0x74   : > { %1569 = vst [vmem:[%s10770_s11 + $0x580] sm:$0xff] %v1568_v48  ;;  %v1572_v50 = vld [vmem:[%s10765_s10 + $0xb20] sm:$0xff]  ;;  %v1574_v51 = vld [vmem:[%s10765_s10 + $0xb30] sm:$0xff]  ;;  %1571 = vst [vmem:[%s10770_s11 + $0x588] sm:$0xff] %v1570_v49 }
  0x75   : > { %1573 = vst [vmem:[%s10770_s11 + $0x590] sm:$0xff] %v1572_v50  ;;  %1575 = vst [vmem:[%s10770_s11 + $0x598] sm:$0xff] %v1574_v51  ;;  %v1576_v52 = vld [vmem:[%s10765_s10 + $0xb40] sm:$0xff]  ;;  %v1578_v53 = vld [vmem:[%s10765_s10 + $0xb50] sm:$0xff] }
  0x76   : > { %v1580_v54 = vld [vmem:[%s10765_s10 + $0xb60] sm:$0xff]  ;;  %1577 = vst [vmem:[%s10770_s11 + $0x5a0] sm:$0xff] %v1576_v52  ;;  %1579 = vst [vmem:[%s10770_s11 + $0x5a8] sm:$0xff] %v1578_v53  ;;  %v1582_v55 = vld [vmem:[%s10765_s10 + $0xb70] sm:$0xff] }
  0x77   : > { %1581 = vst [vmem:[%s10770_s11 + $0x5b0] sm:$0xff] %v1580_v54  ;;  %v1584_v56 = vld [vmem:[%s10765_s10 + $0xb80] sm:$0xff]  ;;  %v1586_v57 = vld [vmem:[%s10765_s10 + $0xb90] sm:$0xff]  ;;  %1583 = vst [vmem:[%s10770_s11 + $0x5b8] sm:$0xff] %v1582_v55 }
  0x78   : > { %1585 = vst [vmem:[%s10770_s11 + $0x5c0] sm:$0xff] %v1584_v56  ;;  %1587 = vst [vmem:[%s10770_s11 + $0x5c8] sm:$0xff] %v1586_v57  ;;  %v1588_v58 = vld [vmem:[%s10765_s10 + $0xba0] sm:$0xff]  ;;  %v1590_v59 = vld [vmem:[%s10765_s10 + $0xbb0] sm:$0xff] }
  0x79   : > { %v1592_v60 = vld [vmem:[%s10765_s10 + $0xbc0] sm:$0xff]  ;;  %1589 = vst [vmem:[%s10770_s11 + $0x5d0] sm:$0xff] %v1588_v58  ;;  %1591 = vst [vmem:[%s10770_s11 + $0x5d8] sm:$0xff] %v1590_v59  ;;  %v1594_v61 = vld [vmem:[%s10765_s10 + $0xbd0] sm:$0xff] }
  0x7a   : > { %1593 = vst [vmem:[%s10770_s11 + $0x5e0] sm:$0xff] %v1592_v60  ;;  %v1596_v62 = vld [vmem:[%s10765_s10 + $0xbe0] sm:$0xff]  ;;  %v1598_v63 = vld [vmem:[%s10765_s10 + $0xbf0] sm:$0xff]  ;;  %1595 = vst [vmem:[%s10770_s11 + $0x5e8] sm:$0xff] %v1594_v61 }
  0x7b   : > { %1597 = vst [vmem:[%s10770_s11 + $0x5f0] sm:$0xff] %v1596_v62  ;;  %1599 = vst [vmem:[%s10770_s11 + $0x5f8] sm:$0xff] %v1598_v63  ;;  %v1600_v0 = vld [vmem:[%s10765_s10 + $0xc00] sm:$0xff]  ;;  %v1602_v1 = vld [vmem:[%s10765_s10 + $0xc10] sm:$0xff] }
  0x7c   : > { %v1604_v2 = vld [vmem:[%s10765_s10 + $0xc20] sm:$0xff]  ;;  %1601 = vst [vmem:[%s10770_s11 + $0x600] sm:$0xff] %v1600_v0  ;;  %1603 = vst [vmem:[%s10770_s11 + $0x608] sm:$0xff] %v1602_v1  ;;  %v1606_v3 = vld [vmem:[%s10765_s10 + $0xc30] sm:$0xff] }
  0x7d   : > { %1605 = vst [vmem:[%s10770_s11 + $0x610] sm:$0xff] %v1604_v2  ;;  %v1608_v4 = vld [vmem:[%s10765_s10 + $0xc40] sm:$0xff]  ;;  %v1610_v5 = vld [vmem:[%s10765_s10 + $0xc50] sm:$0xff]  ;;  %1607 = vst [vmem:[%s10770_s11 + $0x618] sm:$0xff] %v1606_v3 }
  0x7e   : > { %1609 = vst [vmem:[%s10770_s11 + $0x620] sm:$0xff] %v1608_v4  ;;  %1611 = vst [vmem:[%s10770_s11 + $0x628] sm:$0xff] %v1610_v5  ;;  %v1612_v6 = vld [vmem:[%s10765_s10 + $0xc60] sm:$0xff]  ;;  %v1614_v7 = vld [vmem:[%s10765_s10 + $0xc70] sm:$0xff] }
  0x7f   : > { %v1616_v8 = vld [vmem:[%s10765_s10 + $0xc80] sm:$0xff]  ;;  %1613 = vst [vmem:[%s10770_s11 + $0x630] sm:$0xff] %v1612_v6  ;;  %1615 = vst [vmem:[%s10770_s11 + $0x638] sm:$0xff] %v1614_v7  ;;  %v1618_v9 = vld [vmem:[%s10765_s10 + $0xc90] sm:$0xff] }
  0x80   : > { %1617 = vst [vmem:[%s10770_s11 + $0x640] sm:$0xff] %v1616_v8  ;;  %v1620_v10 = vld [vmem:[%s10765_s10 + $0xca0] sm:$0xff]  ;;  %v1622_v11 = vld [vmem:[%s10765_s10 + $0xcb0] sm:$0xff]  ;;  %1619 = vst [vmem:[%s10770_s11 + $0x648] sm:$0xff] %v1618_v9 }
  0x81   : > { %1621 = vst [vmem:[%s10770_s11 + $0x650] sm:$0xff] %v1620_v10  ;;  %1623 = vst [vmem:[%s10770_s11 + $0x658] sm:$0xff] %v1622_v11  ;;  %v1624_v12 = vld [vmem:[%s10765_s10 + $0xcc0] sm:$0xff]  ;;  %v1626_v13 = vld [vmem:[%s10765_s10 + $0xcd0] sm:$0xff] }
  0x82   : > { %v1628_v14 = vld [vmem:[%s10765_s10 + $0xce0] sm:$0xff]  ;;  %1625 = vst [vmem:[%s10770_s11 + $0x660] sm:$0xff] %v1624_v12  ;;  %1627 = vst [vmem:[%s10770_s11 + $0x668] sm:$0xff] %v1626_v13  ;;  %v1630_v15 = vld [vmem:[%s10765_s10 + $0xcf0] sm:$0xff] }
  0x83   : > { %1629 = vst [vmem:[%s10770_s11 + $0x670] sm:$0xff] %v1628_v14  ;;  %v1632_v16 = vld [vmem:[%s10765_s10 + $0xd00] sm:$0xff]  ;;  %v1634_v17 = vld [vmem:[%s10765_s10 + $0xd10] sm:$0xff]  ;;  %1631 = vst [vmem:[%s10770_s11 + $0x678] sm:$0xff] %v1630_v15 }
  0x84   : > { %1633 = vst [vmem:[%s10770_s11 + $0x680] sm:$0xff] %v1632_v16  ;;  %1635 = vst [vmem:[%s10770_s11 + $0x688] sm:$0xff] %v1634_v17  ;;  %v1636_v18 = vld [vmem:[%s10765_s10 + $0xd20] sm:$0xff]  ;;  %v1638_v19 = vld [vmem:[%s10765_s10 + $0xd30] sm:$0xff] }
  0x85   : > { %v1640_v20 = vld [vmem:[%s10765_s10 + $0xd40] sm:$0xff]  ;;  %1637 = vst [vmem:[%s10770_s11 + $0x690] sm:$0xff] %v1636_v18  ;;  %1639 = vst [vmem:[%s10770_s11 + $0x698] sm:$0xff] %v1638_v19  ;;  %v1642_v21 = vld [vmem:[%s10765_s10 + $0xd50] sm:$0xff] }
  0x86   : > { %1641 = vst [vmem:[%s10770_s11 + $0x6a0] sm:$0xff] %v1640_v20  ;;  %v1644_v22 = vld [vmem:[%s10765_s10 + $0xd60] sm:$0xff]  ;;  %v1646_v23 = vld [vmem:[%s10765_s10 + $0xd70] sm:$0xff]  ;;  %1643 = vst [vmem:[%s10770_s11 + $0x6a8] sm:$0xff] %v1642_v21 }
  0x87   : > { %1645 = vst [vmem:[%s10770_s11 + $0x6b0] sm:$0xff] %v1644_v22  ;;  %1647 = vst [vmem:[%s10770_s11 + $0x6b8] sm:$0xff] %v1646_v23  ;;  %v1648_v24 = vld [vmem:[%s10765_s10 + $0xd80] sm:$0xff]  ;;  %v1650_v25 = vld [vmem:[%s10765_s10 + $0xd90] sm:$0xff] }
  0x88   : > { %v1652_v26 = vld [vmem:[%s10765_s10 + $0xda0] sm:$0xff]  ;;  %1649 = vst [vmem:[%s10770_s11 + $0x6c0] sm:$0xff] %v1648_v24  ;;  %1651 = vst [vmem:[%s10770_s11 + $0x6c8] sm:$0xff] %v1650_v25  ;;  %v1654_v27 = vld [vmem:[%s10765_s10 + $0xdb0] sm:$0xff] }
  0x89   : > { %1653 = vst [vmem:[%s10770_s11 + $0x6d0] sm:$0xff] %v1652_v26  ;;  %v1656_v28 = vld [vmem:[%s10765_s10 + $0xdc0] sm:$0xff]  ;;  %v1658_v29 = vld [vmem:[%s10765_s10 + $0xdd0] sm:$0xff]  ;;  %1655 = vst [vmem:[%s10770_s11 + $0x6d8] sm:$0xff] %v1654_v27 }
  0x8a   : > { %1657 = vst [vmem:[%s10770_s11 + $0x6e0] sm:$0xff] %v1656_v28  ;;  %1659 = vst [vmem:[%s10770_s11 + $0x6e8] sm:$0xff] %v1658_v29  ;;  %v1660_v30 = vld [vmem:[%s10765_s10 + $0xde0] sm:$0xff]  ;;  %v1662_v31 = vld [vmem:[%s10765_s10 + $0xdf0] sm:$0xff] }
  0x8b   : > { %v1664_v32 = vld [vmem:[%s10765_s10 + $0xe00] sm:$0xff]  ;;  %1661 = vst [vmem:[%s10770_s11 + $0x6f0] sm:$0xff] %v1660_v30  ;;  %1663 = vst [vmem:[%s10770_s11 + $0x6f8] sm:$0xff] %v1662_v31  ;;  %v1666_v33 = vld [vmem:[%s10765_s10 + $0xe10] sm:$0xff] }
  0x8c   : > { %1665 = vst [vmem:[%s10770_s11 + $0x700] sm:$0xff] %v1664_v32  ;;  %v1668_v34 = vld [vmem:[%s10765_s10 + $0xe20] sm:$0xff]  ;;  %v1670_v35 = vld [vmem:[%s10765_s10 + $0xe30] sm:$0xff]  ;;  %1667 = vst [vmem:[%s10770_s11 + $0x708] sm:$0xff] %v1666_v33 }
  0x8d   : > { %1669 = vst [vmem:[%s10770_s11 + $0x710] sm:$0xff] %v1668_v34  ;;  %1671 = vst [vmem:[%s10770_s11 + $0x718] sm:$0xff] %v1670_v35  ;;  %v1672_v36 = vld [vmem:[%s10765_s10 + $0xe40] sm:$0xff]  ;;  %v1674_v37 = vld [vmem:[%s10765_s10 + $0xe50] sm:$0xff] }
  0x8e   : > { %v1676_v38 = vld [vmem:[%s10765_s10 + $0xe60] sm:$0xff]  ;;  %1673 = vst [vmem:[%s10770_s11 + $0x720] sm:$0xff] %v1672_v36  ;;  %1675 = vst [vmem:[%s10770_s11 + $0x728] sm:$0xff] %v1674_v37  ;;  %v1678_v39 = vld [vmem:[%s10765_s10 + $0xe70] sm:$0xff] }
  0x8f   : > { %1677 = vst [vmem:[%s10770_s11 + $0x730] sm:$0xff] %v1676_v38  ;;  %v1680_v40 = vld [vmem:[%s10765_s10 + $0xe80] sm:$0xff]  ;;  %v1682_v41 = vld [vmem:[%s10765_s10 + $0xe90] sm:$0xff]  ;;  %1679 = vst [vmem:[%s10770_s11 + $0x738] sm:$0xff] %v1678_v39 }
  0x90   : > { %1681 = vst [vmem:[%s10770_s11 + $0x740] sm:$0xff] %v1680_v40  ;;  %1683 = vst [vmem:[%s10770_s11 + $0x748] sm:$0xff] %v1682_v41  ;;  %v1684_v42 = vld [vmem:[%s10765_s10 + $0xea0] sm:$0xff]  ;;  %v1686_v43 = vld [vmem:[%s10765_s10 + $0xeb0] sm:$0xff] }
  0x91   : > { %v1688_v44 = vld [vmem:[%s10765_s10 + $0xec0] sm:$0xff]  ;;  %1685 = vst [vmem:[%s10770_s11 + $0x750] sm:$0xff] %v1684_v42  ;;  %1687 = vst [vmem:[%s10770_s11 + $0x758] sm:$0xff] %v1686_v43  ;;  %v1690_v45 = vld [vmem:[%s10765_s10 + $0xed0] sm:$0xff] }
  0x92   : > { %1689 = vst [vmem:[%s10770_s11 + $0x760] sm:$0xff] %v1688_v44  ;;  %v1692_v46 = vld [vmem:[%s10765_s10 + $0xee0] sm:$0xff]  ;;  %v1694_v47 = vld [vmem:[%s10765_s10 + $0xef0] sm:$0xff]  ;;  %1691 = vst [vmem:[%s10770_s11 + $0x768] sm:$0xff] %v1690_v45 }
  0x93   : > { %1693 = vst [vmem:[%s10770_s11 + $0x770] sm:$0xff] %v1692_v46  ;;  %1695 = vst [vmem:[%s10770_s11 + $0x778] sm:$0xff] %v1694_v47  ;;  %v1696_v48 = vld [vmem:[%s10765_s10 + $0xf00] sm:$0xff]  ;;  %v1698_v49 = vld [vmem:[%s10765_s10 + $0xf10] sm:$0xff] }
  0x94   : > { %v1700_v50 = vld [vmem:[%s10765_s10 + $0xf20] sm:$0xff]  ;;  %1697 = vst [vmem:[%s10770_s11 + $0x780] sm:$0xff] %v1696_v48  ;;  %1699 = vst [vmem:[%s10770_s11 + $0x788] sm:$0xff] %v1698_v49  ;;  %v1702_v51 = vld [vmem:[%s10765_s10 + $0xf30] sm:$0xff] }
  0x95   : > { %1701 = vst [vmem:[%s10770_s11 + $0x790] sm:$0xff] %v1700_v50  ;;  %v1704_v52 = vld [vmem:[%s10765_s10 + $0xf40] sm:$0xff]  ;;  %v1706_v53 = vld [vmem:[%s10765_s10 + $0xf50] sm:$0xff]  ;;  %1703 = vst [vmem:[%s10770_s11 + $0x798] sm:$0xff] %v1702_v51 }
  0x96   : > { %1705 = vst [vmem:[%s10770_s11 + $0x7a0] sm:$0xff] %v1704_v52  ;;  %1707 = vst [vmem:[%s10770_s11 + $0x7a8] sm:$0xff] %v1706_v53  ;;  %v1708_v54 = vld [vmem:[%s10765_s10 + $0xf60] sm:$0xff]  ;;  %v1710_v55 = vld [vmem:[%s10765_s10 + $0xf70] sm:$0xff] }
  0x97   : > { %v1712_v56 = vld [vmem:[%s10765_s10 + $0xf80] sm:$0xff]  ;;  %1709 = vst [vmem:[%s10770_s11 + $0x7b0] sm:$0xff] %v1708_v54  ;;  %1711 = vst [vmem:[%s10770_s11 + $0x7b8] sm:$0xff] %v1710_v55  ;;  %v1714_v57 = vld [vmem:[%s10765_s10 + $0xf90] sm:$0xff] }
  0x98   : > { %1713 = vst [vmem:[%s10770_s11 + $0x7c0] sm:$0xff] %v1712_v56  ;;  %v1716_v58 = vld [vmem:[%s10765_s10 + $0xfa0] sm:$0xff]  ;;  %v1718_v59 = vld [vmem:[%s10765_s10 + $0xfb0] sm:$0xff]  ;;  %1715 = vst [vmem:[%s10770_s11 + $0x7c8] sm:$0xff] %v1714_v57 }
  0x99   : > { %1717 = vst [vmem:[%s10770_s11 + $0x7d0] sm:$0xff] %v1716_v58  ;;  %1719 = vst [vmem:[%s10770_s11 + $0x7d8] sm:$0xff] %v1718_v59  ;;  %v1720_v60 = vld [vmem:[%s10765_s10 + $0xfc0] sm:$0xff]  ;;  %v1722_v61 = vld [vmem:[%s10765_s10 + $0xfd0] sm:$0xff] }
  0x9a   : > { %v1724_v62 = vld [vmem:[%s10765_s10 + $0xfe0] sm:$0xff]  ;;  %1721 = vst [vmem:[%s10770_s11 + $0x7e0] sm:$0xff] %v1720_v60  ;;  %1723 = vst [vmem:[%s10770_s11 + $0x7e8] sm:$0xff] %v1722_v61  ;;  %v1726_v63 = vld [vmem:[%s10765_s10 + $0xff0] sm:$0xff] }
  0x9b   : > { %1725 = vst [vmem:[%s10770_s11 + $0x7f0] sm:$0xff] %v1724_v62  ;;  %v1728_v0 = vld [vmem:[%s10765_s10 + $0x1000] sm:$0xff]  ;;  %v1730_v1 = vld [vmem:[%s10765_s10 + $0x1010] sm:$0xff]  ;;  %1727 = vst [vmem:[%s10770_s11 + $0x7f8] sm:$0xff] %v1726_v63 }
  0x9c   : > { %1729 = vst [vmem:[%s10770_s11 + $0x800] sm:$0xff] %v1728_v0  ;;  %1731 = vst [vmem:[%s10770_s11 + $0x808] sm:$0xff] %v1730_v1  ;;  %v1732_v2 = vld [vmem:[%s10765_s10 + $0x1020] sm:$0xff]  ;;  %v1734_v3 = vld [vmem:[%s10765_s10 + $0x1030] sm:$0xff] }
  0x9d   : > { %v1736_v4 = vld [vmem:[%s10765_s10 + $0x1040] sm:$0xff]  ;;  %1733 = vst [vmem:[%s10770_s11 + $0x810] sm:$0xff] %v1732_v2  ;;  %1735 = vst [vmem:[%s10770_s11 + $0x818] sm:$0xff] %v1734_v3  ;;  %v1738_v5 = vld [vmem:[%s10765_s10 + $0x1050] sm:$0xff] }
  0x9e   : > { %1737 = vst [vmem:[%s10770_s11 + $0x820] sm:$0xff] %v1736_v4  ;;  %v1740_v6 = vld [vmem:[%s10765_s10 + $0x1060] sm:$0xff]  ;;  %v1742_v7 = vld [vmem:[%s10765_s10 + $0x1070] sm:$0xff]  ;;  %1739 = vst [vmem:[%s10770_s11 + $0x828] sm:$0xff] %v1738_v5 }
  0x9f   : > { %1741 = vst [vmem:[%s10770_s11 + $0x830] sm:$0xff] %v1740_v6  ;;  %1743 = vst [vmem:[%s10770_s11 + $0x838] sm:$0xff] %v1742_v7  ;;  %v1744_v8 = vld [vmem:[%s10765_s10 + $0x1080] sm:$0xff]  ;;  %v1746_v9 = vld [vmem:[%s10765_s10 + $0x1090] sm:$0xff] }
  0xa0   : > { %v1748_v10 = vld [vmem:[%s10765_s10 + $0x10a0] sm:$0xff]  ;;  %1745 = vst [vmem:[%s10770_s11 + $0x840] sm:$0xff] %v1744_v8  ;;  %1747 = vst [vmem:[%s10770_s11 + $0x848] sm:$0xff] %v1746_v9  ;;  %v1750_v11 = vld [vmem:[%s10765_s10 + $0x10b0] sm:$0xff] }
  0xa1   : > { %1749 = vst [vmem:[%s10770_s11 + $0x850] sm:$0xff] %v1748_v10  ;;  %v1752_v12 = vld [vmem:[%s10765_s10 + $0x10c0] sm:$0xff]  ;;  %v1754_v13 = vld [vmem:[%s10765_s10 + $0x10d0] sm:$0xff]  ;;  %1751 = vst [vmem:[%s10770_s11 + $0x858] sm:$0xff] %v1750_v11 }
  0xa2   : > { %1753 = vst [vmem:[%s10770_s11 + $0x860] sm:$0xff] %v1752_v12  ;;  %1755 = vst [vmem:[%s10770_s11 + $0x868] sm:$0xff] %v1754_v13  ;;  %v1756_v14 = vld [vmem:[%s10765_s10 + $0x10e0] sm:$0xff]  ;;  %v1758_v15 = vld [vmem:[%s10765_s10 + $0x10f0] sm:$0xff] }
  0xa3   : > { %v1760_v16 = vld [vmem:[%s10765_s10 + $0x1100] sm:$0xff]  ;;  %1757 = vst [vmem:[%s10770_s11 + $0x870] sm:$0xff] %v1756_v14  ;;  %1759 = vst [vmem:[%s10770_s11 + $0x878] sm:$0xff] %v1758_v15  ;;  %v1762_v17 = vld [vmem:[%s10765_s10 + $0x1110] sm:$0xff] }
  0xa4   : > { %1761 = vst [vmem:[%s10770_s11 + $0x880] sm:$0xff] %v1760_v16  ;;  %v1764_v18 = vld [vmem:[%s10765_s10 + $0x1120] sm:$0xff]  ;;  %v1766_v19 = vld [vmem:[%s10765_s10 + $0x1130] sm:$0xff]  ;;  %1763 = vst [vmem:[%s10770_s11 + $0x888] sm:$0xff] %v1762_v17 }
  0xa5   : > { %1765 = vst [vmem:[%s10770_s11 + $0x890] sm:$0xff] %v1764_v18  ;;  %1767 = vst [vmem:[%s10770_s11 + $0x898] sm:$0xff] %v1766_v19  ;;  %v1768_v20 = vld [vmem:[%s10765_s10 + $0x1140] sm:$0xff]  ;;  %v1770_v21 = vld [vmem:[%s10765_s10 + $0x1150] sm:$0xff] }
  0xa6   : > { %v1772_v22 = vld [vmem:[%s10765_s10 + $0x1160] sm:$0xff]  ;;  %1769 = vst [vmem:[%s10770_s11 + $0x8a0] sm:$0xff] %v1768_v20  ;;  %1771 = vst [vmem:[%s10770_s11 + $0x8a8] sm:$0xff] %v1770_v21  ;;  %v1774_v23 = vld [vmem:[%s10765_s10 + $0x1170] sm:$0xff] }
  0xa7   : > { %1773 = vst [vmem:[%s10770_s11 + $0x8b0] sm:$0xff] %v1772_v22  ;;  %v1776_v24 = vld [vmem:[%s10765_s10 + $0x1180] sm:$0xff]  ;;  %v1778_v25 = vld [vmem:[%s10765_s10 + $0x1190] sm:$0xff]  ;;  %1775 = vst [vmem:[%s10770_s11 + $0x8b8] sm:$0xff] %v1774_v23 }
  0xa8   : > { %1777 = vst [vmem:[%s10770_s11 + $0x8c0] sm:$0xff] %v1776_v24  ;;  %1779 = vst [vmem:[%s10770_s11 + $0x8c8] sm:$0xff] %v1778_v25  ;;  %v1780_v26 = vld [vmem:[%s10765_s10 + $0x11a0] sm:$0xff]  ;;  %v1782_v27 = vld [vmem:[%s10765_s10 + $0x11b0] sm:$0xff] }
  0xa9   : > { %v1784_v28 = vld [vmem:[%s10765_s10 + $0x11c0] sm:$0xff]  ;;  %1781 = vst [vmem:[%s10770_s11 + $0x8d0] sm:$0xff] %v1780_v26  ;;  %1783 = vst [vmem:[%s10770_s11 + $0x8d8] sm:$0xff] %v1782_v27  ;;  %v1786_v29 = vld [vmem:[%s10765_s10 + $0x11d0] sm:$0xff] }
  0xaa   : > { %1785 = vst [vmem:[%s10770_s11 + $0x8e0] sm:$0xff] %v1784_v28  ;;  %v1788_v30 = vld [vmem:[%s10765_s10 + $0x11e0] sm:$0xff]  ;;  %v1790_v31 = vld [vmem:[%s10765_s10 + $0x11f0] sm:$0xff]  ;;  %1787 = vst [vmem:[%s10770_s11 + $0x8e8] sm:$0xff] %v1786_v29 }
  0xab   : > { %1789 = vst [vmem:[%s10770_s11 + $0x8f0] sm:$0xff] %v1788_v30  ;;  %1791 = vst [vmem:[%s10770_s11 + $0x8f8] sm:$0xff] %v1790_v31  ;;  %v1792_v32 = vld [vmem:[%s10765_s10 + $0x1200] sm:$0xff]  ;;  %v1794_v33 = vld [vmem:[%s10765_s10 + $0x1210] sm:$0xff] }
  0xac   : > { %v1796_v34 = vld [vmem:[%s10765_s10 + $0x1220] sm:$0xff]  ;;  %1793 = vst [vmem:[%s10770_s11 + $0x900] sm:$0xff] %v1792_v32  ;;  %1795 = vst [vmem:[%s10770_s11 + $0x908] sm:$0xff] %v1794_v33  ;;  %v1798_v35 = vld [vmem:[%s10765_s10 + $0x1230] sm:$0xff] }
  0xad   : > { %1797 = vst [vmem:[%s10770_s11 + $0x910] sm:$0xff] %v1796_v34  ;;  %v1800_v36 = vld [vmem:[%s10765_s10 + $0x1240] sm:$0xff]  ;;  %v1802_v37 = vld [vmem:[%s10765_s10 + $0x1250] sm:$0xff]  ;;  %1799 = vst [vmem:[%s10770_s11 + $0x918] sm:$0xff] %v1798_v35 }
  0xae   : > { %1801 = vst [vmem:[%s10770_s11 + $0x920] sm:$0xff] %v1800_v36  ;;  %1803 = vst [vmem:[%s10770_s11 + $0x928] sm:$0xff] %v1802_v37  ;;  %v1804_v38 = vld [vmem:[%s10765_s10 + $0x1260] sm:$0xff]  ;;  %v1806_v39 = vld [vmem:[%s10765_s10 + $0x1270] sm:$0xff] }
  0xaf   : > { %v1808_v40 = vld [vmem:[%s10765_s10 + $0x1280] sm:$0xff]  ;;  %1805 = vst [vmem:[%s10770_s11 + $0x930] sm:$0xff] %v1804_v38  ;;  %1807 = vst [vmem:[%s10770_s11 + $0x938] sm:$0xff] %v1806_v39  ;;  %v1810_v41 = vld [vmem:[%s10765_s10 + $0x1290] sm:$0xff] }
  0xb0   : > { %1809 = vst [vmem:[%s10770_s11 + $0x940] sm:$0xff] %v1808_v40  ;;  %v1812_v42 = vld [vmem:[%s10765_s10 + $0x12a0] sm:$0xff]  ;;  %v1814_v43 = vld [vmem:[%s10765_s10 + $0x12b0] sm:$0xff]  ;;  %1811 = vst [vmem:[%s10770_s11 + $0x948] sm:$0xff] %v1810_v41 }
  0xb1   : > { %1813 = vst [vmem:[%s10770_s11 + $0x950] sm:$0xff] %v1812_v42  ;;  %1815 = vst [vmem:[%s10770_s11 + $0x958] sm:$0xff] %v1814_v43  ;;  %v1816_v44 = vld [vmem:[%s10765_s10 + $0x12c0] sm:$0xff]  ;;  %v1818_v45 = vld [vmem:[%s10765_s10 + $0x12d0] sm:$0xff] }
  0xb2   : > { %v1820_v46 = vld [vmem:[%s10765_s10 + $0x12e0] sm:$0xff]  ;;  %1817 = vst [vmem:[%s10770_s11 + $0x960] sm:$0xff] %v1816_v44  ;;  %1819 = vst [vmem:[%s10770_s11 + $0x968] sm:$0xff] %v1818_v45  ;;  %v1822_v47 = vld [vmem:[%s10765_s10 + $0x12f0] sm:$0xff] }
  0xb3   : > { %1821 = vst [vmem:[%s10770_s11 + $0x970] sm:$0xff] %v1820_v46  ;;  %v1824_v48 = vld [vmem:[%s10765_s10 + $0x1300] sm:$0xff]  ;;  %v1826_v49 = vld [vmem:[%s10765_s10 + $0x1310] sm:$0xff]  ;;  %1823 = vst [vmem:[%s10770_s11 + $0x978] sm:$0xff] %v1822_v47 }
  0xb4   : > { %1825 = vst [vmem:[%s10770_s11 + $0x980] sm:$0xff] %v1824_v48  ;;  %1827 = vst [vmem:[%s10770_s11 + $0x988] sm:$0xff] %v1826_v49  ;;  %v1828_v50 = vld [vmem:[%s10765_s10 + $0x1320] sm:$0xff]  ;;  %v1830_v51 = vld [vmem:[%s10765_s10 + $0x1330] sm:$0xff] }
  0xb5   : > { %v1832_v52 = vld [vmem:[%s10765_s10 + $0x1340] sm:$0xff]  ;;  %1829 = vst [vmem:[%s10770_s11 + $0x990] sm:$0xff] %v1828_v50  ;;  %1831 = vst [vmem:[%s10770_s11 + $0x998] sm:$0xff] %v1830_v51  ;;  %v1834_v53 = vld [vmem:[%s10765_s10 + $0x1350] sm:$0xff] }
  0xb6   : > { %1833 = vst [vmem:[%s10770_s11 + $0x9a0] sm:$0xff] %v1832_v52  ;;  %v1836_v54 = vld [vmem:[%s10765_s10 + $0x1360] sm:$0xff]  ;;  %v1838_v55 = vld [vmem:[%s10765_s10 + $0x1370] sm:$0xff]  ;;  %1835 = vst [vmem:[%s10770_s11 + $0x9a8] sm:$0xff] %v1834_v53 }
  0xb7   : > { %1837 = vst [vmem:[%s10770_s11 + $0x9b0] sm:$0xff] %v1836_v54  ;;  %1839 = vst [vmem:[%s10770_s11 + $0x9b8] sm:$0xff] %v1838_v55  ;;  %v1840_v56 = vld [vmem:[%s10765_s10 + $0x1380] sm:$0xff]  ;;  %v1842_v57 = vld [vmem:[%s10765_s10 + $0x1390] sm:$0xff] }
  0xb8   : > { %v1844_v58 = vld [vmem:[%s10765_s10 + $0x13a0] sm:$0xff]  ;;  %1841 = vst [vmem:[%s10770_s11 + $0x9c0] sm:$0xff] %v1840_v56  ;;  %1843 = vst [vmem:[%s10770_s11 + $0x9c8] sm:$0xff] %v1842_v57  ;;  %v1846_v59 = vld [vmem:[%s10765_s10 + $0x13b0] sm:$0xff] }
  0xb9   : > { %1845 = vst [vmem:[%s10770_s11 + $0x9d0] sm:$0xff] %v1844_v58  ;;  %v1848_v60 = vld [vmem:[%s10765_s10 + $0x13c0] sm:$0xff]  ;;  %v1850_v61 = vld [vmem:[%s10765_s10 + $0x13d0] sm:$0xff]  ;;  %1847 = vst [vmem:[%s10770_s11 + $0x9d8] sm:$0xff] %v1846_v59 }
  0xba   : > { %1849 = vst [vmem:[%s10770_s11 + $0x9e0] sm:$0xff] %v1848_v60  ;;  %1851 = vst [vmem:[%s10770_s11 + $0x9e8] sm:$0xff] %v1850_v61  ;;  %v1852_v62 = vld [vmem:[%s10765_s10 + $0x13e0] sm:$0xff]  ;;  %v1854_v63 = vld [vmem:[%s10765_s10 + $0x13f0] sm:$0xff] }
  0xbb   : > { %v1856_v0 = vld [vmem:[%s10765_s10 + $0x1400] sm:$0xff]  ;;  %1853 = vst [vmem:[%s10770_s11 + $0x9f0] sm:$0xff] %v1852_v62  ;;  %1855 = vst [vmem:[%s10770_s11 + $0x9f8] sm:$0xff] %v1854_v63  ;;  %v1858_v1 = vld [vmem:[%s10765_s10 + $0x1410] sm:$0xff] }
  0xbc   : > { %1857 = vst [vmem:[%s10770_s11 + $0xa00] sm:$0xff] %v1856_v0  ;;  %v1860_v2 = vld [vmem:[%s10765_s10 + $0x1420] sm:$0xff]  ;;  %v1862_v3 = vld [vmem:[%s10765_s10 + $0x1430] sm:$0xff]  ;;  %1859 = vst [vmem:[%s10770_s11 + $0xa08] sm:$0xff] %v1858_v1 }
  0xbd   : > { %1861 = vst [vmem:[%s10770_s11 + $0xa10] sm:$0xff] %v1860_v2  ;;  %1863 = vst [vmem:[%s10770_s11 + $0xa18] sm:$0xff] %v1862_v3  ;;  %v1864_v4 = vld [vmem:[%s10765_s10 + $0x1440] sm:$0xff]  ;;  %v1866_v5 = vld [vmem:[%s10765_s10 + $0x1450] sm:$0xff] }
  0xbe   : > { %v1868_v6 = vld [vmem:[%s10765_s10 + $0x1460] sm:$0xff]  ;;  %1865 = vst [vmem:[%s10770_s11 + $0xa20] sm:$0xff] %v1864_v4  ;;  %1867 = vst [vmem:[%s10770_s11 + $0xa28] sm:$0xff] %v1866_v5  ;;  %v1870_v7 = vld [vmem:[%s10765_s10 + $0x1470] sm:$0xff] }
  0xbf   : > { %1869 = vst [vmem:[%s10770_s11 + $0xa30] sm:$0xff] %v1868_v6  ;;  %v1872_v8 = vld [vmem:[%s10765_s10 + $0x1480] sm:$0xff]  ;;  %v1874_v9 = vld [vmem:[%s10765_s10 + $0x1490] sm:$0xff]  ;;  %1871 = vst [vmem:[%s10770_s11 + $0xa38] sm:$0xff] %v1870_v7 }
  0xc0   : > { %1873 = vst [vmem:[%s10770_s11 + $0xa40] sm:$0xff] %v1872_v8  ;;  %1875 = vst [vmem:[%s10770_s11 + $0xa48] sm:$0xff] %v1874_v9  ;;  %v1876_v10 = vld [vmem:[%s10765_s10 + $0x14a0] sm:$0xff]  ;;  %v1878_v11 = vld [vmem:[%s10765_s10 + $0x14b0] sm:$0xff] }
  0xc1   : > { %v1880_v12 = vld [vmem:[%s10765_s10 + $0x14c0] sm:$0xff]  ;;  %1877 = vst [vmem:[%s10770_s11 + $0xa50] sm:$0xff] %v1876_v10  ;;  %1879 = vst [vmem:[%s10770_s11 + $0xa58] sm:$0xff] %v1878_v11  ;;  %v1882_v13 = vld [vmem:[%s10765_s10 + $0x14d0] sm:$0xff] }
  0xc2   : > { %1881 = vst [vmem:[%s10770_s11 + $0xa60] sm:$0xff] %v1880_v12  ;;  %v1884_v14 = vld [vmem:[%s10765_s10 + $0x14e0] sm:$0xff]  ;;  %v1886_v15 = vld [vmem:[%s10765_s10 + $0x14f0] sm:$0xff]  ;;  %1883 = vst [vmem:[%s10770_s11 + $0xa68] sm:$0xff] %v1882_v13 }
  0xc3   : > { %1885 = vst [vmem:[%s10770_s11 + $0xa70] sm:$0xff] %v1884_v14  ;;  %1887 = vst [vmem:[%s10770_s11 + $0xa78] sm:$0xff] %v1886_v15  ;;  %v1888_v16 = vld [vmem:[%s10765_s10 + $0x1500] sm:$0xff]  ;;  %v1890_v17 = vld [vmem:[%s10765_s10 + $0x1510] sm:$0xff] }
  0xc4   : > { %v1892_v18 = vld [vmem:[%s10765_s10 + $0x1520] sm:$0xff]  ;;  %1889 = vst [vmem:[%s10770_s11 + $0xa80] sm:$0xff] %v1888_v16  ;;  %1891 = vst [vmem:[%s10770_s11 + $0xa88] sm:$0xff] %v1890_v17  ;;  %v1894_v19 = vld [vmem:[%s10765_s10 + $0x1530] sm:$0xff] }
  0xc5   : > { %1893 = vst [vmem:[%s10770_s11 + $0xa90] sm:$0xff] %v1892_v18  ;;  %v1896_v20 = vld [vmem:[%s10765_s10 + $0x1540] sm:$0xff]  ;;  %v1898_v21 = vld [vmem:[%s10765_s10 + $0x1550] sm:$0xff]  ;;  %1895 = vst [vmem:[%s10770_s11 + $0xa98] sm:$0xff] %v1894_v19 }
  0xc6   : > { %1897 = vst [vmem:[%s10770_s11 + $0xaa0] sm:$0xff] %v1896_v20  ;;  %1899 = vst [vmem:[%s10770_s11 + $0xaa8] sm:$0xff] %v1898_v21  ;;  %v1900_v22 = vld [vmem:[%s10765_s10 + $0x1560] sm:$0xff]  ;;  %v1902_v23 = vld [vmem:[%s10765_s10 + $0x1570] sm:$0xff] }
  0xc7   : > { %v1904_v24 = vld [vmem:[%s10765_s10 + $0x1580] sm:$0xff]  ;;  %1901 = vst [vmem:[%s10770_s11 + $0xab0] sm:$0xff] %v1900_v22  ;;  %1903 = vst [vmem:[%s10770_s11 + $0xab8] sm:$0xff] %v1902_v23  ;;  %v1906_v25 = vld [vmem:[%s10765_s10 + $0x1590] sm:$0xff] }
  0xc8   : > { %1905 = vst [vmem:[%s10770_s11 + $0xac0] sm:$0xff] %v1904_v24  ;;  %v1908_v26 = vld [vmem:[%s10765_s10 + $0x15a0] sm:$0xff]  ;;  %v1910_v27 = vld [vmem:[%s10765_s10 + $0x15b0] sm:$0xff]  ;;  %1907 = vst [vmem:[%s10770_s11 + $0xac8] sm:$0xff] %v1906_v25 }
  0xc9   : > { %1909 = vst [vmem:[%s10770_s11 + $0xad0] sm:$0xff] %v1908_v26  ;;  %1911 = vst [vmem:[%s10770_s11 + $0xad8] sm:$0xff] %v1910_v27  ;;  %v1912_v28 = vld [vmem:[%s10765_s10 + $0x15c0] sm:$0xff]  ;;  %v1914_v29 = vld [vmem:[%s10765_s10 + $0x15d0] sm:$0xff] }
  0xca   : > { %v1916_v30 = vld [vmem:[%s10765_s10 + $0x15e0] sm:$0xff]  ;;  %1913 = vst [vmem:[%s10770_s11 + $0xae0] sm:$0xff] %v1912_v28  ;;  %1915 = vst [vmem:[%s10770_s11 + $0xae8] sm:$0xff] %v1914_v29  ;;  %v1918_v31 = vld [vmem:[%s10765_s10 + $0x15f0] sm:$0xff] }
  0xcb   : > { %1917 = vst [vmem:[%s10770_s11 + $0xaf0] sm:$0xff] %v1916_v30  ;;  %v1920_v32 = vld [vmem:[%s10765_s10 + $0x1600] sm:$0xff]  ;;  %v1922_v33 = vld [vmem:[%s10765_s10 + $0x1610] sm:$0xff]  ;;  %1919 = vst [vmem:[%s10770_s11 + $0xaf8] sm:$0xff] %v1918_v31 }
  0xcc   : > { %1921 = vst [vmem:[%s10770_s11 + $0xb00] sm:$0xff] %v1920_v32  ;;  %1923 = vst [vmem:[%s10770_s11 + $0xb08] sm:$0xff] %v1922_v33  ;;  %v1924_v34 = vld [vmem:[%s10765_s10 + $0x1620] sm:$0xff]  ;;  %v1926_v35 = vld [vmem:[%s10765_s10 + $0x1630] sm:$0xff] }
  0xcd   : > { %v1928_v36 = vld [vmem:[%s10765_s10 + $0x1640] sm:$0xff]  ;;  %1925 = vst [vmem:[%s10770_s11 + $0xb10] sm:$0xff] %v1924_v34  ;;  %1927 = vst [vmem:[%s10770_s11 + $0xb18] sm:$0xff] %v1926_v35  ;;  %v1930_v37 = vld [vmem:[%s10765_s10 + $0x1650] sm:$0xff] }
  0xce   : > { %1929 = vst [vmem:[%s10770_s11 + $0xb20] sm:$0xff] %v1928_v36  ;;  %v1932_v38 = vld [vmem:[%s10765_s10 + $0x1660] sm:$0xff]  ;;  %v1934_v39 = vld [vmem:[%s10765_s10 + $0x1670] sm:$0xff]  ;;  %1931 = vst [vmem:[%s10770_s11 + $0xb28] sm:$0xff] %v1930_v37 }
  0xcf   : > { %1933 = vst [vmem:[%s10770_s11 + $0xb30] sm:$0xff] %v1932_v38  ;;  %1935 = vst [vmem:[%s10770_s11 + $0xb38] sm:$0xff] %v1934_v39  ;;  %v1936_v40 = vld [vmem:[%s10765_s10 + $0x1680] sm:$0xff]  ;;  %v1938_v41 = vld [vmem:[%s10765_s10 + $0x1690] sm:$0xff] }
  0xd0   : > { %v1940_v42 = vld [vmem:[%s10765_s10 + $0x16a0] sm:$0xff]  ;;  %1937 = vst [vmem:[%s10770_s11 + $0xb40] sm:$0xff] %v1936_v40  ;;  %1939 = vst [vmem:[%s10770_s11 + $0xb48] sm:$0xff] %v1938_v41  ;;  %v1942_v43 = vld [vmem:[%s10765_s10 + $0x16b0] sm:$0xff] }
  0xd1   : > { %1941 = vst [vmem:[%s10770_s11 + $0xb50] sm:$0xff] %v1940_v42  ;;  %v1944_v44 = vld [vmem:[%s10765_s10 + $0x16c0] sm:$0xff]  ;;  %v1946_v45 = vld [vmem:[%s10765_s10 + $0x16d0] sm:$0xff]  ;;  %1943 = vst [vmem:[%s10770_s11 + $0xb58] sm:$0xff] %v1942_v43 }
  0xd2   : > { %1945 = vst [vmem:[%s10770_s11 + $0xb60] sm:$0xff] %v1944_v44  ;;  %1947 = vst [vmem:[%s10770_s11 + $0xb68] sm:$0xff] %v1946_v45  ;;  %v1948_v46 = vld [vmem:[%s10765_s10 + $0x16e0] sm:$0xff]  ;;  %v1950_v47 = vld [vmem:[%s10765_s10 + $0x16f0] sm:$0xff] }
  0xd3   : > { %v1952_v48 = vld [vmem:[%s10765_s10 + $0x1700] sm:$0xff]  ;;  %1949 = vst [vmem:[%s10770_s11 + $0xb70] sm:$0xff] %v1948_v46  ;;  %1951 = vst [vmem:[%s10770_s11 + $0xb78] sm:$0xff] %v1950_v47  ;;  %v1954_v49 = vld [vmem:[%s10765_s10 + $0x1710] sm:$0xff] }
  0xd4   : > { %1953 = vst [vmem:[%s10770_s11 + $0xb80] sm:$0xff] %v1952_v48  ;;  %v1956_v50 = vld [vmem:[%s10765_s10 + $0x1720] sm:$0xff]  ;;  %v1958_v51 = vld [vmem:[%s10765_s10 + $0x1730] sm:$0xff]  ;;  %1955 = vst [vmem:[%s10770_s11 + $0xb88] sm:$0xff] %v1954_v49 }
  0xd5   : > { %1957 = vst [vmem:[%s10770_s11 + $0xb90] sm:$0xff] %v1956_v50  ;;  %1959 = vst [vmem:[%s10770_s11 + $0xb98] sm:$0xff] %v1958_v51  ;;  %v1960_v52 = vld [vmem:[%s10765_s10 + $0x1740] sm:$0xff]  ;;  %v1962_v53 = vld [vmem:[%s10765_s10 + $0x1750] sm:$0xff] }
  0xd6   : > { %v1964_v54 = vld [vmem:[%s10765_s10 + $0x1760] sm:$0xff]  ;;  %1961 = vst [vmem:[%s10770_s11 + $0xba0] sm:$0xff] %v1960_v52  ;;  %1963 = vst [vmem:[%s10770_s11 + $0xba8] sm:$0xff] %v1962_v53  ;;  %v1966_v55 = vld [vmem:[%s10765_s10 + $0x1770] sm:$0xff] }
  0xd7   : > { %1965 = vst [vmem:[%s10770_s11 + $0xbb0] sm:$0xff] %v1964_v54  ;;  %v1968_v56 = vld [vmem:[%s10765_s10 + $0x1780] sm:$0xff]  ;;  %v1970_v57 = vld [vmem:[%s10765_s10 + $0x1790] sm:$0xff]  ;;  %1967 = vst [vmem:[%s10770_s11 + $0xbb8] sm:$0xff] %v1966_v55 }
  0xd8   : > { %1969 = vst [vmem:[%s10770_s11 + $0xbc0] sm:$0xff] %v1968_v56  ;;  %1971 = vst [vmem:[%s10770_s11 + $0xbc8] sm:$0xff] %v1970_v57  ;;  %v1972_v58 = vld [vmem:[%s10765_s10 + $0x17a0] sm:$0xff]  ;;  %v1974_v59 = vld [vmem:[%s10765_s10 + $0x17b0] sm:$0xff] }
  0xd9   : > { %v1976_v60 = vld [vmem:[%s10765_s10 + $0x17c0] sm:$0xff]  ;;  %1973 = vst [vmem:[%s10770_s11 + $0xbd0] sm:$0xff] %v1972_v58  ;;  %1975 = vst [vmem:[%s10770_s11 + $0xbd8] sm:$0xff] %v1974_v59  ;;  %v1978_v61 = vld [vmem:[%s10765_s10 + $0x17d0] sm:$0xff] }
  0xda   : > { %1977 = vst [vmem:[%s10770_s11 + $0xbe0] sm:$0xff] %v1976_v60  ;;  %v1980_v62 = vld [vmem:[%s10765_s10 + $0x17e0] sm:$0xff]  ;;  %v1982_v63 = vld [vmem:[%s10765_s10 + $0x17f0] sm:$0xff]  ;;  %1979 = vst [vmem:[%s10770_s11 + $0xbe8] sm:$0xff] %v1978_v61 }
  0xdb   : > { %1981 = vst [vmem:[%s10770_s11 + $0xbf0] sm:$0xff] %v1980_v62  ;;  %1983 = vst [vmem:[%s10770_s11 + $0xbf8] sm:$0xff] %v1982_v63  ;;  %v1984_v0 = vld [vmem:[%s10765_s10 + $0x1800] sm:$0xff]  ;;  %v1986_v1 = vld [vmem:[%s10765_s10 + $0x1810] sm:$0xff] }
  0xdc   : > { %v1988_v2 = vld [vmem:[%s10765_s10 + $0x1820] sm:$0xff]  ;;  %1985 = vst [vmem:[%s10770_s11 + $0xc00] sm:$0xff] %v1984_v0  ;;  %1987 = vst [vmem:[%s10770_s11 + $0xc08] sm:$0xff] %v1986_v1  ;;  %v1990_v3 = vld [vmem:[%s10765_s10 + $0x1830] sm:$0xff] }
  0xdd   : > { %1989 = vst [vmem:[%s10770_s11 + $0xc10] sm:$0xff] %v1988_v2  ;;  %v1992_v4 = vld [vmem:[%s10765_s10 + $0x1840] sm:$0xff]  ;;  %v1994_v5 = vld [vmem:[%s10765_s10 + $0x1850] sm:$0xff]  ;;  %1991 = vst [vmem:[%s10770_s11 + $0xc18] sm:$0xff] %v1990_v3 }
  0xde   : > { %1993 = vst [vmem:[%s10770_s11 + $0xc20] sm:$0xff] %v1992_v4  ;;  %1995 = vst [vmem:[%s10770_s11 + $0xc28] sm:$0xff] %v1994_v5  ;;  %v1996_v6 = vld [vmem:[%s10765_s10 + $0x1860] sm:$0xff]  ;;  %v1998_v7 = vld [vmem:[%s10765_s10 + $0x1870] sm:$0xff] }
  0xdf   : > { %v2000_v8 = vld [vmem:[%s10765_s10 + $0x1880] sm:$0xff]  ;;  %1997 = vst [vmem:[%s10770_s11 + $0xc30] sm:$0xff] %v1996_v6  ;;  %1999 = vst [vmem:[%s10770_s11 + $0xc38] sm:$0xff] %v1998_v7  ;;  %v2002_v9 = vld [vmem:[%s10765_s10 + $0x1890] sm:$0xff] }
  0xe0   : > { %2001 = vst [vmem:[%s10770_s11 + $0xc40] sm:$0xff] %v2000_v8  ;;  %v2004_v10 = vld [vmem:[%s10765_s10 + $0x18a0] sm:$0xff]  ;;  %v2006_v11 = vld [vmem:[%s10765_s10 + $0x18b0] sm:$0xff]  ;;  %2003 = vst [vmem:[%s10770_s11 + $0xc48] sm:$0xff] %v2002_v9 }
  0xe1   : > { %2005 = vst [vmem:[%s10770_s11 + $0xc50] sm:$0xff] %v2004_v10  ;;  %2007 = vst [vmem:[%s10770_s11 + $0xc58] sm:$0xff] %v2006_v11  ;;  %v2008_v12 = vld [vmem:[%s10765_s10 + $0x18c0] sm:$0xff]  ;;  %v2010_v13 = vld [vmem:[%s10765_s10 + $0x18d0] sm:$0xff] }
  0xe2   : > { %v2012_v14 = vld [vmem:[%s10765_s10 + $0x18e0] sm:$0xff]  ;;  %2009 = vst [vmem:[%s10770_s11 + $0xc60] sm:$0xff] %v2008_v12  ;;  %2011 = vst [vmem:[%s10770_s11 + $0xc68] sm:$0xff] %v2010_v13  ;;  %v2014_v15 = vld [vmem:[%s10765_s10 + $0x18f0] sm:$0xff] }
  0xe3   : > { %2013 = vst [vmem:[%s10770_s11 + $0xc70] sm:$0xff] %v2012_v14  ;;  %v2016_v16 = vld [vmem:[%s10765_s10 + $0x1900] sm:$0xff]  ;;  %v2018_v17 = vld [vmem:[%s10765_s10 + $0x1910] sm:$0xff]  ;;  %2015 = vst [vmem:[%s10770_s11 + $0xc78] sm:$0xff] %v2014_v15 }
  0xe4   : > { %2017 = vst [vmem:[%s10770_s11 + $0xc80] sm:$0xff] %v2016_v16  ;;  %2019 = vst [vmem:[%s10770_s11 + $0xc88] sm:$0xff] %v2018_v17  ;;  %v2020_v18 = vld [vmem:[%s10765_s10 + $0x1920] sm:$0xff]  ;;  %v2022_v19 = vld [vmem:[%s10765_s10 + $0x1930] sm:$0xff] }
  0xe5   : > { %v2024_v20 = vld [vmem:[%s10765_s10 + $0x1940] sm:$0xff]  ;;  %2021 = vst [vmem:[%s10770_s11 + $0xc90] sm:$0xff] %v2020_v18  ;;  %2023 = vst [vmem:[%s10770_s11 + $0xc98] sm:$0xff] %v2022_v19  ;;  %v2026_v21 = vld [vmem:[%s10765_s10 + $0x1950] sm:$0xff] }
  0xe6   : > { %2025 = vst [vmem:[%s10770_s11 + $0xca0] sm:$0xff] %v2024_v20  ;;  %v2028_v22 = vld [vmem:[%s10765_s10 + $0x1960] sm:$0xff]  ;;  %v2030_v23 = vld [vmem:[%s10765_s10 + $0x1970] sm:$0xff]  ;;  %2027 = vst [vmem:[%s10770_s11 + $0xca8] sm:$0xff] %v2026_v21 }
  0xe7   : > { %2029 = vst [vmem:[%s10770_s11 + $0xcb0] sm:$0xff] %v2028_v22  ;;  %2031 = vst [vmem:[%s10770_s11 + $0xcb8] sm:$0xff] %v2030_v23  ;;  %v2032_v24 = vld [vmem:[%s10765_s10 + $0x1980] sm:$0xff]  ;;  %v2034_v25 = vld [vmem:[%s10765_s10 + $0x1990] sm:$0xff] }
  0xe8   : > { %v2036_v26 = vld [vmem:[%s10765_s10 + $0x19a0] sm:$0xff]  ;;  %2033 = vst [vmem:[%s10770_s11 + $0xcc0] sm:$0xff] %v2032_v24  ;;  %2035 = vst [vmem:[%s10770_s11 + $0xcc8] sm:$0xff] %v2034_v25  ;;  %v2038_v27 = vld [vmem:[%s10765_s10 + $0x19b0] sm:$0xff] }
  0xe9   : > { %2037 = vst [vmem:[%s10770_s11 + $0xcd0] sm:$0xff] %v2036_v26  ;;  %v2040_v28 = vld [vmem:[%s10765_s10 + $0x19c0] sm:$0xff]  ;;  %v2042_v29 = vld [vmem:[%s10765_s10 + $0x19d0] sm:$0xff]  ;;  %2039 = vst [vmem:[%s10770_s11 + $0xcd8] sm:$0xff] %v2038_v27 }
  0xea   : > { %2041 = vst [vmem:[%s10770_s11 + $0xce0] sm:$0xff] %v2040_v28  ;;  %2043 = vst [vmem:[%s10770_s11 + $0xce8] sm:$0xff] %v2042_v29  ;;  %v2044_v30 = vld [vmem:[%s10765_s10 + $0x19e0] sm:$0xff]  ;;  %v2046_v31 = vld [vmem:[%s10765_s10 + $0x19f0] sm:$0xff] }
  0xeb   : > { %v2048_v32 = vld [vmem:[%s10765_s10 + $0x1a00] sm:$0xff]  ;;  %2045 = vst [vmem:[%s10770_s11 + $0xcf0] sm:$0xff] %v2044_v30  ;;  %2047 = vst [vmem:[%s10770_s11 + $0xcf8] sm:$0xff] %v2046_v31  ;;  %v2050_v33 = vld [vmem:[%s10765_s10 + $0x1a10] sm:$0xff] }
  0xec   : > { %2049 = vst [vmem:[%s10770_s11 + $0xd00] sm:$0xff] %v2048_v32  ;;  %v2052_v34 = vld [vmem:[%s10765_s10 + $0x1a20] sm:$0xff]  ;;  %v2054_v35 = vld [vmem:[%s10765_s10 + $0x1a30] sm:$0xff]  ;;  %2051 = vst [vmem:[%s10770_s11 + $0xd08] sm:$0xff] %v2050_v33 }
  0xed   : > { %2053 = vst [vmem:[%s10770_s11 + $0xd10] sm:$0xff] %v2052_v34  ;;  %2055 = vst [vmem:[%s10770_s11 + $0xd18] sm:$0xff] %v2054_v35  ;;  %v2056_v36 = vld [vmem:[%s10765_s10 + $0x1a40] sm:$0xff]  ;;  %v2058_v37 = vld [vmem:[%s10765_s10 + $0x1a50] sm:$0xff] }
  0xee   : > { %v2060_v38 = vld [vmem:[%s10765_s10 + $0x1a60] sm:$0xff]  ;;  %2057 = vst [vmem:[%s10770_s11 + $0xd20] sm:$0xff] %v2056_v36  ;;  %2059 = vst [vmem:[%s10770_s11 + $0xd28] sm:$0xff] %v2058_v37  ;;  %v2062_v39 = vld [vmem:[%s10765_s10 + $0x1a70] sm:$0xff] }
  0xef   : > { %2061 = vst [vmem:[%s10770_s11 + $0xd30] sm:$0xff] %v2060_v38  ;;  %v2064_v40 = vld [vmem:[%s10765_s10 + $0x1a80] sm:$0xff]  ;;  %v2066_v41 = vld [vmem:[%s10765_s10 + $0x1a90] sm:$0xff]  ;;  %2063 = vst [vmem:[%s10770_s11 + $0xd38] sm:$0xff] %v2062_v39 }
  0xf0   : > { %2065 = vst [vmem:[%s10770_s11 + $0xd40] sm:$0xff] %v2064_v40  ;;  %2067 = vst [vmem:[%s10770_s11 + $0xd48] sm:$0xff] %v2066_v41  ;;  %v2068_v42 = vld [vmem:[%s10765_s10 + $0x1aa0] sm:$0xff]  ;;  %v2070_v43 = vld [vmem:[%s10765_s10 + $0x1ab0] sm:$0xff] }
  0xf1   : > { %v2072_v44 = vld [vmem:[%s10765_s10 + $0x1ac0] sm:$0xff]  ;;  %2069 = vst [vmem:[%s10770_s11 + $0xd50] sm:$0xff] %v2068_v42  ;;  %2071 = vst [vmem:[%s10770_s11 + $0xd58] sm:$0xff] %v2070_v43  ;;  %v2074_v45 = vld [vmem:[%s10765_s10 + $0x1ad0] sm:$0xff] }
  0xf2   : > { %2073 = vst [vmem:[%s10770_s11 + $0xd60] sm:$0xff] %v2072_v44  ;;  %v2076_v46 = vld [vmem:[%s10765_s10 + $0x1ae0] sm:$0xff]  ;;  %v2078_v47 = vld [vmem:[%s10765_s10 + $0x1af0] sm:$0xff]  ;;  %2075 = vst [vmem:[%s10770_s11 + $0xd68] sm:$0xff] %v2074_v45 }
  0xf3   : > { %2077 = vst [vmem:[%s10770_s11 + $0xd70] sm:$0xff] %v2076_v46  ;;  %2079 = vst [vmem:[%s10770_s11 + $0xd78] sm:$0xff] %v2078_v47  ;;  %v2080_v48 = vld [vmem:[%s10765_s10 + $0x1b00] sm:$0xff]  ;;  %v2082_v49 = vld [vmem:[%s10765_s10 + $0x1b10] sm:$0xff] }
  0xf4   : > { %v2084_v50 = vld [vmem:[%s10765_s10 + $0x1b20] sm:$0xff]  ;;  %2081 = vst [vmem:[%s10770_s11 + $0xd80] sm:$0xff] %v2080_v48  ;;  %2083 = vst [vmem:[%s10770_s11 + $0xd88] sm:$0xff] %v2082_v49  ;;  %v2086_v51 = vld [vmem:[%s10765_s10 + $0x1b30] sm:$0xff] }
  0xf5   : > { %2085 = vst [vmem:[%s10770_s11 + $0xd90] sm:$0xff] %v2084_v50  ;;  %v2088_v52 = vld [vmem:[%s10765_s10 + $0x1b40] sm:$0xff]  ;;  %v2090_v53 = vld [vmem:[%s10765_s10 + $0x1b50] sm:$0xff]  ;;  %2087 = vst [vmem:[%s10770_s11 + $0xd98] sm:$0xff] %v2086_v51 }
  0xf6   : > { %2089 = vst [vmem:[%s10770_s11 + $0xda0] sm:$0xff] %v2088_v52  ;;  %2091 = vst [vmem:[%s10770_s11 + $0xda8] sm:$0xff] %v2090_v53  ;;  %v2092_v54 = vld [vmem:[%s10765_s10 + $0x1b60] sm:$0xff]  ;;  %v2094_v55 = vld [vmem:[%s10765_s10 + $0x1b70] sm:$0xff] }
  0xf7   : > { %v2096_v56 = vld [vmem:[%s10765_s10 + $0x1b80] sm:$0xff]  ;;  %2093 = vst [vmem:[%s10770_s11 + $0xdb0] sm:$0xff] %v2092_v54  ;;  %2095 = vst [vmem:[%s10770_s11 + $0xdb8] sm:$0xff] %v2094_v55  ;;  %v2098_v57 = vld [vmem:[%s10765_s10 + $0x1b90] sm:$0xff] }
  0xf8   : > { %2097 = vst [vmem:[%s10770_s11 + $0xdc0] sm:$0xff] %v2096_v56  ;;  %v2100_v58 = vld [vmem:[%s10765_s10 + $0x1ba0] sm:$0xff]  ;;  %v2102_v59 = vld [vmem:[%s10765_s10 + $0x1bb0] sm:$0xff]  ;;  %2099 = vst [vmem:[%s10770_s11 + $0xdc8] sm:$0xff] %v2098_v57 }
  0xf9   : > { %2101 = vst [vmem:[%s10770_s11 + $0xdd0] sm:$0xff] %v2100_v58  ;;  %2103 = vst [vmem:[%s10770_s11 + $0xdd8] sm:$0xff] %v2102_v59  ;;  %v2104_v60 = vld [vmem:[%s10765_s10 + $0x1bc0] sm:$0xff]  ;;  %v2106_v61 = vld [vmem:[%s10765_s10 + $0x1bd0] sm:$0xff] }
  0xfa   : > { %v2108_v62 = vld [vmem:[%s10765_s10 + $0x1be0] sm:$0xff]  ;;  %2105 = vst [vmem:[%s10770_s11 + $0xde0] sm:$0xff] %v2104_v60  ;;  %2107 = vst [vmem:[%s10770_s11 + $0xde8] sm:$0xff] %v2106_v61  ;;  %v2110_v63 = vld [vmem:[%s10765_s10 + $0x1bf0] sm:$0xff] }
  0xfb   : > { %2109 = vst [vmem:[%s10770_s11 + $0xdf0] sm:$0xff] %v2108_v62  ;;  %v2112_v0 = vld [vmem:[%s10765_s10 + $0x1c00] sm:$0xff]  ;;  %v2114_v1 = vld [vmem:[%s10765_s10 + $0x1c10] sm:$0xff]  ;;  %2111 = vst [vmem:[%s10770_s11 + $0xdf8] sm:$0xff] %v2110_v63 }
  0xfc   : > { %2113 = vst [vmem:[%s10770_s11 + $0xe00] sm:$0xff] %v2112_v0  ;;  %2115 = vst [vmem:[%s10770_s11 + $0xe08] sm:$0xff] %v2114_v1  ;;  %v2116_v2 = vld [vmem:[%s10765_s10 + $0x1c20] sm:$0xff]  ;;  %v2118_v3 = vld [vmem:[%s10765_s10 + $0x1c30] sm:$0xff] }
  0xfd   : > { %v2120_v4 = vld [vmem:[%s10765_s10 + $0x1c40] sm:$0xff]  ;;  %2117 = vst [vmem:[%s10770_s11 + $0xe10] sm:$0xff] %v2116_v2  ;;  %2119 = vst [vmem:[%s10770_s11 + $0xe18] sm:$0xff] %v2118_v3  ;;  %v2122_v5 = vld [vmem:[%s10765_s10 + $0x1c50] sm:$0xff] }
  0xfe   : > { %2121 = vst [vmem:[%s10770_s11 + $0xe20] sm:$0xff] %v2120_v4  ;;  %v2124_v6 = vld [vmem:[%s10765_s10 + $0x1c60] sm:$0xff]  ;;  %v2126_v7 = vld [vmem:[%s10765_s10 + $0x1c70] sm:$0xff]  ;;  %2123 = vst [vmem:[%s10770_s11 + $0xe28] sm:$0xff] %v2122_v5 }
  0xff   : > { %2125 = vst [vmem:[%s10770_s11 + $0xe30] sm:$0xff] %v2124_v6  ;;  %2127 = vst [vmem:[%s10770_s11 + $0xe38] sm:$0xff] %v2126_v7  ;;  %v2128_v8 = vld [vmem:[%s10765_s10 + $0x1c80] sm:$0xff]  ;;  %v2130_v9 = vld [vmem:[%s10765_s10 + $0x1c90] sm:$0xff] }
 0x100   : > { %v2132_v10 = vld [vmem:[%s10765_s10 + $0x1ca0] sm:$0xff]  ;;  %2129 = vst [vmem:[%s10770_s11 + $0xe40] sm:$0xff] %v2128_v8  ;;  %2131 = vst [vmem:[%s10770_s11 + $0xe48] sm:$0xff] %v2130_v9  ;;  %v2134_v11 = vld [vmem:[%s10765_s10 + $0x1cb0] sm:$0xff] }
 0x101   : > { %2133 = vst [vmem:[%s10770_s11 + $0xe50] sm:$0xff] %v2132_v10  ;;  %v2136_v12 = vld [vmem:[%s10765_s10 + $0x1cc0] sm:$0xff]  ;;  %v2138_v13 = vld [vmem:[%s10765_s10 + $0x1cd0] sm:$0xff]  ;;  %2135 = vst [vmem:[%s10770_s11 + $0xe58] sm:$0xff] %v2134_v11 }
 0x102   : > { %2137 = vst [vmem:[%s10770_s11 + $0xe60] sm:$0xff] %v2136_v12  ;;  %2139 = vst [vmem:[%s10770_s11 + $0xe68] sm:$0xff] %v2138_v13  ;;  %v2140_v14 = vld [vmem:[%s10765_s10 + $0x1ce0] sm:$0xff]  ;;  %v2142_v15 = vld [vmem:[%s10765_s10 + $0x1cf0] sm:$0xff] }
 0x103   : > { %v2144_v16 = vld [vmem:[%s10765_s10 + $0x1d00] sm:$0xff]  ;;  %2141 = vst [vmem:[%s10770_s11 + $0xe70] sm:$0xff] %v2140_v14  ;;  %2143 = vst [vmem:[%s10770_s11 + $0xe78] sm:$0xff] %v2142_v15  ;;  %v2146_v17 = vld [vmem:[%s10765_s10 + $0x1d10] sm:$0xff] }
 0x104   : > { %2145 = vst [vmem:[%s10770_s11 + $0xe80] sm:$0xff] %v2144_v16  ;;  %v2148_v18 = vld [vmem:[%s10765_s10 + $0x1d20] sm:$0xff]  ;;  %v2150_v19 = vld [vmem:[%s10765_s10 + $0x1d30] sm:$0xff]  ;;  %2147 = vst [vmem:[%s10770_s11 + $0xe88] sm:$0xff] %v2146_v17 }
 0x105   : > { %2149 = vst [vmem:[%s10770_s11 + $0xe90] sm:$0xff] %v2148_v18  ;;  %2151 = vst [vmem:[%s10770_s11 + $0xe98] sm:$0xff] %v2150_v19  ;;  %v2152_v20 = vld [vmem:[%s10765_s10 + $0x1d40] sm:$0xff]  ;;  %v2154_v21 = vld [vmem:[%s10765_s10 + $0x1d50] sm:$0xff] }
 0x106   : > { %v2156_v22 = vld [vmem:[%s10765_s10 + $0x1d60] sm:$0xff]  ;;  %2153 = vst [vmem:[%s10770_s11 + $0xea0] sm:$0xff] %v2152_v20  ;;  %2155 = vst [vmem:[%s10770_s11 + $0xea8] sm:$0xff] %v2154_v21  ;;  %v2158_v23 = vld [vmem:[%s10765_s10 + $0x1d70] sm:$0xff] }
 0x107   : > { %2157 = vst [vmem:[%s10770_s11 + $0xeb0] sm:$0xff] %v2156_v22  ;;  %v2160_v24 = vld [vmem:[%s10765_s10 + $0x1d80] sm:$0xff]  ;;  %v2162_v25 = vld [vmem:[%s10765_s10 + $0x1d90] sm:$0xff]  ;;  %2159 = vst [vmem:[%s10770_s11 + $0xeb8] sm:$0xff] %v2158_v23 }
 0x108   : > { %2161 = vst [vmem:[%s10770_s11 + $0xec0] sm:$0xff] %v2160_v24  ;;  %2163 = vst [vmem:[%s10770_s11 + $0xec8] sm:$0xff] %v2162_v25  ;;  %v2164_v26 = vld [vmem:[%s10765_s10 + $0x1da0] sm:$0xff]  ;;  %v2166_v27 = vld [vmem:[%s10765_s10 + $0x1db0] sm:$0xff] }
 0x109   : > { %v2168_v28 = vld [vmem:[%s10765_s10 + $0x1dc0] sm:$0xff]  ;;  %2165 = vst [vmem:[%s10770_s11 + $0xed0] sm:$0xff] %v2164_v26  ;;  %2167 = vst [vmem:[%s10770_s11 + $0xed8] sm:$0xff] %v2166_v27  ;;  %v2170_v29 = vld [vmem:[%s10765_s10 + $0x1dd0] sm:$0xff] }
 0x10a   : > { %2169 = vst [vmem:[%s10770_s11 + $0xee0] sm:$0xff] %v2168_v28  ;;  %v2172_v30 = vld [vmem:[%s10765_s10 + $0x1de0] sm:$0xff]  ;;  %v2174_v31 = vld [vmem:[%s10765_s10 + $0x1df0] sm:$0xff]  ;;  %2171 = vst [vmem:[%s10770_s11 + $0xee8] sm:$0xff] %v2170_v29 }
 0x10b   : > { %2173 = vst [vmem:[%s10770_s11 + $0xef0] sm:$0xff] %v2172_v30  ;;  %2175 = vst [vmem:[%s10770_s11 + $0xef8] sm:$0xff] %v2174_v31  ;;  %v2176_v32 = vld [vmem:[%s10765_s10 + $0x1e00] sm:$0xff]  ;;  %v2178_v33 = vld [vmem:[%s10765_s10 + $0x1e10] sm:$0xff] }
 0x10c   : > { %v2180_v34 = vld [vmem:[%s10765_s10 + $0x1e20] sm:$0xff]  ;;  %2177 = vst [vmem:[%s10770_s11 + $0xf00] sm:$0xff] %v2176_v32  ;;  %2179 = vst [vmem:[%s10770_s11 + $0xf08] sm:$0xff] %v2178_v33  ;;  %v2182_v35 = vld [vmem:[%s10765_s10 + $0x1e30] sm:$0xff] }
 0x10d   : > { %2181 = vst [vmem:[%s10770_s11 + $0xf10] sm:$0xff] %v2180_v34  ;;  %v2184_v36 = vld [vmem:[%s10765_s10 + $0x1e40] sm:$0xff]  ;;  %v2186_v37 = vld [vmem:[%s10765_s10 + $0x1e50] sm:$0xff]  ;;  %2183 = vst [vmem:[%s10770_s11 + $0xf18] sm:$0xff] %v2182_v35 }
 0x10e   : > { %2185 = vst [vmem:[%s10770_s11 + $0xf20] sm:$0xff] %v2184_v36  ;;  %2187 = vst [vmem:[%s10770_s11 + $0xf28] sm:$0xff] %v2186_v37  ;;  %v2188_v38 = vld [vmem:[%s10765_s10 + $0x1e60] sm:$0xff]  ;;  %v2190_v39 = vld [vmem:[%s10765_s10 + $0x1e70] sm:$0xff] }
 0x10f   : > { %v2192_v40 = vld [vmem:[%s10765_s10 + $0x1e80] sm:$0xff]  ;;  %2189 = vst [vmem:[%s10770_s11 + $0xf30] sm:$0xff] %v2188_v38  ;;  %2191 = vst [vmem:[%s10770_s11 + $0xf38] sm:$0xff] %v2190_v39  ;;  %v2194_v41 = vld [vmem:[%s10765_s10 + $0x1e90] sm:$0xff] }
 0x110   : > { %2193 = vst [vmem:[%s10770_s11 + $0xf40] sm:$0xff] %v2192_v40  ;;  %v2196_v42 = vld [vmem:[%s10765_s10 + $0x1ea0] sm:$0xff]  ;;  %v2198_v43 = vld [vmem:[%s10765_s10 + $0x1eb0] sm:$0xff]  ;;  %2195 = vst [vmem:[%s10770_s11 + $0xf48] sm:$0xff] %v2194_v41 }
 0x111   : > { %2197 = vst [vmem:[%s10770_s11 + $0xf50] sm:$0xff] %v2196_v42  ;;  %2199 = vst [vmem:[%s10770_s11 + $0xf58] sm:$0xff] %v2198_v43  ;;  %v2200_v44 = vld [vmem:[%s10765_s10 + $0x1ec0] sm:$0xff]  ;;  %v2202_v45 = vld [vmem:[%s10765_s10 + $0x1ed0] sm:$0xff] }
 0x112   : > { %v2204_v46 = vld [vmem:[%s10765_s10 + $0x1ee0] sm:$0xff]  ;;  %2201 = vst [vmem:[%s10770_s11 + $0xf60] sm:$0xff] %v2200_v44  ;;  %2203 = vst [vmem:[%s10770_s11 + $0xf68] sm:$0xff] %v2202_v45  ;;  %v2206_v47 = vld [vmem:[%s10765_s10 + $0x1ef0] sm:$0xff] }
 0x113   : > { %2205 = vst [vmem:[%s10770_s11 + $0xf70] sm:$0xff] %v2204_v46  ;;  %v2208_v48 = vld [vmem:[%s10765_s10 + $0x1f00] sm:$0xff]  ;;  %v2210_v49 = vld [vmem:[%s10765_s10 + $0x1f10] sm:$0xff]  ;;  %2207 = vst [vmem:[%s10770_s11 + $0xf78] sm:$0xff] %v2206_v47 }
 0x114   : > { %2209 = vst [vmem:[%s10770_s11 + $0xf80] sm:$0xff] %v2208_v48  ;;  %2211 = vst [vmem:[%s10770_s11 + $0xf88] sm:$0xff] %v2210_v49  ;;  %v2212_v50 = vld [vmem:[%s10765_s10 + $0x1f20] sm:$0xff]  ;;  %v2214_v51 = vld [vmem:[%s10765_s10 + $0x1f30] sm:$0xff] }
 0x115   : > { %v2216_v52 = vld [vmem:[%s10765_s10 + $0x1f40] sm:$0xff]  ;;  %2213 = vst [vmem:[%s10770_s11 + $0xf90] sm:$0xff] %v2212_v50  ;;  %2215 = vst [vmem:[%s10770_s11 + $0xf98] sm:$0xff] %v2214_v51  ;;  %v2218_v53 = vld [vmem:[%s10765_s10 + $0x1f50] sm:$0xff] }
 0x116   : > { %2217 = vst [vmem:[%s10770_s11 + $0xfa0] sm:$0xff] %v2216_v52  ;;  %v2220_v54 = vld [vmem:[%s10765_s10 + $0x1f60] sm:$0xff]  ;;  %v2222_v55 = vld [vmem:[%s10765_s10 + $0x1f70] sm:$0xff]  ;;  %2219 = vst [vmem:[%s10770_s11 + $0xfa8] sm:$0xff] %v2218_v53 }
 0x117   : > { %2221 = vst [vmem:[%s10770_s11 + $0xfb0] sm:$0xff] %v2220_v54  ;;  %2223 = vst [vmem:[%s10770_s11 + $0xfb8] sm:$0xff] %v2222_v55  ;;  %v2224_v56 = vld [vmem:[%s10765_s10 + $0x1f80] sm:$0xff]  ;;  %v2226_v57 = vld [vmem:[%s10765_s10 + $0x1f90] sm:$0xff] }
 0x118   : > { %v2228_v58 = vld [vmem:[%s10765_s10 + $0x1fa0] sm:$0xff]  ;;  %2225 = vst [vmem:[%s10770_s11 + $0xfc0] sm:$0xff] %v2224_v56  ;;  %2227 = vst [vmem:[%s10770_s11 + $0xfc8] sm:$0xff] %v2226_v57  ;;  %v2230_v59 = vld [vmem:[%s10765_s10 + $0x1fb0] sm:$0xff] }
 0x119   : > { %2229 = vst [vmem:[%s10770_s11 + $0xfd0] sm:$0xff] %v2228_v58  ;;  %v2232_v60 = vld [vmem:[%s10765_s10 + $0x1fc0] sm:$0xff]  ;;  %v2234_v61 = vld [vmem:[%s10765_s10 + $0x1fd0] sm:$0xff]  ;;  %2231 = vst [vmem:[%s10770_s11 + $0xfd8] sm:$0xff] %v2230_v59 }
 0x11a   : > { %2233 = vst [vmem:[%s10770_s11 + $0xfe0] sm:$0xff] %v2232_v60  ;;  %2235 = vst [vmem:[%s10770_s11 + $0xfe8] sm:$0xff] %v2234_v61  ;;  %v2236_v62 = vld [vmem:[%s10765_s10 + $0x1fe0] sm:$0xff]  ;;  %v2238_v63 = vld [vmem:[%s10765_s10 + $0x1ff0] sm:$0xff] }
 0x11b   : > { %2237 = vst [vmem:[%s10770_s11 + $0xff0] sm:$0xff] %v2236_v62  ;;  %2239 = vst [vmem:[%s10770_s11 + $0xff8] sm:$0xff] %v2238_v63 }
 0x11c PF: > { %p8744_p11 = scmp.ge.s32.totalorder %s10663_s20, 1  ;;  %p4336_p12 = scmp.lt.s32.totalorder %s10663_s20, 5 }
 0x11e   : > { %p4337_p13 = pnand %p8744_p11, %p4336_p12 }
 0x11f   : > { %s4343_s21 = sand.u32 (!%p4337_p13), 1, %s10639_s14   ;;  %p4374_p0 = scmp.lt.s32.totalorder (!%p4337_p13), %s10651_s17, 1  ;;  %vm8493_vm0 = vcmask (!%p4337_p13), 1040384   ;;  %vm8579_vm1 = vsmask.f32 (!%p4337_p13), 256  ;;  %vm8581_vm2 = vcmask (!%p4337_p13), 1044484  }
 0x120   : > { %4340 = sbr.rel (%p4337_p13) target bundleno = 1076 (0x434), region = 80  ;;  %s8745_s24 = sshll.u32 (!%p4337_p13), %s4343_s21, 12  ;;  %vm8582_vm3 = vsmask.f32 (!%p4337_p13), 4352  ;;  %vm12499_vm4 = vmand (!%p4337_p13), %vm8493_vm0, %vm8579_vm1 }
 0x121   : > { %s11796_s25 = scalar_lea.vmem (!%p4337_p13), [#allocation2], %s8745_s24  ;;  %s12462_s6 = sshll.u32 (!%p4337_p13), %s10647_s16, 1  ;;  %vm12503_vm7 = vmand (!%p4337_p13), %vm8581_vm2, %vm8582_vm3 }
 0x122   : > { %v9821_v0 = vld [vmem:[%s11796_s25 + $0x404] ss:$8 sps:$4 sm:$0xff] (!%p4337_p13)   ;;  %v9825_v2 = vld [vmem:[%s11796_s25 + $0x400] ss:$8 sps:$4 sm:$0xff] (!%p4337_p13)   ;;  %v9827_v4 = vld [vmem:[%s11796_s25 + $0x414] ss:$8 sps:$4 sm:$0xff] (!%p4337_p13)  }
 0x123   : > { %v9823_v1 = vld [vmem:[%s11796_s25 + $0x804] ss:$8 sps:$4 sm:$0xff] (!%p4337_p13)   ;;  %5403 = vmatprep.subr.bf16.mxu1 (!%p4337_p13), %v9821_v0  ;;  %v9826_v3 = vld [vmem:[%s11796_s25 + $0x800] ss:$8 sps:$4 sm:$0xff] (!%p4337_p13)   ;;  %v9829_v5 = vld [vmem:[%s11796_s25 + $0x814] ss:$8 sps:$4 sm:$0xff] (!%p4337_p13)  }
 0x124   : > { %7252 = vmatprep.subr.bf16.mxu0 (!%p4337_p13), %v9823_v1  ;;  %5404 = vmatpush1.bf16.msra.mxu1 (!%p4337_p13), %v9825_v2  ;;  %v9831_v6 = vld [vmem:[%s11796_s25 + $0x410] ss:$8 sps:$4 sm:$0xff] (!%p4337_p13)   ;;  %v9833_v8 = vld [vmem:[%s11796_s25 + $0x424] ss:$8 sps:$4 sm:$0xff] (!%p4337_p13)   ;;  %v9837_v10 = vld [vmem:[%s11796_s25 + $0x420] ss:$8 sps:$4 sm:$0xff] (!%p4337_p13)  }
 0x125   : > { %7253 = vmatpush1.bf16.msra.mxu0 (!%p4337_p13), %v9826_v3  ;;  %5405 = vmatprep.subr.bf16.mxu1 (!%p4337_p13), %v9827_v4  ;;  %v9832_v7 = vld [vmem:[%s11796_s25 + $0x810] ss:$8 sps:$4 sm:$0xff] (!%p4337_p13)   ;;  %v9835_v9 = vld [vmem:[%s11796_s25 + $0x824] ss:$8 sps:$4 sm:$0xff] (!%p4337_p13)   ;;  %v9838_v11 = vld [vmem:[%s11796_s25 + $0x820] ss:$8 sps:$4 sm:$0xff] (!%p4337_p13)  }
 0x126   : > { %7254 = vmatprep.subr.bf16.mxu0 (!%p4337_p13), %v9829_v5  ;;  %v9839_v12 = vld [vmem:[%s11796_s25 + $0x434] ss:$8 sps:$4 sm:$0xff] (!%p4337_p13)   ;;  %v9843_v14 = vld [vmem:[%s11796_s25 + $0x430] ss:$8 sps:$4 sm:$0xff] (!%p4337_p13)   ;;  %v9845_v16 = vld [vmem:[%s11796_s25 + $0x444] ss:$8 sps:$4 sm:$0xff] (!%p4337_p13)  }
 0x127   : > { %v9841_v13 = vld [vmem:[%s11796_s25 + $0x834] ss:$8 sps:$4 sm:$0xff]   ;;  %v9844_v15 = vld [vmem:[%s11796_s25 + $0x830] ss:$8 sps:$4 sm:$0xff]   ;;  %v9847_v17 = vld [vmem:[%s11796_s25 + $0x844] ss:$8 sps:$4 sm:$0xff]  }
 0x128   : > { %5406 = vmatpush1.bf16.msra.mxu1 %v9831_v6  ;;  %v9849_v18 = vld [vmem:[%s11796_s25 + $0x440] ss:$8 sps:$4 sm:$0xff]   ;;  %v9851_v20 = vld [vmem:[%s11796_s25 + $0x454] ss:$8 sps:$4 sm:$0xff]   ;;  %v9855_v22 = vld [vmem:[%s11796_s25 + $0x450] ss:$8 sps:$4 sm:$0xff]  }
 0x129   : > { %7255 = vmatpush1.bf16.msra.mxu0 %v9832_v7  ;;  %5407 = vmatprep.subr.bf16.mxu1 %v9833_v8  ;;  %v9850_v19 = vld [vmem:[%s11796_s25 + $0x840] ss:$8 sps:$4 sm:$0xff]   ;;  %v9853_v21 = vld [vmem:[%s11796_s25 + $0x854] ss:$8 sps:$4 sm:$0xff]   ;;  %v9856_v23 = vld [vmem:[%s11796_s25 + $0x850] ss:$8 sps:$4 sm:$0xff]  }
 0x12a   : > { %7256 = vmatprep.subr.bf16.mxu0 %v9835_v9  ;;  %v9857_v24 = vld [vmem:[%s11796_s25 + $0x464] ss:$8 sps:$4 sm:$0xff]   ;;  %v9861_v26 = vld [vmem:[%s11796_s25 + $0x460] ss:$8 sps:$4 sm:$0xff]   ;;  %v9863_v28 = vld [vmem:[%s11796_s25 + $0x474] ss:$8 sps:$4 sm:$0xff]  }
 0x12b   : > { %v9859_v25 = vld [vmem:[%s11796_s25 + $0x864] ss:$8 sps:$4 sm:$0xff]   ;;  %v9862_v27 = vld [vmem:[%s11796_s25 + $0x860] ss:$8 sps:$4 sm:$0xff]   ;;  %v9865_v29 = vld [vmem:[%s11796_s25 + $0x874] ss:$8 sps:$4 sm:$0xff]  }
 0x12c   : > { %5408 = vmatpush1.bf16.msra.mxu1 %v9837_v10  ;;  %v9867_v30 = vld [vmem:[%s11796_s25 + $0x470] ss:$8 sps:$4 sm:$0xff]   ;;  %v9869_v32 = vld [vmem:[%s11796_s25 + $0x484] ss:$8 sps:$4 sm:$0xff]   ;;  %v9873_v34 = vld [vmem:[%s11796_s25 + $0x480] ss:$8 sps:$4 sm:$0xff]  }
 0x12d   : > { %7257 = vmatpush1.bf16.msra.mxu0 %v9838_v11  ;;  %5409 = vmatprep.subr.bf16.mxu1 %v9839_v12  ;;  %v9868_v31 = vld [vmem:[%s11796_s25 + $0x870] ss:$8 sps:$4 sm:$0xff]   ;;  %v9871_v33 = vld [vmem:[%s11796_s25 + $0x884] ss:$8 sps:$4 sm:$0xff]   ;;  %v9874_v35 = vld [vmem:[%s11796_s25 + $0x880] ss:$8 sps:$4 sm:$0xff]  }
 0x12e   : > { %7258 = vmatprep.subr.bf16.mxu0 %v9841_v13  ;;  %s4375_s14 = scalar_select %p4374_p0, %s10651_s17, 1  ;;  %v9875_v36 = vld [vmem:[%s11796_s25 + $0x494] ss:$8 sps:$4 sm:$0xff]   ;;  %v9879_v38 = vld [vmem:[%s11796_s25 + $0x490] ss:$8 sps:$4 sm:$0xff]   ;;  %vm8584_vm10 = vmor %vm12503_vm7, %vm12499_vm4 }
 0x12f   : > { %v9877_v37 = vld [vmem:[%s11796_s25 + $0x894] ss:$8 sps:$4 sm:$0xff]   ;;  %v9880_v39 = vld [vmem:[%s11796_s25 + $0x890] ss:$8 sps:$4 sm:$0xff]   ;;  %v9881_v40 = vld [vmem:[%s11796_s25 + $0x4a4] ss:$8 sps:$4 sm:$0xff]  }
 0x130   : > { %5410 = vmatpush1.bf16.msra.mxu1 %v9843_v14  ;;  %s9748_s26 = smul.u32 96, %s4375_s14  ;;  %v9883_v41 = vld [vmem:[%s11796_s25 + $0x8a4] ss:$8 sps:$4 sm:$0xff]   ;;  %v9885_v42 = vld [vmem:[%s11796_s25 + $0x4a0] ss:$8 sps:$4 sm:$0xff]   ;;  %p4381_p1 = scmp.lt.s32.totalorder %s12462_s6, 3 }
 0x131   : > { %7259 = vmatpush1.bf16.msra.mxu0 %v9844_v15  ;;  %5411 = vmatprep.subr.bf16.mxu1 %v9845_v16  ;;  %v9886_v43 = vld [vmem:[%s11796_s25 + $0x8a0] ss:$8 sps:$4 sm:$0xff]   ;;  %v9887_v44 = vld [vmem:[%s11796_s25 + $0x4b4] ss:$8 sps:$4 sm:$0xff]   ;;  %v9891_v46 = vld [vmem:[%s11796_s25 + $0x4b0] ss:$8 sps:$4 sm:$0xff]  }
 0x132   : > { %7260 = vmatprep.subr.bf16.mxu0 %v9847_v17  ;;  %s11847_s5 = scalar_lea.vmem %s12545_s0, %s9748_s26  ;;  %v9889_v45 = vld [vmem:[%s11796_s25 + $0x8b4] ss:$8 sps:$4 sm:$0xff]   ;;  %v9892_v47 = vld [vmem:[%s11796_s25 + $0x8b0] ss:$8 sps:$4 sm:$0xff]   ;;  %v9893_v50 = vld [vmem:[%s11796_s25 + $0x4c4] ss:$8 sps:$4 sm:$0xff]  }
 0x133   : > { %v4522_v48 = vld [vmem:[%s11847_s5] sm:$0xee]  ;;  %v9899_v60 = vld [vmem:[%s11796_s25 + $0x4d4] ss:$8 sps:$4 sm:$0xff]   ;;  %v9903_v2 = vld [vmem:[%s11796_s25 + $0x4d0] ss:$8 sps:$4 sm:$0xff]  }
 0x134   : > { %5412 = vmatpush1.bf16.msra.mxu1 %v9849_v18  ;;  %v4526_v49 = vld [vmem:[%s11847_s5 + $0x20] sm:$0x33]  ;;  %v6427_v53 = vld [vmem:[%s11847_s5] sm:$0x88]  ;;  %v9901_v0 = vld [vmem:[%s11796_s25 + $0x8d4] ss:$8 sps:$4 sm:$0xff]  }
 0x135   : > { %7261 = vmatpush1.bf16.msra.mxu0 %v9850_v19  ;;  %5413 = vmatprep.subr.bf16.mxu1 %v9851_v20  ;;  %v9895_v51 = vld [vmem:[%s11796_s25 + $0x8c4] ss:$8 sps:$4 sm:$0xff]   ;;  %v8878_v52 = vcombine.high %v4522_v48, %v4526_v49  ;;  %v9897_v55 = vld [vmem:[%s11796_s25 + $0x4c0] ss:$8 sps:$4 sm:$0xff]   ;;  %v8877_v3 = vcombine.low %v4522_v48, %v4526_v49  ;;  %v9904_v4 = vld [vmem:[%s11796_s25 + $0x8d0] ss:$8 sps:$4 sm:$0xff]  }
 0x136   : > { %7262 = vmatprep.subr.bf16.mxu0 %v9853_v21  ;;  %v6431_v54 = vld [vmem:[%s11847_s5 + $0x20] sm:$0xff]  ;;  %v9911_v11 = vld [vmem:[%s11796_s25 + $0x4f4] ss:$8 sps:$4 sm:$0xff]   ;;  %v9915_v13 = vld [vmem:[%s11796_s25 + $0x4f0] ss:$8 sps:$4 sm:$0xff]   ;;  %s4382_s7 = scalar_select %p4381_p1, %s12462_s6, 3 }
 0x137   : > { %v4700_v56 = vshrl.u32 %v8878_v52, 16  ;;  %v4703_v57 = vshll.u32 %v8878_v52, 16  ;;  %v9278_v58 = vcombine.high %v6427_v53, %v6431_v54  ;;  %v9898_v59 = vld [vmem:[%s11796_s25 + $0x8c0] ss:$8 sps:$4 sm:$0xff]   ;;  %v9905_v5 = vld [vmem:[%s11796_s25 + $0x4e4] ss:$8 sps:$4 sm:$0xff]   ;;  %v9277_v14 = vcombine.low %v6427_v53, %v6431_v54 }
 0x138   : > { %5414 = vmatpush1.bf16.msra.mxu1 %v9855_v22  ;;  %v9907_v6 = vld [vmem:[%s11796_s25 + $0x8e4] ss:$8 sps:$4 sm:$0xff]   ;;  %v9909_v7 = vld [vmem:[%s11796_s25 + $0x4e0] ss:$8 sps:$4 sm:$0xff]   ;;  %v4692_v8 = vshrl.u32 %v8877_v3, 16  ;;  %v4695_v9 = vshll.u32 %v8877_v3, 16  ;;  %s4383_s10 = scalar_lea.vmem %s12547_s2, %s4382_s7 }
 0x139   : > { %7263 = vmatpush1.bf16.msra.mxu0 %v9856_v23  ;;  %5415 = vmatprep.subr.bf16.mxu1 %v9857_v24  ;;  %v4702_v61 = vrot.slane %v4700_v56, 1  ;;  %v4705_v62 = vrot.slane %v4703_v57, 2  ;;  %v6597_v63 = vrot.slane %v9278_v58, 3  ;;  %v9910_v10 = vld [vmem:[%s11796_s25 + $0x8e0] ss:$8 sps:$4 sm:$0xff]   ;;  %v6596_v21 = vrot.slane %v9277_v14, 3 }
 0x13a   : > { %7264 = vmatprep.subr.bf16.mxu0 %v9859_v25  ;;  %v9913_v12 = vld [vmem:[%s11796_s25 + $0x8f4] ss:$8 sps:$4 sm:$0xff]   ;;  %v4694_v15 = vrot.slane %v4692_v8, 1  ;;  %v4697_v16 = vrot.slane %v4695_v9, 2  ;;  %v9916_v17 = vld [vmem:[%s11796_s25 + $0x8f0] ss:$8 sps:$4 sm:$0xff]  }
 0x13b   : > { %v4706_v1 = vor.u32 %v4705_v62, %v4702_v61  ;;  %7284 = vmatprep.mubr.bf16.mxu0 %v6597_v63  ;;  %v9919_v18 = vld [vmem:[%s11796_s25 + $0x504] ss:$8 sps:$4 sm:$0xff]   ;;  %v9917_v20 = vld [vmem:[%s11796_s25 + $0x500] ss:$8 sps:$4 sm:$0xff]   ;;  %v9925_v24 = vld [vmem:[%s11796_s25 + $0x514] ss:$8 sps:$4 sm:$0xff]  }
 0x13c   : > { %5416 = vmatpush1.bf16.msra.mxu1 %v9861_v26  ;;  %v9922_v19 = vld [vmem:[%s11796_s25 + $0x904] ss:$8 sps:$4 sm:$0xff]   ;;  %v4698_v22 = vor.u32 %v4697_v16, %v4694_v15  ;;  %v9920_v23 = vld [vmem:[%s11796_s25 + $0x900] ss:$8 sps:$4 sm:$0xff]   ;;  %v9928_v25 = vld [vmem:[%s11796_s25 + $0x914] ss:$8 sps:$4 sm:$0xff]  }
 0x13d   : > { %7265 = vmatpush1.bf16.msra.mxu0 %v9862_v27  ;;  %5417 = vmatprep.subr.bf16.mxu1 %v9863_v28  ;;  %v9923_v26 = vld [vmem:[%s11796_s25 + $0x510] ss:$8 sps:$4 sm:$0xff]   ;;  %v9931_v28 = vld [vmem:[%s11796_s25 + $0x524] ss:$8 sps:$4 sm:$0xff]   ;;  %v9968_v3 = vld [vmem:[%s11796_s25 + $0x980] ss:$8 sps:$4 sm:$0xff]  }
 0x13e   : > { %7266 = vmatprep.subr.bf16.mxu0 %v9865_v29  ;;  %5435 = vmatprep.mubr.bf16.mxu1 %v4706_v1  ;;  %v9926_v27 = vld [vmem:[%s11796_s25 + $0x910] ss:$8 sps:$4 sm:$0xff]   ;;  %v9934_v29 = vld [vmem:[%s11796_s25 + $0x924] ss:$8 sps:$4 sm:$0xff]   ;;  %s4371_s16 = sand.u32 1, %s10631_s12   ;;  %s9681_s21 = sshll.u32 (%p10752_p9), %s10651_s17, 3 }
 0x13f   : > { %v11902_v48 = vld [vmem:[%s11847_s5 + $0x8] sm:$0xee]  ;;  %v9962_v56 = vld [vmem:[%s11796_s25 + $0x970] ss:$8 sps:$4 sm:$0xff]   ;;  %s8746_s11 = sshll.u32 %s4371_s16, 4  ;;  %s8597_s24 = sadd.s32 (%p10752_p9), %s9681_s21, %s12462_s6 }
 0x140   : > { %5418 = vmatpush1.bf16.msra.mxu1 %v9867_v30  ;;  %v9929_v30 = vld [vmem:[%s11796_s25 + $0x520] ss:$8 sps:$4 sm:$0xff]   ;;  %v9970_v61 = vld [vmem:[%s11796_s25 + $0x984] ss:$8 sps:$4 sm:$0xff]   ;;  %v9983_v14 = vld [vmem:[%s11796_s25 + $0x5b0] ss:$8 sps:$4 sm:$0xff]  }
 0x141   : > { %7267 = vmatpush1.bf16.msra.mxu0 %v9868_v31  ;;  %5419 = vmatprep.subr.bf16.mxu1 %v9869_v32  ;;  %v9932_v31 = vld [vmem:[%s11796_s25 + $0x920] ss:$8 sps:$4 sm:$0xff]   ;;  %v9937_v32 = vld [vmem:[%s11796_s25 + $0x534] ss:$8 sps:$4 sm:$0xff]   ;;  %v9979_v8 = vld [vmem:[%s11796_s25 + $0x5a4] ss:$8 sps:$4 sm:$0xff]  }
 0x142   : > { %7268 = vmatprep.subr.bf16.mxu0 %v9871_v33  ;;  %v9940_v33 = vld [vmem:[%s11796_s25 + $0x934] ss:$8 sps:$4 sm:$0xff]   ;;  %v11905_v49 = vld [vmem:[%s11847_s5 + $0x28] sm:$0x33]  ;;  %v11912_v53 = vld [vmem:[%s11847_s5 + $0x8] sm:$0x88] }
 0x143   : > { %v8880_v52 = vcombine.high %v11902_v48, %v11905_v49  ;;  %v11915_v54 = vld [vmem:[%s11847_s5 + $0x28] sm:$0xff]  ;;  %v9986_v15 = vld [vmem:[%s11796_s25 + $0x9b0] ss:$8 sps:$4 sm:$0xff]   ;;  %s4373_s12 = scalar_lea.vmem [#allocation3], %s8746_s11 }
 0x144   : > { %5420 = vmatpush1.bf16.msra.mxu1 %v9873_v34  ;;  %v9935_v34 = vld [vmem:[%s11796_s25 + $0x530] ss:$8 sps:$4 sm:$0xff]   ;;  %v9982_v9 = vld [vmem:[%s11796_s25 + $0x9a4] ss:$8 sps:$4 sm:$0xff]  }
 0x145   : > { %7269 = vmatpush1.bf16.msra.mxu0 %v9874_v35  ;;  %5421 = vmatprep.subr.bf16.mxu1 %v9875_v36  ;;  %v9938_v35 = vld [vmem:[%s11796_s25 + $0x930] ss:$8 sps:$4 sm:$0xff]   ;;  %v9943_v36 = vld [vmem:[%s11796_s25 + $0x544] ss:$8 sps:$4 sm:$0xff]   ;;  %v4716_v57 = vshrl.u32 %v8880_v52, 16  ;;  %v4719_v58 = vshll.u32 %v8880_v52, 16 }
 0x146   : > { %7270 = vmatprep.subr.bf16.mxu0 %v9877_v37  ;;  %v9946_v37 = vld [vmem:[%s11796_s25 + $0x944] ss:$8 sps:$4 sm:$0xff]   ;;  %v10025_v52 = vld [vmem:[%s11796_s25 + $0x620] ss:$8 sps:$4 sm:$0xff]  }
 0x147   : > { %v4718_v62 = vrot.slane %v4716_v57, 1  ;;  %v4721_v63 = vrot.slane %v4719_v58, 2  ;;  %v9991_v16 = vld [vmem:[%s11796_s25 + $0x5c4] ss:$8 sps:$4 sm:$0xff]   ;;  %v10033_v57 = vld [vmem:[%s11796_s25 + $0x634] ss:$8 sps:$4 sm:$0xff]  }
 0x148   : > { %5422 = vmatpush1.bf16.msra.mxu1 %v9879_v38  ;;  %v9941_v38 = vld [vmem:[%s11796_s25 + $0x540] ss:$8 sps:$4 sm:$0xff]  }
 0x149   : > { %7271 = vmatpush1.bf16.msra.mxu0 %v9880_v39  ;;  %5423 = vmatprep.subr.bf16.mxu1 %v9881_v40  ;;  %v9944_v39 = vld [vmem:[%s11796_s25 + $0x940] ss:$8 sps:$4 sm:$0xff]   ;;  %v9949_v40 = vld [vmem:[%s11796_s25 + $0x554] ss:$8 sps:$4 sm:$0xff]   ;;  %v4722_v1 = vor.u32 %v4721_v63, %v4718_v62 }
 0x14a   : > { %7272 = vmatprep.subr.bf16.mxu0 %v9883_v41  ;;  %v9952_v41 = vld [vmem:[%s11796_s25 + $0x954] ss:$8 sps:$4 sm:$0xff]  }
 0x14c   : > { %5424 = vmatpush1.bf16.msra.mxu1 %v9885_v42  ;;  %v9947_v42 = vld [vmem:[%s11796_s25 + $0x550] ss:$8 sps:$4 sm:$0xff]  }
 0x14d   : > { %7273 = vmatpush1.bf16.msra.mxu0 %v9886_v43  ;;  %5425 = vmatprep.subr.bf16.mxu1 %v9887_v44  ;;  %v9950_v43 = vld [vmem:[%s11796_s25 + $0x950] ss:$8 sps:$4 sm:$0xff]   ;;  %v9955_v44 = vld [vmem:[%s11796_s25 + $0x564] ss:$8 sps:$4 sm:$0xff]  }
 0x14e   : > { %7274 = vmatprep.subr.bf16.mxu0 %v9889_v45  ;;  %v9958_v45 = vld [vmem:[%s11796_s25 + $0x964] ss:$8 sps:$4 sm:$0xff]  }
 0x150   : > { %5426 = vmatpush1.bf16.msra.mxu1 %v9891_v46  ;;  %v9953_v46 = vld [vmem:[%s11796_s25 + $0x560] ss:$8 sps:$4 sm:$0xff]  }
 0x151   : > { %7275 = vmatpush1.bf16.msra.mxu0 %v9892_v47  ;;  %5427 = vmatprep.subr.bf16.mxu1 %v9893_v50  ;;  %v9956_v47 = vld [vmem:[%s11796_s25 + $0x960] ss:$8 sps:$4 sm:$0xff]   ;;  %v9961_v50 = vld [vmem:[%s11796_s25 + $0x574] ss:$8 sps:$4 sm:$0xff]  }
 0x152   : > { %7276 = vmatprep.subr.bf16.mxu0 %v9895_v51  ;;  %v9964_v51 = vld [vmem:[%s11796_s25 + $0x974] ss:$8 sps:$4 sm:$0xff]  }
 0x154   : > { %5428 = vmatpush1.bf16.msra.mxu1 %v9897_v55  ;;  %v9959_v55 = vld [vmem:[%s11796_s25 + $0x570] ss:$8 sps:$4 sm:$0xff]  }
 0x155   : > { %7277 = vmatpush1.bf16.msra.mxu0 %v9898_v59  ;;  %5429 = vmatprep.subr.bf16.mxu1 %v9899_v60  ;;  %v9280_v59 = vcombine.high %v11912_v53, %v11915_v54  ;;  %v9967_v60 = vld [vmem:[%s11796_s25 + $0x584] ss:$8 sps:$4 sm:$0xff]  }
 0x156   : > { %7278 = vmatprep.subr.bf16.mxu0 %v9901_v0 }
 0x157   : > { %v6599_v0 = vrot.slane %v9280_v59, 3 }
 0x158   : > { %5430 = vmatpush1.bf16.msra.mxu1 %v9903_v2  ;;  %v9965_v2 = vld [vmem:[%s11796_s25 + $0x580] ss:$8 sps:$4 sm:$0xff]  }
 0x159   : > { %7279 = vmatpush1.bf16.msra.mxu0 %v9904_v4  ;;  %5431 = vmatprep.subr.bf16.mxu1 %v9905_v5  ;;  %v9973_v4 = vld [vmem:[%s11796_s25 + $0x594] ss:$8 sps:$4 sm:$0xff]  }
 0x15a   : > { %7280 = vmatprep.subr.bf16.mxu0 %v9907_v6  ;;  %v9976_v5 = vld [vmem:[%s11796_s25 + $0x994] ss:$8 sps:$4 sm:$0xff]   ;;  %v9971_v6 = vld [vmem:[%s11796_s25 + $0x590] ss:$8 sps:$4 sm:$0xff]  }
 0x15c   : > { %5432 = vmatpush1.bf16.msra.mxu1 %v9909_v7  ;;  %v9974_v7 = vld [vmem:[%s11796_s25 + $0x990] ss:$8 sps:$4 sm:$0xff]  }
 0x15d   : > { %7281 = vmatpush1.bf16.msra.mxu0 %v9910_v10  ;;  %5433 = vmatprep.subr.bf16.mxu1 %v9911_v11  ;;  %v9977_v10 = vld [vmem:[%s11796_s25 + $0x5a0] ss:$8 sps:$4 sm:$0xff]  }
 0x15e   : > { %7282 = vmatprep.subr.bf16.mxu0 %v9913_v12  ;;  %v9980_v11 = vld [vmem:[%s11796_s25 + $0x9a0] ss:$8 sps:$4 sm:$0xff]   ;;  %v9985_v12 = vld [vmem:[%s11796_s25 + $0x5b4] ss:$8 sps:$4 sm:$0xff]  }
 0x160   : > { %5434 = vmatpush1.bf16.msra.mxu1 %v9915_v13  ;;  %v9988_v13 = vld [vmem:[%s11796_s25 + $0x9b4] ss:$8 sps:$4 sm:$0xff]  }
 0x161   : > { %7283 = vmatpush1.bf16.msra.mxu0 %v9916_v17  ;;  %5446 = vmatprep.subr.bf16.mxu1 %v9919_v18  ;;  %v9994_v17 = vld [vmem:[%s11796_s25 + $0x9c4] ss:$8 sps:$4 sm:$0xff]   ;;  %v9989_v18 = vld [vmem:[%s11796_s25 + $0x5c0] ss:$8 sps:$4 sm:$0xff]  }
 0x162   : > { %7295 = vmatprep.subr.bf16.mxu0 %v9922_v19  ;;  %v9992_v19 = vld [vmem:[%s11796_s25 + $0x9c0] ss:$8 sps:$4 sm:$0xff]  }
 0x163   : > { %5436 = vmatmul.mubr.bf16.vlgmr.msra.gmra.mrb[0].mxu1 %v4698_v22  ;;  %v8879_v22 = vcombine.low %v11902_v48, %v11905_v49  ;;  %v10027_v48 = vld [vmem:[%s11796_s25 + $0x624] ss:$8 sps:$4 sm:$0xff]  }
 0x164   : > { %7285 = vmatmul.mubr.bf16.vlgmr.msra.gmra.mrb[0].mxu0 %v6596_v21  ;;  %5447 = vmatpush1.bf16.msra.mxu1 %v9917_v20  ;;  %v9997_v20 = vld [vmem:[%s11796_s25 + $0x5d4] ss:$8 sps:$4 sm:$0xff]   ;;  %v10030_v49 = vld [vmem:[%s11796_s25 + $0xa24] ss:$8 sps:$4 sm:$0xff]  }
 0x165   : > { %7296 = vmatpush1.bf16.msra.mxu0 %v9920_v23  ;;  %5448 = vmatprep.subr.bf16.mxu1 %v9925_v24  ;;  %v10000_v21 = vld [vmem:[%s11796_s25 + $0x9d4] ss:$8 sps:$4 sm:$0xff]   ;;  %v9995_v23 = vld [vmem:[%s11796_s25 + $0x5d0] ss:$8 sps:$4 sm:$0xff]  }
 0x166   : > { %7297 = vmatprep.subr.bf16.mxu0 %v9928_v25  ;;  %7327 = vmatprep.mubr.bf16.mxu0 %v6599_v0  ;;  %v9998_v24 = vld [vmem:[%s11796_s25 + $0x9d0] ss:$8 sps:$4 sm:$0xff]   ;;  %v10003_v25 = vld [vmem:[%s11796_s25 + $0x5e4] ss:$8 sps:$4 sm:$0xff]  }
 0x167   : > { %5478 = vmatprep.mubr.bf16.mxu1 %v4722_v1  ;;  %v10031_v1 = vld [vmem:[%s11796_s25 + $0x630] ss:$8 sps:$4 sm:$0xff]  }
 0x168   : > { %5449 = vmatpush1.bf16.msra.mxu1 %v9923_v26  ;;  %v10006_v26 = vld [vmem:[%s11796_s25 + $0x9e4] ss:$8 sps:$4 sm:$0xff]  }
 0x169   : > { %7298 = vmatpush1.bf16.msra.mxu0 %v9926_v27  ;;  %5450 = vmatprep.subr.bf16.mxu1 %v9931_v28  ;;  %v4708_v27 = vshrl.u32 %v8879_v22, 16  ;;  %v4711_v28 = vshll.u32 %v8879_v22, 16  ;;  %v10061_v22 = vld [vmem:[%s11796_s25 + $0x680] ss:$8 sps:$4 sm:$0xff]  }
 0x16a   : > { %7299 = vmatprep.subr.bf16.mxu0 %v9934_v29  ;;  %v10001_v29 = vld [vmem:[%s11796_s25 + $0x5e0] ss:$8 sps:$4 sm:$0xff]  }
 0x16c   : > { %5451 = vmatpush1.bf16.msra.mxu1 %v9929_v30  ;;  %v10004_v30 = vld [vmem:[%s11796_s25 + $0x9e0] ss:$8 sps:$4 sm:$0xff]  }
 0x16d   : > { %7300 = vmatpush1.bf16.msra.mxu0 %v9932_v31  ;;  %5452 = vmatprep.subr.bf16.mxu1 %v9937_v32  ;;  %v10009_v31 = vld [vmem:[%s11796_s25 + $0x5f4] ss:$8 sps:$4 sm:$0xff]  }
 0x16e   : > { %7301 = vmatprep.subr.bf16.mxu0 %v9940_v33  ;;  %v10012_v32 = vld [vmem:[%s11796_s25 + $0x9f4] ss:$8 sps:$4 sm:$0xff]   ;;  %v9279_v33 = vcombine.low %v11912_v53, %v11915_v54 }
 0x16f   : > { %v11977_v54 = vld [vmem:[%s11847_s5 + $0x10] sm:$0x88] }
 0x170   : > { %5453 = vmatpush1.bf16.msra.mxu1 %v9935_v34  ;;  %v4710_v34 = vrot.slane %v4708_v27, 1  ;;  %v10070_v27 = vld [vmem:[%s11796_s25 + $0xa90] ss:$8 sps:$4 sm:$0xff]  }
 0x171   : > { %7302 = vmatpush1.bf16.msra.mxu0 %v9938_v35  ;;  %5454 = vmatprep.subr.bf16.mxu1 %v9943_v36  ;;  %v4713_v35 = vrot.slane %v4711_v28, 2  ;;  %v10007_v36 = vld [vmem:[%s11796_s25 + $0x5f0] ss:$8 sps:$4 sm:$0xff]   ;;  %v10075_v28 = vld [vmem:[%s11796_s25 + $0x6a4] ss:$8 sps:$4 sm:$0xff]  }
 0x172   : > { %7303 = vmatprep.subr.bf16.mxu0 %v9946_v37  ;;  %v10010_v37 = vld [vmem:[%s11796_s25 + $0x9f0] ss:$8 sps:$4 sm:$0xff]  }
 0x174   : > { %5455 = vmatpush1.bf16.msra.mxu1 %v9941_v38  ;;  %v10015_v38 = vld [vmem:[%s11796_s25 + $0x604] ss:$8 sps:$4 sm:$0xff]  }
 0x175   : > { %7304 = vmatpush1.bf16.msra.mxu0 %v9944_v39  ;;  %5456 = vmatprep.subr.bf16.mxu1 %v9949_v40  ;;  %v10018_v39 = vld [vmem:[%s11796_s25 + $0xa04] ss:$8 sps:$4 sm:$0xff]   ;;  %v6598_v40 = vrot.slane %v9279_v33, 3  ;;  %v10084_v33 = vld [vmem:[%s11796_s25 + $0xab4] ss:$8 sps:$4 sm:$0xff]  }
 0x176   : > { %7305 = vmatprep.subr.bf16.mxu0 %v9952_v41  ;;  %v4714_v41 = vor.u32 %v4713_v35, %v4710_v34  ;;  %v10079_v34 = vld [vmem:[%s11796_s25 + $0x6b0] ss:$8 sps:$4 sm:$0xff]  }
 0x177   : > { %v10082_v35 = vld [vmem:[%s11796_s25 + $0xab0] ss:$8 sps:$4 sm:$0xff]  }
 0x178   : > { %5457 = vmatpush1.bf16.msra.mxu1 %v9947_v42  ;;  %v10013_v42 = vld [vmem:[%s11796_s25 + $0x600] ss:$8 sps:$4 sm:$0xff]  }
 0x179   : > { %7306 = vmatpush1.bf16.msra.mxu0 %v9950_v43  ;;  %5458 = vmatprep.subr.bf16.mxu1 %v9955_v44  ;;  %v10016_v43 = vld [vmem:[%s11796_s25 + $0xa00] ss:$8 sps:$4 sm:$0xff]   ;;  %v10021_v44 = vld [vmem:[%s11796_s25 + $0x614] ss:$8 sps:$4 sm:$0xff]  }
 0x17a   : > { %7307 = vmatprep.subr.bf16.mxu0 %v9958_v45  ;;  %v10024_v45 = vld [vmem:[%s11796_s25 + $0xa14] ss:$8 sps:$4 sm:$0xff]  }
 0x17c   : > { %5459 = vmatpush1.bf16.msra.mxu1 %v9953_v46  ;;  %v10019_v46 = vld [vmem:[%s11796_s25 + $0x610] ss:$8 sps:$4 sm:$0xff]  }
 0x17d   : > { %7308 = vmatpush1.bf16.msra.mxu0 %v9956_v47  ;;  %5460 = vmatprep.subr.bf16.mxu1 %v9961_v50  ;;  %v10022_v47 = vld [vmem:[%s11796_s25 + $0xa10] ss:$8 sps:$4 sm:$0xff]  }
 0x17e   : > { %7309 = vmatprep.subr.bf16.mxu0 %v9964_v51  ;;  %v11968_v50 = vld [vmem:[%s11847_s5 + $0x10] sm:$0xee] }
 0x17f   : > { %v11971_v51 = vld [vmem:[%s11847_s5 + $0x30] sm:$0x33] }
 0x180   : > { %5461 = vmatpush1.bf16.msra.mxu1 %v9959_v55  ;;  %v8882_v53 = vcombine.high %v11968_v50, %v11971_v51  ;;  %v11980_v55 = vld [vmem:[%s11847_s5 + $0x30] sm:$0xff] }
 0x181   : > { %7310 = vmatpush1.bf16.msra.mxu0 %v9962_v56  ;;  %5462 = vmatprep.subr.bf16.mxu1 %v9967_v60  ;;  %v10028_v56 = vld [vmem:[%s11796_s25 + $0xa20] ss:$8 sps:$4 sm:$0xff]   ;;  %v9282_v60 = vcombine.high %v11977_v54, %v11980_v55 }
 0x182   : > { %7311 = vmatprep.subr.bf16.mxu0 %v9970_v61  ;;  %v4732_v58 = vshrl.u32 %v8882_v53, 16  ;;  %v4735_v59 = vshll.u32 %v8882_v53, 16  ;;  %v10036_v61 = vld [vmem:[%s11796_s25 + $0xa34] ss:$8 sps:$4 sm:$0xff]  }
 0x183   : > { %v6601_v0 = vrot.slane %v9282_v60, 3 }
 0x184   : > { %5463 = vmatpush1.bf16.msra.mxu1 %v9965_v2  ;;  %v4734_v62 = vrot.slane %v4732_v58, 1  ;;  %v4737_v63 = vrot.slane %v4735_v59, 2  ;;  %v10034_v2 = vld [vmem:[%s11796_s25 + $0xa30] ss:$8 sps:$4 sm:$0xff]  }
 0x185   : > { %7312 = vmatpush1.bf16.msra.mxu0 %v9968_v3  ;;  %5464 = vmatprep.subr.bf16.mxu1 %v9973_v4  ;;  %v10039_v4 = vld [vmem:[%s11796_s25 + $0x644] ss:$8 sps:$4 sm:$0xff]   ;;  %v10103_v58 = vld [vmem:[%s11796_s25 + $0x6f0] ss:$8 sps:$4 sm:$0xff]  }
 0x186   : > { %7313 = vmatprep.subr.bf16.mxu0 %v9976_v5  ;;  %v4738_v3 = vor.u32 %v4737_v63, %v4734_v62  ;;  %v10042_v5 = vld [vmem:[%s11796_s25 + $0xa44] ss:$8 sps:$4 sm:$0xff]   ;;  %v10106_v59 = vld [vmem:[%s11796_s25 + $0xaf0] ss:$8 sps:$4 sm:$0xff]   ;;  %v9281_v62 = vcombine.low %v11977_v54, %v11980_v55  ;;  %v10109_v55 = vld [vmem:[%s11796_s25 + $0x700] ss:$8 sps:$4 sm:$0xff]  }
 0x188   : > { %5465 = vmatpush1.bf16.msra.mxu1 %v9971_v6  ;;  %v10037_v6 = vld [vmem:[%s11796_s25 + $0x640] ss:$8 sps:$4 sm:$0xff]  }
 0x189   : > { %7314 = vmatpush1.bf16.msra.mxu0 %v9974_v7  ;;  %5466 = vmatprep.subr.bf16.mxu1 %v9979_v8  ;;  %v10040_v7 = vld [vmem:[%s11796_s25 + $0xa40] ss:$8 sps:$4 sm:$0xff]   ;;  %v10045_v8 = vld [vmem:[%s11796_s25 + $0x654] ss:$8 sps:$4 sm:$0xff]  }
 0x18a   : > { %7315 = vmatprep.subr.bf16.mxu0 %v9982_v9  ;;  %v10048_v9 = vld [vmem:[%s11796_s25 + $0xa54] ss:$8 sps:$4 sm:$0xff]  }
 0x18c   : > { %5467 = vmatpush1.bf16.msra.mxu1 %v9977_v10  ;;  %v10043_v10 = vld [vmem:[%s11796_s25 + $0x650] ss:$8 sps:$4 sm:$0xff]  }
 0x18d   : > { %7316 = vmatpush1.bf16.msra.mxu0 %v9980_v11  ;;  %5468 = vmatprep.subr.bf16.mxu1 %v9985_v12  ;;  %v10046_v11 = vld [vmem:[%s11796_s25 + $0xa50] ss:$8 sps:$4 sm:$0xff]   ;;  %v10051_v12 = vld [vmem:[%s11796_s25 + $0x664] ss:$8 sps:$4 sm:$0xff]  }
 0x18e   : > { %7317 = vmatprep.subr.bf16.mxu0 %v9988_v13  ;;  %v10054_v13 = vld [vmem:[%s11796_s25 + $0xa64] ss:$8 sps:$4 sm:$0xff]  }
 0x190   : > { %5469 = vmatpush1.bf16.msra.mxu1 %v9983_v14  ;;  %v10049_v14 = vld [vmem:[%s11796_s25 + $0x660] ss:$8 sps:$4 sm:$0xff]  }
 0x191   : > { %7318 = vmatpush1.bf16.msra.mxu0 %v9986_v15  ;;  %5470 = vmatprep.subr.bf16.mxu1 %v9991_v16  ;;  %v10052_v15 = vld [vmem:[%s11796_s25 + $0xa60] ss:$8 sps:$4 sm:$0xff]   ;;  %v10057_v16 = vld [vmem:[%s11796_s25 + $0x674] ss:$8 sps:$4 sm:$0xff]  }
 0x192   : > { %7319 = vmatprep.subr.bf16.mxu0 %v9994_v17  ;;  %v10060_v17 = vld [vmem:[%s11796_s25 + $0xa74] ss:$8 sps:$4 sm:$0xff]  }
 0x194   : > { %5471 = vmatpush1.bf16.msra.mxu1 %v9989_v18  ;;  %v10055_v18 = vld [vmem:[%s11796_s25 + $0x670] ss:$8 sps:$4 sm:$0xff]  }
 0x195   : > { %7320 = vmatpush1.bf16.msra.mxu0 %v9992_v19  ;;  %5472 = vmatprep.subr.bf16.mxu1 %v9997_v20  ;;  %v10058_v19 = vld [vmem:[%s11796_s25 + $0xa70] ss:$8 sps:$4 sm:$0xff]   ;;  %v10063_v20 = vld [vmem:[%s11796_s25 + $0x684] ss:$8 sps:$4 sm:$0xff]  }
 0x196   : > { %7321 = vmatprep.subr.bf16.mxu0 %v10000_v21  ;;  %v10066_v21 = vld [vmem:[%s11796_s25 + $0xa84] ss:$8 sps:$4 sm:$0xff]  }
 0x198   : > { %5473 = vmatpush1.bf16.msra.mxu1 %v9995_v23  ;;  %v10064_v23 = vld [vmem:[%s11796_s25 + $0xa80] ss:$8 sps:$4 sm:$0xff]  }
 0x199   : > { %7322 = vmatpush1.bf16.msra.mxu0 %v9998_v24  ;;  %5474 = vmatprep.subr.bf16.mxu1 %v10003_v25  ;;  %v10069_v24 = vld [vmem:[%s11796_s25 + $0x694] ss:$8 sps:$4 sm:$0xff]  }
 0x19a   : > { %7323 = vmatprep.subr.bf16.mxu0 %v10006_v26  ;;  %v10072_v25 = vld [vmem:[%s11796_s25 + $0xa94] ss:$8 sps:$4 sm:$0xff]   ;;  %v10067_v26 = vld [vmem:[%s11796_s25 + $0x690] ss:$8 sps:$4 sm:$0xff]  }
 0x19c   : > { %5475 = vmatpush1.bf16.msra.mxu1 %v10001_v29  ;;  %v10078_v29 = vld [vmem:[%s11796_s25 + $0xaa4] ss:$8 sps:$4 sm:$0xff]  }
 0x19d   : > { %7324 = vmatpush1.bf16.msra.mxu0 %v10004_v30  ;;  %5476 = vmatprep.subr.bf16.mxu1 %v10009_v31  ;;  %v10073_v30 = vld [vmem:[%s11796_s25 + $0x6a0] ss:$8 sps:$4 sm:$0xff]  }
 0x19e   : > { %7325 = vmatprep.subr.bf16.mxu0 %v10012_v32  ;;  %v10076_v31 = vld [vmem:[%s11796_s25 + $0xaa0] ss:$8 sps:$4 sm:$0xff]   ;;  %v10081_v32 = vld [vmem:[%s11796_s25 + $0x6b4] ss:$8 sps:$4 sm:$0xff]  }
 0x1a0   : > { %5477 = vmatpush1.bf16.msra.mxu1 %v10007_v36  ;;  %v10087_v36 = vld [vmem:[%s11796_s25 + $0x6c4] ss:$8 sps:$4 sm:$0xff]  }
 0x1a1   : > { %7326 = vmatpush1.bf16.msra.mxu0 %v10010_v37  ;;  %5489 = vmatprep.subr.bf16.mxu1 %v10015_v38  ;;  %v10090_v37 = vld [vmem:[%s11796_s25 + $0xac4] ss:$8 sps:$4 sm:$0xff]   ;;  %v10085_v38 = vld [vmem:[%s11796_s25 + $0x6c0] ss:$8 sps:$4 sm:$0xff]  }
 0x1a2   : > { %7338 = vmatprep.subr.bf16.mxu0 %v10018_v39  ;;  %v10088_v39 = vld [vmem:[%s11796_s25 + $0xac0] ss:$8 sps:$4 sm:$0xff]  }
 0x1a3   : > { %5479 = vmatmul.mubr.bf16.vlgmr.msra.gmra.mrb[0].mxu1 %v4714_v41  ;;  %v10096_v41 = vld [vmem:[%s11796_s25 + $0xad4] ss:$8 sps:$4 sm:$0xff]  }
 0x1a4   : > { %7328 = vmatmul.mubr.bf16.vlgmr.msra.gmra.mrb[0].mxu0 %v6598_v40  ;;  %5490 = vmatpush1.bf16.msra.mxu1 %v10013_v42  ;;  %v10093_v40 = vld [vmem:[%s11796_s25 + $0x6d4] ss:$8 sps:$4 sm:$0xff]   ;;  %v10091_v42 = vld [vmem:[%s11796_s25 + $0x6d0] ss:$8 sps:$4 sm:$0xff]  }
 0x1a5   : > { %7339 = vmatpush1.bf16.msra.mxu0 %v10016_v43  ;;  %5491 = vmatprep.subr.bf16.mxu1 %v10021_v44  ;;  %v8881_v43 = vcombine.low %v11968_v50, %v11971_v51  ;;  %v12031_v44 = vld [vmem:[%s11847_s5 + $0x18] sm:$0xee]  ;;  %v10100_v50 = vld [vmem:[%s11796_s25 + $0xae0] ss:$8 sps:$4 sm:$0xff]  }
 0x1a6   : > { %7340 = vmatprep.subr.bf16.mxu0 %v10024_v45  ;;  %5521 = vmatprep.mubr.bf16.mxu1 %v4738_v3  ;;  %v12034_v45 = vld [vmem:[%s11847_s5 + $0x38] sm:$0x33]  ;;  %v10111_v3 = vld [vmem:[%s11796_s25 + $0x704] ss:$8 sps:$4 sm:$0xff]  }
 0x1a7   : > { %7370 = vmatprep.mubr.bf16.mxu0 %v6601_v0  ;;  %v4724_v51 = vshrl.u32 %v8881_v43, 16  ;;  %v4727_v53 = vshll.u32 %v8881_v43, 16  ;;  %v10160_v43 = vld [vmem:[%s11796_s25 + $0xb80] ss:$8 sps:$4 sm:$0xff]  }
 0x1a8   : > { %5492 = vmatpush1.bf16.msra.mxu1 %v10019_v46  ;;  %v10094_v46 = vld [vmem:[%s11796_s25 + $0xad0] ss:$8 sps:$4 sm:$0xff]  }
 0x1a9   : > { %7341 = vmatpush1.bf16.msra.mxu0 %v10022_v47  ;;  %5493 = vmatprep.subr.bf16.mxu1 %v10027_v48  ;;  %v10099_v47 = vld [vmem:[%s11796_s25 + $0x6e4] ss:$8 sps:$4 sm:$0xff]   ;;  %v4726_v63 = vrot.slane %v4724_v51, 1  ;;  %v4729_v0 = vrot.slane %v4727_v53, 2  ;;  %v10169_v51 = vld [vmem:[%s11796_s25 + $0x7a0] ss:$8 sps:$4 sm:$0xff]  }
 0x1aa   : > { %7342 = vmatprep.subr.bf16.mxu0 %v10030_v49  ;;  %v10102_v48 = vld [vmem:[%s11796_s25 + $0xae4] ss:$8 sps:$4 sm:$0xff]   ;;  %v8884_v49 = vcombine.high %v12031_v44, %v12034_v45  ;;  %v10172_v53 = vld [vmem:[%s11796_s25 + $0xba0] ss:$8 sps:$4 sm:$0xff]  }
 0x1ac   : > { %5494 = vmatpush1.bf16.msra.mxu1 %v10025_v52  ;;  %v10097_v52 = vld [vmem:[%s11796_s25 + $0x6e0] ss:$8 sps:$4 sm:$0xff]   ;;  %v4748_v60 = vshrl.u32 %v8884_v49, 16 }
 0x1ad   : > { %7343 = vmatpush1.bf16.msra.mxu0 %v10028_v56  ;;  %5495 = vmatprep.subr.bf16.mxu1 %v10033_v57  ;;  %v10105_v56 = vld [vmem:[%s11796_s25 + $0x6f4] ss:$8 sps:$4 sm:$0xff]  }
 0x1ae   : > { %7344 = vmatprep.subr.bf16.mxu0 %v10036_v61  ;;  %v10108_v57 = vld [vmem:[%s11796_s25 + $0xaf4] ss:$8 sps:$4 sm:$0xff]   ;;  %v4751_v61 = vshll.u32 %v8884_v49, 16  ;;  %v10166_v49 = vld [vmem:[%s11796_s25 + $0xb90] ss:$8 sps:$4 sm:$0xff]  }
 0x1b0   : > { %5496 = vmatpush1.bf16.msra.mxu1 %v10031_v1  ;;  %v12050_v1 = vld [vmem:[%s11847_s5 + $0x18] sm:$0x88] }
 0x1b1   : > { %7345 = vmatpush1.bf16.msra.mxu0 %v10034_v2  ;;  %5497 = vmatprep.subr.bf16.mxu1 %v10039_v4  ;;  %v12053_v2 = vld [vmem:[%s11847_s5 + $0x38] sm:$0xff]  ;;  %v10114_v4 = vld [vmem:[%s11796_s25 + $0xb04] ss:$8 sps:$4 sm:$0xff]  }
 0x1b2   : > { %7346 = vmatprep.subr.bf16.mxu0 %v10042_v5  ;;  %v4750_v5 = vrot.slane %v4748_v60, 1  ;;  %v9284_v54 = vcombine.high %v12050_v1, %v12053_v2  ;;  %v10183_v60 = vld [vmem:[%s11796_s25 + $0x7c4] ss:$8 sps:$4 sm:$0xff]  }
 0x1b4   : > { %5498 = vmatpush1.bf16.msra.mxu1 %v10037_v6  ;;  %v4753_v6 = vrot.slane %v4751_v61, 2  ;;  %v10186_v61 = vld [vmem:[%s11796_s25 + $0xbc4] ss:$8 sps:$4 sm:$0xff]  }
 0x1b5   : > { %7347 = vmatpush1.bf16.msra.mxu0 %v10040_v7  ;;  %5499 = vmatprep.subr.bf16.mxu1 %v10045_v8  ;;  %v6600_v7 = vrot.slane %v9281_v62, 3  ;;  %v10112_v8 = vld [vmem:[%s11796_s25 + $0xb00] ss:$8 sps:$4 sm:$0xff]  }
 0x1b6   : > { %7348 = vmatprep.subr.bf16.mxu0 %v10048_v9  ;;  %v4730_v9 = vor.u32 %v4729_v0, %v4726_v63  ;;  %v10181_v62 = vld [vmem:[%s11796_s25 + $0x7c0] ss:$8 sps:$4 sm:$0xff]   ;;  %v10189_v0 = vld [vmem:[%s11796_s25 + $0x7d4] ss:$8 sps:$4 sm:$0xff]  }
 0x1b7   : > { %v10184_v63 = vld [vmem:[%s11796_s25 + $0xbc0] ss:$8 sps:$4 sm:$0xff]  }
 0x1b8   : > { %5500 = vmatpush1.bf16.msra.mxu1 %v10043_v10  ;;  %v10117_v10 = vld [vmem:[%s11796_s25 + $0x714] ss:$8 sps:$4 sm:$0xff]  }
 0x1b9   : > { %7349 = vmatpush1.bf16.msra.mxu0 %v10046_v11  ;;  %5501 = vmatprep.subr.bf16.mxu1 %v10051_v12  ;;  %v10120_v11 = vld [vmem:[%s11796_s25 + $0xb14] ss:$8 sps:$4 sm:$0xff]   ;;  %v4754_v12 = vor.u32 %v4753_v6, %v4750_v5  ;;  %v12113_v5 = vld [vmem:[%s11847_s5 + $0x20] sm:$0xff]  ;;  %v8883_v6 = vcombine.low %v12031_v44, %v12034_v45 }
 0x1ba   : > { %7350 = vmatprep.subr.bf16.mxu0 %v10054_v13  ;;  %v6603_v13 = vrot.slane %v9284_v54, 3  ;;  %v12118_v54 = vld [vmem:[%s11847_s5 + $0x40] sm:$0x11]  ;;  %v10201_v45 = vld [vmem:[%s11796_s25 + $0x7f4] ss:$8 sps:$4 sm:$0xff]  }
 0x1bb   : > { %v10196_v44 = vld [vmem:[%s11796_s25 + $0xbe0] ss:$8 sps:$4 sm:$0xff]  }
 0x1bc   : > { %5502 = vmatpush1.bf16.msra.mxu1 %v10049_v14  ;;  %v10115_v14 = vld [vmem:[%s11796_s25 + $0x710] ss:$8 sps:$4 sm:$0xff]  }
 0x1bd   : > { %7351 = vmatpush1.bf16.msra.mxu0 %v10052_v15  ;;  %5503 = vmatprep.subr.bf16.mxu1 %v10057_v16  ;;  %v10118_v15 = vld [vmem:[%s11796_s25 + $0xb10] ss:$8 sps:$4 sm:$0xff]   ;;  %v10123_v16 = vld [vmem:[%s11796_s25 + $0x724] ss:$8 sps:$4 sm:$0xff]  }
 0x1be   : > { %7352 = vmatprep.subr.bf16.mxu0 %v10060_v17  ;;  %v10126_v17 = vld [vmem:[%s11796_s25 + $0xb24] ss:$8 sps:$4 sm:$0xff]  }
 0x1c0   : > { %5504 = vmatpush1.bf16.msra.mxu1 %v10055_v18  ;;  %v10121_v18 = vld [vmem:[%s11796_s25 + $0x720] ss:$8 sps:$4 sm:$0xff]  }
 0x1c1   : > { %7353 = vmatpush1.bf16.msra.mxu0 %v10058_v19  ;;  %5505 = vmatprep.subr.bf16.mxu1 %v10063_v20  ;;  %v10124_v19 = vld [vmem:[%s11796_s25 + $0xb20] ss:$8 sps:$4 sm:$0xff]   ;;  %v10129_v20 = vld [vmem:[%s11796_s25 + $0x734] ss:$8 sps:$4 sm:$0xff]  }
 0x1c2   : > { %7354 = vmatprep.subr.bf16.mxu0 %v10066_v21  ;;  %v10132_v21 = vld [vmem:[%s11796_s25 + $0xb34] ss:$8 sps:$4 sm:$0xff]  }
 0x1c4   : > { %5506 = vmatpush1.bf16.msra.mxu1 %v10061_v22  ;;  %v10127_v22 = vld [vmem:[%s11796_s25 + $0x730] ss:$8 sps:$4 sm:$0xff]  }
 0x1c5   : > { %7355 = vmatpush1.bf16.msra.mxu0 %v10064_v23  ;;  %5507 = vmatprep.subr.bf16.mxu1 %v10069_v24  ;;  %v10130_v23 = vld [vmem:[%s11796_s25 + $0xb30] ss:$8 sps:$4 sm:$0xff]   ;;  %v10135_v24 = vld [vmem:[%s11796_s25 + $0x744] ss:$8 sps:$4 sm:$0xff]  }
 0x1c6   : > { %7356 = vmatprep.subr.bf16.mxu0 %v10072_v25  ;;  %v10138_v25 = vld [vmem:[%s11796_s25 + $0xb44] ss:$8 sps:$4 sm:$0xff]  }
 0x1c8   : > { %5508 = vmatpush1.bf16.msra.mxu1 %v10067_v26  ;;  %v10133_v26 = vld [vmem:[%s11796_s25 + $0x740] ss:$8 sps:$4 sm:$0xff]  }
 0x1c9   : > { %7357 = vmatpush1.bf16.msra.mxu0 %v10070_v27  ;;  %5509 = vmatprep.subr.bf16.mxu1 %v10075_v28  ;;  %v10136_v27 = vld [vmem:[%s11796_s25 + $0xb40] ss:$8 sps:$4 sm:$0xff]   ;;  %v10141_v28 = vld [vmem:[%s11796_s25 + $0x754] ss:$8 sps:$4 sm:$0xff]  }
 0x1ca   : > { %7358 = vmatprep.subr.bf16.mxu0 %v10078_v29  ;;  %v10144_v29 = vld [vmem:[%s11796_s25 + $0xb54] ss:$8 sps:$4 sm:$0xff]  }
 0x1cc   : > { %5510 = vmatpush1.bf16.msra.mxu1 %v10073_v30  ;;  %v10139_v30 = vld [vmem:[%s11796_s25 + $0x750] ss:$8 sps:$4 sm:$0xff]  }
 0x1cd   : > { %7359 = vmatpush1.bf16.msra.mxu0 %v10076_v31  ;;  %5511 = vmatprep.subr.bf16.mxu1 %v10081_v32  ;;  %v10142_v31 = vld [vmem:[%s11796_s25 + $0xb50] ss:$8 sps:$4 sm:$0xff]   ;;  %v10147_v32 = vld [vmem:[%s11796_s25 + $0x764] ss:$8 sps:$4 sm:$0xff]  }
 0x1ce   : > { %7360 = vmatprep.subr.bf16.mxu0 %v10084_v33  ;;  %v10150_v33 = vld [vmem:[%s11796_s25 + $0xb64] ss:$8 sps:$4 sm:$0xff]  }
 0x1d0   : > { %5512 = vmatpush1.bf16.msra.mxu1 %v10079_v34  ;;  %v10145_v34 = vld [vmem:[%s11796_s25 + $0x760] ss:$8 sps:$4 sm:$0xff]  }
 0x1d1   : > { %7361 = vmatpush1.bf16.msra.mxu0 %v10082_v35  ;;  %5513 = vmatprep.subr.bf16.mxu1 %v10087_v36  ;;  %v10148_v35 = vld [vmem:[%s11796_s25 + $0xb60] ss:$8 sps:$4 sm:$0xff]   ;;  %v10153_v36 = vld [vmem:[%s11796_s25 + $0x774] ss:$8 sps:$4 sm:$0xff]  }
 0x1d2   : > { %7362 = vmatprep.subr.bf16.mxu0 %v10090_v37  ;;  %v10156_v37 = vld [vmem:[%s11796_s25 + $0xb74] ss:$8 sps:$4 sm:$0xff]  }
 0x1d4   : > { %5514 = vmatpush1.bf16.msra.mxu1 %v10085_v38  ;;  %v10151_v38 = vld [vmem:[%s11796_s25 + $0x770] ss:$8 sps:$4 sm:$0xff]  }
 0x1d5   : > { %7363 = vmatpush1.bf16.msra.mxu0 %v10088_v39  ;;  %5515 = vmatprep.subr.bf16.mxu1 %v10093_v40  ;;  %v10154_v39 = vld [vmem:[%s11796_s25 + $0xb70] ss:$8 sps:$4 sm:$0xff]   ;;  %v10159_v40 = vld [vmem:[%s11796_s25 + $0x784] ss:$8 sps:$4 sm:$0xff]  }
 0x1d6   : > { %7364 = vmatprep.subr.bf16.mxu0 %v10096_v41  ;;  %v10162_v41 = vld [vmem:[%s11796_s25 + $0xb84] ss:$8 sps:$4 sm:$0xff]  }
 0x1d8   : > { %5516 = vmatpush1.bf16.msra.mxu1 %v10091_v42  ;;  %v10157_v42 = vld [vmem:[%s11796_s25 + $0x780] ss:$8 sps:$4 sm:$0xff]  }
 0x1d9   : > { %7365 = vmatpush1.bf16.msra.mxu0 %v10094_v46  ;;  %5517 = vmatprep.subr.bf16.mxu1 %v10099_v47  ;;  %v10165_v46 = vld [vmem:[%s11796_s25 + $0x794] ss:$8 sps:$4 sm:$0xff]  }
 0x1da   : > { %7366 = vmatprep.subr.bf16.mxu0 %v10102_v48  ;;  %v10168_v47 = vld [vmem:[%s11796_s25 + $0xb94] ss:$8 sps:$4 sm:$0xff]   ;;  %v10163_v48 = vld [vmem:[%s11796_s25 + $0x790] ss:$8 sps:$4 sm:$0xff]  }
 0x1dc   : > { %5518 = vmatpush1.bf16.msra.mxu1 %v10097_v52  ;;  %v10171_v52 = vld [vmem:[%s11796_s25 + $0x7a4] ss:$8 sps:$4 sm:$0xff]  }
 0x1dd   : > { %7367 = vmatpush1.bf16.msra.mxu0 %v10100_v50  ;;  %5519 = vmatprep.subr.bf16.mxu1 %v10105_v56  ;;  %v10174_v50 = vld [vmem:[%s11796_s25 + $0xba4] ss:$8 sps:$4 sm:$0xff]   ;;  %v10177_v56 = vld [vmem:[%s11796_s25 + $0x7b4] ss:$8 sps:$4 sm:$0xff]  }
 0x1de   : > { %7368 = vmatprep.subr.bf16.mxu0 %v10108_v57  ;;  %v10180_v57 = vld [vmem:[%s11796_s25 + $0xbb4] ss:$8 sps:$4 sm:$0xff]  }
 0x1e0   : > { %5520 = vmatpush1.bf16.msra.mxu1 %v10103_v58  ;;  %v10175_v58 = vld [vmem:[%s11796_s25 + $0x7b0] ss:$8 sps:$4 sm:$0xff]  }
 0x1e1   : > { %7369 = vmatpush1.bf16.msra.mxu0 %v10106_v59  ;;  %5532 = vmatprep.subr.bf16.mxu1 %v10111_v3  ;;  %v10178_v59 = vld [vmem:[%s11796_s25 + $0xbb0] ss:$8 sps:$4 sm:$0xff]   ;;  %v10192_v3 = vld [vmem:[%s11796_s25 + $0xbd4] ss:$8 sps:$4 sm:$0xff]  }
 0x1e2   : > { %7381 = vmatprep.subr.bf16.mxu0 %v10114_v4  ;;  %v10187_v4 = vld [vmem:[%s11796_s25 + $0x7d0] ss:$8 sps:$4 sm:$0xff]  }
 0x1e3   : > { %5522 = vmatmul.mubr.bf16.vlgmr.msra.gmra.mrb[0].mxu1 %v4730_v9  ;;  %v9542_v9 = vcombine.high %v12113_v5, %v12118_v54 }
 0x1e4   : > { %7371 = vmatmul.mubr.bf16.vlgmr.msra.gmra.mrb[0].mxu0 %v6600_v7  ;;  %5533 = vmatpush1.bf16.msra.mxu1 %v10109_v55  ;;  %v10190_v55 = vld [vmem:[%s11796_s25 + $0xbd0] ss:$8 sps:$4 sm:$0xff]   ;;  %v10195_v7 = vld [vmem:[%s11796_s25 + $0x7e4] ss:$8 sps:$4 sm:$0xff]  }
 0x1e5   : > { %7382 = vmatpush1.bf16.msra.mxu0 %v10112_v8  ;;  %5534 = vmatprep.subr.bf16.mxu1 %v10117_v10  ;;  %v10198_v8 = vld [vmem:[%s11796_s25 + $0xbe4] ss:$8 sps:$4 sm:$0xff]   ;;  %v10193_v10 = vld [vmem:[%s11796_s25 + $0x7e0] ss:$8 sps:$4 sm:$0xff]  }
 0x1e6   : > { %7383 = vmatprep.subr.bf16.mxu0 %v10120_v11  ;;  %5564 = vmatprep.mubr.bf16.mxu1 %v4754_v12  ;;  %v4740_v11 = vshrl.u32 %v8883_v6, 16  ;;  %v4743_v12 = vshll.u32 %v8883_v6, 16  ;;  %v10264_v6 = vld [vmem:[%s11796_s25 + $0xc94] ss:$8 sps:$4 sm:$0xff]  }
 0x1e7   : > { %7413 = vmatprep.mubr.bf16.mxu0 %v6603_v13  ;;  %v10204_v13 = vld [vmem:[%s11796_s25 + $0xbf4] ss:$8 sps:$4 sm:$0xff]  }
 0x1e8   : > { %5535 = vmatpush1.bf16.msra.mxu1 %v10115_v14  ;;  %v7607_v14 = vshll.u32 %v9542_v9, 16 }
 0x1e9   : > { %7384 = vmatpush1.bf16.msra.mxu0 %v10118_v15  ;;  %5536 = vmatprep.subr.bf16.mxu1 %v10123_v16  ;;  %v10199_v15 = vld [vmem:[%s11796_s25 + $0x7f0] ss:$8 sps:$4 sm:$0xff]   ;;  %v9283_v16 = vcombine.low %v12050_v1, %v12053_v2 }
 0x1ea   : > { %7385 = vmatprep.subr.bf16.mxu0 %v10126_v17  ;;  %v4742_v17 = vrot.slane %v4740_v11, 1  ;;  %v10268_v11 = vld [vmem:[%s11796_s25 + $0xca0] ss:$8 sps:$4 sm:$0xff]  }
 0x1eb   : > { %v6602_v1 = vrot.slane %v9283_v16, 3  ;;  %v10277_v16 = vld [vmem:[%s11796_s25 + $0xc0] ss:$8 sps:$4 sm:$0xff]  }
 0x1ec   : > { %5537 = vmatpush1.bf16.msra.mxu1 %v10121_v18  ;;  %v4745_v18 = vrot.slane %v4743_v12, 2  ;;  %v10273_v12 = vld [vmem:[%s11796_s25 + $0xb4] ss:$8 sps:$4 sm:$0xff]  }
 0x1ed   : > { %7386 = vmatpush1.bf16.msra.mxu0 %v10124_v19  ;;  %5538 = vmatprep.subr.bf16.mxu1 %v10129_v20  ;;  %v10202_v19 = vld [vmem:[%s11796_s25 + $0xbf0] ss:$8 sps:$4 sm:$0xff]   ;;  %v10207_v20 = vld [vmem:[%s11796_s25 + $0x4] ss:$8 sps:$4 sm:$0xff]  }
 0x1ee   : > { %7387 = vmatprep.subr.bf16.mxu0 %v10132_v21  ;;  %v10210_v21 = vld [vmem:[%s11796_s25 + $0xc04] ss:$8 sps:$4 sm:$0xff]   ;;  %v4746_v2 = vor.u32 %v4745_v18, %v4742_v17  ;;  %v10280_v17 = vld [vmem:[%s11796_s25 + $0xcc0] ss:$8 sps:$4 sm:$0xff]   ;;  %v10285_v18 = vld [vmem:[%s11796_s25 + $0xd4] ss:$8 sps:$4 sm:$0xff]  }
 0x1f0   : > { %5539 = vmatpush1.bf16.msra.mxu1 %v10127_v22  ;;  %v10205_v22 = vld [vmem:[%s11796_s25] ss:$8 sps:$4 sm:$0xff]  }
 0x1f1   : > { %7388 = vmatpush1.bf16.msra.mxu0 %v10130_v23  ;;  %5540 = vmatprep.subr.bf16.mxu1 %v10135_v24  ;;  %v12137_v23 = vld [vmem:[%s11847_s5] sm:$0xff]  ;;  %v7605_v24 = vshrl.u32 %v9542_v9, 16 }
 0x1f2   : > { %7389 = vmatprep.subr.bf16.mxu0 %v10138_v25  ;;  %v7609_v25 = vrot.slane %v7607_v14, 1  ;;  %v10270_v9 = vld [vmem:[%s11796_s25 + $0xca4] ss:$8 sps:$4 sm:$0xff]  }
 0x1f3   : > { %v10279_v14 = vld [vmem:[%s11796_s25 + $0xc4] ss:$8 sps:$4 sm:$0xff]  }
 0x1f4   : > { %5541 = vmatpush1.bf16.msra.mxu1 %v10133_v26  ;;  %v12140_v26 = vld [vmem:[%s11847_s5 + $0x20] sm:$0x11] }
 0x1f5   : > { %7390 = vmatpush1.bf16.msra.mxu0 %v10136_v27  ;;  %5542 = vmatprep.subr.bf16.mxu1 %v10141_v28  ;;  %v10208_v27 = vld [vmem:[%s11796_s25 + $0xc00] ss:$8 sps:$4 sm:$0xff]   ;;  %v10213_v28 = vld [vmem:[%s11796_s25 + $0x14] ss:$8 sps:$4 sm:$0xff]  }
 0x1f6   : > { %7391 = vmatprep.subr.bf16.mxu0 %v10144_v29  ;;  %v10216_v29 = vld [vmem:[%s11796_s25 + $0xc14] ss:$8 sps:$4 sm:$0xff]  }
 0x1f8   : > { %5543 = vmatpush1.bf16.msra.mxu1 %v10139_v30  ;;  %v9014_v30 = vcombine.high %v12137_v23, %v12140_v26 }
 0x1f9   : > { %7392 = vmatpush1.bf16.msra.mxu0 %v10142_v31  ;;  %5544 = vmatprep.subr.bf16.mxu1 %v10147_v32  ;;  %v7610_v31 = vor.u32 %v7609_v25, %v7605_v24  ;;  %v10211_v32 = vld [vmem:[%s11796_s25 + $0x10] ss:$8 sps:$4 sm:$0xff]  }
 0x1fa   : > { %7393 = vmatprep.subr.bf16.mxu0 %v10150_v33  ;;  %v10214_v33 = vld [vmem:[%s11796_s25 + $0xc10] ss:$8 sps:$4 sm:$0xff]  }
 0x1fb   : > { %v10283_v24 = vld [vmem:[%s11796_s25 + $0xd0] ss:$8 sps:$4 sm:$0xff]  }
 0x1fc   : > { %5545 = vmatpush1.bf16.msra.mxu1 %v10145_v34  ;;  %v10219_v34 = vld [vmem:[%s11796_s25 + $0x24] ss:$8 sps:$4 sm:$0xff]   ;;  %v10286_v25 = vld [vmem:[%s11796_s25 + $0xcd0] ss:$8 sps:$4 sm:$0xff]  }
 0x1fd   : > { %7394 = vmatpush1.bf16.msra.mxu0 %v10148_v35  ;;  %5546 = vmatprep.subr.bf16.mxu1 %v10153_v36  ;;  %v10222_v35 = vld [vmem:[%s11796_s25 + $0xc24] ss:$8 sps:$4 sm:$0xff]   ;;  %v10217_v36 = vld [vmem:[%s11796_s25 + $0x20] ss:$8 sps:$4 sm:$0xff]  }
 0x1fe   : > { %7395 = vmatprep.subr.bf16.mxu0 %v10156_v37  ;;  %v10220_v37 = vld [vmem:[%s11796_s25 + $0xc20] ss:$8 sps:$4 sm:$0xff]  }
 0x200   : > { %5547 = vmatpush1.bf16.msra.mxu1 %v10151_v38  ;;  %v10225_v38 = vld [vmem:[%s11796_s25 + $0x34] ss:$8 sps:$4 sm:$0xff]  }
 0x201   : > { %7396 = vmatpush1.bf16.msra.mxu0 %v10154_v39  ;;  %5548 = vmatprep.subr.bf16.mxu1 %v10159_v40  ;;  %v10228_v39 = vld [vmem:[%s11796_s25 + $0xc34] ss:$8 sps:$4 sm:$0xff]   ;;  %v10223_v40 = vld [vmem:[%s11796_s25 + $0x30] ss:$8 sps:$4 sm:$0xff]  }
 0x202   : > { %7397 = vmatprep.subr.bf16.mxu0 %v10162_v41  ;;  %v10226_v41 = vld [vmem:[%s11796_s25 + $0xc30] ss:$8 sps:$4 sm:$0xff]  }
 0x204   : > { %5549 = vmatpush1.bf16.msra.mxu1 %v10157_v42  ;;  %v10231_v42 = vld [vmem:[%s11796_s25 + $0x44] ss:$8 sps:$4 sm:$0xff]  }
 0x205   : > { %7398 = vmatpush1.bf16.msra.mxu0 %v10160_v43  ;;  %5550 = vmatprep.subr.bf16.mxu1 %v10165_v46  ;;  %v10234_v43 = vld [vmem:[%s11796_s25 + $0xc44] ss:$8 sps:$4 sm:$0xff]   ;;  %v10229_v46 = vld [vmem:[%s11796_s25 + $0x40] ss:$8 sps:$4 sm:$0xff]  }
 0x206   : > { %7399 = vmatprep.subr.bf16.mxu0 %v10168_v47  ;;  %v10232_v47 = vld [vmem:[%s11796_s25 + $0xc40] ss:$8 sps:$4 sm:$0xff]  }
 0x208   : > { %5551 = vmatpush1.bf16.msra.mxu1 %v10163_v48  ;;  %v10237_v48 = vld [vmem:[%s11796_s25 + $0x54] ss:$8 sps:$4 sm:$0xff]  }
 0x209   : > { %7400 = vmatpush1.bf16.msra.mxu0 %v10166_v49  ;;  %5552 = vmatprep.subr.bf16.mxu1 %v10171_v52  ;;  %v10240_v49 = vld [vmem:[%s11796_s25 + $0xc54] ss:$8 sps:$4 sm:$0xff]   ;;  %v10235_v52 = vld [vmem:[%s11796_s25 + $0x50] ss:$8 sps:$4 sm:$0xff]  }
 0x20a   : > { %7401 = vmatprep.subr.bf16.mxu0 %v10174_v50  ;;  %v10238_v50 = vld [vmem:[%s11796_s25 + $0xc50] ss:$8 sps:$4 sm:$0xff]  }
 0x20c   : > { %5553 = vmatpush1.bf16.msra.mxu1 %v10169_v51  ;;  %v10243_v51 = vld [vmem:[%s11796_s25 + $0x64] ss:$8 sps:$4 sm:$0xff]  }
 0x20d   : > { %7402 = vmatpush1.bf16.msra.mxu0 %v10172_v53  ;;  %5554 = vmatprep.subr.bf16.mxu1 %v10177_v56  ;;  %v10246_v53 = vld [vmem:[%s11796_s25 + $0xc64] ss:$8 sps:$4 sm:$0xff]   ;;  %v10241_v56 = vld [vmem:[%s11796_s25 + $0x60] ss:$8 sps:$4 sm:$0xff]  }
 0x20e   : > { %7403 = vmatprep.subr.bf16.mxu0 %v10180_v57  ;;  %v10244_v57 = vld [vmem:[%s11796_s25 + $0xc60] ss:$8 sps:$4 sm:$0xff]  }
 0x210   : > { %5555 = vmatpush1.bf16.msra.mxu1 %v10175_v58  ;;  %v10249_v58 = vld [vmem:[%s11796_s25 + $0x74] ss:$8 sps:$4 sm:$0xff]  }
 0x211   : > { %7404 = vmatpush1.bf16.msra.mxu0 %v10178_v59  ;;  %5556 = vmatprep.subr.bf16.mxu1 %v10183_v60  ;;  %v10252_v59 = vld [vmem:[%s11796_s25 + $0xc74] ss:$8 sps:$4 sm:$0xff]   ;;  %v10247_v60 = vld [vmem:[%s11796_s25 + $0x70] ss:$8 sps:$4 sm:$0xff]  }
 0x212   : > { %7405 = vmatprep.subr.bf16.mxu0 %v10186_v61  ;;  %v10250_v61 = vld [vmem:[%s11796_s25 + $0xc70] ss:$8 sps:$4 sm:$0xff]  }
 0x214   : > { %5557 = vmatpush1.bf16.msra.mxu1 %v10181_v62  ;;  %v10255_v62 = vld [vmem:[%s11796_s25 + $0x84] ss:$8 sps:$4 sm:$0xff]  }
 0x215   : > { %7406 = vmatpush1.bf16.msra.mxu0 %v10184_v63  ;;  %5558 = vmatprep.subr.bf16.mxu1 %v10189_v0  ;;  %v10258_v63 = vld [vmem:[%s11796_s25 + $0xc84] ss:$8 sps:$4 sm:$0xff]   ;;  %v10253_v0 = vld [vmem:[%s11796_s25 + $0x80] ss:$8 sps:$4 sm:$0xff]  }
 0x216   : > { %7407 = vmatprep.subr.bf16.mxu0 %v10192_v3  ;;  %v10256_v3 = vld [vmem:[%s11796_s25 + $0xc80] ss:$8 sps:$4 sm:$0xff]  }
 0x218   : > { %5559 = vmatpush1.bf16.msra.mxu1 %v10187_v4  ;;  %v10261_v4 = vld [vmem:[%s11796_s25 + $0x94] ss:$8 sps:$4 sm:$0xff]  }
 0x219   : > { %7408 = vmatpush1.bf16.msra.mxu0 %v10190_v55  ;;  %5560 = vmatprep.subr.bf16.mxu1 %v10195_v7  ;;  %v10259_v55 = vld [vmem:[%s11796_s25 + $0x90] ss:$8 sps:$4 sm:$0xff]  }
 0x21a   : > { %7409 = vmatprep.subr.bf16.mxu0 %v10198_v8  ;;  %v10262_v7 = vld [vmem:[%s11796_s25 + $0xc90] ss:$8 sps:$4 sm:$0xff]   ;;  %v10267_v8 = vld [vmem:[%s11796_s25 + $0xa4] ss:$8 sps:$4 sm:$0xff]  }
 0x21c   : > { %5561 = vmatpush1.bf16.msra.mxu1 %v10193_v10  ;;  %v10265_v10 = vld [vmem:[%s11796_s25 + $0xa0] ss:$8 sps:$4 sm:$0xff]  }
 0x21d   : > { %7410 = vmatpush1.bf16.msra.mxu0 %v10196_v44  ;;  %5562 = vmatprep.subr.bf16.mxu1 %v10201_v45  ;;  %v10276_v44 = vld [vmem:[%s11796_s25 + $0xcb4] ss:$8 sps:$4 sm:$0xff]   ;;  %v10271_v45 = vld [vmem:[%s11796_s25 + $0xb0] ss:$8 sps:$4 sm:$0xff]  }
 0x21e   : > { %7411 = vmatprep.subr.bf16.mxu0 %v10204_v13  ;;  %v10274_v13 = vld [vmem:[%s11796_s25 + $0xcb0] ss:$8 sps:$4 sm:$0xff]  }
 0x220   : > { %5563 = vmatpush1.bf16.msra.mxu1 %v10199_v15  ;;  %v10282_v15 = vld [vmem:[%s11796_s25 + $0xcc4] ss:$8 sps:$4 sm:$0xff]  }
 0x221   : > { %7412 = vmatpush1.bf16.msra.mxu0 %v10202_v19  ;;  %6255 = vmatprep.subr.bf16.mxu1 %v10207_v20  ;;  %v10288_v19 = vld [vmem:[%s11796_s25 + $0xcd4] ss:$8 sps:$4 sm:$0xff]   ;;  %v12196_v20 = vld [vmem:[%s11847_s5 + $0x28] sm:$0xff] }
 0x222   : > { %8301 = vmatprep.subr.bf16.mxu0 %v10210_v21  ;;  %v12199_v21 = vld [vmem:[%s11847_s5 + $0x48] sm:$0x11] }
 0x223   : > { %5565 = vmatmul.mubr.bf16.vlgmr.msra.gmra.mrb[0].mxu1 %v4746_v2  ;;  %v10294_v2 = vld [vmem:[%s11796_s25 + $0xce4] ss:$8 sps:$4 sm:$0xff]  }
 0x224   : > { %7414 = vmatmul.mubr.bf16.vlgmr.msra.gmra.mrb[0].mxu0 %v6602_v1  ;;  %6256 = vmatpush1.bf16.msra.mxu1 %v10205_v22  ;;  %v9541_v22 = vcombine.low %v12113_v5, %v12118_v54  ;;  %v10291_v1 = vld [vmem:[%s11796_s25 + $0xe4] ss:$8 sps:$4 sm:$0xff]   ;;  %v10289_v5 = vld [vmem:[%s11796_s25 + $0xe0] ss:$8 sps:$4 sm:$0xff]  }
 0x225   : > { %8302 = vmatpush1.bf16.msra.mxu0 %v10208_v27  ;;  %6257 = vmatprep.subr.bf16.mxu1 %v10213_v28  ;;  %v9544_v27 = vcombine.high %v12196_v20, %v12199_v21  ;;  %v10292_v54 = vld [vmem:[%s11796_s25 + $0xce0] ss:$8 sps:$4 sm:$0xff]  }
 0x226   : > { %8303 = vmatprep.subr.bf16.mxu0 %v10216_v29  ;;  %6287 = vmatprep.mubr.bf16.mxu1 %v9014_v30  ;;  %v7600_v28 = vshll.u32 %v9541_v22, 16  ;;  %v10297_v29 = vld [vmem:[%s11796_s25 + $0xf4] ss:$8 sps:$4 sm:$0xff]  }
 0x227   : > { %8333 = vmatprep.mubr.bf16.mxu0 %v7610_v31  ;;  %v10300_v30 = vld [vmem:[%s11796_s25 + $0xcf4] ss:$8 sps:$4 sm:$0xff]   ;;  %v10295_v31 = vld [vmem:[%s11796_s25 + $0xf0] ss:$8 sps:$4 sm:$0xff]  }
 0x228   : > { %6258 = vmatpush1.bf16.msra.mxu1 %v10211_v32  ;;  %v10298_v32 = vld [vmem:[%s11796_s25 + $0xcf0] ss:$8 sps:$4 sm:$0xff]  }
 0x229   : > { %8304 = vmatpush1.bf16.msra.mxu0 %v10214_v33  ;;  %6259 = vmatprep.subr.bf16.mxu1 %v10219_v34  ;;  %v7621_v33 = vshll.u32 %v9544_v27, 16  ;;  %v7598_v34 = vshrl.u32 %v9541_v22, 16  ;;  %v10355_v22 = vld [vmem:[%s11796_s25 + $0x190] ss:$8 sps:$4 sm:$0xff]  }
 0x22a   : > { %8305 = vmatprep.subr.bf16.mxu0 %v10222_v35  ;;  %v7602_v35 = vrot.slane %v7600_v28, 1  ;;  %v10369_v28 = vld [vmem:[%s11796_s25 + $0x1b4] ss:$8 sps:$4 sm:$0xff]  }
 0x22c   : > { %6260 = vmatpush1.bf16.msra.mxu1 %v10217_v36  ;;  %v10303_v36 = vld [vmem:[%s11796_s25 + $0x104] ss:$8 sps:$4 sm:$0xff]  }
 0x22d   : > { %8306 = vmatpush1.bf16.msra.mxu0 %v10220_v37  ;;  %6261 = vmatprep.subr.bf16.mxu1 %v10225_v38  ;;  %v10306_v37 = vld [vmem:[%s11796_s25 + $0xd04] ss:$8 sps:$4 sm:$0xff]  }
 0x22e   : > { %8307 = vmatprep.subr.bf16.mxu0 %v10228_v39  ;;  %v12218_v38 = vld [vmem:[%s11847_s5 + $0x8] sm:$0xff] }
 0x22f   : > { %v12221_v39 = vld [vmem:[%s11847_s5 + $0x28] sm:$0x11] }
 0x230   : > { %6262 = vmatpush1.bf16.msra.mxu1 %v10223_v40  ;;  %v7619_v40 = vshrl.u32 %v9544_v27, 16  ;;  %v10364_v27 = vld [vmem:[%s11796_s25 + $0xda0] ss:$8 sps:$4 sm:$0xff]  }
 0x231   : > { %8308 = vmatpush1.bf16.msra.mxu0 %v10226_v41  ;;  %6263 = vmatprep.subr.bf16.mxu1 %v10231_v42  ;;  %v7623_v41 = vrot.slane %v7621_v33, 1  ;;  %v9013_v42 = vcombine.low %v12137_v23, %v12140_v26  ;;  %v10307_v23 = vld [vmem:[%s11796_s25 + $0x110] ss:$8 sps:$4 sm:$0xff]   ;;  %v10376_v33 = vld [vmem:[%s11796_s25 + $0xdc0] ss:$8 sps:$4 sm:$0xff]  }
 0x232   : > { %8309 = vmatprep.subr.bf16.mxu0 %v10234_v43  ;;  %v7603_v43 = vor.u32 %v7602_v35, %v7598_v34  ;;  %v10310_v26 = vld [vmem:[%s11796_s25 + $0xd10] ss:$8 sps:$4 sm:$0xff]   ;;  %v10381_v34 = vld [vmem:[%s11796_s25 + $0x1d4] ss:$8 sps:$4 sm:$0xff]  }
 0x233   : > { %v10384_v35 = vld [vmem:[%s11796_s25 + $0xdd4] ss:$8 sps:$4 sm:$0xff]  }
 0x234   : > { %6264 = vmatpush1.bf16.msra.mxu1 %v10229_v46  ;;  %v10301_v46 = vld [vmem:[%s11796_s25 + $0x100] ss:$8 sps:$4 sm:$0xff]  }
 0x235   : > { %8310 = vmatpush1.bf16.msra.mxu0 %v10232_v47  ;;  %6265 = vmatprep.subr.bf16.mxu1 %v10237_v48  ;;  %v10304_v47 = vld [vmem:[%s11796_s25 + $0xd00] ss:$8 sps:$4 sm:$0xff]   ;;  %v10309_v48 = vld [vmem:[%s11796_s25 + $0x114] ss:$8 sps:$4 sm:$0xff]  }
 0x236   : > { %8311 = vmatprep.subr.bf16.mxu0 %v10240_v49  ;;  %v10312_v49 = vld [vmem:[%s11796_s25 + $0xd14] ss:$8 sps:$4 sm:$0xff]  }
 0x238   : > { %6266 = vmatpush1.bf16.msra.mxu1 %v10235_v52  ;;  %v9016_v52 = vcombine.high %v12218_v38, %v12221_v39 }
 0x239   : > { %8312 = vmatpush1.bf16.msra.mxu0 %v10238_v50  ;;  %6267 = vmatprep.subr.bf16.mxu1 %v10243_v51  ;;  %v7624_v50 = vor.u32 %v7623_v41, %v7619_v40  ;;  %v10315_v51 = vld [vmem:[%s11796_s25 + $0x124] ss:$8 sps:$4 sm:$0xff]   ;;  %v12285_v40 = vld [vmem:[%s11847_s5 + $0x50] sm:$0x11] }
 0x23a   : > { %8313 = vmatprep.subr.bf16.mxu0 %v10246_v53  ;;  %v10318_v53 = vld [vmem:[%s11796_s25 + $0xd24] ss:$8 sps:$4 sm:$0xff]   ;;  %v10379_v41 = vld [vmem:[%s11796_s25 + $0x1d0] ss:$8 sps:$4 sm:$0xff]  }
 0x23c   : > { %6268 = vmatpush1.bf16.msra.mxu1 %v10241_v56  ;;  %v10313_v56 = vld [vmem:[%s11796_s25 + $0x120] ss:$8 sps:$4 sm:$0xff]  }
 0x23d   : > { %8314 = vmatpush1.bf16.msra.mxu0 %v10244_v57  ;;  %6269 = vmatprep.subr.bf16.mxu1 %v10249_v58  ;;  %v10316_v57 = vld [vmem:[%s11796_s25 + $0xd20] ss:$8 sps:$4 sm:$0xff]   ;;  %v10321_v58 = vld [vmem:[%s11796_s25 + $0x134] ss:$8 sps:$4 sm:$0xff]  }
 0x23e   : > { %8315 = vmatprep.subr.bf16.mxu0 %v10252_v59  ;;  %v10324_v59 = vld [vmem:[%s11796_s25 + $0xd34] ss:$8 sps:$4 sm:$0xff]  }
 0x240   : > { %6270 = vmatpush1.bf16.msra.mxu1 %v10247_v60  ;;  %v10319_v60 = vld [vmem:[%s11796_s25 + $0x130] ss:$8 sps:$4 sm:$0xff]  }
 0x241   : > { %8316 = vmatpush1.bf16.msra.mxu0 %v10250_v61  ;;  %6271 = vmatprep.subr.bf16.mxu1 %v10255_v62  ;;  %v10322_v61 = vld [vmem:[%s11796_s25 + $0xd30] ss:$8 sps:$4 sm:$0xff]   ;;  %v10327_v62 = vld [vmem:[%s11796_s25 + $0x144] ss:$8 sps:$4 sm:$0xff]  }
 0x242   : > { %8317 = vmatprep.subr.bf16.mxu0 %v10258_v63  ;;  %v10330_v63 = vld [vmem:[%s11796_s25 + $0xd44] ss:$8 sps:$4 sm:$0xff]  }
 0x244   : > { %6272 = vmatpush1.bf16.msra.mxu1 %v10253_v0  ;;  %v10325_v0 = vld [vmem:[%s11796_s25 + $0x140] ss:$8 sps:$4 sm:$0xff]  }
 0x245   : > { %8318 = vmatpush1.bf16.msra.mxu0 %v10256_v3  ;;  %6273 = vmatprep.subr.bf16.mxu1 %v10261_v4  ;;  %v10328_v3 = vld [vmem:[%s11796_s25 + $0xd40] ss:$8 sps:$4 sm:$0xff]   ;;  %v10333_v4 = vld [vmem:[%s11796_s25 + $0x154] ss:$8 sps:$4 sm:$0xff]  }
 0x246   : > { %8319 = vmatprep.subr.bf16.mxu0 %v10264_v6  ;;  %v10336_v6 = vld [vmem:[%s11796_s25 + $0xd54] ss:$8 sps:$4 sm:$0xff]  }
 0x248   : > { %6274 = vmatpush1.bf16.msra.mxu1 %v10259_v55  ;;  %v10331_v55 = vld [vmem:[%s11796_s25 + $0x150] ss:$8 sps:$4 sm:$0xff]  }
 0x249   : > { %8320 = vmatpush1.bf16.msra.mxu0 %v10262_v7  ;;  %6275 = vmatprep.subr.bf16.mxu1 %v10267_v8  ;;  %v10334_v7 = vld [vmem:[%s11796_s25 + $0xd50] ss:$8 sps:$4 sm:$0xff]   ;;  %v10339_v8 = vld [vmem:[%s11796_s25 + $0x164] ss:$8 sps:$4 sm:$0xff]  }
 0x24a   : > { %8321 = vmatprep.subr.bf16.mxu0 %v10270_v9  ;;  %v10342_v9 = vld [vmem:[%s11796_s25 + $0xd64] ss:$8 sps:$4 sm:$0xff]  }
 0x24c   : > { %6276 = vmatpush1.bf16.msra.mxu1 %v10265_v10  ;;  %v10337_v10 = vld [vmem:[%s11796_s25 + $0x160] ss:$8 sps:$4 sm:$0xff]  }
 0x24d   : > { %8322 = vmatpush1.bf16.msra.mxu0 %v10268_v11  ;;  %6277 = vmatprep.subr.bf16.mxu1 %v10273_v12  ;;  %v10340_v11 = vld [vmem:[%s11796_s25 + $0xd60] ss:$8 sps:$4 sm:$0xff]   ;;  %v10345_v12 = vld [vmem:[%s11796_s25 + $0x174] ss:$8 sps:$4 sm:$0xff]  }
 0x24e   : > { %8323 = vmatprep.subr.bf16.mxu0 %v10276_v44  ;;  %v10348_v44 = vld [vmem:[%s11796_s25 + $0xd74] ss:$8 sps:$4 sm:$0xff]  }
 0x250   : > { %6278 = vmatpush1.bf16.msra.mxu1 %v10271_v45  ;;  %v10343_v45 = vld [vmem:[%s11796_s25 + $0x170] ss:$8 sps:$4 sm:$0xff]  }
 0x251   : > { %8324 = vmatpush1.bf16.msra.mxu0 %v10274_v13  ;;  %6279 = vmatprep.subr.bf16.mxu1 %v10279_v14  ;;  %v10346_v13 = vld [vmem:[%s11796_s25 + $0xd70] ss:$8 sps:$4 sm:$0xff]   ;;  %v10351_v14 = vld [vmem:[%s11796_s25 + $0x184] ss:$8 sps:$4 sm:$0xff]  }
 0x252   : > { %8325 = vmatprep.subr.bf16.mxu0 %v10282_v15  ;;  %v10354_v15 = vld [vmem:[%s11796_s25 + $0xd84] ss:$8 sps:$4 sm:$0xff]  }
 0x254   : > { %6280 = vmatpush1.bf16.msra.mxu1 %v10277_v16  ;;  %v10349_v16 = vld [vmem:[%s11796_s25 + $0x180] ss:$8 sps:$4 sm:$0xff]  }
 0x255   : > { %8326 = vmatpush1.bf16.msra.mxu0 %v10280_v17  ;;  %6281 = vmatprep.subr.bf16.mxu1 %v10285_v18  ;;  %v10352_v17 = vld [vmem:[%s11796_s25 + $0xd80] ss:$8 sps:$4 sm:$0xff]   ;;  %v10357_v18 = vld [vmem:[%s11796_s25 + $0x194] ss:$8 sps:$4 sm:$0xff]  }
 0x256   : > { %8327 = vmatprep.subr.bf16.mxu0 %v10288_v19  ;;  %v10360_v19 = vld [vmem:[%s11796_s25 + $0xd94] ss:$8 sps:$4 sm:$0xff]  }
 0x258   : > { %6282 = vmatpush1.bf16.msra.mxu1 %v10283_v24  ;;  %v10358_v24 = vld [vmem:[%s11796_s25 + $0xd90] ss:$8 sps:$4 sm:$0xff]  }
 0x259   : > { %8328 = vmatpush1.bf16.msra.mxu0 %v10286_v25  ;;  %6283 = vmatprep.subr.bf16.mxu1 %v10291_v1  ;;  %v10363_v25 = vld [vmem:[%s11796_s25 + $0x1a4] ss:$8 sps:$4 sm:$0xff]  }
 0x25a   : > { %8329 = vmatprep.subr.bf16.mxu0 %v10294_v2  ;;  %v10366_v1 = vld [vmem:[%s11796_s25 + $0xda4] ss:$8 sps:$4 sm:$0xff]   ;;  %v10361_v2 = vld [vmem:[%s11796_s25 + $0x1a0] ss:$8 sps:$4 sm:$0xff]  }
 0x25c   : > { %6284 = vmatpush1.bf16.msra.mxu1 %v10289_v5  ;;  %v10372_v5 = vld [vmem:[%s11796_s25 + $0xdb4] ss:$8 sps:$4 sm:$0xff]  }
 0x25d   : > { %8330 = vmatpush1.bf16.msra.mxu0 %v10292_v54  ;;  %6285 = vmatprep.subr.bf16.mxu1 %v10297_v29  ;;  %v10367_v54 = vld [vmem:[%s11796_s25 + $0x1b0] ss:$8 sps:$4 sm:$0xff]  }
 0x25e   : > { %8331 = vmatprep.subr.bf16.mxu0 %v10300_v30  ;;  %v10370_v29 = vld [vmem:[%s11796_s25 + $0xdb0] ss:$8 sps:$4 sm:$0xff]   ;;  %v10375_v30 = vld [vmem:[%s11796_s25 + $0x1c4] ss:$8 sps:$4 sm:$0xff]  }
 0x260   : > { %6286 = vmatpush1.bf16.msra.mxu1 %v10295_v31  ;;  %v10378_v31 = vld [vmem:[%s11796_s25 + $0xdc4] ss:$8 sps:$4 sm:$0xff]  }
 0x261   : > { %8332 = vmatpush1.bf16.msra.mxu0 %v10298_v32  ;;  %6298 = vmatprep.subr.bf16.mxu1 %v10303_v36  ;;  %v10373_v32 = vld [vmem:[%s11796_s25 + $0x1c0] ss:$8 sps:$4 sm:$0xff]   ;;  %v9543_v36 = vcombine.low %v12196_v20, %v12199_v21 }
 0x262   : > { %8344 = vmatprep.subr.bf16.mxu0 %v10306_v37  ;;  %v12282_v37 = vld [vmem:[%s11847_s5 + $0x30] sm:$0xff]  ;;  %v10385_v21 = vld [vmem:[%s11796_s25 + $0x1e0] ss:$8 sps:$4 sm:$0xff]  }
 0x263   : > { %6288 = vmatmul.mubr.bf16.vlgmr.msra.gmra.mrb[0].mxu1 %v9013_v42  ;;  %v10382_v42 = vld [vmem:[%s11796_s25 + $0xdd0] ss:$8 sps:$4 sm:$0xff]   ;;  %v7614_v20 = vshll.u32 %v9543_v36, 16 }
 0x264   : > { %8334 = vmatmul.mubr.bf16.vlgmr.msra.gmra.mrb[0].mxu0 %v7603_v43  ;;  %6299 = vmatpush1.bf16.msra.mxu1 %v10301_v46  ;;  %v10387_v43 = vld [vmem:[%s11796_s25 + $0x1e4] ss:$8 sps:$4 sm:$0xff]  }
 0x265   : > { %8345 = vmatpush1.bf16.msra.mxu0 %v10304_v47  ;;  %6300 = vmatprep.subr.bf16.mxu1 %v10309_v48  ;;  %v10390_v46 = vld [vmem:[%s11796_s25 + $0xde4] ss:$8 sps:$4 sm:$0xff]   ;;  %v9546_v47 = vcombine.high %v12282_v37, %v12285_v40  ;;  %v10388_v48 = vld [vmem:[%s11796_s25 + $0xde0] ss:$8 sps:$4 sm:$0xff]  }
 0x266   : > { %8346 = vmatprep.subr.bf16.mxu0 %v10312_v49  ;;  %6330 = vmatprep.mubr.bf16.mxu1 %v9016_v52  ;;  %v10393_v49 = vld [vmem:[%s11796_s25 + $0x1f4] ss:$8 sps:$4 sm:$0xff]  }
 0x267   : > { %8376 = vmatprep.mubr.bf16.mxu0 %v7624_v50  ;;  %v10396_v52 = vld [vmem:[%s11796_s25 + $0xdf4] ss:$8 sps:$4 sm:$0xff]   ;;  %v7635_v50 = vshll.u32 %v9546_v47, 16 }
 0x268   : > { %6301 = vmatpush1.bf16.msra.mxu1 %v10307_v23  ;;  %v7612_v23 = vshrl.u32 %v9543_v36, 16  ;;  %v10451_v36 = vld [vmem:[%s11796_s25 + $0x290] ss:$8 sps:$4 sm:$0xff]  }
 0x269   : > { %8347 = vmatpush1.bf16.msra.mxu0 %v10310_v26  ;;  %6302 = vmatprep.subr.bf16.mxu1 %v10315_v51  ;;  %v7616_v26 = vrot.slane %v7614_v20, 1  ;;  %v10391_v51 = vld [vmem:[%s11796_s25 + $0x1f0] ss:$8 sps:$4 sm:$0xff]   ;;  %v10465_v20 = vld [vmem:[%s11796_s25 + $0x2b4] ss:$8 sps:$4 sm:$0xff]  }
 0x26a   : > { %8348 = vmatprep.subr.bf16.mxu0 %v10318_v53  ;;  %v10394_v53 = vld [vmem:[%s11796_s25 + $0xdf0] ss:$8 sps:$4 sm:$0xff]  }
 0x26c   : > { %6303 = vmatpush1.bf16.msra.mxu1 %v10313_v56  ;;  %v10399_v56 = vld [vmem:[%s11796_s25 + $0x204] ss:$8 sps:$4 sm:$0xff]  }
 0x26d   : > { %8349 = vmatpush1.bf16.msra.mxu0 %v10316_v57  ;;  %6304 = vmatprep.subr.bf16.mxu1 %v10321_v58  ;;  %v10402_v57 = vld [vmem:[%s11796_s25 + $0xe04] ss:$8 sps:$4 sm:$0xff]   ;;  %v7633_v58 = vshrl.u32 %v9546_v47, 16  ;;  %v10460_v47 = vld [vmem:[%s11796_s25 + $0xea0] ss:$8 sps:$4 sm:$0xff]  }
 0x26e   : > { %8350 = vmatprep.subr.bf16.mxu0 %v10324_v59  ;;  %v7637_v59 = vrot.slane %v7635_v50, 1  ;;  %v10474_v50 = vld [vmem:[%s11796_s25 + $0xec4] ss:$8 sps:$4 sm:$0xff]  }
 0x270   : > { %6305 = vmatpush1.bf16.msra.mxu1 %v10319_v60  ;;  %v9015_v60 = vcombine.low %v12218_v38, %v12221_v39  ;;  %v7638_v39 = vor.u32 %v7637_v59, %v7633_v58  ;;  %v12369_v58 = vld [vmem:[%s11847_s5 + $0x58] sm:$0x11] }
 0x271   : > { %8351 = vmatpush1.bf16.msra.mxu0 %v10322_v61  ;;  %6306 = vmatprep.subr.bf16.mxu1 %v10327_v62  ;;  %v7617_v61 = vor.u32 %v7616_v26, %v7612_v23  ;;  %v12304_v62 = vld [vmem:[%s11847_s5 + $0x10] sm:$0xff]  ;;  %v10469_v23 = vld [vmem:[%s11796_s25 + $0x2c0] ss:$8 sps:$4 sm:$0xff]  }
 0x272   : > { %8352 = vmatprep.subr.bf16.mxu0 %v10330_v63  ;;  %v12307_v63 = vld [vmem:[%s11847_s5 + $0x30] sm:$0x11]  ;;  %v10472_v26 = vld [vmem:[%s11796_s25 + $0xec0] ss:$8 sps:$4 sm:$0xff]  }
 0x273   : > { %v9018_v38 = vcombine.high %v12304_v62, %v12307_v63  ;;  %v10475_v59 = vld [vmem:[%s11796_s25 + $0x2d0] ss:$8 sps:$4 sm:$0xff]  }
 0x274   : > { %6307 = vmatpush1.bf16.msra.mxu1 %v10325_v0  ;;  %v10397_v0 = vld [vmem:[%s11796_s25 + $0x200] ss:$8 sps:$4 sm:$0xff]  }
 0x275   : > { %8353 = vmatpush1.bf16.msra.mxu0 %v10328_v3  ;;  %6308 = vmatprep.subr.bf16.mxu1 %v10333_v4  ;;  %v10400_v3 = vld [vmem:[%s11796_s25 + $0xe00] ss:$8 sps:$4 sm:$0xff]   ;;  %v10405_v4 = vld [vmem:[%s11796_s25 + $0x214] ss:$8 sps:$4 sm:$0xff]  }
 0x276   : > { %8354 = vmatprep.subr.bf16.mxu0 %v10336_v6  ;;  %v10408_v6 = vld [vmem:[%s11796_s25 + $0xe14] ss:$8 sps:$4 sm:$0xff]  }
 0x278   : > { %6309 = vmatpush1.bf16.msra.mxu1 %v10331_v55  ;;  %v10403_v55 = vld [vmem:[%s11796_s25 + $0x210] ss:$8 sps:$4 sm:$0xff]  }
 0x279   : > { %8355 = vmatpush1.bf16.msra.mxu0 %v10334_v7  ;;  %6310 = vmatprep.subr.bf16.mxu1 %v10339_v8  ;;  %v10406_v7 = vld [vmem:[%s11796_s25 + $0xe10] ss:$8 sps:$4 sm:$0xff]   ;;  %v10411_v8 = vld [vmem:[%s11796_s25 + $0x224] ss:$8 sps:$4 sm:$0xff]  }
 0x27a   : > { %8356 = vmatprep.subr.bf16.mxu0 %v10342_v9  ;;  %v10414_v9 = vld [vmem:[%s11796_s25 + $0xe24] ss:$8 sps:$4 sm:$0xff]  }
 0x27c   : > { %6311 = vmatpush1.bf16.msra.mxu1 %v10337_v10  ;;  %v10409_v10 = vld [vmem:[%s11796_s25 + $0x220] ss:$8 sps:$4 sm:$0xff]  }
 0x27d   : > { %8357 = vmatpush1.bf16.msra.mxu0 %v10340_v11  ;;  %6312 = vmatprep.subr.bf16.mxu1 %v10345_v12  ;;  %v10412_v11 = vld [vmem:[%s11796_s25 + $0xe20] ss:$8 sps:$4 sm:$0xff]   ;;  %v10417_v12 = vld [vmem:[%s11796_s25 + $0x234] ss:$8 sps:$4 sm:$0xff]  }
 0x27e   : > { %8358 = vmatprep.subr.bf16.mxu0 %v10348_v44  ;;  %v10420_v44 = vld [vmem:[%s11796_s25 + $0xe34] ss:$8 sps:$4 sm:$0xff]  }
 0x280   : > { %6313 = vmatpush1.bf16.msra.mxu1 %v10343_v45  ;;  %v10415_v45 = vld [vmem:[%s11796_s25 + $0x230] ss:$8 sps:$4 sm:$0xff]  }
 0x281   : > { %8359 = vmatpush1.bf16.msra.mxu0 %v10346_v13  ;;  %6314 = vmatprep.subr.bf16.mxu1 %v10351_v14  ;;  %v10418_v13 = vld [vmem:[%s11796_s25 + $0xe30] ss:$8 sps:$4 sm:$0xff]   ;;  %v10423_v14 = vld [vmem:[%s11796_s25 + $0x244] ss:$8 sps:$4 sm:$0xff]  }
 0x282   : > { %8360 = vmatprep.subr.bf16.mxu0 %v10354_v15  ;;  %v10426_v15 = vld [vmem:[%s11796_s25 + $0xe44] ss:$8 sps:$4 sm:$0xff]  }
 0x284   : > { %6315 = vmatpush1.bf16.msra.mxu1 %v10349_v16  ;;  %v10421_v16 = vld [vmem:[%s11796_s25 + $0x240] ss:$8 sps:$4 sm:$0xff]  }
 0x285   : > { %8361 = vmatpush1.bf16.msra.mxu0 %v10352_v17  ;;  %6316 = vmatprep.subr.bf16.mxu1 %v10357_v18  ;;  %v10424_v17 = vld [vmem:[%s11796_s25 + $0xe40] ss:$8 sps:$4 sm:$0xff]   ;;  %v10429_v18 = vld [vmem:[%s11796_s25 + $0x254] ss:$8 sps:$4 sm:$0xff]  }
 0x286   : > { %8362 = vmatprep.subr.bf16.mxu0 %v10360_v19  ;;  %v10432_v19 = vld [vmem:[%s11796_s25 + $0xe54] ss:$8 sps:$4 sm:$0xff]  }
 0x288   : > { %6317 = vmatpush1.bf16.msra.mxu1 %v10355_v22  ;;  %v10427_v22 = vld [vmem:[%s11796_s25 + $0x250] ss:$8 sps:$4 sm:$0xff]  }
 0x289   : > { %8363 = vmatpush1.bf16.msra.mxu0 %v10358_v24  ;;  %6318 = vmatprep.subr.bf16.mxu1 %v10363_v25  ;;  %v10430_v24 = vld [vmem:[%s11796_s25 + $0xe50] ss:$8 sps:$4 sm:$0xff]   ;;  %v10435_v25 = vld [vmem:[%s11796_s25 + $0x264] ss:$8 sps:$4 sm:$0xff]  }
 0x28a   : > { %8364 = vmatprep.subr.bf16.mxu0 %v10366_v1  ;;  %v10438_v1 = vld [vmem:[%s11796_s25 + $0xe64] ss:$8 sps:$4 sm:$0xff]  }
 0x28c   : > { %6319 = vmatpush1.bf16.msra.mxu1 %v10361_v2  ;;  %v10433_v2 = vld [vmem:[%s11796_s25 + $0x260] ss:$8 sps:$4 sm:$0xff]  }
 0x28d   : > { %8365 = vmatpush1.bf16.msra.mxu0 %v10364_v27  ;;  %6320 = vmatprep.subr.bf16.mxu1 %v10369_v28  ;;  %v10436_v27 = vld [vmem:[%s11796_s25 + $0xe60] ss:$8 sps:$4 sm:$0xff]   ;;  %v10441_v28 = vld [vmem:[%s11796_s25 + $0x274] ss:$8 sps:$4 sm:$0xff]  }
 0x28e   : > { %8366 = vmatprep.subr.bf16.mxu0 %v10372_v5  ;;  %v10444_v5 = vld [vmem:[%s11796_s25 + $0xe74] ss:$8 sps:$4 sm:$0xff]  }
 0x290   : > { %6321 = vmatpush1.bf16.msra.mxu1 %v10367_v54  ;;  %v10439_v54 = vld [vmem:[%s11796_s25 + $0x270] ss:$8 sps:$4 sm:$0xff]  }
 0x291   : > { %8367 = vmatpush1.bf16.msra.mxu0 %v10370_v29  ;;  %6322 = vmatprep.subr.bf16.mxu1 %v10375_v30  ;;  %v10442_v29 = vld [vmem:[%s11796_s25 + $0xe70] ss:$8 sps:$4 sm:$0xff]   ;;  %v10447_v30 = vld [vmem:[%s11796_s25 + $0x284] ss:$8 sps:$4 sm:$0xff]  }
 0x292   : > { %8368 = vmatprep.subr.bf16.mxu0 %v10378_v31  ;;  %v10450_v31 = vld [vmem:[%s11796_s25 + $0xe84] ss:$8 sps:$4 sm:$0xff]  }
 0x294   : > { %6323 = vmatpush1.bf16.msra.mxu1 %v10373_v32  ;;  %v10445_v32 = vld [vmem:[%s11796_s25 + $0x280] ss:$8 sps:$4 sm:$0xff]  }
 0x295   : > { %8369 = vmatpush1.bf16.msra.mxu0 %v10376_v33  ;;  %6324 = vmatprep.subr.bf16.mxu1 %v10381_v34  ;;  %v10448_v33 = vld [vmem:[%s11796_s25 + $0xe80] ss:$8 sps:$4 sm:$0xff]   ;;  %v10453_v34 = vld [vmem:[%s11796_s25 + $0x294] ss:$8 sps:$4 sm:$0xff]  }
 0x296   : > { %8370 = vmatprep.subr.bf16.mxu0 %v10384_v35  ;;  %v10456_v35 = vld [vmem:[%s11796_s25 + $0xe94] ss:$8 sps:$4 sm:$0xff]  }
 0x298   : > { %6325 = vmatpush1.bf16.msra.mxu1 %v10379_v41  ;;  %v10454_v41 = vld [vmem:[%s11796_s25 + $0xe90] ss:$8 sps:$4 sm:$0xff]  }
 0x299   : > { %8371 = vmatpush1.bf16.msra.mxu0 %v10382_v42  ;;  %6326 = vmatprep.subr.bf16.mxu1 %v10387_v43  ;;  %v10459_v42 = vld [vmem:[%s11796_s25 + $0x2a4] ss:$8 sps:$4 sm:$0xff]  }
 0x29a   : > { %8372 = vmatprep.subr.bf16.mxu0 %v10390_v46  ;;  %v10462_v43 = vld [vmem:[%s11796_s25 + $0xea4] ss:$8 sps:$4 sm:$0xff]   ;;  %v10457_v46 = vld [vmem:[%s11796_s25 + $0x2a0] ss:$8 sps:$4 sm:$0xff]  }
 0x29c   : > { %6327 = vmatpush1.bf16.msra.mxu1 %v10385_v21  ;;  %v10468_v21 = vld [vmem:[%s11796_s25 + $0xeb4] ss:$8 sps:$4 sm:$0xff]  }
 0x29d   : > { %8373 = vmatpush1.bf16.msra.mxu0 %v10388_v48  ;;  %6328 = vmatprep.subr.bf16.mxu1 %v10393_v49  ;;  %v10463_v48 = vld [vmem:[%s11796_s25 + $0x2b0] ss:$8 sps:$4 sm:$0xff]  }
 0x29e   : > { %8374 = vmatprep.subr.bf16.mxu0 %v10396_v52  ;;  %v10466_v49 = vld [vmem:[%s11796_s25 + $0xeb0] ss:$8 sps:$4 sm:$0xff]   ;;  %v10471_v52 = vld [vmem:[%s11796_s25 + $0x2c4] ss:$8 sps:$4 sm:$0xff]  }
 0x2a0   : > { %6329 = vmatpush1.bf16.msra.mxu1 %v10391_v51  ;;  %v10477_v51 = vld [vmem:[%s11796_s25 + $0x2d4] ss:$8 sps:$4 sm:$0xff]  }
 0x2a1   : > { %8375 = vmatpush1.bf16.msra.mxu0 %v10394_v53  ;;  %6341 = vmatprep.subr.bf16.mxu1 %v10399_v56  ;;  %v10480_v53 = vld [vmem:[%s11796_s25 + $0xed4] ss:$8 sps:$4 sm:$0xff]   ;;  %v9545_v56 = vcombine.low %v12282_v37, %v12285_v40  ;;  %v10481_v40 = vld [vmem:[%s11796_s25 + $0x2e0] ss:$8 sps:$4 sm:$0xff]  }
 0x2a2   : > { %8387 = vmatprep.subr.bf16.mxu0 %v10402_v57  ;;  %v12366_v57 = vld [vmem:[%s11847_s5 + $0x38] sm:$0xff] }
 0x2a3   : > { %6331 = vmatmul.mubr.bf16.vlgmr.msra.gmra.mrb[0].mxu1 %v9015_v60  ;;  %v10478_v60 = vld [vmem:[%s11796_s25 + $0xed0] ss:$8 sps:$4 sm:$0xff]   ;;  %v7628_v37 = vshll.u32 %v9545_v56, 16 }
 0x2a4   : > { %8377 = vmatmul.mubr.bf16.vlgmr.msra.gmra.mrb[0].mxu0 %v7617_v61  ;;  %6342 = vmatpush1.bf16.msra.mxu1 %v10397_v0  ;;  %v10483_v61 = vld [vmem:[%s11796_s25 + $0x2e4] ss:$8 sps:$4 sm:$0xff]  }
 0x2a5   : > { %8388 = vmatpush1.bf16.msra.mxu0 %v10400_v3  ;;  %6343 = vmatprep.subr.bf16.mxu1 %v10405_v4  ;;  %v10486_v0 = vld [vmem:[%s11796_s25 + $0xee4] ss:$8 sps:$4 sm:$0xff]   ;;  %v9548_v3 = vcombine.high %v12366_v57, %v12369_v58  ;;  %v10484_v4 = vld [vmem:[%s11796_s25 + $0xee0] ss:$8 sps:$4 sm:$0xff]  }
 0x2a6   : > { %8389 = vmatprep.subr.bf16.mxu0 %v10408_v6  ;;  %6373 = vmatprep.mubr.bf16.mxu1 %v9018_v38  ;;  %v10489_v6 = vld [vmem:[%s11796_s25 + $0x2f4] ss:$8 sps:$4 sm:$0xff]  }
 0x2a7   : > { %8419 = vmatprep.mubr.bf16.mxu0 %v7638_v39  ;;  %v10492_v38 = vld [vmem:[%s11796_s25 + $0xef4] ss:$8 sps:$4 sm:$0xff]   ;;  %v7649_v39 = vshll.u32 %v9548_v3, 16 }
 0x2a8   : > { %6344 = vmatpush1.bf16.msra.mxu1 %v10403_v55  ;;  %v7626_v55 = vshrl.u32 %v9545_v56, 16  ;;  %v10547_v56 = vld [vmem:[%s11796_s25 + $0x390] ss:$8 sps:$4 sm:$0xff]  }
 0x2a9   : > { %8390 = vmatpush1.bf16.msra.mxu0 %v10406_v7  ;;  %6345 = vmatprep.subr.bf16.mxu1 %v10411_v8  ;;  %v7630_v7 = vrot.slane %v7628_v37, 1  ;;  %v10487_v8 = vld [vmem:[%s11796_s25 + $0x2f0] ss:$8 sps:$4 sm:$0xff]   ;;  %v10561_v37 = vld [vmem:[%s11796_s25 + $0x3b4] ss:$8 sps:$4 sm:$0xff]  }
 0x2aa   : > { %8391 = vmatprep.subr.bf16.mxu0 %v10414_v9  ;;  %v10490_v9 = vld [vmem:[%s11796_s25 + $0xef0] ss:$8 sps:$4 sm:$0xff]  }
 0x2ac   : > { %6346 = vmatpush1.bf16.msra.mxu1 %v10409_v10  ;;  %v10495_v10 = vld [vmem:[%s11796_s25 + $0x304] ss:$8 sps:$4 sm:$0xff]  }
 0x2ad   : > { %8392 = vmatpush1.bf16.msra.mxu0 %v10412_v11  ;;  %6347 = vmatprep.subr.bf16.mxu1 %v10417_v12  ;;  %v10498_v11 = vld [vmem:[%s11796_s25 + $0xf04] ss:$8 sps:$4 sm:$0xff]   ;;  %v7647_v12 = vshrl.u32 %v9548_v3, 16  ;;  %v10556_v3 = vld [vmem:[%s11796_s25 + $0xfa0] ss:$8 sps:$4 sm:$0xff]  }
 0x2ae   : > { %8393 = vmatprep.subr.bf16.mxu0 %v10420_v44  ;;  %v7651_v44 = vrot.slane %v7649_v39, 1  ;;  %v10570_v39 = vld [vmem:[%s11796_s25 + $0xfc4] ss:$8 sps:$4 sm:$0xff]  }
 0x2b0   : > { %6348 = vmatpush1.bf16.msra.mxu1 %v10415_v45  ;;  %v9017_v45 = vcombine.low %v12304_v62, %v12307_v63  ;;  %v7652_v63 = vor.u32 %v7651_v44, %v7647_v12  ;;  %v10574_v12 = vld [vmem:[%s11796_s25 + $0xfd0] ss:$8 sps:$4 sm:$0xff]   ;;  %v10579_v44 = vld [vmem:[%s11796_s25 + $0x3e4] ss:$8 sps:$4 sm:$0xff]  }
 0x2b1   : > { %8394 = vmatpush1.bf16.msra.mxu0 %v10418_v13  ;;  %6349 = vmatprep.subr.bf16.mxu1 %v10423_v14  ;;  %v7631_v13 = vor.u32 %v7630_v7, %v7626_v55  ;;  %v12388_v14 = vld [vmem:[%s11847_s5 + $0x18] sm:$0xff]  ;;  %v10565_v55 = vld [vmem:[%s11796_s25 + $0x3c0] ss:$8 sps:$4 sm:$0xff]  }
 0x2b2   : > { %8395 = vmatprep.subr.bf16.mxu0 %v10426_v15  ;;  %v12391_v15 = vld [vmem:[%s11847_s5 + $0x38] sm:$0x11]  ;;  %v10568_v7 = vld [vmem:[%s11796_s25 + $0xfc0] ss:$8 sps:$4 sm:$0xff]  }
 0x2b3   : > { %v9020_v62 = vcombine.high %v12388_v14, %v12391_v15 }
 0x2b4   : > { %6350 = vmatpush1.bf16.msra.mxu1 %v10421_v16  ;;  %v10493_v16 = vld [vmem:[%s11796_s25 + $0x300] ss:$8 sps:$4 sm:$0xff]  }
 0x2b5   : > { %8396 = vmatpush1.bf16.msra.mxu0 %v10424_v17  ;;  %6351 = vmatprep.subr.bf16.mxu1 %v10429_v18  ;;  %v10496_v17 = vld [vmem:[%s11796_s25 + $0xf00] ss:$8 sps:$4 sm:$0xff]   ;;  %v10501_v18 = vld [vmem:[%s11796_s25 + $0x314] ss:$8 sps:$4 sm:$0xff]  }
 0x2b6   : > { %8397 = vmatprep.subr.bf16.mxu0 %v10432_v19  ;;  %v10504_v19 = vld [vmem:[%s11796_s25 + $0xf14] ss:$8 sps:$4 sm:$0xff]  }
 0x2b8   : > { %6352 = vmatpush1.bf16.msra.mxu1 %v10427_v22  ;;  %v10499_v22 = vld [vmem:[%s11796_s25 + $0x310] ss:$8 sps:$4 sm:$0xff]  }
 0x2b9   : > { %8398 = vmatpush1.bf16.msra.mxu0 %v10430_v24  ;;  %6353 = vmatprep.subr.bf16.mxu1 %v10435_v25  ;;  %v10502_v24 = vld [vmem:[%s11796_s25 + $0xf10] ss:$8 sps:$4 sm:$0xff]   ;;  %v10507_v25 = vld [vmem:[%s11796_s25 + $0x324] ss:$8 sps:$4 sm:$0xff]  }
 0x2ba   : > { %8399 = vmatprep.subr.bf16.mxu0 %v10438_v1  ;;  %v10510_v1 = vld [vmem:[%s11796_s25 + $0xf24] ss:$8 sps:$4 sm:$0xff]  }
 0x2bc   : > { %6354 = vmatpush1.bf16.msra.mxu1 %v10433_v2  ;;  %v10505_v2 = vld [vmem:[%s11796_s25 + $0x320] ss:$8 sps:$4 sm:$0xff]  }
 0x2bd   : > { %8400 = vmatpush1.bf16.msra.mxu0 %v10436_v27  ;;  %6355 = vmatprep.subr.bf16.mxu1 %v10441_v28  ;;  %v10508_v27 = vld [vmem:[%s11796_s25 + $0xf20] ss:$8 sps:$4 sm:$0xff]   ;;  %v10513_v28 = vld [vmem:[%s11796_s25 + $0x334] ss:$8 sps:$4 sm:$0xff]  }
 0x2be   : > { %8401 = vmatprep.subr.bf16.mxu0 %v10444_v5  ;;  %v10516_v5 = vld [vmem:[%s11796_s25 + $0xf34] ss:$8 sps:$4 sm:$0xff]  }
 0x2c0   : > { %6356 = vmatpush1.bf16.msra.mxu1 %v10439_v54  ;;  %v10511_v54 = vld [vmem:[%s11796_s25 + $0x330] ss:$8 sps:$4 sm:$0xff]  }
 0x2c1   : > { %8402 = vmatpush1.bf16.msra.mxu0 %v10442_v29  ;;  %6357 = vmatprep.subr.bf16.mxu1 %v10447_v30  ;;  %v10514_v29 = vld [vmem:[%s11796_s25 + $0xf30] ss:$8 sps:$4 sm:$0xff]   ;;  %v10519_v30 = vld [vmem:[%s11796_s25 + $0x344] ss:$8 sps:$4 sm:$0xff]  }
 0x2c2   : > { %8403 = vmatprep.subr.bf16.mxu0 %v10450_v31  ;;  %v10522_v31 = vld [vmem:[%s11796_s25 + $0xf44] ss:$8 sps:$4 sm:$0xff]  }
 0x2c4   : > { %6358 = vmatpush1.bf16.msra.mxu1 %v10445_v32  ;;  %v10517_v32 = vld [vmem:[%s11796_s25 + $0x340] ss:$8 sps:$4 sm:$0xff]  }
 0x2c5   : > { %8404 = vmatpush1.bf16.msra.mxu0 %v10448_v33  ;;  %6359 = vmatprep.subr.bf16.mxu1 %v10453_v34  ;;  %v10520_v33 = vld [vmem:[%s11796_s25 + $0xf40] ss:$8 sps:$4 sm:$0xff]   ;;  %v10525_v34 = vld [vmem:[%s11796_s25 + $0x354] ss:$8 sps:$4 sm:$0xff]  }
 0x2c6   : > { %8405 = vmatprep.subr.bf16.mxu0 %v10456_v35  ;;  %v10528_v35 = vld [vmem:[%s11796_s25 + $0xf54] ss:$8 sps:$4 sm:$0xff]  }
 0x2c8   : > { %6360 = vmatpush1.bf16.msra.mxu1 %v10451_v36  ;;  %v10523_v36 = vld [vmem:[%s11796_s25 + $0x350] ss:$8 sps:$4 sm:$0xff]  }
 0x2c9   : > { %8406 = vmatpush1.bf16.msra.mxu0 %v10454_v41  ;;  %6361 = vmatprep.subr.bf16.mxu1 %v10459_v42  ;;  %v10526_v41 = vld [vmem:[%s11796_s25 + $0xf50] ss:$8 sps:$4 sm:$0xff]   ;;  %v10531_v42 = vld [vmem:[%s11796_s25 + $0x364] ss:$8 sps:$4 sm:$0xff]  }
 0x2ca   : > { %8407 = vmatprep.subr.bf16.mxu0 %v10462_v43  ;;  %v10534_v43 = vld [vmem:[%s11796_s25 + $0xf64] ss:$8 sps:$4 sm:$0xff]  }
 0x2cc   : > { %6362 = vmatpush1.bf16.msra.mxu1 %v10457_v46  ;;  %v10529_v46 = vld [vmem:[%s11796_s25 + $0x360] ss:$8 sps:$4 sm:$0xff]  }
 0x2cd   : > { %8408 = vmatpush1.bf16.msra.mxu0 %v10460_v47  ;;  %6363 = vmatprep.subr.bf16.mxu1 %v10465_v20  ;;  %v10532_v47 = vld [vmem:[%s11796_s25 + $0xf60] ss:$8 sps:$4 sm:$0xff]   ;;  %v10537_v20 = vld [vmem:[%s11796_s25 + $0x374] ss:$8 sps:$4 sm:$0xff]  }
 0x2ce   : > { %8409 = vmatprep.subr.bf16.mxu0 %v10468_v21  ;;  %v10540_v21 = vld [vmem:[%s11796_s25 + $0xf74] ss:$8 sps:$4 sm:$0xff]  }
 0x2d0   : > { %6364 = vmatpush1.bf16.msra.mxu1 %v10463_v48  ;;  %v10535_v48 = vld [vmem:[%s11796_s25 + $0x370] ss:$8 sps:$4 sm:$0xff]  }
 0x2d1   : > { %8410 = vmatpush1.bf16.msra.mxu0 %v10466_v49  ;;  %6365 = vmatprep.subr.bf16.mxu1 %v10471_v52  ;;  %v10538_v49 = vld [vmem:[%s11796_s25 + $0xf70] ss:$8 sps:$4 sm:$0xff]   ;;  %v10543_v52 = vld [vmem:[%s11796_s25 + $0x384] ss:$8 sps:$4 sm:$0xff]  }
 0x2d2   : > { %8411 = vmatprep.subr.bf16.mxu0 %v10474_v50  ;;  %v10546_v50 = vld [vmem:[%s11796_s25 + $0xf84] ss:$8 sps:$4 sm:$0xff]  }
 0x2d4   : > { %6366 = vmatpush1.bf16.msra.mxu1 %v10469_v23  ;;  %v10541_v23 = vld [vmem:[%s11796_s25 + $0x380] ss:$8 sps:$4 sm:$0xff]  }
 0x2d5   : > { %8412 = vmatpush1.bf16.msra.mxu0 %v10472_v26  ;;  %6367 = vmatprep.subr.bf16.mxu1 %v10477_v51  ;;  %v10544_v26 = vld [vmem:[%s11796_s25 + $0xf80] ss:$8 sps:$4 sm:$0xff]   ;;  %v10549_v51 = vld [vmem:[%s11796_s25 + $0x394] ss:$8 sps:$4 sm:$0xff]  }
 0x2d6   : > { %8413 = vmatprep.subr.bf16.mxu0 %v10480_v53  ;;  %v10552_v53 = vld [vmem:[%s11796_s25 + $0xf94] ss:$8 sps:$4 sm:$0xff]  }
 0x2d8   : > { %6368 = vmatpush1.bf16.msra.mxu1 %v10475_v59  ;;  %v10550_v59 = vld [vmem:[%s11796_s25 + $0xf90] ss:$8 sps:$4 sm:$0xff]  }
 0x2d9   : > { %8414 = vmatpush1.bf16.msra.mxu0 %v10478_v60  ;;  %6369 = vmatprep.subr.bf16.mxu1 %v10483_v61  ;;  %v10555_v60 = vld [vmem:[%s11796_s25 + $0x3a4] ss:$8 sps:$4 sm:$0xff]  }
 0x2da   : > { %8415 = vmatprep.subr.bf16.mxu0 %v10486_v0  ;;  %v10558_v61 = vld [vmem:[%s11796_s25 + $0xfa4] ss:$8 sps:$4 sm:$0xff]   ;;  %v10553_v0 = vld [vmem:[%s11796_s25 + $0x3a0] ss:$8 sps:$4 sm:$0xff]  }
 0x2dc   : > { %6370 = vmatpush1.bf16.msra.mxu1 %v10481_v40  ;;  %v10564_v40 = vld [vmem:[%s11796_s25 + $0xfb4] ss:$8 sps:$4 sm:$0xff]  }
 0x2dd   : > { %8416 = vmatpush1.bf16.msra.mxu0 %v10484_v4  ;;  %6371 = vmatprep.subr.bf16.mxu1 %v10489_v6  ;;  %v10559_v4 = vld [vmem:[%s11796_s25 + $0x3b0] ss:$8 sps:$4 sm:$0xff]  }
 0x2de   : > { %8417 = vmatprep.subr.bf16.mxu0 %v10492_v38  ;;  %v10562_v6 = vld [vmem:[%s11796_s25 + $0xfb0] ss:$8 sps:$4 sm:$0xff]   ;;  %v10567_v38 = vld [vmem:[%s11796_s25 + $0x3c4] ss:$8 sps:$4 sm:$0xff]  }
 0x2e0   : > { %6372 = vmatpush1.bf16.msra.mxu1 %v10487_v8  ;;  %v10573_v8 = vld [vmem:[%s11796_s25 + $0x3d4] ss:$8 sps:$4 sm:$0xff]  }
 0x2e1   : > { %8418 = vmatpush1.bf16.msra.mxu0 %v10490_v9  ;;  %6384 = vmatprep.subr.bf16.mxu1 %v10495_v10  ;;  %v10576_v9 = vld [vmem:[%s11796_s25 + $0xfd4] ss:$8 sps:$4 sm:$0xff]   ;;  %v9547_v10 = vcombine.low %v12366_v57, %v12369_v58 }
 0x2e2   : > { %8430 = vmatprep.subr.bf16.mxu0 %v10498_v11  ;;  %v10571_v11 = vld [vmem:[%s11796_s25 + $0x3d0] ss:$8 sps:$4 sm:$0xff]   ;;  %v10585_v57 = vld [vmem:[%s11796_s25 + $0x3f4] ss:$8 sps:$4 sm:$0xff]  }
 0x2e3   : > { %6374 = vmatmul.mubr.bf16.vlgmr.msra.gmra.mrb[0].mxu1 %v9017_v45  ;;  %v10582_v45 = vld [vmem:[%s11796_s25 + $0xfe4] ss:$8 sps:$4 sm:$0xff]   ;;  %v10588_v58 = vld [vmem:[%s11796_s25 + $0xff4] ss:$8 sps:$4 sm:$0xff]  }
 0x2e4   : > { %8420 = vmatmul.mubr.bf16.vlgmr.msra.gmra.mrb[0].mxu0 %v7631_v13  ;;  %6385 = vmatpush1.bf16.msra.mxu1 %v10493_v16  ;;  %v7642_v13 = vshll.u32 %v9547_v10, 16  ;;  %v10577_v16 = vld [vmem:[%s11796_s25 + $0x3e0] ss:$8 sps:$4 sm:$0xff]  }
 0x2e5   : > { %8431 = vmatpush1.bf16.msra.mxu0 %v10496_v17  ;;  %6386 = vmatprep.subr.bf16.mxu1 %v10501_v18  ;;  %v10580_v17 = vld [vmem:[%s11796_s25 + $0xfe0] ss:$8 sps:$4 sm:$0xff]   ;;  %v7640_v18 = vshrl.u32 %v9547_v10, 16 }
 0x2e6   : > { %8432 = vmatprep.subr.bf16.mxu0 %v10504_v19  ;;  %6416 = vmatprep.mubr.bf16.mxu1 %v9020_v62  ;;  %v7644_v19 = vrot.slane %v7642_v13, 1  ;;  %v10583_v62 = vld [vmem:[%s11796_s25 + $0x3f0] ss:$8 sps:$4 sm:$0xff]  }
 0x2e7   : > { %8462 = vmatprep.mubr.bf16.mxu0 %v7652_v63  ;;  %v10586_v63 = vld [vmem:[%s11796_s25 + $0xff0] ss:$8 sps:$4 sm:$0xff]   ;;  %s9682_s25 = sshll.u32 (%p10752_p9), %s8597_s24, 2 }
 0x2e8   : > { %6387 = vmatpush1.bf16.msra.mxu1 %v10499_v22  ;;  %v9019_v22 = vcombine.low %v12388_v14, %v12391_v15  ;;  %s8599_s28 = scalar_lea.vmem (%p10752_p9), %s12548_s3, %s9682_s25 }
 0x2e9   : > { %8433 = vmatpush1.bf16.msra.mxu0 %v10502_v24  ;;  %6388 = vmatprep.subr.bf16.mxu1 %v10507_v25  ;;  %v7645_v24 = vor.u32 %v7644_v19, %v7640_v18  ;;  %v8479_v25 = vlaneseq }
 0x2ea   : > { %8434 = vmatprep.subr.bf16.mxu0 %v10510_v1 }
 0x2eb   : > { %v8480_v1 = vshrl.u32 %v8479_v25, 7 }
 0x2ec   : > { %6389 = vmatpush1.bf16.msra.mxu1 %v10505_v2 }
 0x2ed   : > { %8435 = vmatpush1.bf16.msra.mxu0 %v10508_v27  ;;  %6390 = vmatprep.subr.bf16.mxu1 %v10513_v28  ;;  %v8481_v2 = vsub.s32 0, %v8480_v1  ;;  %v8477_v27 = vld [vmem:[%s4383_s10] sm:$0x3]  ;;  %v8485_v14 = vsub.s32 1, %v8480_v1 }
 0x2ee   : > { %8436 = vmatprep.subr.bf16.mxu0 %v10516_v5 }
 0x2ef   : > { %v8482_v5 = vrot.slane %v8477_v27, %v8481_v2 }
 0x2f0   : > { %6391 = vmatpush1.bf16.msra.mxu1 %v10511_v54 }
 0x2f1   : > { %8437 = vmatpush1.bf16.msra.mxu0 %v10514_v29  ;;  %6392 = vmatprep.subr.bf16.mxu1 %v10519_v30 }
 0x2f2   : > { %8438 = vmatprep.subr.bf16.mxu0 %v10522_v31  ;;  %v8486_v31 = vrot.slane %v8477_v27, %v8485_v14 }
 0x2f4   : > { %6393 = vmatpush1.bf16.msra.mxu1 %v10517_v32 }
 0x2f5   : > { %8439 = vmatpush1.bf16.msra.mxu0 %v10520_v33  ;;  %6394 = vmatprep.subr.bf16.mxu1 %v10525_v34 }
 0x2f6   : > { %8440 = vmatprep.subr.bf16.mxu0 %v10528_v35 }
 0x2f8   : > { %6395 = vmatpush1.bf16.msra.mxu1 %v10523_v36 }
 0x2f9   : > { %8441 = vmatpush1.bf16.msra.mxu0 %v10526_v41  ;;  %6396 = vmatprep.subr.bf16.mxu1 %v10531_v42 }
 0x2fa   : > { %8442 = vmatprep.subr.bf16.mxu0 %v10534_v43 }
 0x2fc   : > { %6397 = vmatpush1.bf16.msra.mxu1 %v10529_v46 }
 0x2fd   : > { %8443 = vmatpush1.bf16.msra.mxu0 %v10532_v47  ;;  %6398 = vmatprep.subr.bf16.mxu1 %v10537_v20 }
 0x2fe   : > { %8444 = vmatprep.subr.bf16.mxu0 %v10540_v21 }
 0x300   : > { %6399 = vmatpush1.bf16.msra.mxu1 %v10535_v48 }
 0x301   : > { %8445 = vmatpush1.bf16.msra.mxu0 %v10538_v49  ;;  %6400 = vmatprep.subr.bf16.mxu1 %v10543_v52 }
 0x302   : > { %8446 = vmatprep.subr.bf16.mxu0 %v10546_v50 }
 0x304   : > { %6401 = vmatpush1.bf16.msra.mxu1 %v10541_v23 }
 0x305   : > { %8447 = vmatpush1.bf16.msra.mxu0 %v10544_v26  ;;  %6402 = vmatprep.subr.bf16.mxu1 %v10549_v51 }
 0x306   : > { %8448 = vmatprep.subr.bf16.mxu0 %v10552_v53 }
 0x308   : > { %6403 = vmatpush1.bf16.msra.mxu1 %v10547_v56 }
 0x309   : > { %8449 = vmatpush1.bf16.msra.mxu0 %v10550_v59  ;;  %6404 = vmatprep.subr.bf16.mxu1 %v10555_v60 }
 0x30a   : > { %8450 = vmatprep.subr.bf16.mxu0 %v10558_v61 }
 0x30c   : > { %6405 = vmatpush1.bf16.msra.mxu1 %v10553_v0 }
 0x30d   : > { %8451 = vmatpush1.bf16.msra.mxu0 %v10556_v3  ;;  %6406 = vmatprep.subr.bf16.mxu1 %v10561_v37 }
 0x30e   : > { %8452 = vmatprep.subr.bf16.mxu0 %v10564_v40 }
 0x310   : > { %6407 = vmatpush1.bf16.msra.mxu1 %v10559_v4 }
 0x311   : > { %8453 = vmatpush1.bf16.msra.mxu0 %v10562_v6  ;;  %6408 = vmatprep.subr.bf16.mxu1 %v10567_v38 }
 0x312   : > { %8454 = vmatprep.subr.bf16.mxu0 %v10570_v39 }
 0x314   : > { %6409 = vmatpush1.bf16.msra.mxu1 %v10565_v55 }
 0x315   : > { %8455 = vmatpush1.bf16.msra.mxu0 %v10568_v7  ;;  %6410 = vmatprep.subr.bf16.mxu1 %v10573_v8 }
 0x316   : > { %8456 = vmatprep.subr.bf16.mxu0 %v10576_v9 }
 0x318   : > { %6411 = vmatpush1.bf16.msra.mxu1 %v10571_v11 }
 0x319   : > { %8457 = vmatpush1.bf16.msra.mxu0 %v10574_v12  ;;  %6412 = vmatprep.subr.bf16.mxu1 %v10579_v44 }
 0x31a   : > { %8458 = vmatprep.subr.bf16.mxu0 %v10582_v45 }
 0x31c   : > { %6413 = vmatpush1.bf16.msra.mxu1 %v10577_v16 }
 0x31d   : > { %8459 = vmatpush1.bf16.msra.mxu0 %v10580_v17  ;;  %6414 = vmatprep.subr.bf16.mxu1 %v10585_v57 }
 0x31e   : > { %8460 = vmatprep.subr.bf16.mxu0 %v10588_v58 }
 0x320   : > { %6415 = vmatpush1.bf16.msra.mxu1 %v10583_v62 }
 0x321   : > { %8461 = vmatpush1.bf16.msra.mxu0 %v10586_v63 }
 0x323   : > { %6417 = vmatmul.mubr.bf16.vlgmr.msra.gmra.mrb[0].mxu1 %v9019_v22 }
 0x324   : > { %8463 = vmatmul.mubr.bf16.vlgmr.msra.gmra.mrb[0].mxu0 %v7645_v24 }
 0x3f6   : > { %v6418_v15 = vpop.f32.mrb[0].mxu1 }
 0x3f7   : > { %v8464_v28 = vpop.f32.mrb[0].mxu0  ;;  %v6420_v29 = vpop.f32.mrb[1].mxu1 }
 0x3f8   : > { %v9688_v54 = vadd.f32 %v8464_v28, %v6418_v15  ;;  %v8466_v30 = vpop.f32.mrb[1].mxu0  ;;  %v6422_v33 = vpop.f32.mrb[2].mxu1 }
 0x3f9   : > { %v9689_v32 = vadd.f32 %v8466_v30, %v6420_v29  ;;  %v8468_v34 = vpop.f32.mrb[2].mxu0  ;;  %v6424_v36 = vpop.f32.mrb[3].mxu1 }
 0x3fa   : > { %v9690_v35 = vadd.f32 %v8468_v34, %v6422_v33  ;;  %v8470_v41 = vpop.f32.mrb[3].mxu0  ;;  %v12469_v42 = vadd.f32 %v9688_v54, %v8482_v5 }
 0x3fb   : > { %v9691_v43 = vadd.f32 %v8470_v41, %v6424_v36  ;;  %v12471_v46 = vadd.f32 %v9689_v32, %v8486_v31 }
 0x3fc   : > { %v12473_v47 = vadd.f32 %v9690_v35, %v8482_v5  ;;  %v8513_v49 = vmul.f32 %v12469_v42, %v12469_v42 }
 0x3fd   : > { %v12475_v20 = vadd.f32 %v9691_v43, %v8486_v31  ;;  %v8514_v26 = vmul.f32 %v12471_v46, %v12471_v46 }
 0x3fe   : > { %v8494_v21 = vsel %vm8493_vm0, %v12473_v47, 0.0  ;;  %v8515_v48 = vmul.f32 %v12473_v47, %v12473_v47 }
 0x3ff   : > { %v8495_v52 = vadd.f32 %v8494_v21, %v12469_v42  ;;  %v8502_v50 = vsel %vm8493_vm0, %v12475_v20, 0.0  ;;  %v8516_v23 = vmul.f32 %v12475_v20, %v12475_v20 }
 0x400   : > { %v8517_v51 = vsel %vm8493_vm0, %v8515_v48, 0.0  ;;  %v8503_v53 = vadd.f32 %v8502_v50, %v12471_v46  ;;  %v8585_v50 = vld [vmem:[%s4373_s12 + $0x8] sm:$0x11] }
 0x401   : > { %v8496_v56 = vrot.slane %v8495_v52, 4  ;;  %v8518_v59 = vadd.f32 %v8517_v51, %v8513_v49  ;;  %v8525_v60 = vsel %vm8493_vm0, %v8516_v23, 0.0 }
 0x402   : > { %v8504_v61 = vrot.slane %v8503_v53, 4  ;;  %v8526_v0 = vadd.f32 %v8525_v60, %v8514_v26 }
 0x403   : > { %v8497_v3 = vadd.f32 %v8496_v56, %v8495_v52  ;;  %v8519_v37 = vrot.slane %v8518_v59, 4 }
 0x404   : > { %v8505_v40 = vadd.f32 %v8504_v61, %v8503_v53  ;;  %v8527_v4 = vrot.slane %v8526_v0, 4 }
 0x405   : > { %v8498_v6 = vrot.slane %v8497_v3, 2  ;;  %v8520_v38 = vadd.f32 %v8519_v37, %v8518_v59 }
 0x406   : > { %v8506_v39 = vrot.slane %v8505_v40, 2  ;;  %v8528_v55 = vadd.f32 %v8527_v4, %v8526_v0 }
 0x407   : > { %v8499_v7 = vadd.f32 %v8498_v6, %v8497_v3  ;;  %v8521_v8 = vrot.slane %v8520_v38, 2 }
 0x408   : > { %v8507_v9 = vadd.f32 %v8506_v39, %v8505_v40  ;;  %v8529_v10 = vrot.slane %v8528_v55, 2 }
 0x409   : > { %v8500_v11 = vrot.slane %v8499_v7, 1  ;;  %v8522_v12 = vadd.f32 %v8521_v8, %v8520_v38 }
 0x40a   : > { %v8508_v44 = vrot.slane %v8507_v9, 1  ;;  %v8530_v45 = vadd.f32 %v8529_v10, %v8528_v55 }
 0x40b   : > { %v8501_v13 = vadd.f32 %v8500_v11, %v8499_v7  ;;  %v8523_v16 = vrot.slane %v8522_v12, 1 }
 0x40c   : > { %v8509_v17 = vadd.f32 %v8508_v44, %v8507_v9  ;;  %v8531_v57 = vrot.slane %v8530_v45, 1 }
 0x40d   : > { %v8511_v58 = vmul.f32 0.11111111, %v8501_v13  ;;  %v8524_v18 = vadd.f32 %v8523_v16, %v8522_v12 }
 0x40e   : > { %v8512_v19 = vmul.f32 0.11111111, %v8509_v17  ;;  %v8532_v62 = vadd.f32 %v8531_v57, %v8530_v45 }
 0x40f   : > { %v8533_v63 = vmul.f32 0.11111111, %v8524_v18  ;;  %v8535_v22 = vmul.f32 %v8511_v58, %v8511_v58  ;;  %v8541_v24 = vsub.f32 %v12469_v42, %v8511_v58  ;;  %v8543_v25 = vsub.f32 %v12473_v47, %v8511_v58 }
 0x410   : > { %v8534_v1 = vmul.f32 0.11111111, %v8532_v62  ;;  %v8536_v2 = vmul.f32 %v8512_v19, %v8512_v19  ;;  %v8542_v27 = vsub.f32 %v12471_v46, %v8512_v19  ;;  %v8544_v14 = vsub.f32 %v12475_v20, %v8512_v19 }
 0x411   : > { %v8537_v15 = vsub.f32 %v8533_v63, %v8535_v22 }
 0x412   : > { %v8538_v28 = vsub.f32 %v8534_v1, %v8536_v2 }
 0x413   : > { %v8539_v5 = vmax.f32 %v8537_v15, 0.0 }
 0x414   : > { %v8540_v54 = vmax.f32 %v8538_v28, 0.0 }
 0x415   : > { %v8545_v29 = vadd.f32 1e-05, %v8539_v5 }
 0x416   : > { %v8546_v30 = vadd.f32 1e-05, %v8540_v54 }
 0x417   : > { %10589 = vrsqrt.f32 %v8545_v29 }
 0x418   : > { %10591 = vrsqrt.f32 %v8546_v30 }
 0x421   : > { %v10590_v31 = vpop.eup %10589 }
 0x422   : > { %v10592_v32 = vpop.eup %10591  ;;  %v8549_v33 = vmul.f32 %v10590_v31, %v8541_v24  ;;  %v8551_v34 = vmul.f32 %v10590_v31, %v8543_v25 }
 0x423   : > { %v8550_v36 = vmul.f32 %v10592_v32, %v8542_v27  ;;  %v8552_v41 = vmul.f32 %v10592_v32, %v8544_v14 }
 0x424   : > { %vm8553_vm5 = vcmp.ge.f32.partialorder %v8549_v33, 0.0  ;;  %vm8555_vm6 = vcmp.ge.f32.partialorder %v8551_v34, 0.0  ;;  %v8557_v42 = vmul.f32 0.2, %v8549_v33  ;;  %v8559_v43 = vmul.f32 0.2, %v8551_v34 }
 0x425   : > { %vm8554_vm8 = vcmp.ge.f32.partialorder %v8550_v36, 0.0  ;;  %vm8556_vm9 = vcmp.ge.f32.partialorder %v8552_v41, 0.0  ;;  %v8558_v47 = vmul.f32 0.2, %v8550_v36  ;;  %v8560_v20 = vmul.f32 0.2, %v8552_v41 }
 0x426   : > { %v8561_v21 = vsel %vm8553_vm5, %v8549_v33, %v8557_v42  ;;  %v8563_v48 = vsel %vm8555_vm6, %v8551_v34, %v8559_v43  ;;  %8594 = sbr.rel (!%p10752_p9) target bundleno = 1076 (0x434), region = 88 }
 0x427   : > { %v8562_v49 = vsel %vm8554_vm8, %v8550_v36, %v8558_v47  ;;  %v8564_v52 = vsel %vm8556_vm9, %v8552_v41, %v8560_v20 }
 0x428   : > { %v9686_v23 = vpack.c.bf16 %v8562_v49, %v8561_v21  ;;  %v9687_v26 = vpack.c.bf16 %v8564_v52, %v8563_v48 }
 0x42a   : > { %8577 = vst [vmem:[%s4373_s12] sm:$0xff] %v9686_v23  ;;  %v8586_v51 = vsel %vm8584_vm10, %v9687_v26, %v8585_v50 }
 0x42b   : > { %8587 = vst [vmem:[%s4373_s12 + $0x8] sm:$0x11] %v8586_v51 }
 0x431   : > { %v8629_v53 = vld [vmem:[%s4373_s12] sm:$0xff] }
 0x432   : > { %v8631_v56 = vld [vmem:[%s4373_s12 + $0x8] sm:$0xff]  ;;  %8630 = vst [vmem:[%s8599_s28] sm:$0xff] %v8629_v53 }
 0x433   : > { %8632 = vst [vmem:[%s8599_s28 + $0x10] sm:$0xff] %v8631_v56 }
 0x434 PF: > { %s13_s20 = sadd.s32 1, %s10663_s20   ;;  %s12554_s12 = smov %s10635_s13 }
 0x435   : > { %p10_p2 = scmp.ge.s32.totalorder %s13_s20, 6   ;;  %s12555_s13 = smov %s10757_s4 }
 0x436   : > { %s12556_s14 = smov %s10643_s15  ;;  %s12557_s15 = smov %s10746_s27 }
 0x437   : > { %s12558_s16 = smov %s10655_s18  ;;  %s12559_s17 = smov %s10659_s19 }
 0x438   : > { %s12560_s18 = smov %s12563_s22  ;;  %s12561_s19 = smov %s12567_s23 }
 0x439   :  { %12 = sbr.rel (!%p10_p2) target bundleno = 5 (0x5), region = 172 }

// kernel: _lambda_.9
= control target key start
LH: loop header
LB: loop body
LE: loop exit
PB: predicated region body
PF: predicated region fallthrough
CT: control target
= control target key end

     0   :  { %s8748_s12 = smov 0   ;;  %s8750_s13 = smov 0   ;;  %s10394_s0 = inlined_call_operand.vmem [shape: bf16[2,10,2048], index: 0, kind: input, shape index: {}]   ;;  %s10395_s1 = inlined_call_operand.vmem [shape: bf16[4,2048,8], index: 1, kind: input, shape index: {}]   ;;  %s10396_s2 = inlined_call_operand.vmem [shape: f32[1,8], index: 2, kind: input, shape index: {}]   ;;  %s10397_s3 = inlined_call_operand.vmem [shape: f32[2,4,8], index: 3, kind: output, shape index: {}]  }
   0x1   :  { %s8752_s14 = smov 0  }
   0x2 LB: > { %s25_s15 = sadd.s32 1, %s8722_s13  ;;  %p6059_p0 = scmp.ge.s32.totalorder %s8726_s14, 1  ;;  %s8726_s14 = sphi %s8752_s14, %s13_s14   ;;  %s8722_s13 = sphi %s8750_s13, %s10399_s13   ;;  %s8718_s12 = sphi %s8748_s12, %s10398_s12  }
   0x3   : > { %p27_p1 = scmp.ge.s32.totalorder %s25_s15, 2  ;;  %p168_p2 = scmp.lt.s32.totalorder %s8726_s14, 3 }
   0x5   : > { %s10401_s15 = smov (%p27_p1, %s25_s15), 0  ;;  %p169_p3 = pnand %p6059_p0, %p168_p2 }
   0x6   : > { %v8140_v0 = vld [vmem:[%s10395_s1 + $0x440] sm:$0xff] (!%p169_p3)   ;;  %v8144_v4 = vld [vmem:[%s10395_s1 + $0x448] sm:$0xff] (!%p169_p3)   ;;  %v8148_v8 = vld [vmem:[%s10395_s1 + $0x450] sm:$0xff] (!%p169_p3)   ;;  %p201_p4 = scmp.lt.s32.totalorder (!%p169_p3), %s8718_s12, 1  ;;  %vm5952_vm0 = vcmask (!%p169_p3), 60416  }
   0x7   : > { %172 = sbr.rel (%p169_p3) target bundleno = 770 (0x302), region = 32  ;;  %v8141_v1 = vld [vmem:[%s10395_s1 + $0x4c0] sm:$0xff] (!%p169_p3)   ;;  %7412 = vmatprep.subr.bf16.mxu0 (!%p169_p3), %v8140_v0  ;;  %v8145_v5 = vld [vmem:[%s10395_s1 + $0x4c8] sm:$0xff] (!%p169_p3)   ;;  %v8149_v9 = vld [vmem:[%s10395_s1 + $0x4d0] sm:$0xff] (!%p169_p3)  }
   0x8   : > { %v8142_v2 = vld [vmem:[%s10395_s1 + $0x400] sm:$0xff] (!%p169_p3)   ;;  %7434 = vmatprep.subr.bf16.mxu1 (!%p169_p3), %v8141_v1  ;;  %v8146_v6 = vld [vmem:[%s10395_s1 + $0x408] sm:$0xff] (!%p169_p3)   ;;  %v8150_v10 = vld [vmem:[%s10395_s1 + $0x410] sm:$0xff] (!%p169_p3)  }
   0x9   : > { %v8143_v3 = vld [vmem:[%s10395_s1 + $0x480] sm:$0xff] (!%p169_p3)   ;;  %7413 = vmatpush3.bf16.msra.mxu0 (!%p169_p3), %v8142_v2  ;;  %v8147_v7 = vld [vmem:[%s10395_s1 + $0x488] sm:$0xff] (!%p169_p3)   ;;  %v8151_v11 = vld [vmem:[%s10395_s1 + $0x490] sm:$0xff] (!%p169_p3)  }
   0xa   : > { %7435 = vmatpush3.bf16.msra.mxu1 (!%p169_p3), %v8143_v3  ;;  %7414 = vmatprep.subr.bf16.mxu0 (!%p169_p3), %v8144_v4  ;;  %v8152_v12 = vld [vmem:[%s10395_s1 + $0x458] sm:$0xff] (!%p169_p3)   ;;  %v8156_v16 = vld [vmem:[%s10395_s1 + $0x460] sm:$0xff] (!%p169_p3)   ;;  %v8160_v20 = vld [vmem:[%s10395_s1 + $0x468] sm:$0xff] (!%p169_p3)  }
   0xb   : > { %7436 = vmatprep.subr.bf16.mxu1 (!%p169_p3), %v8145_v5  ;;  %v8153_v13 = vld [vmem:[%s10395_s1 + $0x4d8] sm:$0xff] (!%p169_p3)   ;;  %v8157_v17 = vld [vmem:[%s10395_s1 + $0x4e0] sm:$0xff] (!%p169_p3)   ;;  %v8161_v21 = vld [vmem:[%s10395_s1 + $0x4e8] sm:$0xff] (!%p169_p3)  }
   0xc   : > { %v8154_v14 = vld [vmem:[%s10395_s1 + $0x418] sm:$0xff] (!%p169_p3)   ;;  %v8158_v18 = vld [vmem:[%s10395_s1 + $0x420] sm:$0xff] (!%p169_p3)   ;;  %v8162_v22 = vld [vmem:[%s10395_s1 + $0x428] sm:$0xff] (!%p169_p3)  }
   0xd   : > { %7415 = vmatpush3.bf16.msra.mxu0 (!%p169_p3), %v8146_v6  ;;  %v8155_v15 = vld [vmem:[%s10395_s1 + $0x498] sm:$0xff] (!%p169_p3)   ;;  %v8159_v19 = vld [vmem:[%s10395_s1 + $0x4a0] sm:$0xff] (!%p169_p3)   ;;  %v8163_v23 = vld [vmem:[%s10395_s1 + $0x4a8] sm:$0xff] (!%p169_p3)  }
   0xe   : > { %7437 = vmatpush3.bf16.msra.mxu1 %v8147_v7  ;;  %7416 = vmatprep.subr.bf16.mxu0 %v8148_v8  ;;  %s10403_s12 = smov (!%p201_p4, %s8718_s12), 1  ;;  %v8164_v24 = vld [vmem:[%s10395_s1 + $0x470] sm:$0xff]   ;;  %v8168_v28 = vld [vmem:[%s10395_s1 + $0x478] sm:$0xff]   ;;  %v8176_v38 = vld [vmem:[%s10395_s1 + $0x540] sm:$0xff]  }
   0xf   : > { %7438 = vmatprep.subr.bf16.mxu1 %v8149_v9  ;;  %v8165_v25 = vld [vmem:[%s10395_s1 + $0x4f0] sm:$0xff]   ;;  %s7411_s24 = sshll.u32 %s10403_s12, 7  ;;  %v8169_v29 = vld [vmem:[%s10395_s1 + $0x4f8] sm:$0xff]   ;;  %v8177_v39 = vld [vmem:[%s10395_s1 + $0x5c0] sm:$0xff]   ;;  %s6062_s30 = sshll.u32 %s10403_s12, 2 }
  0x10   : > { %v8166_v26 = vld [vmem:[%s10395_s1 + $0x430] sm:$0xff]   ;;  %s8866_s6 = scalar_lea.vmem %s10394_s0, %s7411_s24  ;;  %v8170_v30 = vld [vmem:[%s10395_s1 + $0x438] sm:$0xff]   ;;  %v8178_v44 = vld [vmem:[%s10395_s1 + $0x500] sm:$0xff]   ;;  %s219_s7 = scalar_lea.vmem %s10397_s3, %s6062_s30 }
  0x11   : > { %7417 = vmatpush3.bf16.msra.mxu0 %v8150_v10  ;;  %v8167_v27 = vld [vmem:[%s10395_s1 + $0x4b0] sm:$0xff]   ;;  %v8171_v31 = vld [vmem:[%s10395_s1 + $0x4b8] sm:$0xff]   ;;  %v485_v32 = vld [vmem:[%s8866_s6] sm:$0x66] }
  0x12   : > { %7439 = vmatpush3.bf16.msra.mxu1 %v8151_v11  ;;  %7418 = vmatprep.subr.bf16.mxu0 %v8152_v12  ;;  %v486_v33 = vld [vmem:[%s8866_s6 + $0x8] sm:$0x66]  ;;  %v6319_v34 = vcombine.low %v485_v32, %v485_v32  ;;  %v6320_v35 = vcombine.high %v485_v32, %v485_v32  ;;  %v8179_v45 = vld [vmem:[%s10395_s1 + $0x580] sm:$0xff]   ;;  %v8184_v50 = vld [vmem:[%s10395_s1 + $0x550] sm:$0xff]  }
  0x13   : > { %7440 = vmatprep.subr.bf16.mxu1 %v8153_v13  ;;  %v6321_v36 = vcombine.low %v486_v33, %v486_v33  ;;  %v6322_v37 = vcombine.high %v486_v33, %v486_v33  ;;  %v8180_v46 = vld [vmem:[%s10395_s1 + $0x548] sm:$0xff]   ;;  %v8185_v51 = vld [vmem:[%s10395_s1 + $0x5d0] sm:$0xff]   ;;  %v8188_v54 = vld [vmem:[%s10395_s1 + $0x558] sm:$0xff]  }
  0x14   : > { %v790_v40 = vrot.slane %v6319_v34, 1  ;;  %v791_v41 = vrot.slane %v6320_v35, 1  ;;  %v8181_v47 = vld [vmem:[%s10395_s1 + $0x5c8] sm:$0xff]   ;;  %v8186_v52 = vld [vmem:[%s10395_s1 + $0x510] sm:$0xff]   ;;  %v8189_v55 = vld [vmem:[%s10395_s1 + $0x5d8] sm:$0xff]  }
  0x15   : > { %7419 = vmatpush3.bf16.msra.mxu0 %v8154_v14  ;;  %v792_v42 = vrot.slane %v6321_v36, 1  ;;  %v793_v43 = vrot.slane %v6322_v37, 1  ;;  %v8182_v48 = vld [vmem:[%s10395_s1 + $0x508] sm:$0xff]   ;;  %v8187_v53 = vld [vmem:[%s10395_s1 + $0x590] sm:$0xff]   ;;  %v8190_v56 = vld [vmem:[%s10395_s1 + $0x518] sm:$0xff]  }
  0x16   : > { %7441 = vmatpush3.bf16.msra.mxu1 %v8155_v15  ;;  %7420 = vmatprep.subr.bf16.mxu0 %v8156_v16  ;;  %v8183_v49 = vld [vmem:[%s10395_s1 + $0x588] sm:$0xff]   ;;  %v8191_v57 = vld [vmem:[%s10395_s1 + $0x598] sm:$0xff]   ;;  %v8192_v58 = vld [vmem:[%s10395_s1 + $0x560] sm:$0xff]  }
  0x17   : > { %7442 = vmatprep.subr.bf16.mxu1 %v8157_v17  ;;  %1622 = vmatprep.mubr.bf16.mxu0 %v791_v41  ;;  %v8193_v59 = vld [vmem:[%s10395_s1 + $0x5e0] sm:$0xff]   ;;  %v8196_v62 = vld [vmem:[%s10395_s1 + $0x568] sm:$0xff]   ;;  %v8200_v2 = vld [vmem:[%s10395_s1 + $0x570] sm:$0xff]  }
  0x18   : > { %1662 = vmatprep.mubr.bf16.mxu1 %v793_v43  ;;  %v8194_v60 = vld [vmem:[%s10395_s1 + $0x520] sm:$0xff]   ;;  %v8197_v63 = vld [vmem:[%s10395_s1 + $0x5e8] sm:$0xff]   ;;  %v8201_v3 = vld [vmem:[%s10395_s1 + $0x5f0] sm:$0xff]  }
  0x19   : > { %7421 = vmatpush3.bf16.msra.mxu0 %v8158_v18  ;;  %v8195_v61 = vld [vmem:[%s10395_s1 + $0x5a0] sm:$0xff]   ;;  %v8198_v0 = vld [vmem:[%s10395_s1 + $0x528] sm:$0xff]   ;;  %v8202_v4 = vld [vmem:[%s10395_s1 + $0x530] sm:$0xff]  }
  0x1a   : > { %7443 = vmatpush3.bf16.msra.mxu1 %v8159_v19  ;;  %7422 = vmatprep.subr.bf16.mxu0 %v8160_v20  ;;  %v8199_v1 = vld [vmem:[%s10395_s1 + $0x5a8] sm:$0xff]   ;;  %v8203_v5 = vld [vmem:[%s10395_s1 + $0x5b0] sm:$0xff]   ;;  %v8204_v6 = vld [vmem:[%s10395_s1 + $0x578] sm:$0xff]  }
  0x1b   : > { %7444 = vmatprep.subr.bf16.mxu1 %v8161_v21  ;;  %v8205_v7 = vld [vmem:[%s10395_s1 + $0x5f8] sm:$0xff]   ;;  %v487_v10 = vld [vmem:[%s8866_s6 + $0x10] sm:$0x66]  ;;  %v8212_v16 = vld [vmem:[%s10395_s1 + $0x640] sm:$0xff]  }
  0x1c   : > { %v8206_v8 = vld [vmem:[%s10395_s1 + $0x538] sm:$0xff]   ;;  %v6323_v12 = vcombine.low %v487_v10, %v487_v10  ;;  %v6324_v13 = vcombine.high %v487_v10, %v487_v10  ;;  %v8213_v17 = vld [vmem:[%s10395_s1 + $0x6c0] sm:$0xff]   ;;  %v8233_v41 = vld [vmem:[%s10395_s1 + $0x6e8] sm:$0xff]  }
  0x1d   : > { %7423 = vmatpush3.bf16.msra.mxu0 %v8162_v22  ;;  %v8207_v9 = vld [vmem:[%s10395_s1 + $0x5b8] sm:$0xff]   ;;  %v8214_v22 = vld [vmem:[%s10395_s1 + $0x600] sm:$0xff]   ;;  %v8235_v43 = vld [vmem:[%s10395_s1 + $0x6a8] sm:$0xff]  }
  0x1e   : > { %7445 = vmatpush3.bf16.msra.mxu1 %v8163_v23  ;;  %7424 = vmatprep.subr.bf16.mxu0 %v8164_v24  ;;  %v488_v11 = vld [vmem:[%s8866_s6 + $0x18] sm:$0x66]  ;;  %v794_v18 = vrot.slane %v6323_v12, 1  ;;  %v795_v19 = vrot.slane %v6324_v13, 1  ;;  %v8215_v23 = vld [vmem:[%s10395_s1 + $0x680] sm:$0xff]   ;;  %v8216_v24 = vld [vmem:[%s10395_s1 + $0x648] sm:$0xff]  }
  0x1f   : > { %7446 = vmatprep.subr.bf16.mxu1 %v8165_v25  ;;  %v6325_v14 = vcombine.low %v488_v11, %v488_v11  ;;  %v6326_v15 = vcombine.high %v488_v11, %v488_v11  ;;  %v8217_v25 = vld [vmem:[%s10395_s1 + $0x6c8] sm:$0xff]   ;;  %v8224_v32 = vld [vmem:[%s10395_s1 + $0x658] sm:$0xff]   ;;  %v8228_v36 = vld [vmem:[%s10395_s1 + $0x660] sm:$0xff]  }
  0x20   : > { %v8225_v33 = vld [vmem:[%s10395_s1 + $0x6d8] sm:$0xff]   ;;  %v8229_v37 = vld [vmem:[%s10395_s1 + $0x6e0] sm:$0xff]  }
  0x21   : > { %7425 = vmatpush3.bf16.msra.mxu0 %v8166_v26  ;;  %v796_v20 = vrot.slane %v6325_v14, 1  ;;  %v797_v21 = vrot.slane %v6326_v15, 1  ;;  %v8218_v26 = vld [vmem:[%s10395_s1 + $0x608] sm:$0xff]   ;;  %v8226_v34 = vld [vmem:[%s10395_s1 + $0x618] sm:$0xff]   ;;  %v8264_v14 = vld [vmem:[%s10395_s1 + $0x760] sm:$0xff]  }
  0x22   : > { %7447 = vmatpush3.bf16.msra.mxu1 %v8167_v27  ;;  %7426 = vmatprep.subr.bf16.mxu0 %v8168_v28  ;;  %v8219_v27 = vld [vmem:[%s10395_s1 + $0x688] sm:$0xff]   ;;  %v8220_v28 = vld [vmem:[%s10395_s1 + $0x650] sm:$0xff]   ;;  %v8227_v35 = vld [vmem:[%s10395_s1 + $0x698] sm:$0xff]  }
  0x23   : > { %7448 = vmatprep.subr.bf16.mxu1 %v8169_v29  ;;  %v8221_v29 = vld [vmem:[%s10395_s1 + $0x6d0] sm:$0xff]   ;;  %v8260_v10 = vld [vmem:[%s10395_s1 + $0x758] sm:$0xff]   ;;  %v8265_v15 = vld [vmem:[%s10395_s1 + $0x7e0] sm:$0xff]  }
  0x24   : > { %v8261_v11 = vld [vmem:[%s10395_s1 + $0x7d8] sm:$0xff]  }
  0x25   : > { %7427 = vmatpush3.bf16.msra.mxu0 %v8170_v30  ;;  %v8222_v30 = vld [vmem:[%s10395_s1 + $0x610] sm:$0xff]   ;;  %v8262_v12 = vld [vmem:[%s10395_s1 + $0x718] sm:$0xff]  }
  0x26   : > { %7449 = vmatpush3.bf16.msra.mxu1 %v8171_v31  ;;  %7456 = vmatprep.subr.bf16.mxu0 %v8176_v38  ;;  %v8223_v31 = vld [vmem:[%s10395_s1 + $0x690] sm:$0xff]   ;;  %v8230_v38 = vld [vmem:[%s10395_s1 + $0x620] sm:$0xff]   ;;  %v8263_v13 = vld [vmem:[%s10395_s1 + $0x798] sm:$0xff]  }
  0x27   : > { %7478 = vmatprep.subr.bf16.mxu1 %v8177_v39  ;;  %v8231_v39 = vld [vmem:[%s10395_s1 + $0x6a0] sm:$0xff]  }
  0x28   : > { %1623 = vmatmul.mubr.bf16.vlgmr.msra.gmra.mrb[0].mxu0 %v790_v40  ;;  %v8232_v40 = vld [vmem:[%s10395_s1 + $0x668] sm:$0xff]  }
  0x29   : > { %1663 = vmatmul.mubr.bf16.vlgmr.msra.gmra.mrb[0].mxu1 %v792_v42  ;;  %7457 = vmatpush3.bf16.msra.mxu0 %v8178_v44  ;;  %v8234_v42 = vld [vmem:[%s10395_s1 + $0x628] sm:$0xff]   ;;  %v8236_v44 = vld [vmem:[%s10395_s1 + $0x670] sm:$0xff]  }
  0x2a   : > { %7479 = vmatpush3.bf16.msra.mxu1 %v8179_v45  ;;  %7458 = vmatprep.subr.bf16.mxu0 %v8180_v46  ;;  %v8237_v45 = vld [vmem:[%s10395_s1 + $0x6f0] sm:$0xff]  }
  0x2b   : > { %7480 = vmatprep.subr.bf16.mxu1 %v8181_v47  ;;  %1702 = vmatprep.mubr.bf16.mxu0 %v795_v19  ;;  %v8238_v46 = vld [vmem:[%s10395_s1 + $0x630] sm:$0xff]   ;;  %v8269_v19 = vld [vmem:[%s10395_s1 + $0x7e8] sm:$0xff]  }
  0x2c   : > { %1742 = vmatprep.mubr.bf16.mxu1 %v797_v21  ;;  %v8239_v47 = vld [vmem:[%s10395_s1 + $0x6b0] sm:$0xff]   ;;  %v8271_v21 = vld [vmem:[%s10395_s1 + $0x7a8] sm:$0xff]  }
  0x2d   : > { %7459 = vmatpush3.bf16.msra.mxu0 %v8182_v48  ;;  %v8240_v48 = vld [vmem:[%s10395_s1 + $0x678] sm:$0xff]  }
  0x2e   : > { %7481 = vmatpush3.bf16.msra.mxu1 %v8183_v49  ;;  %7460 = vmatprep.subr.bf16.mxu0 %v8184_v50  ;;  %v8241_v49 = vld [vmem:[%s10395_s1 + $0x6f8] sm:$0xff]  }
  0x2f   : > { %7482 = vmatprep.subr.bf16.mxu1 %v8185_v51  ;;  %v8242_v50 = vld [vmem:[%s10395_s1 + $0x638] sm:$0xff]  }
  0x30   : > { %v8243_v51 = vld [vmem:[%s10395_s1 + $0x6b8] sm:$0xff]  }
  0x31   : > { %7461 = vmatpush3.bf16.msra.mxu0 %v8186_v52  ;;  %v489_v52 = vld [vmem:[%s8866_s6 + $0x20] sm:$0x66] }
  0x32   : > { %7483 = vmatpush3.bf16.msra.mxu1 %v8187_v53  ;;  %7462 = vmatprep.subr.bf16.mxu0 %v8188_v54  ;;  %v6327_v53 = vcombine.low %v489_v52, %v489_v52  ;;  %v6328_v54 = vcombine.high %v489_v52, %v489_v52  ;;  %v8296_v52 = vld [vmem:[%s10395_s1 + $0x58] sm:$0xff]  }
  0x33   : > { %7484 = vmatprep.subr.bf16.mxu1 %v8189_v55  ;;  %v490_v55 = vld [vmem:[%s8866_s6 + $0x28] sm:$0x66] }
  0x35   : > { %7463 = vmatpush3.bf16.msra.mxu0 %v8190_v56  ;;  %v6329_v56 = vcombine.low %v490_v55, %v490_v55 }
  0x36   : > { %7485 = vmatpush3.bf16.msra.mxu1 %v8191_v57  ;;  %7464 = vmatprep.subr.bf16.mxu0 %v8192_v58  ;;  %v6330_v57 = vcombine.high %v490_v55, %v490_v55  ;;  %v8248_v58 = vld [vmem:[%s10395_s1 + $0x740] sm:$0xff]   ;;  %v8299_v55 = vld [vmem:[%s10395_s1 + $0x98] sm:$0xff]  }
  0x37   : > { %7486 = vmatprep.subr.bf16.mxu1 %v8193_v59  ;;  %v798_v59 = vrot.slane %v6327_v53, 1  ;;  %v8297_v53 = vld [vmem:[%s10395_s1 + $0xd8] sm:$0xff]  }
  0x39   : > { %7465 = vmatpush3.bf16.msra.mxu0 %v8194_v60  ;;  %v799_v60 = vrot.slane %v6328_v54, 1  ;;  %v8298_v54 = vld [vmem:[%s10395_s1 + $0x18] sm:$0xff]  }
  0x3a   : > { %7487 = vmatpush3.bf16.msra.mxu1 %v8195_v61  ;;  %7466 = vmatprep.subr.bf16.mxu0 %v8196_v62  ;;  %v8249_v61 = vld [vmem:[%s10395_s1 + $0x7c0] sm:$0xff]  }
  0x3b   : > { %7488 = vmatprep.subr.bf16.mxu1 %v8197_v63  ;;  %v8250_v62 = vld [vmem:[%s10395_s1 + $0x700] sm:$0xff]   ;;  %v800_v63 = vrot.slane %v6329_v56, 1 }
  0x3c   : > { %v8300_v56 = vld [vmem:[%s10395_s1 + $0x60] sm:$0xff]  }
  0x3d   : > { %7467 = vmatpush3.bf16.msra.mxu0 %v8198_v0  ;;  %v801_v0 = vrot.slane %v6330_v57, 1  ;;  %v8301_v57 = vld [vmem:[%s10395_s1 + $0xe0] sm:$0xff]  }
  0x3e   : > { %7489 = vmatpush3.bf16.msra.mxu1 %v8199_v1  ;;  %7468 = vmatprep.subr.bf16.mxu0 %v8200_v2  ;;  %v8251_v1 = vld [vmem:[%s10395_s1 + $0x780] sm:$0xff]   ;;  %v8252_v2 = vld [vmem:[%s10395_s1 + $0x748] sm:$0xff]  }
  0x3f   : > { %7490 = vmatprep.subr.bf16.mxu1 %v8201_v3  ;;  %v8253_v3 = vld [vmem:[%s10395_s1 + $0x7c8] sm:$0xff]  }
  0x41   : > { %7469 = vmatpush3.bf16.msra.mxu0 %v8202_v4  ;;  %v8254_v4 = vld [vmem:[%s10395_s1 + $0x708] sm:$0xff]  }
  0x42   : > { %7491 = vmatpush3.bf16.msra.mxu1 %v8203_v5  ;;  %7470 = vmatprep.subr.bf16.mxu0 %v8204_v6  ;;  %v8255_v5 = vld [vmem:[%s10395_s1 + $0x788] sm:$0xff]   ;;  %v8256_v6 = vld [vmem:[%s10395_s1 + $0x750] sm:$0xff]  }
  0x43   : > { %7492 = vmatprep.subr.bf16.mxu1 %v8205_v7  ;;  %v8257_v7 = vld [vmem:[%s10395_s1 + $0x7d0] sm:$0xff]  }
  0x45   : > { %7471 = vmatpush3.bf16.msra.mxu0 %v8206_v8  ;;  %v8258_v8 = vld [vmem:[%s10395_s1 + $0x710] sm:$0xff]  }
  0x46   : > { %7493 = vmatpush3.bf16.msra.mxu1 %v8207_v9  ;;  %7500 = vmatprep.subr.bf16.mxu0 %v8212_v16  ;;  %v8259_v9 = vld [vmem:[%s10395_s1 + $0x790] sm:$0xff]   ;;  %v8266_v16 = vld [vmem:[%s10395_s1 + $0x720] sm:$0xff]  }
  0x47   : > { %7522 = vmatprep.subr.bf16.mxu1 %v8213_v17  ;;  %v8267_v17 = vld [vmem:[%s10395_s1 + $0x7a0] sm:$0xff]  }
  0x48   : > { %1703 = vmatmul.mubr.bf16.vlgmr.msra.gmra.mrb[4].mxu0 %v794_v18  ;;  %v8268_v18 = vld [vmem:[%s10395_s1 + $0x768] sm:$0xff]  }
  0x49   : > { %1743 = vmatmul.mubr.bf16.vlgmr.msra.gmra.mrb[4].mxu1 %v796_v20  ;;  %7501 = vmatpush3.bf16.msra.mxu0 %v8214_v22  ;;  %v8270_v20 = vld [vmem:[%s10395_s1 + $0x728] sm:$0xff]   ;;  %v8272_v22 = vld [vmem:[%s10395_s1 + $0x770] sm:$0xff]  }
  0x4a   : > { %7523 = vmatpush3.bf16.msra.mxu1 %v8215_v23  ;;  %7502 = vmatprep.subr.bf16.mxu0 %v8216_v24  ;;  %v8273_v23 = vld [vmem:[%s10395_s1 + $0x7f0] sm:$0xff]  }
  0x4b   : > { %7524 = vmatprep.subr.bf16.mxu1 %v8217_v25  ;;  %1782 = vmatprep.mubr.bf16.mxu0 %v799_v60  ;;  %v8274_v24 = vld [vmem:[%s10395_s1 + $0x730] sm:$0xff]   ;;  %v8304_v60 = vld [vmem:[%s10395_s1 + $0x68] sm:$0xff]  }
  0x4c   : > { %1822 = vmatprep.mubr.bf16.mxu1 %v801_v0  ;;  %v8275_v25 = vld [vmem:[%s10395_s1 + $0x7b0] sm:$0xff]  }
  0x4d   : > { %7503 = vmatpush3.bf16.msra.mxu0 %v8218_v26  ;;  %v8276_v26 = vld [vmem:[%s10395_s1 + $0x778] sm:$0xff]   ;;  %v8308_v0 = vld [vmem:[%s10395_s1 + $0x70] sm:$0xff]  }
  0x4e   : > { %7525 = vmatpush3.bf16.msra.mxu1 %v8219_v27  ;;  %7504 = vmatprep.subr.bf16.mxu0 %v8220_v28  ;;  %v8277_v27 = vld [vmem:[%s10395_s1 + $0x7f8] sm:$0xff]  }
  0x4f   : > { %7526 = vmatprep.subr.bf16.mxu1 %v8221_v29  ;;  %v8278_v28 = vld [vmem:[%s10395_s1 + $0x738] sm:$0xff]  }
  0x50   : > { %v8279_v29 = vld [vmem:[%s10395_s1 + $0x7b8] sm:$0xff]  }
  0x51   : > { %7505 = vmatpush3.bf16.msra.mxu0 %v8222_v30  ;;  %v491_v30 = vld [vmem:[%s8866_s6 + $0x30] sm:$0x66] }
  0x52   : > { %7527 = vmatpush3.bf16.msra.mxu1 %v8223_v31  ;;  %7506 = vmatprep.subr.bf16.mxu0 %v8224_v32  ;;  %v6331_v31 = vcombine.low %v491_v30, %v491_v30  ;;  %v6332_v32 = vcombine.high %v491_v30, %v491_v30  ;;  %v8336_v30 = vld [vmem:[%s10395_s1 + $0x160] sm:$0xff]  }
  0x53   : > { %7528 = vmatprep.subr.bf16.mxu1 %v8225_v33  ;;  %v492_v33 = vld [vmem:[%s8866_s6 + $0x38] sm:$0x66] }
  0x55   : > { %7507 = vmatpush3.bf16.msra.mxu0 %v8226_v34  ;;  %v6333_v34 = vcombine.low %v492_v33, %v492_v33 }
  0x56   : > { %7529 = vmatpush3.bf16.msra.mxu1 %v8227_v35  ;;  %7508 = vmatprep.subr.bf16.mxu0 %v8228_v36  ;;  %v6334_v35 = vcombine.high %v492_v33, %v492_v33  ;;  %v8284_v36 = vld [vmem:[%s10395_s1 + $0x40] sm:$0xff]  }
  0x57   : > { %7530 = vmatprep.subr.bf16.mxu1 %v8229_v37  ;;  %v802_v37 = vrot.slane %v6331_v31, 1  ;;  %v8337_v31 = vld [vmem:[%s10395_s1 + $0x1e0] sm:$0xff]  }
  0x58   : > { %v8339_v33 = vld [vmem:[%s10395_s1 + $0x1a0] sm:$0xff]  }
  0x59   : > { %7509 = vmatpush3.bf16.msra.mxu0 %v8230_v38  ;;  %v803_v38 = vrot.slane %v6332_v32, 1  ;;  %v8338_v32 = vld [vmem:[%s10395_s1 + $0x120] sm:$0xff]  }
  0x5a   : > { %7531 = vmatpush3.bf16.msra.mxu1 %v8231_v39  ;;  %7510 = vmatprep.subr.bf16.mxu0 %v8232_v40  ;;  %v8285_v39 = vld [vmem:[%s10395_s1 + $0xc0] sm:$0xff]  }
  0x5b   : > { %7532 = vmatprep.subr.bf16.mxu1 %v8233_v41  ;;  %v8286_v40 = vld [vmem:[%s10395_s1] sm:$0xff]   ;;  %v804_v41 = vrot.slane %v6333_v34, 1  ;;  %v8340_v34 = vld [vmem:[%s10395_s1 + $0x168] sm:$0xff]  }
  0x5d   : > { %7511 = vmatpush3.bf16.msra.mxu0 %v8234_v42  ;;  %v805_v42 = vrot.slane %v6334_v35, 1  ;;  %v8341_v35 = vld [vmem:[%s10395_s1 + $0x1e8] sm:$0xff]  }
  0x5e   : > { %7533 = vmatpush3.bf16.msra.mxu1 %v8235_v43  ;;  %7512 = vmatprep.subr.bf16.mxu0 %v8236_v44  ;;  %v8287_v43 = vld [vmem:[%s10395_s1 + $0x80] sm:$0xff]   ;;  %v8288_v44 = vld [vmem:[%s10395_s1 + $0x48] sm:$0xff]  }
  0x5f   : > { %7534 = vmatprep.subr.bf16.mxu1 %v8237_v45  ;;  %v8289_v45 = vld [vmem:[%s10395_s1 + $0xc8] sm:$0xff]  }
  0x61   : > { %7513 = vmatpush3.bf16.msra.mxu0 %v8238_v46  ;;  %v8290_v46 = vld [vmem:[%s10395_s1 + $0x8] sm:$0xff]  }
  0x62   : > { %7535 = vmatpush3.bf16.msra.mxu1 %v8239_v47  ;;  %7514 = vmatprep.subr.bf16.mxu0 %v8240_v48  ;;  %v8291_v47 = vld [vmem:[%s10395_s1 + $0x88] sm:$0xff]   ;;  %v8292_v48 = vld [vmem:[%s10395_s1 + $0x50] sm:$0xff]  }
  0x63   : > { %7536 = vmatprep.subr.bf16.mxu1 %v8241_v49  ;;  %v8293_v49 = vld [vmem:[%s10395_s1 + $0xd0] sm:$0xff]  }
  0x65   : > { %7515 = vmatpush3.bf16.msra.mxu0 %v8242_v50  ;;  %v8294_v50 = vld [vmem:[%s10395_s1 + $0x10] sm:$0xff]  }
  0x66   : > { %7537 = vmatpush3.bf16.msra.mxu1 %v8243_v51  ;;  %7544 = vmatprep.subr.bf16.mxu0 %v8248_v58  ;;  %v8295_v51 = vld [vmem:[%s10395_s1 + $0x90] sm:$0xff]   ;;  %v8302_v58 = vld [vmem:[%s10395_s1 + $0x20] sm:$0xff]  }
  0x67   : > { %7566 = vmatprep.subr.bf16.mxu1 %v8249_v61  ;;  %v8305_v61 = vld [vmem:[%s10395_s1 + $0xe8] sm:$0xff]  }
  0x68   : > { %1783 = vmatmul.mubr.bf16.vlgmr.msra.gmra.mrb[8].mxu0 %v798_v59  ;;  %v8303_v59 = vld [vmem:[%s10395_s1 + $0xa0] sm:$0xff]  }
  0x69   : > { %1823 = vmatmul.mubr.bf16.vlgmr.msra.gmra.mrb[8].mxu1 %v800_v63  ;;  %7545 = vmatpush3.bf16.msra.mxu0 %v8250_v62  ;;  %v8306_v62 = vld [vmem:[%s10395_s1 + $0x28] sm:$0xff]  }
  0x6a   : > { %7567 = vmatpush3.bf16.msra.mxu1 %v8251_v1  ;;  %7546 = vmatprep.subr.bf16.mxu0 %v8252_v2  ;;  %v8307_v63 = vld [vmem:[%s10395_s1 + $0xa8] sm:$0xff]   ;;  %v8309_v1 = vld [vmem:[%s10395_s1 + $0xf0] sm:$0xff]  }
  0x6b   : > { %7568 = vmatprep.subr.bf16.mxu1 %v8253_v3  ;;  %1862 = vmatprep.mubr.bf16.mxu0 %v803_v38  ;;  %v8310_v2 = vld [vmem:[%s10395_s1 + $0x30] sm:$0xff]  }
  0x6c   : > { %1902 = vmatprep.mubr.bf16.mxu1 %v805_v42  ;;  %v8311_v3 = vld [vmem:[%s10395_s1 + $0xb0] sm:$0xff]   ;;  %v8348_v42 = vld [vmem:[%s10395_s1 + $0x178] sm:$0xff]  }
  0x6d   : > { %7547 = vmatpush3.bf16.msra.mxu0 %v8254_v4  ;;  %v8312_v4 = vld [vmem:[%s10395_s1 + $0x78] sm:$0xff]   ;;  %v8344_v38 = vld [vmem:[%s10395_s1 + $0x170] sm:$0xff]  }
  0x6e   : > { %7569 = vmatpush3.bf16.msra.mxu1 %v8255_v5  ;;  %7548 = vmatprep.subr.bf16.mxu0 %v8256_v6  ;;  %v8313_v5 = vld [vmem:[%s10395_s1 + $0xf8] sm:$0xff]  }
  0x6f   : > { %7570 = vmatprep.subr.bf16.mxu1 %v8257_v7  ;;  %v8314_v6 = vld [vmem:[%s10395_s1 + $0x38] sm:$0xff]  }
  0x70   : > { %v8315_v7 = vld [vmem:[%s10395_s1 + $0xb8] sm:$0xff]  }
  0x71   : > { %7549 = vmatpush3.bf16.msra.mxu0 %v8258_v8  ;;  %v221_v8 = vld [vmem:[%s8866_s6] sm:$0x33] }
  0x72   : > { %7571 = vmatpush3.bf16.msra.mxu1 %v8259_v9  ;;  %7550 = vmatprep.subr.bf16.mxu0 %v8260_v10  ;;  %v6463_v9 = vcombine.low %v221_v8, %v221_v8  ;;  %v6464_v10 = vcombine.high %v221_v8, %v221_v8  ;;  %v8376_v8 = vld [vmem:[%s10395_s1 + $0x268] sm:$0xff]  }
  0x73   : > { %7572 = vmatprep.subr.bf16.mxu1 %v8261_v11  ;;  %v222_v11 = vld [vmem:[%s8866_s6 + $0x8] sm:$0x33] }
  0x75   : > { %7551 = vmatpush3.bf16.msra.mxu0 %v8262_v12  ;;  %v6465_v12 = vcombine.low %v222_v11, %v222_v11 }
  0x76   : > { %7573 = vmatpush3.bf16.msra.mxu1 %v8263_v13  ;;  %7552 = vmatprep.subr.bf16.mxu0 %v8264_v14  ;;  %v6466_v13 = vcombine.high %v222_v11, %v222_v11  ;;  %v8320_v14 = vld [vmem:[%s10395_s1 + $0x140] sm:$0xff]   ;;  %v8379_v11 = vld [vmem:[%s10395_s1 + $0x2a8] sm:$0xff]  }
  0x77   : > { %7574 = vmatprep.subr.bf16.mxu1 %v8265_v15  ;;  %v8321_v15 = vld [vmem:[%s10395_s1 + $0x1c0] sm:$0xff]  }
  0x79   : > { %7553 = vmatpush3.bf16.msra.mxu0 %v8266_v16  ;;  %v8322_v16 = vld [vmem:[%s10395_s1 + $0x100] sm:$0xff]  }
  0x7a   : > { %7575 = vmatpush3.bf16.msra.mxu1 %v8267_v17  ;;  %7554 = vmatprep.subr.bf16.mxu0 %v8268_v18  ;;  %v8323_v17 = vld [vmem:[%s10395_s1 + $0x180] sm:$0xff]   ;;  %v8324_v18 = vld [vmem:[%s10395_s1 + $0x148] sm:$0xff]  }
  0x7b   : > { %7576 = vmatprep.subr.bf16.mxu1 %v8269_v19  ;;  %v8325_v19 = vld [vmem:[%s10395_s1 + $0x1c8] sm:$0xff]  }
  0x7d   : > { %7555 = vmatpush3.bf16.msra.mxu0 %v8270_v20  ;;  %v8326_v20 = vld [vmem:[%s10395_s1 + $0x108] sm:$0xff]  }
  0x7e   : > { %7577 = vmatpush3.bf16.msra.mxu1 %v8271_v21  ;;  %7556 = vmatprep.subr.bf16.mxu0 %v8272_v22  ;;  %v8327_v21 = vld [vmem:[%s10395_s1 + $0x188] sm:$0xff]   ;;  %v8328_v22 = vld [vmem:[%s10395_s1 + $0x150] sm:$0xff]  }
  0x7f   : > { %7578 = vmatprep.subr.bf16.mxu1 %v8273_v23  ;;  %v8329_v23 = vld [vmem:[%s10395_s1 + $0x1d0] sm:$0xff]  }
  0x81   : > { %7557 = vmatpush3.bf16.msra.mxu0 %v8274_v24  ;;  %v8330_v24 = vld [vmem:[%s10395_s1 + $0x110] sm:$0xff]  }
  0x82   : > { %7579 = vmatpush3.bf16.msra.mxu1 %v8275_v25  ;;  %7558 = vmatprep.subr.bf16.mxu0 %v8276_v26  ;;  %v8331_v25 = vld [vmem:[%s10395_s1 + $0x190] sm:$0xff]   ;;  %v8332_v26 = vld [vmem:[%s10395_s1 + $0x158] sm:$0xff]  }
  0x83   : > { %7580 = vmatprep.subr.bf16.mxu1 %v8277_v27  ;;  %v8333_v27 = vld [vmem:[%s10395_s1 + $0x1d8] sm:$0xff]  }
  0x85   : > { %7559 = vmatpush3.bf16.msra.mxu0 %v8278_v28  ;;  %v8334_v28 = vld [vmem:[%s10395_s1 + $0x118] sm:$0xff]  }
  0x86   : > { %7581 = vmatpush3.bf16.msra.mxu1 %v8279_v29  ;;  %7588 = vmatprep.subr.bf16.mxu0 %v8284_v36  ;;  %v8335_v29 = vld [vmem:[%s10395_s1 + $0x198] sm:$0xff]   ;;  %v8342_v36 = vld [vmem:[%s10395_s1 + $0x128] sm:$0xff]  }
  0x87   : > { %7610 = vmatprep.subr.bf16.mxu1 %v8285_v39  ;;  %v8345_v39 = vld [vmem:[%s10395_s1 + $0x1f0] sm:$0xff]  }
  0x88   : > { %1863 = vmatmul.mubr.bf16.vlgmr.msra.gmra.mrb[12].mxu0 %v802_v37  ;;  %v8343_v37 = vld [vmem:[%s10395_s1 + $0x1a8] sm:$0xff]  }
  0x89   : > { %1903 = vmatmul.mubr.bf16.vlgmr.msra.gmra.mrb[12].mxu1 %v804_v41  ;;  %7589 = vmatpush3.bf16.msra.mxu0 %v8286_v40  ;;  %v8346_v40 = vld [vmem:[%s10395_s1 + $0x130] sm:$0xff]  }
  0x8a   : > { %7611 = vmatpush3.bf16.msra.mxu1 %v8287_v43  ;;  %7590 = vmatprep.subr.bf16.mxu0 %v8288_v44  ;;  %v8347_v41 = vld [vmem:[%s10395_s1 + $0x1b0] sm:$0xff]   ;;  %v8349_v43 = vld [vmem:[%s10395_s1 + $0x1f8] sm:$0xff]  }
  0x8b   : > { %7612 = vmatprep.subr.bf16.mxu1 %v8289_v45  ;;  %2766 = vmatprep.mubr.bf16.mxu0 %v6464_v10  ;;  %v8350_v44 = vld [vmem:[%s10395_s1 + $0x138] sm:$0xff]   ;;  %v8378_v10 = vld [vmem:[%s10395_s1 + $0x228] sm:$0xff]  }
  0x8c   : > { %2806 = vmatprep.mubr.bf16.mxu1 %v6466_v13  ;;  %v8351_v45 = vld [vmem:[%s10395_s1 + $0x1b8] sm:$0xff]   ;;  %v8381_v13 = vld [vmem:[%s10395_s1 + $0x2f0] sm:$0xff]  }
  0x8d   : > { %7591 = vmatpush3.bf16.msra.mxu0 %v8290_v46  ;;  %v223_v46 = vld [vmem:[%s8866_s6 + $0x10] sm:$0x33] }
  0x8e   : > { %7613 = vmatpush3.bf16.msra.mxu1 %v8291_v47  ;;  %7592 = vmatprep.subr.bf16.mxu0 %v8292_v48  ;;  %v224_v47 = vld [vmem:[%s8866_s6 + $0x18] sm:$0x33]  ;;  %v6467_v48 = vcombine.low %v223_v46, %v223_v46 }
  0x8f   : > { %7614 = vmatprep.subr.bf16.mxu1 %v8293_v49  ;;  %v6468_v49 = vcombine.high %v223_v46, %v223_v46  ;;  %v8411_v46 = vld [vmem:[%s10395_s1 + $0x3a0] sm:$0xff]  }
  0x91   : > { %7593 = vmatpush3.bf16.msra.mxu0 %v8294_v50  ;;  %v6469_v50 = vcombine.low %v224_v47, %v224_v47 }
  0x92   : > { %7615 = vmatpush3.bf16.msra.mxu1 %v8295_v51  ;;  %7594 = vmatprep.subr.bf16.mxu0 %v8296_v52  ;;  %v6470_v51 = vcombine.high %v224_v47, %v224_v47  ;;  %v8356_v52 = vld [vmem:[%s10395_s1 + $0x240] sm:$0xff]  }
  0x93   : > { %7616 = vmatprep.subr.bf16.mxu1 %v8297_v53  ;;  %v8357_v53 = vld [vmem:[%s10395_s1 + $0x2c0] sm:$0xff]  }
  0x95   : > { %7595 = vmatpush3.bf16.msra.mxu0 %v8298_v54  ;;  %v8358_v54 = vld [vmem:[%s10395_s1 + $0x200] sm:$0xff]  }
  0x96   : > { %7617 = vmatpush3.bf16.msra.mxu1 %v8299_v55  ;;  %7596 = vmatprep.subr.bf16.mxu0 %v8300_v56  ;;  %v8359_v55 = vld [vmem:[%s10395_s1 + $0x280] sm:$0xff]   ;;  %v8360_v56 = vld [vmem:[%s10395_s1 + $0x248] sm:$0xff]  }
  0x97   : > { %7618 = vmatprep.subr.bf16.mxu1 %v8301_v57  ;;  %v8361_v57 = vld [vmem:[%s10395_s1 + $0x2c8] sm:$0xff]  }
  0x99   : > { %7597 = vmatpush3.bf16.msra.mxu0 %v8302_v58  ;;  %v8362_v58 = vld [vmem:[%s10395_s1 + $0x208] sm:$0xff]  }
  0x9a   : > { %7619 = vmatpush3.bf16.msra.mxu1 %v8303_v59  ;;  %7598 = vmatprep.subr.bf16.mxu0 %v8304_v60  ;;  %v8363_v59 = vld [vmem:[%s10395_s1 + $0x288] sm:$0xff]   ;;  %v8364_v60 = vld [vmem:[%s10395_s1 + $0x250] sm:$0xff]  }
  0x9b   : > { %7620 = vmatprep.subr.bf16.mxu1 %v8305_v61  ;;  %v8365_v61 = vld [vmem:[%s10395_s1 + $0x2d0] sm:$0xff]  }
  0x9d   : > { %7599 = vmatpush3.bf16.msra.mxu0 %v8306_v62  ;;  %v8366_v62 = vld [vmem:[%s10395_s1 + $0x210] sm:$0xff]  }
  0x9e   : > { %7621 = vmatpush3.bf16.msra.mxu1 %v8307_v63  ;;  %7600 = vmatprep.subr.bf16.mxu0 %v8308_v0  ;;  %v8367_v63 = vld [vmem:[%s10395_s1 + $0x290] sm:$0xff]   ;;  %v8368_v0 = vld [vmem:[%s10395_s1 + $0x258] sm:$0xff]  }
  0x9f   : > { %7622 = vmatprep.subr.bf16.mxu1 %v8309_v1  ;;  %v8369_v1 = vld [vmem:[%s10395_s1 + $0x2d8] sm:$0xff]  }
  0xa1   : > { %7601 = vmatpush3.bf16.msra.mxu0 %v8310_v2  ;;  %v8370_v2 = vld [vmem:[%s10395_s1 + $0x218] sm:$0xff]  }
  0xa2   : > { %7623 = vmatpush3.bf16.msra.mxu1 %v8311_v3  ;;  %7602 = vmatprep.subr.bf16.mxu0 %v8312_v4  ;;  %v8371_v3 = vld [vmem:[%s10395_s1 + $0x298] sm:$0xff]   ;;  %v8372_v4 = vld [vmem:[%s10395_s1 + $0x260] sm:$0xff]  }
  0xa3   : > { %7624 = vmatprep.subr.bf16.mxu1 %v8313_v5  ;;  %v8373_v5 = vld [vmem:[%s10395_s1 + $0x2e0] sm:$0xff]  }
  0xa5   : > { %7603 = vmatpush3.bf16.msra.mxu0 %v8314_v6  ;;  %v8374_v6 = vld [vmem:[%s10395_s1 + $0x220] sm:$0xff]  }
  0xa6   : > { %7625 = vmatpush3.bf16.msra.mxu1 %v8315_v7  ;;  %7632 = vmatprep.subr.bf16.mxu0 %v8320_v14  ;;  %v8375_v7 = vld [vmem:[%s10395_s1 + $0x2a0] sm:$0xff]   ;;  %v8382_v14 = vld [vmem:[%s10395_s1 + $0x230] sm:$0xff]  }
  0xa7   : > { %7654 = vmatprep.subr.bf16.mxu1 %v8321_v15  ;;  %v8383_v15 = vld [vmem:[%s10395_s1 + $0x2b0] sm:$0xff]  }
  0xa8   : > { %2767 = vmatmul.mubr.bf16.vlgmr.msra.gmra.mrb[16].mxu0 %v6463_v9  ;;  %v8377_v9 = vld [vmem:[%s10395_s1 + $0x2e8] sm:$0xff]  }
  0xa9   : > { %2807 = vmatmul.mubr.bf16.vlgmr.msra.gmra.mrb[16].mxu1 %v6465_v12  ;;  %7633 = vmatpush3.bf16.msra.mxu0 %v8322_v16  ;;  %v8380_v12 = vld [vmem:[%s10395_s1 + $0x270] sm:$0xff]   ;;  %v8384_v16 = vld [vmem:[%s10395_s1 + $0x278] sm:$0xff]  }
  0xaa   : > { %7655 = vmatpush3.bf16.msra.mxu1 %v8323_v17  ;;  %7634 = vmatprep.subr.bf16.mxu0 %v8324_v18  ;;  %v8385_v17 = vld [vmem:[%s10395_s1 + $0x2f8] sm:$0xff]  }
  0xab   : > { %7656 = vmatprep.subr.bf16.mxu1 %v8325_v19  ;;  %2846 = vmatprep.mubr.bf16.mxu0 %v6468_v49  ;;  %v8386_v18 = vld [vmem:[%s10395_s1 + $0x238] sm:$0xff]   ;;  %v8412_v49 = vld [vmem:[%s10395_s1 + $0x368] sm:$0xff]  }
  0xac   : > { %2886 = vmatprep.mubr.bf16.mxu1 %v6470_v51  ;;  %v8387_v19 = vld [vmem:[%s10395_s1 + $0x2b8] sm:$0xff]  }
  0xad   : > { %7635 = vmatpush3.bf16.msra.mxu0 %v8326_v20  ;;  %v225_v20 = vld [vmem:[%s8866_s6 + $0x20] sm:$0x33] }
  0xae   : > { %7657 = vmatpush3.bf16.msra.mxu1 %v8327_v21  ;;  %7636 = vmatprep.subr.bf16.mxu0 %v8328_v22  ;;  %v226_v21 = vld [vmem:[%s8866_s6 + $0x28] sm:$0x33]  ;;  %v6471_v22 = vcombine.low %v225_v20, %v225_v20 }
  0xaf   : > { %7658 = vmatprep.subr.bf16.mxu1 %v8329_v23  ;;  %v6472_v23 = vcombine.high %v225_v20, %v225_v20  ;;  %v8437_v20 = vld [vmem:[%s10395_s1 + $0x8d0] sm:$0xff]  }
  0xb1   : > { %7637 = vmatpush3.bf16.msra.mxu0 %v8330_v24  ;;  %v6473_v24 = vcombine.low %v226_v21, %v226_v21 }
  0xb2   : > { %7659 = vmatpush3.bf16.msra.mxu1 %v8331_v25  ;;  %7638 = vmatprep.subr.bf16.mxu0 %v8332_v26  ;;  %v8392_v25 = vld [vmem:[%s10395_s1 + $0x340] sm:$0xff]   ;;  %v6474_v26 = vcombine.high %v226_v21, %v226_v21  ;;  %v8438_v21 = vld [vmem:[%s10395_s1 + $0x810] sm:$0xff]  }
  0xb3   : > { %7660 = vmatprep.subr.bf16.mxu1 %v8333_v27  ;;  %v8393_v27 = vld [vmem:[%s10395_s1 + $0x3c0] sm:$0xff]  }
  0xb5   : > { %7639 = vmatpush3.bf16.msra.mxu0 %v8334_v28  ;;  %v8394_v28 = vld [vmem:[%s10395_s1 + $0x300] sm:$0xff]  }
  0xb6   : > { %7661 = vmatpush3.bf16.msra.mxu1 %v8335_v29  ;;  %7640 = vmatprep.subr.bf16.mxu0 %v8336_v30  ;;  %v8395_v29 = vld [vmem:[%s10395_s1 + $0x380] sm:$0xff]   ;;  %v8396_v30 = vld [vmem:[%s10395_s1 + $0x348] sm:$0xff]  }
  0xb7   : > { %7662 = vmatprep.subr.bf16.mxu1 %v8337_v31  ;;  %v8397_v31 = vld [vmem:[%s10395_s1 + $0x3c8] sm:$0xff]  }
  0xb9   : > { %7641 = vmatpush3.bf16.msra.mxu0 %v8338_v32  ;;  %v8398_v32 = vld [vmem:[%s10395_s1 + $0x308] sm:$0xff]  }
  0xba   : > { %7663 = vmatpush3.bf16.msra.mxu1 %v8339_v33  ;;  %7642 = vmatprep.subr.bf16.mxu0 %v8340_v34  ;;  %v8399_v33 = vld [vmem:[%s10395_s1 + $0x388] sm:$0xff]   ;;  %v8400_v34 = vld [vmem:[%s10395_s1 + $0x350] sm:$0xff]  }
  0xbb   : > { %7664 = vmatprep.subr.bf16.mxu1 %v8341_v35  ;;  %v8401_v35 = vld [vmem:[%s10395_s1 + $0x3d0] sm:$0xff]  }
  0xbd   : > { %7643 = vmatpush3.bf16.msra.mxu0 %v8342_v36  ;;  %v8402_v36 = vld [vmem:[%s10395_s1 + $0x310] sm:$0xff]  }
  0xbe   : > { %7665 = vmatpush3.bf16.msra.mxu1 %v8343_v37  ;;  %7644 = vmatprep.subr.bf16.mxu0 %v8344_v38  ;;  %v8403_v37 = vld [vmem:[%s10395_s1 + $0x390] sm:$0xff]   ;;  %v8404_v38 = vld [vmem:[%s10395_s1 + $0x358] sm:$0xff]  }
  0xbf   : > { %7666 = vmatprep.subr.bf16.mxu1 %v8345_v39  ;;  %v8405_v39 = vld [vmem:[%s10395_s1 + $0x3d8] sm:$0xff]  }
  0xc1   : > { %7645 = vmatpush3.bf16.msra.mxu0 %v8346_v40  ;;  %v8406_v40 = vld [vmem:[%s10395_s1 + $0x318] sm:$0xff]  }
  0xc2   : > { %7667 = vmatpush3.bf16.msra.mxu1 %v8347_v41  ;;  %7646 = vmatprep.subr.bf16.mxu0 %v8348_v42  ;;  %v8407_v41 = vld [vmem:[%s10395_s1 + $0x398] sm:$0xff]   ;;  %v8408_v42 = vld [vmem:[%s10395_s1 + $0x360] sm:$0xff]  }
  0xc3   : > { %7668 = vmatprep.subr.bf16.mxu1 %v8349_v43  ;;  %v8409_v43 = vld [vmem:[%s10395_s1 + $0x3e0] sm:$0xff]  }
  0xc5   : > { %7647 = vmatpush3.bf16.msra.mxu0 %v8350_v44  ;;  %v8410_v44 = vld [vmem:[%s10395_s1 + $0x320] sm:$0xff]  }
  0xc6   : > { %7669 = vmatpush3.bf16.msra.mxu1 %v8351_v45  ;;  %7676 = vmatprep.subr.bf16.mxu0 %v8356_v52  ;;  %v8413_v52 = vld [vmem:[%s10395_s1 + $0x3e8] sm:$0xff]  }
  0xc7   : > { %7698 = vmatprep.subr.bf16.mxu1 %v8357_v53 }
  0xc8   : > { %2847 = vmatmul.mubr.bf16.vlgmr.msra.gmra.mrb[20].mxu0 %v6467_v48 }
  0xc9   : > { %2887 = vmatmul.mubr.bf16.vlgmr.msra.gmra.mrb[20].mxu1 %v6469_v50  ;;  %7677 = vmatpush3.bf16.msra.mxu0 %v8358_v54 }
  0xca   : > { %7699 = vmatpush3.bf16.msra.mxu1 %v8359_v55  ;;  %7678 = vmatprep.subr.bf16.mxu0 %v8360_v56  ;;  %v8414_v56 = vld [vmem:[%s10395_s1 + $0x328] sm:$0xff]  }
  0xcb   : > { %7700 = vmatprep.subr.bf16.mxu1 %v8361_v57  ;;  %2926 = vmatprep.mubr.bf16.mxu0 %v6472_v23  ;;  %v8440_v23 = vld [vmem:[%s10395_s1 + $0x858] sm:$0xff]  }
  0xcc   : > { %2966 = vmatprep.mubr.bf16.mxu1 %v6474_v26  ;;  %v8443_v26 = vld [vmem:[%s10395_s1 + $0x898] sm:$0xff]  }
  0xcd   : > { %7679 = vmatpush3.bf16.msra.mxu0 %v8362_v58 }
  0xce   : > { %7701 = vmatpush3.bf16.msra.mxu1 %v8363_v59  ;;  %7680 = vmatprep.subr.bf16.mxu0 %v8364_v60  ;;  %v8415_v59 = vld [vmem:[%s10395_s1 + $0x3a8] sm:$0xff]  }
  0xcf   : > { %7702 = vmatprep.subr.bf16.mxu1 %v8365_v61  ;;  %v8416_v61 = vld [vmem:[%s10395_s1 + $0x370] sm:$0xff]  }
  0xd1   : > { %7681 = vmatpush3.bf16.msra.mxu0 %v8366_v62  ;;  %v8417_v62 = vld [vmem:[%s10395_s1 + $0x3f0] sm:$0xff]  }
  0xd2   : > { %7703 = vmatpush3.bf16.msra.mxu1 %v8367_v63  ;;  %7682 = vmatprep.subr.bf16.mxu0 %v8368_v0  ;;  %v8418_v63 = vld [vmem:[%s10395_s1 + $0x330] sm:$0xff]  }
  0xd3   : > { %7704 = vmatprep.subr.bf16.mxu1 %v8369_v1  ;;  %v8419_v0 = vld [vmem:[%s10395_s1 + $0x3b0] sm:$0xff]   ;;  %v8420_v1 = vld [vmem:[%s10395_s1 + $0x378] sm:$0xff]  }
  0xd5   : > { %7683 = vmatpush3.bf16.msra.mxu0 %v8370_v2  ;;  %v8421_v2 = vld [vmem:[%s10395_s1 + $0x3f8] sm:$0xff]  }
  0xd6   : > { %7705 = vmatpush3.bf16.msra.mxu1 %v8371_v3  ;;  %7684 = vmatprep.subr.bf16.mxu0 %v8372_v4  ;;  %v8422_v3 = vld [vmem:[%s10395_s1 + $0x338] sm:$0xff]  }
  0xd7   : > { %7706 = vmatprep.subr.bf16.mxu1 %v8373_v5  ;;  %v8423_v4 = vld [vmem:[%s10395_s1 + $0x3b8] sm:$0xff]   ;;  %v227_v5 = vld [vmem:[%s8866_s6 + $0x30] sm:$0x33] }
  0xd9   : > { %7685 = vmatpush3.bf16.msra.mxu0 %v8374_v6  ;;  %v228_v6 = vld [vmem:[%s8866_s6 + $0x38] sm:$0x33] }
  0xda   : > { %7707 = vmatpush3.bf16.msra.mxu1 %v8375_v7  ;;  %7686 = vmatprep.subr.bf16.mxu0 %v8376_v8  ;;  %v6475_v7 = vcombine.low %v227_v5, %v227_v5  ;;  %v6476_v8 = vcombine.high %v227_v5, %v227_v5  ;;  %v8468_v5 = vld [vmem:[%s10395_s1 + $0x948] sm:$0xff]  }
  0xdb   : > { %7708 = vmatprep.subr.bf16.mxu1 %v8377_v9  ;;  %v6477_v9 = vcombine.low %v228_v6, %v228_v6 }
  0xdd   : > { %7687 = vmatpush3.bf16.msra.mxu0 %v8378_v10  ;;  %v8428_v10 = vld [vmem:[%s10395_s1 + $0x840] sm:$0xff]  }
  0xde   : > { %7709 = vmatpush3.bf16.msra.mxu1 %v8379_v11  ;;  %7688 = vmatprep.subr.bf16.mxu0 %v8380_v12  ;;  %v6478_v11 = vcombine.high %v228_v6, %v228_v6  ;;  %v8429_v12 = vld [vmem:[%s10395_s1 + $0x8c0] sm:$0xff]   ;;  %v8469_v6 = vld [vmem:[%s10395_s1 + $0x9c8] sm:$0xff]  }
  0xdf   : > { %7710 = vmatprep.subr.bf16.mxu1 %v8381_v13  ;;  %v8430_v13 = vld [vmem:[%s10395_s1 + $0x800] sm:$0xff]  }
  0xe1   : > { %7689 = vmatpush3.bf16.msra.mxu0 %v8382_v14  ;;  %v8431_v14 = vld [vmem:[%s10395_s1 + $0x880] sm:$0xff]  }
  0xe2   : > { %7711 = vmatpush3.bf16.msra.mxu1 %v8383_v15  ;;  %7690 = vmatprep.subr.bf16.mxu0 %v8384_v16  ;;  %v8432_v15 = vld [vmem:[%s10395_s1 + $0x848] sm:$0xff]  }
  0xe3   : > { %7712 = vmatprep.subr.bf16.mxu1 %v8385_v17  ;;  %v8433_v16 = vld [vmem:[%s10395_s1 + $0x8c8] sm:$0xff]  }
  0xe4   : > { %v8434_v17 = vld [vmem:[%s10395_s1 + $0x808] sm:$0xff]  }
  0xe5   : > { %7691 = vmatpush3.bf16.msra.mxu0 %v8386_v18  ;;  %v8435_v18 = vld [vmem:[%s10395_s1 + $0x888] sm:$0xff]  }
  0xe6   : > { %7713 = vmatpush3.bf16.msra.mxu1 %v8387_v19  ;;  %7720 = vmatprep.subr.bf16.mxu0 %v8392_v25  ;;  %v8436_v19 = vld [vmem:[%s10395_s1 + $0x850] sm:$0xff]   ;;  %v8442_v25 = vld [vmem:[%s10395_s1 + $0x818] sm:$0xff]  }
  0xe7   : > { %7742 = vmatprep.subr.bf16.mxu1 %v8393_v27  ;;  %v8444_v27 = vld [vmem:[%s10395_s1 + $0x860] sm:$0xff]  }
  0xe8   : > { %2927 = vmatmul.mubr.bf16.vlgmr.msra.gmra.mrb[24].mxu0 %v6471_v22  ;;  %v8439_v22 = vld [vmem:[%s10395_s1 + $0x890] sm:$0xff]  }
  0xe9   : > { %2967 = vmatmul.mubr.bf16.vlgmr.msra.gmra.mrb[24].mxu1 %v6473_v24  ;;  %7721 = vmatpush3.bf16.msra.mxu0 %v8394_v28  ;;  %v8441_v24 = vld [vmem:[%s10395_s1 + $0x8d8] sm:$0xff]   ;;  %v8445_v28 = vld [vmem:[%s10395_s1 + $0x8e0] sm:$0xff]  }
  0xea   : > { %7743 = vmatpush3.bf16.msra.mxu1 %v8395_v29  ;;  %7722 = vmatprep.subr.bf16.mxu0 %v8396_v30  ;;  %v8446_v29 = vld [vmem:[%s10395_s1 + $0x820] sm:$0xff]  }
  0xeb   : > { %7744 = vmatprep.subr.bf16.mxu1 %v8397_v31  ;;  %3006 = vmatprep.mubr.bf16.mxu0 %v6476_v8  ;;  %v8447_v31 = vld [vmem:[%s10395_s1 + $0x8a0] sm:$0xff]   ;;  %v8471_v8 = vld [vmem:[%s10395_s1 + $0x988] sm:$0xff]  }
  0xec   : > { %3046 = vmatprep.mubr.bf16.mxu1 %v6478_v11  ;;  %v8474_v11 = vld [vmem:[%s10395_s1 + $0x910] sm:$0xff]  }
  0xed   : > { %7723 = vmatpush3.bf16.msra.mxu0 %v8398_v32 }
  0xee   : > { %7745 = vmatpush3.bf16.msra.mxu1 %v8399_v33  ;;  %7724 = vmatprep.subr.bf16.mxu0 %v8400_v34  ;;  %v8448_v34 = vld [vmem:[%s10395_s1 + $0x868] sm:$0xff]  }
  0xef   : > { %7746 = vmatprep.subr.bf16.mxu1 %v8401_v35 }
  0xf1   : > { %7725 = vmatpush3.bf16.msra.mxu0 %v8402_v36 }
  0xf2   : > { %7747 = vmatpush3.bf16.msra.mxu1 %v8403_v37  ;;  %7726 = vmatprep.subr.bf16.mxu0 %v8404_v38  ;;  %v8449_v37 = vld [vmem:[%s10395_s1 + $0x8e8] sm:$0xff]  }
  0xf3   : > { %7748 = vmatprep.subr.bf16.mxu1 %v8405_v39 }
  0xf5   : > { %7727 = vmatpush3.bf16.msra.mxu0 %v8406_v40 }
  0xf6   : > { %7749 = vmatpush3.bf16.msra.mxu1 %v8407_v41  ;;  %7728 = vmatprep.subr.bf16.mxu0 %v8408_v42  ;;  %v8450_v42 = vld [vmem:[%s10395_s1 + $0x828] sm:$0xff]  }
  0xf7   : > { %7750 = vmatprep.subr.bf16.mxu1 %v8409_v43 }
  0xf9   : > { %7729 = vmatpush3.bf16.msra.mxu0 %v8410_v44  ;;  %v8451_v44 = vld [vmem:[%s10395_s1 + $0x8a8] sm:$0xff]  }
  0xfa   : > { %7751 = vmatpush3.bf16.msra.mxu1 %v8411_v46  ;;  %7730 = vmatprep.subr.bf16.mxu0 %v8412_v49  ;;  %v8454_v49 = vld [vmem:[%s10395_s1 + $0x830] sm:$0xff]  }
  0xfb   : > { %v7428_v45 = vpop.f32.mrb[0].mxu0  ;;  %7752 = vmatprep.subr.bf16.mxu1 %v8413_v52  ;;  %v8457_v52 = vld [vmem:[%s10395_s1 + $0x8f8] sm:$0xff]  }
  0xfc   : > { %v7450_v47 = vpop.f32.mrb[0].mxu1  ;;  %v7429_v48 = vpop.f32.mrb[1].mxu0 }
  0xfd   : > { %v7430_v50 = vadd.f32 %v7429_v48, %v7428_v45  ;;  %v7451_v51 = vpop.f32.mrb[1].mxu1  ;;  %v7431_v54 = vpop.f32.mrb[2].mxu0  ;;  %7731 = vmatpush3.bf16.msra.mxu0 %v8414_v56  ;;  %v8453_v48 = vld [vmem:[%s10395_s1 + $0x8f0] sm:$0xff]   ;;  %v3055_v56 = vld [vmem:[%s8866_s6 + $0x8] sm:$0xcc] }
  0xfe   : > { %v7452_v53 = vadd.f32 %v7451_v51, %v7450_v47  ;;  %v7453_v55 = vpop.f32.mrb[2].mxu1  ;;  %v7432_v57 = vpop.f32.mrb[3].mxu0  ;;  %7753 = vmatpush3.bf16.msra.mxu1 %v8415_v59  ;;  %7732 = vmatprep.subr.bf16.mxu0 %v8416_v61  ;;  %v8452_v47 = vld [vmem:[%s10395_s1 + $0x870] sm:$0xff]   ;;  %v8456_v51 = vld [vmem:[%s10395_s1 + $0x878] sm:$0xff]   ;;  %v6865_v59 = vcombine.low %v3055_v56, %v3055_v56  ;;  %v6866_v61 = vcombine.high %v3055_v56, %v3055_v56 }
  0xff   : > { %v7454_v60 = vpop.f32.mrb[3].mxu1  ;;  %7754 = vmatprep.subr.bf16.mxu1 %v8417_v62  ;;  %v8459_v54 = vld [vmem:[%s10395_s1 + $0x8b8] sm:$0xff]   ;;  %v3054_v55 = vld [vmem:[%s8866_s6] sm:$0xcc] }
 0x100   : > { %v9533_v58 = vadd.f32 %v7452_v53, %v7430_v50  ;;  %v8455_v50 = vld [vmem:[%s10395_s1 + $0x8b0] sm:$0xff]   ;;  %v8458_v53 = vld [vmem:[%s10395_s1 + $0x838] sm:$0xff]   ;;  %v6863_v57 = vcombine.low %v3054_v55, %v3054_v55  ;;  %v8464_v60 = vld [vmem:[%s10395_s1 + $0x940] sm:$0xff]  }
 0x101   : > { %7733 = vmatpush3.bf16.msra.mxu0 %v8418_v63  ;;  %v8465_v62 = vld [vmem:[%s10395_s1 + $0x9c0] sm:$0xff]  }
 0x102   : > { %7755 = vmatpush3.bf16.msra.mxu1 %v8419_v0  ;;  %7734 = vmatprep.subr.bf16.mxu0 %v8420_v1  ;;  %v3359_v63 = vrot.slane %v6863_v57, 2  ;;  %v3361_v1 = vrot.slane %v6865_v59, 2  ;;  %v8502_v57 = vld [vmem:[%s10395_s1 + $0xa00] sm:$0xff]   ;;  %v8504_v59 = vld [vmem:[%s10395_s1 + $0xa48] sm:$0xff]  }
 0x103   : > { %7756 = vmatprep.subr.bf16.mxu1 %v8421_v2  ;;  %v8466_v2 = vld [vmem:[%s10395_s1 + $0x900] sm:$0xff]  }
 0x105   : > { %7735 = vmatpush3.bf16.msra.mxu0 %v8422_v3  ;;  %v3362_v3 = vrot.slane %v6866_v61, 2  ;;  %v8506_v61 = vld [vmem:[%s10395_s1 + $0xa08] sm:$0xff]  }
 0x106   : > { %7757 = vmatpush3.bf16.msra.mxu1 %v8423_v4  ;;  %7764 = vmatprep.subr.bf16.mxu0 %v8428_v10  ;;  %v8467_v4 = vld [vmem:[%s10395_s1 + $0x980] sm:$0xff]   ;;  %v8473_v10 = vld [vmem:[%s10395_s1 + $0x9d0] sm:$0xff]  }
 0x107   : > { %7786 = vmatprep.subr.bf16.mxu1 %v8429_v12  ;;  %v8475_v12 = vld [vmem:[%s10395_s1 + $0x990] sm:$0xff]  }
 0x108   : > { %3007 = vmatmul.mubr.bf16.vlgmr.msra.gmra.mrb[28].mxu0 %v6475_v7  ;;  %v8470_v7 = vld [vmem:[%s10395_s1 + $0x908] sm:$0xff]  }
 0x109   : > { %3047 = vmatmul.mubr.bf16.vlgmr.msra.gmra.mrb[28].mxu1 %v6477_v9  ;;  %7765 = vmatpush3.bf16.msra.mxu0 %v8430_v13  ;;  %v8472_v9 = vld [vmem:[%s10395_s1 + $0x950] sm:$0xff]   ;;  %v8476_v13 = vld [vmem:[%s10395_s1 + $0x958] sm:$0xff]  }
 0x10a   : > { %7787 = vmatpush3.bf16.msra.mxu1 %v8431_v14  ;;  %7766 = vmatprep.subr.bf16.mxu0 %v8432_v15  ;;  %v8477_v14 = vld [vmem:[%s10395_s1 + $0x9d8] sm:$0xff]  }
 0x10b   : > { %7788 = vmatprep.subr.bf16.mxu1 %v8433_v16  ;;  %4231 = vmatprep.mubr.bf16.mxu1 %v3362_v3  ;;  %v8478_v15 = vld [vmem:[%s10395_s1 + $0x918] sm:$0xff]  }
 0x10c   : > { %v8479_v16 = vld [vmem:[%s10395_s1 + $0x998] sm:$0xff]  }
 0x10d   : > { %7767 = vmatpush3.bf16.msra.mxu0 %v8434_v17  ;;  %v8480_v17 = vld [vmem:[%s10395_s1 + $0x960] sm:$0xff]   ;;  %v8512_v3 = vld [vmem:[%s10395_s1 + $0xa58] sm:$0xff]  }
 0x10e   : > { %7789 = vmatpush3.bf16.msra.mxu1 %v8435_v18  ;;  %7768 = vmatprep.subr.bf16.mxu0 %v8436_v19  ;;  %v8481_v18 = vld [vmem:[%s10395_s1 + $0x9e0] sm:$0xff]  }
 0x10f   : > { %7790 = vmatprep.subr.bf16.mxu1 %v8437_v20  ;;  %v8482_v19 = vld [vmem:[%s10395_s1 + $0x920] sm:$0xff]  }
 0x111   : > { %7769 = vmatpush3.bf16.msra.mxu0 %v8438_v21  ;;  %v8483_v21 = vld [vmem:[%s10395_s1 + $0x9a0] sm:$0xff]  }
 0x112   : > { %7791 = vmatpush3.bf16.msra.mxu1 %v8439_v22  ;;  %7770 = vmatprep.subr.bf16.mxu0 %v8440_v23 }
 0x113   : > { %7792 = vmatprep.subr.bf16.mxu1 %v8441_v24 }
 0x115   : > { %7771 = vmatpush3.bf16.msra.mxu0 %v8442_v25 }
 0x116   : > { %7793 = vmatpush3.bf16.msra.mxu1 %v8443_v26  ;;  %7772 = vmatprep.subr.bf16.mxu0 %v8444_v27  ;;  %v8484_v27 = vld [vmem:[%s10395_s1 + $0x968] sm:$0xff]  }
 0x117   : > { %7794 = vmatprep.subr.bf16.mxu1 %v8445_v28 }
 0x119   : > { %7773 = vmatpush3.bf16.msra.mxu0 %v8446_v29  ;;  %v8485_v29 = vld [vmem:[%s10395_s1 + $0x9e8] sm:$0xff]  }
 0x11a   : > { %7795 = vmatpush3.bf16.msra.mxu1 %v8447_v31  ;;  %7774 = vmatprep.subr.bf16.mxu0 %v8448_v34  ;;  %v8487_v34 = vld [vmem:[%s10395_s1 + $0x9a8] sm:$0xff]  }
 0x11b   : > { %v7472_v30 = vpop.f32.mrb[4].mxu0  ;;  %7796 = vmatprep.subr.bf16.mxu1 %v8449_v37  ;;  %v8488_v37 = vld [vmem:[%s10395_s1 + $0x970] sm:$0xff]  }
 0x11c   : > { %v7494_v32 = vpop.f32.mrb[4].mxu1  ;;  %v7473_v33 = vpop.f32.mrb[5].mxu0 }
 0x11d   : > { %v7474_v35 = vadd.f32 %v7473_v33, %v7472_v30  ;;  %v7495_v36 = vpop.f32.mrb[5].mxu1  ;;  %v7475_v39 = vpop.f32.mrb[6].mxu0  ;;  %7775 = vmatpush3.bf16.msra.mxu0 %v8450_v42  ;;  %v8493_v42 = vld [vmem:[%s10395_s1 + $0x9f8] sm:$0xff]  }
 0x11e   : > { %v7496_v38 = vadd.f32 %v7495_v36, %v7494_v32  ;;  %v7497_v40 = vpop.f32.mrb[6].mxu1  ;;  %v7476_v43 = vpop.f32.mrb[7].mxu0  ;;  %7797 = vmatpush3.bf16.msra.mxu1 %v8451_v44  ;;  %7776 = vmatprep.subr.bf16.mxu0 %v8452_v47  ;;  %v8486_v32 = vld [vmem:[%s10395_s1 + $0x928] sm:$0xff]   ;;  %v8490_v39 = vld [vmem:[%s10395_s1 + $0x930] sm:$0xff]   ;;  %v8495_v44 = vld [vmem:[%s10395_s1 + $0x9b8] sm:$0xff]  }
 0x11f   : > { %v1705_v41 = vadd.f32 %v7474_v35, %v9533_v58  ;;  %v7498_v45 = vpop.f32.mrb[7].mxu1  ;;  %7798 = vmatprep.subr.bf16.mxu1 %v8453_v48  ;;  %v6864_v58 = vcombine.high %v3054_v55, %v3054_v55  ;;  %v8491_v40 = vld [vmem:[%s10395_s1 + $0x9b0] sm:$0xff]   ;;  %v8494_v43 = vld [vmem:[%s10395_s1 + $0x938] sm:$0xff]  }
 0x120   : > { %v3056_v45 = vld [vmem:[%s8866_s6 + $0x10] sm:$0xcc] }
 0x121   : > { %v9637_v46 = vadd.f32 %v7496_v38, %v1705_v41  ;;  %7777 = vmatpush3.bf16.msra.mxu0 %v8454_v49  ;;  %v3360_v0 = vrot.slane %v6864_v58, 2  ;;  %v8489_v38 = vld [vmem:[%s10395_s1 + $0x9f0] sm:$0xff]   ;;  %v8492_v41 = vld [vmem:[%s10395_s1 + $0x978] sm:$0xff]   ;;  %v6867_v47 = vcombine.low %v3056_v45, %v3056_v45  ;;  %v6868_v48 = vcombine.high %v3056_v45, %v3056_v45  ;;  %v8503_v58 = vld [vmem:[%s10395_s1 + $0xa80] sm:$0xff]  }
 0x122   : > { %7799 = vmatpush3.bf16.msra.mxu1 %v8455_v50  ;;  %7778 = vmatprep.subr.bf16.mxu0 %v8456_v51  ;;  %v8500_v51 = vld [vmem:[%s10395_s1 + $0xa40] sm:$0xff]  }
 0x123   : > { %7800 = vmatprep.subr.bf16.mxu1 %v8457_v52  ;;  %4191 = vmatprep.mubr.bf16.mxu0 %v3360_v0  ;;  %v8501_v52 = vld [vmem:[%s10395_s1 + $0xac0] sm:$0xff]   ;;  %v8509_v0 = vld [vmem:[%s10395_s1 + $0xad0] sm:$0xff]  }
 0x124   : > { %v8538_v45 = vld [vmem:[%s10395_s1 + $0xb00] sm:$0xff]  }
 0x125   : > { %7779 = vmatpush3.bf16.msra.mxu0 %v8458_v53  ;;  %v3363_v53 = vrot.slane %v6867_v47, 2 }
 0x126   : > { %7801 = vmatpush3.bf16.msra.mxu1 %v8459_v54  ;;  %7808 = vmatprep.subr.bf16.mxu0 %v8464_v60  ;;  %v3364_v54 = vrot.slane %v6868_v48, 2  ;;  %v8505_v60 = vld [vmem:[%s10395_s1 + $0xac8] sm:$0xff]   ;;  %v8539_v48 = vld [vmem:[%s10395_s1 + $0xb80] sm:$0xff]  }
 0x127   : > { %7830 = vmatprep.subr.bf16.mxu1 %v8465_v62  ;;  %v8507_v62 = vld [vmem:[%s10395_s1 + $0xa88] sm:$0xff]  }
 0x128   : > { %4192 = vmatmul.mubr.bf16.vlgmr.msra.gmra.mrb[32].mxu0 %v3359_v63  ;;  %v8508_v63 = vld [vmem:[%s10395_s1 + $0xa50] sm:$0xff]  }
 0x129   : > { %4232 = vmatmul.mubr.bf16.vlgmr.msra.gmra.mrb[32].mxu1 %v3361_v1  ;;  %7809 = vmatpush3.bf16.msra.mxu0 %v8466_v2  ;;  %v8510_v1 = vld [vmem:[%s10395_s1 + $0xa10] sm:$0xff]  }
 0x12a   : > { %7831 = vmatpush3.bf16.msra.mxu1 %v8467_v4  ;;  %7810 = vmatprep.subr.bf16.mxu0 %v8468_v5  ;;  %v8511_v2 = vld [vmem:[%s10395_s1 + $0xa90] sm:$0xff]   ;;  %v8513_v4 = vld [vmem:[%s10395_s1 + $0xad8] sm:$0xff]  }
 0x12b   : > { %7832 = vmatprep.subr.bf16.mxu1 %v8469_v6  ;;  %4271 = vmatprep.mubr.bf16.mxu0 %v3364_v54  ;;  %v8514_v5 = vld [vmem:[%s10395_s1 + $0xa18] sm:$0xff]   ;;  %v8545_v54 = vld [vmem:[%s10395_s1 + $0xbd0] sm:$0xff]  }
 0x12c   : > { %v8515_v6 = vld [vmem:[%s10395_s1 + $0xa98] sm:$0xff]  }
 0x12d   : > { %7811 = vmatpush3.bf16.msra.mxu0 %v8470_v7  ;;  %v8516_v7 = vld [vmem:[%s10395_s1 + $0xa60] sm:$0xff]  }
 0x12e   : > { %7833 = vmatpush3.bf16.msra.mxu1 %v8471_v8  ;;  %7812 = vmatprep.subr.bf16.mxu0 %v8472_v9  ;;  %v8517_v8 = vld [vmem:[%s10395_s1 + $0xae0] sm:$0xff]  }
 0x12f   : > { %7834 = vmatprep.subr.bf16.mxu1 %v8473_v10  ;;  %v8518_v10 = vld [vmem:[%s10395_s1 + $0xa20] sm:$0xff]  }
 0x131   : > { %7813 = vmatpush3.bf16.msra.mxu0 %v8474_v11 }
 0x132   : > { %7835 = vmatpush3.bf16.msra.mxu1 %v8475_v12  ;;  %7814 = vmatprep.subr.bf16.mxu0 %v8476_v13  ;;  %v8519_v12 = vld [vmem:[%s10395_s1 + $0xaa0] sm:$0xff]  }
 0x133   : > { %7836 = vmatprep.subr.bf16.mxu1 %v8477_v14 }
 0x135   : > { %7815 = vmatpush3.bf16.msra.mxu0 %v8478_v15  ;;  %v8520_v15 = vld [vmem:[%s10395_s1 + $0xa68] sm:$0xff]  }
 0x136   : > { %7837 = vmatpush3.bf16.msra.mxu1 %v8479_v16  ;;  %7816 = vmatprep.subr.bf16.mxu0 %v8480_v17 }
 0x137   : > { %7838 = vmatprep.subr.bf16.mxu1 %v8481_v18  ;;  %v8521_v18 = vld [vmem:[%s10395_s1 + $0xae8] sm:$0xff]  }
 0x139   : > { %7817 = vmatpush3.bf16.msra.mxu0 %v8482_v19 }
 0x13a   : > { %7839 = vmatpush3.bf16.msra.mxu1 %v8483_v21  ;;  %7818 = vmatprep.subr.bf16.mxu0 %v8484_v27  ;;  %v8522_v21 = vld [vmem:[%s10395_s1 + $0xa28] sm:$0xff]  }
 0x13b   : > { %v7516_v20 = vpop.f32.mrb[8].mxu0  ;;  %7840 = vmatprep.subr.bf16.mxu1 %v8485_v29  ;;  %v8526_v29 = vld [vmem:[%s10395_s1 + $0xa30] sm:$0xff]  }
 0x13c   : > { %v7538_v22 = vpop.f32.mrb[8].mxu1  ;;  %v7517_v23 = vpop.f32.mrb[9].mxu0 }
 0x13d   : > { %v7539_v24 = vpop.f32.mrb[9].mxu1  ;;  %v7518_v25 = vadd.f32 %v7517_v23, %v7516_v20  ;;  %v7519_v28 = vpop.f32.mrb[10].mxu0  ;;  %7819 = vmatpush3.bf16.msra.mxu0 %v8486_v32  ;;  %v8523_v23 = vld [vmem:[%s10395_s1 + $0xaa8] sm:$0xff]   ;;  %v8529_v32 = vld [vmem:[%s10395_s1 + $0xaf8] sm:$0xff]  }
 0x13e   : > { %v7540_v26 = vadd.f32 %v7539_v24, %v7538_v22  ;;  %v7541_v30 = vpop.f32.mrb[10].mxu1  ;;  %v7520_v33 = vpop.f32.mrb[11].mxu0  ;;  %7841 = vmatpush3.bf16.msra.mxu1 %v8487_v34  ;;  %7820 = vmatprep.subr.bf16.mxu0 %v8488_v37  ;;  %v8525_v28 = vld [vmem:[%s10395_s1 + $0xaf0] sm:$0xff]   ;;  %v8531_v34 = vld [vmem:[%s10395_s1 + $0xab8] sm:$0xff]  }
 0x13f   : > { %v1785_v31 = vadd.f32 %v7518_v25, %v9637_v46  ;;  %v7542_v35 = vpop.f32.mrb[11].mxu1  ;;  %7842 = vmatprep.subr.bf16.mxu1 %v8489_v38  ;;  %v3057_v46 = vld [vmem:[%s8866_s6 + $0x18] sm:$0xcc]  ;;  %v8527_v30 = vld [vmem:[%s10395_s1 + $0xab0] sm:$0xff]   ;;  %v3059_v38 = vld [vmem:[%s8866_s6 + $0x28] sm:$0xcc] }
 0x140   : > { %v6869_v49 = vcombine.low %v3057_v46, %v3057_v46  ;;  %v6870_v50 = vcombine.high %v3057_v46, %v3057_v46  ;;  %v8530_v33 = vld [vmem:[%s10395_s1 + $0xa38] sm:$0xff]   ;;  %v3058_v35 = vld [vmem:[%s8866_s6 + $0x20] sm:$0xcc] }
 0x141   : > { %v9738_v36 = vadd.f32 %v7540_v26, %v1785_v31  ;;  %7821 = vmatpush3.bf16.msra.mxu0 %v8490_v39  ;;  %v8524_v26 = vld [vmem:[%s10395_s1 + $0xa70] sm:$0xff]   ;;  %v8528_v31 = vld [vmem:[%s10395_s1 + $0xa78] sm:$0xff]   ;;  %v6872_v37 = vcombine.high %v3058_v35, %v3058_v35  ;;  %v6873_v39 = vcombine.low %v3059_v38, %v3059_v38 }
 0x142   : > { %7843 = vmatpush3.bf16.msra.mxu1 %v8491_v40  ;;  %7822 = vmatprep.subr.bf16.mxu0 %v8492_v41  ;;  %v3365_v55 = vrot.slane %v6869_v49, 2  ;;  %v3366_v56 = vrot.slane %v6870_v50, 2  ;;  %v6874_v40 = vcombine.high %v3059_v38, %v3059_v38  ;;  %v8536_v41 = vld [vmem:[%s10395_s1 + $0xb40] sm:$0xff]   ;;  %v8540_v49 = vld [vmem:[%s10395_s1 + $0xb48] sm:$0xff]  }
 0x143   : > { %7844 = vmatprep.subr.bf16.mxu1 %v8493_v42  ;;  %v3369_v46 = vrot.slane %v6873_v39, 2  ;;  %v8541_v50 = vld [vmem:[%s10395_s1 + $0xbc8] sm:$0xff]   ;;  %v8575_v38 = vld [vmem:[%s10395_s1 + $0xc80] sm:$0xff]  }
 0x144   : > { %4311 = vmatprep.mubr.bf16.mxu1 %v3366_v56  ;;  %v3370_v47 = vrot.slane %v6874_v40, 2  ;;  %v8547_v56 = vld [vmem:[%s10395_s1 + $0xb90] sm:$0xff]   ;;  %v8576_v39 = vld [vmem:[%s10395_s1 + $0xc48] sm:$0xff]  }
 0x145   : > { %7823 = vmatpush3.bf16.msra.mxu0 %v8494_v43  ;;  %v3368_v43 = vrot.slane %v6872_v37, 2  ;;  %v8577_v40 = vld [vmem:[%s10395_s1 + $0xcc8] sm:$0xff]  }
 0x146   : > { %7845 = vmatpush3.bf16.msra.mxu1 %v8495_v44  ;;  %7852 = vmatprep.subr.bf16.mxu0 %v8500_v51  ;;  %v8537_v44 = vld [vmem:[%s10395_s1 + $0xbc0] sm:$0xff]   ;;  %v8542_v51 = vld [vmem:[%s10395_s1 + $0xb08] sm:$0xff]  }
 0x147   : > { %7874 = vmatprep.subr.bf16.mxu1 %v8501_v52  ;;  %v8543_v52 = vld [vmem:[%s10395_s1 + $0xb88] sm:$0xff]  }
 0x148   : > { %4272 = vmatmul.mubr.bf16.vlgmr.msra.gmra.mrb[36].mxu0 %v3363_v53  ;;  %v8544_v53 = vld [vmem:[%s10395_s1 + $0xb50] sm:$0xff]  }
 0x149   : > { %4312 = vmatmul.mubr.bf16.vlgmr.msra.gmra.mrb[36].mxu1 %v3365_v55  ;;  %7853 = vmatpush3.bf16.msra.mxu0 %v8502_v57  ;;  %v8546_v55 = vld [vmem:[%s10395_s1 + $0xb10] sm:$0xff]   ;;  %v8548_v57 = vld [vmem:[%s10395_s1 + $0xb58] sm:$0xff]  }
 0x14a   : > { %7875 = vmatpush3.bf16.msra.mxu1 %v8503_v58  ;;  %7854 = vmatprep.subr.bf16.mxu0 %v8504_v59  ;;  %v8549_v58 = vld [vmem:[%s10395_s1 + $0xbd8] sm:$0xff]  }
 0x14b   : > { %7876 = vmatprep.subr.bf16.mxu1 %v8505_v60  ;;  %4351 = vmatprep.mubr.bf16.mxu0 %v3368_v43  ;;  %v8550_v59 = vld [vmem:[%s10395_s1 + $0xb18] sm:$0xff]   ;;  %v8580_v43 = vld [vmem:[%s10395_s1 + $0xc50] sm:$0xff]  }
 0x14c   : > { %4391 = vmatprep.mubr.bf16.mxu1 %v3370_v47  ;;  %v8551_v60 = vld [vmem:[%s10395_s1 + $0xb98] sm:$0xff]  }
 0x14d   : > { %7855 = vmatpush3.bf16.msra.mxu0 %v8506_v61  ;;  %v8552_v61 = vld [vmem:[%s10395_s1 + $0xb60] sm:$0xff]   ;;  %v8584_v47 = vld [vmem:[%s10395_s1 + $0xc58] sm:$0xff]  }
 0x14e   : > { %7877 = vmatpush3.bf16.msra.mxu1 %v8507_v62  ;;  %7856 = vmatprep.subr.bf16.mxu0 %v8508_v63  ;;  %v8553_v63 = vld [vmem:[%s10395_s1 + $0xbe0] sm:$0xff]  }
 0x14f   : > { %7878 = vmatprep.subr.bf16.mxu1 %v8509_v0 }
 0x151   : > { %7857 = vmatpush3.bf16.msra.mxu0 %v8510_v1  ;;  %v8554_v1 = vld [vmem:[%s10395_s1 + $0xb20] sm:$0xff]  }
 0x152   : > { %7879 = vmatpush3.bf16.msra.mxu1 %v8511_v2  ;;  %7858 = vmatprep.subr.bf16.mxu0 %v8512_v3  ;;  %v8555_v3 = vld [vmem:[%s10395_s1 + $0xba0] sm:$0xff]  }
 0x153   : > { %7880 = vmatprep.subr.bf16.mxu1 %v8513_v4 }
 0x155   : > { %7859 = vmatpush3.bf16.msra.mxu0 %v8514_v5 }
 0x156   : > { %7881 = vmatpush3.bf16.msra.mxu1 %v8515_v6  ;;  %7860 = vmatprep.subr.bf16.mxu0 %v8516_v7  ;;  %v8556_v7 = vld [vmem:[%s10395_s1 + $0xb68] sm:$0xff]  }
 0x157   : > { %7882 = vmatprep.subr.bf16.mxu1 %v8517_v8 }
 0x159   : > { %7861 = vmatpush3.bf16.msra.mxu0 %v8518_v10  ;;  %v8557_v10 = vld [vmem:[%s10395_s1 + $0xbe8] sm:$0xff]  }
 0x15a   : > { %7883 = vmatpush3.bf16.msra.mxu1 %v8519_v12  ;;  %7862 = vmatprep.subr.bf16.mxu0 %v8520_v15  ;;  %v8558_v12 = vld [vmem:[%s10395_s1 + $0xb28] sm:$0xff]  }
 0x15b   : > { %v7560_v9 = vpop.f32.mrb[12].mxu0  ;;  %7884 = vmatprep.subr.bf16.mxu1 %v8521_v18  ;;  %v8559_v15 = vld [vmem:[%s10395_s1 + $0xba8] sm:$0xff]   ;;  %v8561_v18 = vld [vmem:[%s10395_s1 + $0xbf0] sm:$0xff]  }
 0x15c   : > { %v7582_v11 = vpop.f32.mrb[12].mxu1  ;;  %v7561_v13 = vpop.f32.mrb[13].mxu0 }
 0x15d   : > { %v7583_v14 = vpop.f32.mrb[13].mxu1  ;;  %v7562_v16 = vadd.f32 %v7561_v13, %v7560_v9  ;;  %v7563_v19 = vpop.f32.mrb[14].mxu0  ;;  %7863 = vmatpush3.bf16.msra.mxu0 %v8522_v21  ;;  %v8564_v21 = vld [vmem:[%s10395_s1 + $0xb78] sm:$0xff]  }
 0x15e   : > { %v7584_v17 = vadd.f32 %v7583_v14, %v7582_v11  ;;  %v7585_v20 = vpop.f32.mrb[14].mxu1  ;;  %v7564_v24 = vpop.f32.mrb[15].mxu0  ;;  %7885 = vmatpush3.bf16.msra.mxu1 %v8523_v23  ;;  %7864 = vmatprep.subr.bf16.mxu0 %v8524_v26  ;;  %v8562_v19 = vld [vmem:[%s10395_s1 + $0xb30] sm:$0xff]   ;;  %v8566_v23 = vld [vmem:[%s10395_s1 + $0xb38] sm:$0xff]  }
 0x15f   : > { %v1865_v22 = vadd.f32 %v7562_v16, %v9738_v36  ;;  %v7586_v25 = vpop.f32.mrb[15].mxu1  ;;  %7886 = vmatprep.subr.bf16.mxu1 %v8525_v28  ;;  %v6871_v36 = vcombine.low %v3058_v35, %v3058_v35  ;;  %v8563_v20 = vld [vmem:[%s10395_s1 + $0xbb0] sm:$0xff]   ;;  %v8567_v24 = vld [vmem:[%s10395_s1 + $0xbb8] sm:$0xff]   ;;  %v8574_v35 = vld [vmem:[%s10395_s1 + $0xc00] sm:$0xff]  }
 0x160   : > { %v3060_v25 = vld [vmem:[%s8866_s6 + $0x30] sm:$0xcc]  ;;  %v3061_v28 = vld [vmem:[%s8866_s6 + $0x38] sm:$0xcc] }
 0x161   : > { %v9842_v27 = vadd.f32 %v7584_v17, %v1865_v22  ;;  %7865 = vmatpush3.bf16.msra.mxu0 %v8526_v29  ;;  %v3367_v42 = vrot.slane %v6871_v36, 2  ;;  %v8560_v17 = vld [vmem:[%s10395_s1 + $0xb70] sm:$0xff]   ;;  %v8565_v22 = vld [vmem:[%s10395_s1 + $0xbf8] sm:$0xff]   ;;  %v6875_v26 = vcombine.low %v3060_v25, %v3060_v25  ;;  %v6877_v29 = vcombine.low %v3061_v28, %v3061_v28 }
 0x162   : > { %7887 = vmatpush3.bf16.msra.mxu1 %v8527_v30  ;;  %7866 = vmatprep.subr.bf16.mxu0 %v8528_v31  ;;  %v6878_v30 = vcombine.high %v3061_v28, %v3061_v28  ;;  %v8572_v31 = vld [vmem:[%s10395_s1 + $0xc40] sm:$0xff]  }
 0x163   : > { %7888 = vmatprep.subr.bf16.mxu1 %v8529_v32  ;;  %v3371_v32 = vrot.slane %v6875_v26, 2  ;;  %v3373_v36 = vrot.slane %v6877_v29, 2  ;;  %v8606_v29 = vld [vmem:[%s10395_s1 + $0xd00] sm:$0xff]  }
 0x164   : > { %v3374_v37 = vrot.slane %v6878_v30, 2  ;;  %v8607_v30 = vld [vmem:[%s10395_s1 + $0xd80] sm:$0xff]  }
 0x165   : > { %7867 = vmatpush3.bf16.msra.mxu0 %v8530_v33 }
 0x166   : > { %7889 = vmatpush3.bf16.msra.mxu1 %v8531_v34  ;;  %7896 = vmatprep.subr.bf16.mxu0 %v8536_v41  ;;  %v8573_v34 = vld [vmem:[%s10395_s1 + $0xcc0] sm:$0xff]   ;;  %v8578_v41 = vld [vmem:[%s10395_s1 + $0xc08] sm:$0xff]  }
 0x167   : > { %7918 = vmatprep.subr.bf16.mxu1 %v8537_v44  ;;  %v8581_v44 = vld [vmem:[%s10395_s1 + $0xcd0] sm:$0xff]  }
 0x168   : > { %4352 = vmatmul.mubr.bf16.vlgmr.msra.gmra.mrb[40].mxu0 %v3367_v42  ;;  %v8579_v42 = vld [vmem:[%s10395_s1 + $0xc88] sm:$0xff]  }
 0x169   : > { %4392 = vmatmul.mubr.bf16.vlgmr.msra.gmra.mrb[40].mxu1 %v3369_v46  ;;  %7897 = vmatpush3.bf16.msra.mxu0 %v8538_v45  ;;  %v8582_v45 = vld [vmem:[%s10395_s1 + $0xc10] sm:$0xff]  }
 0x16a   : > { %7919 = vmatpush3.bf16.msra.mxu1 %v8539_v48  ;;  %7898 = vmatprep.subr.bf16.mxu0 %v8540_v49  ;;  %v8583_v46 = vld [vmem:[%s10395_s1 + $0xc90] sm:$0xff]   ;;  %v8585_v48 = vld [vmem:[%s10395_s1 + $0xcd8] sm:$0xff]  }
 0x16b   : > { %7920 = vmatprep.subr.bf16.mxu1 %v8541_v50  ;;  %4471 = vmatprep.mubr.bf16.mxu1 %v3374_v37  ;;  %v8586_v49 = vld [vmem:[%s10395_s1 + $0xc18] sm:$0xff]   ;;  %v8614_v37 = vld [vmem:[%s10395_s1 + $0xd10] sm:$0xff]  }
 0x16c   : > { %v8587_v50 = vld [vmem:[%s10395_s1 + $0xc98] sm:$0xff]  }
 0x16d   : > { %7899 = vmatpush3.bf16.msra.mxu0 %v8542_v51 }
 0x16e   : > { %7921 = vmatpush3.bf16.msra.mxu1 %v8543_v52  ;;  %7900 = vmatprep.subr.bf16.mxu0 %v8544_v53  ;;  %v8588_v52 = vld [vmem:[%s10395_s1 + $0xc60] sm:$0xff]  }
 0x16f   : > { %7922 = vmatprep.subr.bf16.mxu1 %v8545_v54  ;;  %v8589_v54 = vld [vmem:[%s10395_s1 + $0xce0] sm:$0xff]  }
 0x171   : > { %7901 = vmatpush3.bf16.msra.mxu0 %v8546_v55 }
 0x172   : > { %7923 = vmatpush3.bf16.msra.mxu1 %v8547_v56  ;;  %7902 = vmatprep.subr.bf16.mxu0 %v8548_v57  ;;  %v8590_v56 = vld [vmem:[%s10395_s1 + $0xc20] sm:$0xff]  }
 0x173   : > { %7924 = vmatprep.subr.bf16.mxu1 %v8549_v58 }
 0x175   : > { %7903 = vmatpush3.bf16.msra.mxu0 %v8550_v59  ;;  %v8591_v59 = vld [vmem:[%s10395_s1 + $0xca0] sm:$0xff]  }
 0x176   : > { %7925 = vmatpush3.bf16.msra.mxu1 %v8551_v60  ;;  %7904 = vmatprep.subr.bf16.mxu0 %v8552_v61 }
 0x177   : > { %7926 = vmatprep.subr.bf16.mxu1 %v8553_v63  ;;  %v8592_v63 = vld [vmem:[%s10395_s1 + $0xc68] sm:$0xff]  }
 0x179   : > { %7905 = vmatpush3.bf16.msra.mxu0 %v8554_v1  ;;  %v8593_v1 = vld [vmem:[%s10395_s1 + $0xce8] sm:$0xff]  }
 0x17a   : > { %7927 = vmatpush3.bf16.msra.mxu1 %v8555_v3  ;;  %7906 = vmatprep.subr.bf16.mxu0 %v8556_v7  ;;  %v8596_v7 = vld [vmem:[%s10395_s1 + $0xc70] sm:$0xff]  }
 0x17b   : > { %v7604_v62 = vpop.f32.mrb[16].mxu0  ;;  %7928 = vmatprep.subr.bf16.mxu1 %v8557_v10  ;;  %v8599_v10 = vld [vmem:[%s10395_s1 + $0xcb0] sm:$0xff]  }
 0x17c   : > { %v7626_v0 = vpop.f32.mrb[16].mxu1  ;;  %v7605_v2 = vpop.f32.mrb[17].mxu0 }
 0x17d   : > { %v7606_v4 = vadd.f32 %v7605_v2, %v7604_v62  ;;  %v7627_v5 = vpop.f32.mrb[17].mxu1  ;;  %v7607_v8 = vpop.f32.mrb[18].mxu0  ;;  %7907 = vmatpush3.bf16.msra.mxu0 %v8558_v12  ;;  %v8601_v12 = vld [vmem:[%s10395_s1 + $0xcf8] sm:$0xff]  }
 0x17e   : > { %v7628_v6 = vadd.f32 %v7627_v5, %v7626_v0  ;;  %v7629_v11 = vpop.f32.mrb[18].mxu1  ;;  %v7608_v13 = vpop.f32.mrb[19].mxu0  ;;  %7929 = vmatpush3.bf16.msra.mxu1 %v8559_v15  ;;  %7908 = vmatprep.subr.bf16.mxu0 %v8560_v17  ;;  %v8597_v8 = vld [vmem:[%s10395_s1 + $0xcf0] sm:$0xff]   ;;  %v4480_v15 = vld [vmem:[%s8866_s6] sm:$0x88] }
 0x17f   : > { %v2769_v9 = vadd.f32 %v7606_v4, %v9842_v27  ;;  %v7630_v16 = vpop.f32.mrb[19].mxu1  ;;  %7930 = vmatprep.subr.bf16.mxu1 %v8561_v18  ;;  %v6876_v27 = vcombine.high %v3060_v25, %v3060_v25  ;;  %v8594_v4 = vld [vmem:[%s10395_s1 + $0xc28] sm:$0xff]   ;;  %v8600_v11 = vld [vmem:[%s10395_s1 + $0xc78] sm:$0xff]  }
 0x180   : > { %v8602_v13 = vld [vmem:[%s10395_s1 + $0xc38] sm:$0xff]   ;;  %v4488_v16 = vld [vmem:[%s8866_s6 + $0x40] sm:$0x11]  ;;  %v4481_v17 = vld [vmem:[%s8866_s6 + $0x8] sm:$0x88] }
 0x181   : > { %v9937_v14 = vadd.f32 %v7628_v6, %v2769_v9  ;;  %7909 = vmatpush3.bf16.msra.mxu0 %v8562_v19  ;;  %v3372_v33 = vrot.slane %v6876_v27, 2  ;;  %v8595_v6 = vld [vmem:[%s10395_s1 + $0xca8] sm:$0xff]   ;;  %v8598_v9 = vld [vmem:[%s10395_s1 + $0xc30] sm:$0xff]   ;;  %v7263_v19 = vcombine.low %v4480_v15, %v4488_v16 }
 0x182   : > { %7931 = vmatpush3.bf16.msra.mxu1 %v8563_v20  ;;  %7910 = vmatprep.subr.bf16.mxu0 %v8564_v21  ;;  %v4489_v18 = vld [vmem:[%s8866_s6 + $0x48] sm:$0x11]  ;;  %v7264_v20 = vcombine.high %v4480_v15, %v4488_v16  ;;  %v8637_v16 = vld [vmem:[%s10395_s1 + $0xec0] sm:$0xff]  }
 0x183   : > { %7932 = vmatprep.subr.bf16.mxu1 %v8565_v22  ;;  %4431 = vmatprep.mubr.bf16.mxu0 %v3372_v33  ;;  %v7265_v21 = vcombine.low %v4481_v17, %v4489_v18  ;;  %v7266_v22 = vcombine.high %v4481_v17, %v4489_v18  ;;  %v4817_v25 = vrot.slane %v7263_v19, 3  ;;  %v8610_v33 = vld [vmem:[%s10395_s1 + $0xd08] sm:$0xff]  }
 0x184   : > { %v4818_v26 = vrot.slane %v7264_v20, 3  ;;  %v8638_v20 = vld [vmem:[%s10395_s1 + $0xe00] sm:$0xff]  }
 0x185   : > { %7911 = vmatpush3.bf16.msra.mxu0 %v8566_v23  ;;  %v8604_v23 = vld [vmem:[%s10395_s1 + $0xd40] sm:$0xff]   ;;  %v4819_v27 = vrot.slane %v7265_v21, 3  ;;  %v4820_v28 = vrot.slane %v7266_v22, 3 }
 0x186   : > { %7933 = vmatpush3.bf16.msra.mxu1 %v8567_v24  ;;  %7940 = vmatprep.subr.bf16.mxu0 %v8572_v31  ;;  %v8605_v24 = vld [vmem:[%s10395_s1 + $0xdc0] sm:$0xff]   ;;  %v8608_v31 = vld [vmem:[%s10395_s1 + $0xd48] sm:$0xff]  }
 0x187   : > { %7962 = vmatprep.subr.bf16.mxu1 %v8573_v34  ;;  %v8611_v34 = vld [vmem:[%s10395_s1 + $0xd88] sm:$0xff]   ;;  %v8639_v22 = vld [vmem:[%s10395_s1 + $0xe80] sm:$0xff]  }
 0x188   : > { %4432 = vmatmul.mubr.bf16.vlgmr.msra.gmra.mrb[44].mxu0 %v3371_v32  ;;  %v8609_v32 = vld [vmem:[%s10395_s1 + $0xdc8] sm:$0xff]  }
 0x189   : > { %4472 = vmatmul.mubr.bf16.vlgmr.msra.gmra.mrb[44].mxu1 %v3373_v36  ;;  %7941 = vmatpush3.bf16.msra.mxu0 %v8574_v35  ;;  %v8612_v35 = vld [vmem:[%s10395_s1 + $0xd50] sm:$0xff]  }
 0x18a   : > { %7963 = vmatpush3.bf16.msra.mxu1 %v8575_v38  ;;  %7942 = vmatprep.subr.bf16.mxu0 %v8576_v39  ;;  %v8613_v36 = vld [vmem:[%s10395_s1 + $0xdd0] sm:$0xff]   ;;  %v8616_v39 = vld [vmem:[%s10395_s1 + $0xd58] sm:$0xff]  }
 0x18b   : > { %7964 = vmatprep.subr.bf16.mxu1 %v8577_v40  ;;  %5649 = vmatprep.mubr.bf16.mxu0 %v4818_v26  ;;  %v8615_v38 = vld [vmem:[%s10395_s1 + $0xd90] sm:$0xff]   ;;  %v8617_v40 = vld [vmem:[%s10395_s1 + $0xdd8] sm:$0xff]   ;;  %v8643_v26 = vld [vmem:[%s10395_s1 + $0xe88] sm:$0xff]  }
 0x18c   : > { %5689 = vmatprep.mubr.bf16.mxu1 %v4820_v28  ;;  %v8645_v28 = vld [vmem:[%s10395_s1 + $0xed0] sm:$0xff]  }
 0x18d   : > { %7943 = vmatpush3.bf16.msra.mxu0 %v8578_v41  ;;  %v8618_v41 = vld [vmem:[%s10395_s1 + $0xd18] sm:$0xff]  }
 0x18e   : > { %7965 = vmatpush3.bf16.msra.mxu1 %v8579_v42  ;;  %7944 = vmatprep.subr.bf16.mxu0 %v8580_v43  ;;  %v8619_v43 = vld [vmem:[%s10395_s1 + $0xd98] sm:$0xff]  }
 0x18f   : > { %7966 = vmatprep.subr.bf16.mxu1 %v8581_v44 }
 0x191   : > { %7945 = vmatpush3.bf16.msra.mxu0 %v8582_v45  ;;  %v8620_v45 = vld [vmem:[%s10395_s1 + $0xd60] sm:$0xff]  }
 0x192   : > { %7967 = vmatpush3.bf16.msra.mxu1 %v8583_v46  ;;  %7946 = vmatprep.subr.bf16.mxu0 %v8584_v47  ;;  %v8621_v47 = vld [vmem:[%s10395_s1 + $0xde0] sm:$0xff]  }
 0x193   : > { %7968 = vmatprep.subr.bf16.mxu1 %v8585_v48 }
 0x195   : > { %7947 = vmatpush3.bf16.msra.mxu0 %v8586_v49 }
 0x196   : > { %7969 = vmatpush3.bf16.msra.mxu1 %v8587_v50  ;;  %7948 = vmatprep.subr.bf16.mxu0 %v8588_v52  ;;  %v8622_v50 = vld [vmem:[%s10395_s1 + $0xd20] sm:$0xff]  }
 0x197   : > { %7970 = vmatprep.subr.bf16.mxu1 %v8589_v54 }
 0x199   : > { %7949 = vmatpush3.bf16.msra.mxu0 %v8590_v56  ;;  %v8624_v56 = vld [vmem:[%s10395_s1 + $0xd68] sm:$0xff]  }
 0x19a   : > { %7971 = vmatpush3.bf16.msra.mxu1 %v8591_v59  ;;  %7950 = vmatprep.subr.bf16.mxu0 %v8592_v63  ;;  %v8625_v59 = vld [vmem:[%s10395_s1 + $0xde8] sm:$0xff]   ;;  %v8628_v63 = vld [vmem:[%s10395_s1 + $0xd70] sm:$0xff]  }
 0x19b   : > { %v7648_v51 = vpop.f32.mrb[20].mxu0  ;;  %7972 = vmatprep.subr.bf16.mxu1 %v8593_v1  ;;  %v8630_v1 = vld [vmem:[%s10395_s1 + $0xd30] sm:$0xff]  }
 0x19c   : > { %v7670_v53 = vpop.f32.mrb[20].mxu1  ;;  %v7649_v55 = vpop.f32.mrb[21].mxu0 }
 0x19d   : > { %v7650_v57 = vadd.f32 %v7649_v55, %v7648_v51  ;;  %v7671_v58 = vpop.f32.mrb[21].mxu1  ;;  %v7651_v61 = vpop.f32.mrb[22].mxu0  ;;  %7951 = vmatpush3.bf16.msra.mxu0 %v8594_v4  ;;  %v8633_v4 = vld [vmem:[%s10395_s1 + $0xdf8] sm:$0xff]  }
 0x19e   : > { %v7672_v60 = vadd.f32 %v7671_v58, %v7670_v53  ;;  %v7673_v0 = vpop.f32.mrb[22].mxu1  ;;  %v7652_v2 = vpop.f32.mrb[23].mxu0  ;;  %7973 = vmatpush3.bf16.msra.mxu1 %v8595_v6  ;;  %7952 = vmatprep.subr.bf16.mxu0 %v8596_v7  ;;  %v8623_v53 = vld [vmem:[%s10395_s1 + $0xda0] sm:$0xff]   ;;  %v8626_v61 = vld [vmem:[%s10395_s1 + $0xd28] sm:$0xff]   ;;  %v8635_v6 = vld [vmem:[%s10395_s1 + $0xdb8] sm:$0xff]  }
 0x19f   : > { %v2849_v62 = vadd.f32 %v7650_v57, %v9937_v14  ;;  %v7674_v5 = vpop.f32.mrb[23].mxu1  ;;  %7974 = vmatprep.subr.bf16.mxu1 %v8597_v8  ;;  %v8603_v14 = vld [vmem:[%s10395_s1 + $0xcb8] sm:$0xff]   ;;  %v8629_v0 = vld [vmem:[%s10395_s1 + $0xdf0] sm:$0xff]  }
 0x1a0   : > { %v8631_v2 = vld [vmem:[%s10395_s1 + $0xdb0] sm:$0xff]   ;;  %v8634_v5 = vld [vmem:[%s10395_s1 + $0xd38] sm:$0xff]  }
 0x1a1   : > { %v10035_v3 = vadd.f32 %v7672_v60, %v2849_v62  ;;  %7953 = vmatpush3.bf16.msra.mxu0 %v8598_v9  ;;  %v8627_v62 = vld [vmem:[%s10395_s1 + $0xda8] sm:$0xff]   ;;  %v4482_v7 = vld [vmem:[%s8866_s6 + $0x10] sm:$0x88]  ;;  %v4490_v8 = vld [vmem:[%s8866_s6 + $0x50] sm:$0x11] }
 0x1a2   : > { %7975 = vmatpush3.bf16.msra.mxu1 %v8599_v10  ;;  %7954 = vmatprep.subr.bf16.mxu0 %v8600_v11  ;;  %v4483_v9 = vld [vmem:[%s8866_s6 + $0x18] sm:$0x88]  ;;  %v4491_v10 = vld [vmem:[%s8866_s6 + $0x58] sm:$0x11]  ;;  %v7267_v11 = vcombine.low %v4482_v7, %v4490_v8 }
 0x1a3   : > { %7976 = vmatprep.subr.bf16.mxu1 %v8601_v12  ;;  %v7268_v12 = vcombine.high %v4482_v7, %v4490_v8  ;;  %v7270_v15 = vcombine.high %v4483_v9, %v4491_v10  ;;  %v8668_v7 = vld [vmem:[%s10395_s1 + $0xf40] sm:$0xff]  }
 0x1a4   : > { %v4821_v17 = vrot.slane %v7267_v11, 3  ;;  %v8670_v11 = vld [vmem:[%s10395_s1 + $0xf00] sm:$0xff]  }
 0x1a5   : > { %7955 = vmatpush3.bf16.msra.mxu0 %v8602_v13  ;;  %v7269_v13 = vcombine.low %v4483_v9, %v4491_v10  ;;  %v4822_v18 = vrot.slane %v7268_v12, 3  ;;  %v4824_v21 = vrot.slane %v7270_v15, 3  ;;  %v8669_v10 = vld [vmem:[%s10395_s1 + $0xfc0] sm:$0xff]   ;;  %v8672_v15 = vld [vmem:[%s10395_s1 + $0xf48] sm:$0xff]  }
 0x1a6   : > { %7977 = vmatpush3.bf16.msra.mxu1 %v8603_v14  ;;  %7984 = vmatprep.subr.bf16.mxu0 %v8604_v23  ;;  %v8636_v14 = vld [vmem:[%s10395_s1 + $0xe40] sm:$0xff]   ;;  %v8640_v23 = vld [vmem:[%s10395_s1 + $0xe48] sm:$0xff]  }
 0x1a7   : > { %8006 = vmatprep.subr.bf16.mxu1 %v8605_v24  ;;  %v4823_v19 = vrot.slane %v7269_v13, 3  ;;  %v8641_v24 = vld [vmem:[%s10395_s1 + $0xec8] sm:$0xff]  }
 0x1a8   : > { %5650 = vmatmul.mubr.bf16.vlgmr.msra.gmra.mrb[48].mxu0 %v4817_v25  ;;  %v8642_v25 = vld [vmem:[%s10395_s1 + $0xe08] sm:$0xff]  }
 0x1a9   : > { %5690 = vmatmul.mubr.bf16.vlgmr.msra.gmra.mrb[48].mxu1 %v4819_v27  ;;  %7985 = vmatpush3.bf16.msra.mxu0 %v8606_v29  ;;  %v8644_v27 = vld [vmem:[%s10395_s1 + $0xe50] sm:$0xff]  }
 0x1aa   : > { %8007 = vmatpush3.bf16.msra.mxu1 %v8607_v30  ;;  %7986 = vmatprep.subr.bf16.mxu0 %v8608_v31  ;;  %v8646_v29 = vld [vmem:[%s10395_s1 + $0xe10] sm:$0xff]   ;;  %v8648_v31 = vld [vmem:[%s10395_s1 + $0xe58] sm:$0xff]  }
 0x1ab   : > { %8008 = vmatprep.subr.bf16.mxu1 %v8609_v32  ;;  %5729 = vmatprep.mubr.bf16.mxu0 %v4822_v18  ;;  %v8647_v30 = vld [vmem:[%s10395_s1 + $0xe90] sm:$0xff]   ;;  %v8649_v32 = vld [vmem:[%s10395_s1 + $0xed8] sm:$0xff]   ;;  %v8675_v18 = vld [vmem:[%s10395_s1 + $0xf88] sm:$0xff]  }
 0x1ac   : > { %5769 = vmatprep.mubr.bf16.mxu1 %v4824_v21  ;;  %v8678_v21 = vld [vmem:[%s10395_s1 + $0xf10] sm:$0xff]  }
 0x1ad   : > { %7987 = vmatpush3.bf16.msra.mxu0 %v8610_v33 }
 0x1ae   : > { %8009 = vmatpush3.bf16.msra.mxu1 %v8611_v34  ;;  %7988 = vmatprep.subr.bf16.mxu0 %v8612_v35  ;;  %v8650_v34 = vld [vmem:[%s10395_s1 + $0xe18] sm:$0xff]  }
 0x1af   : > { %8010 = vmatprep.subr.bf16.mxu1 %v8613_v36  ;;  %v8651_v36 = vld [vmem:[%s10395_s1 + $0xe98] sm:$0xff]  }
 0x1b1   : > { %7989 = vmatpush3.bf16.msra.mxu0 %v8614_v37 }
 0x1b2   : > { %8011 = vmatpush3.bf16.msra.mxu1 %v8615_v38  ;;  %7990 = vmatprep.subr.bf16.mxu0 %v8616_v39  ;;  %v8652_v38 = vld [vmem:[%s10395_s1 + $0xe60] sm:$0xff]  }
 0x1b3   : > { %8012 = vmatprep.subr.bf16.mxu1 %v8617_v40 }
 0x1b5   : > { %7991 = vmatpush3.bf16.msra.mxu0 %v8618_v41  ;;  %v8653_v41 = vld [vmem:[%s10395_s1 + $0xee0] sm:$0xff]  }
 0x1b6   : > { %8013 = vmatpush3.bf16.msra.mxu1 %v8619_v43  ;;  %7992 = vmatprep.subr.bf16.mxu0 %v8620_v45 }
 0x1b7   : > { %8014 = vmatprep.subr.bf16.mxu1 %v8621_v47  ;;  %v8655_v47 = vld [vmem:[%s10395_s1 + $0xea0] sm:$0xff]  }
 0x1b9   : > { %7993 = vmatpush3.bf16.msra.mxu0 %v8622_v50  ;;  %v8656_v50 = vld [vmem:[%s10395_s1 + $0xe68] sm:$0xff]  }
 0x1ba   : > { %8015 = vmatpush3.bf16.msra.mxu1 %v8623_v53  ;;  %7994 = vmatprep.subr.bf16.mxu0 %v8624_v56  ;;  %v8658_v53 = vld [vmem:[%s10395_s1 + $0xe28] sm:$0xff]   ;;  %v8661_v56 = vld [vmem:[%s10395_s1 + $0xef0] sm:$0xff]  }
 0x1bb   : > { %v7692_v42 = vpop.f32.mrb[24].mxu0  ;;  %8016 = vmatprep.subr.bf16.mxu1 %v8625_v59  ;;  %v8664_v59 = vld [vmem:[%s10395_s1 + $0xe78] sm:$0xff]  }
 0x1bc   : > { %v7714_v44 = vpop.f32.mrb[24].mxu1  ;;  %v7693_v46 = vpop.f32.mrb[25].mxu0 }
 0x1bd   : > { %v7694_v48 = vadd.f32 %v7693_v46, %v7692_v42  ;;  %v7715_v49 = vpop.f32.mrb[25].mxu1  ;;  %v7695_v52 = vpop.f32.mrb[26].mxu0  ;;  %7995 = vmatpush3.bf16.msra.mxu0 %v8626_v61  ;;  %v8666_v61 = vld [vmem:[%s10395_s1 + $0xe38] sm:$0xff]  }
 0x1be   : > { %v7716_v51 = vadd.f32 %v7715_v49, %v7714_v44  ;;  %v7717_v55 = vpop.f32.mrb[26].mxu1  ;;  %v7696_v57 = vpop.f32.mrb[27].mxu0  ;;  %8017 = vmatpush3.bf16.msra.mxu1 %v8627_v62  ;;  %7996 = vmatprep.subr.bf16.mxu0 %v8628_v63  ;;  %v8654_v44 = vld [vmem:[%s10395_s1 + $0xe20] sm:$0xff]   ;;  %v8657_v52 = vld [vmem:[%s10395_s1 + $0xee8] sm:$0xff]   ;;  %v8667_v62 = vld [vmem:[%s10395_s1 + $0xeb8] sm:$0xff]  }
 0x1bf   : > { %v2929_v54 = vadd.f32 %v7694_v48, %v10035_v3  ;;  %v7718_v60 = vpop.f32.mrb[27].mxu1  ;;  %8018 = vmatprep.subr.bf16.mxu1 %v8629_v0  ;;  %v8632_v3 = vld [vmem:[%s10395_s1 + $0xd78] sm:$0xff]   ;;  %v8660_v55 = vld [vmem:[%s10395_s1 + $0xe70] sm:$0xff]   ;;  %v4484_v63 = vld [vmem:[%s8866_s6 + $0x20] sm:$0x88] }
 0x1c0   : > { %v8662_v57 = vld [vmem:[%s10395_s1 + $0xe30] sm:$0xff]   ;;  %v8665_v60 = vld [vmem:[%s10395_s1 + $0xef8] sm:$0xff]   ;;  %v4492_v0 = vld [vmem:[%s8866_s6 + $0x60] sm:$0x11] }
 0x1c1   : > { %v10135_v58 = vadd.f32 %v7716_v51, %v2929_v54  ;;  %7997 = vmatpush3.bf16.msra.mxu0 %v8630_v1  ;;  %v8659_v54 = vld [vmem:[%s10395_s1 + $0xea8] sm:$0xff]   ;;  %v7271_v1 = vcombine.low %v4484_v63, %v4492_v0 }
 0x1c2   : > { %8019 = vmatpush3.bf16.msra.mxu1 %v8631_v2  ;;  %7998 = vmatprep.subr.bf16.mxu0 %v8632_v3  ;;  %v7272_v2 = vcombine.high %v4484_v63, %v4492_v0  ;;  %v4485_v3 = vld [vmem:[%s8866_s6 + $0x28] sm:$0x88] }
 0x1c3   : > { %8020 = vmatprep.subr.bf16.mxu1 %v8633_v4  ;;  %v4493_v4 = vld [vmem:[%s8866_s6 + $0x68] sm:$0x11]  ;;  %v4825_v8 = vrot.slane %v7271_v1, 3 }
 0x1c4   : > { %v4826_v9 = vrot.slane %v7272_v2, 3 }
 0x1c5   : > { %7999 = vmatpush3.bf16.msra.mxu0 %v8634_v5  ;;  %v7273_v5 = vcombine.low %v4485_v3, %v4493_v4 }
 0x1c6   : > { %8021 = vmatpush3.bf16.msra.mxu1 %v8635_v6  ;;  %8028 = vmatprep.subr.bf16.mxu0 %v8636_v14  ;;  %v7274_v6 = vcombine.high %v4485_v3, %v4493_v4  ;;  %v8671_v14 = vld [vmem:[%s10395_s1 + $0xf80] sm:$0xff]  }
 0x1c7   : > { %8050 = vmatprep.subr.bf16.mxu1 %v8637_v16  ;;  %v4827_v12 = vrot.slane %v7273_v5, 3  ;;  %v8673_v16 = vld [vmem:[%s10395_s1 + $0xfc8] sm:$0xff]  }
 0x1c8   : > { %5730 = vmatmul.mubr.bf16.vlgmr.msra.gmra.mrb[52].mxu0 %v4821_v17  ;;  %v4828_v13 = vrot.slane %v7274_v6, 3  ;;  %v8674_v17 = vld [vmem:[%s10395_s1 + $0xf08] sm:$0xff]  }
 0x1c9   : > { %5770 = vmatmul.mubr.bf16.vlgmr.msra.gmra.mrb[52].mxu1 %v4823_v19  ;;  %8029 = vmatpush3.bf16.msra.mxu0 %v8638_v20  ;;  %v8676_v19 = vld [vmem:[%s10395_s1 + $0xf50] sm:$0xff]  }
 0x1ca   : > { %8051 = vmatpush3.bf16.msra.mxu1 %v8639_v22  ;;  %8030 = vmatprep.subr.bf16.mxu0 %v8640_v23  ;;  %v8677_v20 = vld [vmem:[%s10395_s1 + $0xfd0] sm:$0xff]   ;;  %v8680_v23 = vld [vmem:[%s10395_s1 + $0xf58] sm:$0xff]  }
 0x1cb   : > { %8052 = vmatprep.subr.bf16.mxu1 %v8641_v24  ;;  %5809 = vmatprep.mubr.bf16.mxu0 %v4826_v9  ;;  %v8679_v22 = vld [vmem:[%s10395_s1 + $0xf90] sm:$0xff]   ;;  %v8681_v24 = vld [vmem:[%s10395_s1 + $0xfd8] sm:$0xff]  }
 0x1cc   : > { %5849 = vmatprep.mubr.bf16.mxu1 %v4828_v13 }
 0x1cd   : > { %8031 = vmatpush3.bf16.msra.mxu0 %v8642_v25  ;;  %v8682_v25 = vld [vmem:[%s10395_s1 + $0xf18] sm:$0xff]  }
 0x1ce   : > { %8053 = vmatpush3.bf16.msra.mxu1 %v8643_v26  ;;  %8032 = vmatprep.subr.bf16.mxu0 %v8644_v27  ;;  %v8683_v26 = vld [vmem:[%s10395_s1 + $0xf98] sm:$0xff]  }
 0x1cf   : > { %8054 = vmatprep.subr.bf16.mxu1 %v8645_v28  ;;  %v8684_v28 = vld [vmem:[%s10395_s1 + $0xf60] sm:$0xff]  }
 0x1d1   : > { %8033 = vmatpush3.bf16.msra.mxu0 %v8646_v29 }
 0x1d2   : > { %8055 = vmatpush3.bf16.msra.mxu1 %v8647_v30  ;;  %8034 = vmatprep.subr.bf16.mxu0 %v8648_v31  ;;  %v8685_v30 = vld [vmem:[%s10395_s1 + $0xfe0] sm:$0xff]  }
 0x1d3   : > { %8056 = vmatprep.subr.bf16.mxu1 %v8649_v32  ;;  %v8686_v32 = vld [vmem:[%s10395_s1 + $0xf20] sm:$0xff]  }
 0x1d5   : > { %8035 = vmatpush3.bf16.msra.mxu0 %v8650_v34 }
 0x1d6   : > { %8057 = vmatpush3.bf16.msra.mxu1 %v8651_v36  ;;  %8036 = vmatprep.subr.bf16.mxu0 %v8652_v38  ;;  %v8688_v38 = vld [vmem:[%s10395_s1 + $0xf68] sm:$0xff]  }
 0x1d7   : > { %8058 = vmatprep.subr.bf16.mxu1 %v8653_v41  ;;  %v8689_v41 = vld [vmem:[%s10395_s1 + $0xfe8] sm:$0xff]  }
 0x1d9   : > { %8037 = vmatpush3.bf16.msra.mxu0 %v8654_v44 }
 0x1da   : > { %8059 = vmatpush3.bf16.msra.mxu1 %v8655_v47  ;;  %8038 = vmatprep.subr.bf16.mxu0 %v8656_v50  ;;  %v8693_v47 = vld [vmem:[%s10395_s1 + $0xff0] sm:$0xff]  }
 0x1db   : > { %v7736_v33 = vpop.f32.mrb[28].mxu0  ;;  %8060 = vmatprep.subr.bf16.mxu1 %v8657_v52  ;;  %v8695_v50 = vld [vmem:[%s10395_s1 + $0xfb0] sm:$0xff]   ;;  %v8697_v52 = vld [vmem:[%s10395_s1 + $0xff8] sm:$0xff]  }
 0x1dc   : > { %v7758_v35 = vpop.f32.mrb[28].mxu1  ;;  %v7737_v37 = vpop.f32.mrb[29].mxu0 }
 0x1dd   : > { %v7738_v39 = vadd.f32 %v7737_v37, %v7736_v33  ;;  %v7759_v40 = vpop.f32.mrb[29].mxu1  ;;  %v7739_v43 = vpop.f32.mrb[30].mxu0  ;;  %8039 = vmatpush3.bf16.msra.mxu0 %v8658_v53  ;;  %v8698_v53 = vld [vmem:[%s10395_s1 + $0xf38] sm:$0xff]  }
 0x1de   : > { %v7760_v42 = vadd.f32 %v7759_v40, %v7758_v35  ;;  %v7761_v46 = vpop.f32.mrb[30].mxu1  ;;  %v7740_v48 = vpop.f32.mrb[31].mxu0  ;;  %8061 = vmatpush3.bf16.msra.mxu1 %v8659_v54  ;;  %8040 = vmatprep.subr.bf16.mxu0 %v8660_v55  ;;  %v8687_v35 = vld [vmem:[%s10395_s1 + $0xfa0] sm:$0xff]   ;;  %v8690_v43 = vld [vmem:[%s10395_s1 + $0xf28] sm:$0xff]   ;;  %v8699_v54 = vld [vmem:[%s10395_s1 + $0xfb8] sm:$0xff]  }
 0x1df   : > { %v3009_v45 = vadd.f32 %v7738_v39, %v10135_v58  ;;  %v7762_v51 = vpop.f32.mrb[31].mxu1  ;;  %8062 = vmatprep.subr.bf16.mxu1 %v8661_v56  ;;  %v8663_v58 = vld [vmem:[%s10395_s1 + $0xeb0] sm:$0xff]  }
 0x1e0   : > { %v8692_v46 = vld [vmem:[%s10395_s1 + $0xf70] sm:$0xff]   ;;  %v8696_v51 = vld [vmem:[%s10395_s1 + $0xf78] sm:$0xff]  }
 0x1e1   : > { %v10235_v49 = vadd.f32 %v7760_v42, %v3009_v45  ;;  %8041 = vmatpush3.bf16.msra.mxu0 %v8662_v57  ;;  %v8691_v45 = vld [vmem:[%s10395_s1 + $0xfa8] sm:$0xff]   ;;  %v8694_v48 = vld [vmem:[%s10395_s1 + $0xf30] sm:$0xff]   ;;  %v4487_v57 = vld [vmem:[%s8866_s6 + $0x38] sm:$0x88] }
 0x1e2   : > { %8063 = vmatpush3.bf16.msra.mxu1 %v8663_v58  ;;  %8042 = vmatprep.subr.bf16.mxu0 %v8664_v59  ;;  %v4486_v55 = vld [vmem:[%s8866_s6 + $0x30] sm:$0x88]  ;;  %v4494_v56 = vld [vmem:[%s8866_s6 + $0x70] sm:$0x11] }
 0x1e3   : > { %8064 = vmatprep.subr.bf16.mxu1 %v8665_v60  ;;  %v7275_v58 = vcombine.low %v4486_v55, %v4494_v56  ;;  %v7276_v59 = vcombine.high %v4486_v55, %v4494_v56  ;;  %v4495_v60 = vld [vmem:[%s8866_s6 + $0x78] sm:$0x11] }
 0x1e5   : > { %8043 = vmatpush3.bf16.msra.mxu0 %v8666_v61  ;;  %v7277_v61 = vcombine.low %v4487_v57, %v4495_v60  ;;  %v4829_v63 = vrot.slane %v7275_v58, 3  ;;  %v4830_v0 = vrot.slane %v7276_v59, 3 }
 0x1e6   : > { %8065 = vmatpush3.bf16.msra.mxu1 %v8667_v62  ;;  %8072 = vmatprep.subr.bf16.mxu0 %v8668_v7  ;;  %v7278_v62 = vcombine.high %v4487_v57, %v4495_v60 }
 0x1e7   : > { %8094 = vmatprep.subr.bf16.mxu1 %v8669_v10  ;;  %v4831_v1 = vrot.slane %v7277_v61, 3 }
 0x1e8   : > { %5810 = vmatmul.mubr.bf16.vlgmr.msra.gmra.mrb[56].mxu0 %v4825_v8  ;;  %v4832_v2 = vrot.slane %v7278_v62, 3 }
 0x1e9   : > { %5850 = vmatmul.mubr.bf16.vlgmr.msra.gmra.mrb[56].mxu1 %v4827_v12  ;;  %8073 = vmatpush3.bf16.msra.mxu0 %v8670_v11 }
 0x1ea   : > { %8095 = vmatpush3.bf16.msra.mxu1 %v8671_v14  ;;  %8074 = vmatprep.subr.bf16.mxu0 %v8672_v15 }
 0x1eb   : > { %8096 = vmatprep.subr.bf16.mxu1 %v8673_v16  ;;  %5889 = vmatprep.mubr.bf16.mxu0 %v4830_v0 }
 0x1ec   : > { %5929 = vmatprep.mubr.bf16.mxu1 %v4832_v2 }
 0x1ed   : > { %8075 = vmatpush3.bf16.msra.mxu0 %v8674_v17 }
 0x1ee   : > { %8097 = vmatpush3.bf16.msra.mxu1 %v8675_v18  ;;  %8076 = vmatprep.subr.bf16.mxu0 %v8676_v19 }
 0x1ef   : > { %8098 = vmatprep.subr.bf16.mxu1 %v8677_v20 }
 0x1f1   : > { %8077 = vmatpush3.bf16.msra.mxu0 %v8678_v21 }
 0x1f2   : > { %8099 = vmatpush3.bf16.msra.mxu1 %v8679_v22  ;;  %8078 = vmatprep.subr.bf16.mxu0 %v8680_v23 }
 0x1f3   : > { %8100 = vmatprep.subr.bf16.mxu1 %v8681_v24 }
 0x1f5   : > { %8079 = vmatpush3.bf16.msra.mxu0 %v8682_v25 }
 0x1f6   : > { %8101 = vmatpush3.bf16.msra.mxu1 %v8683_v26  ;;  %8080 = vmatprep.subr.bf16.mxu0 %v8684_v28 }
 0x1f7   : > { %8102 = vmatprep.subr.bf16.mxu1 %v8685_v30 }
 0x1f9   : > { %8081 = vmatpush3.bf16.msra.mxu0 %v8686_v32 }
 0x1fa   : > { %8103 = vmatpush3.bf16.msra.mxu1 %v8687_v35  ;;  %8082 = vmatprep.subr.bf16.mxu0 %v8688_v38 }
 0x1fb   : > { %v7780_v27 = vpop.f32.mrb[32].mxu0  ;;  %8104 = vmatprep.subr.bf16.mxu1 %v8689_v41 }
 0x1fc   : > { %v7802_v29 = vpop.f32.mrb[32].mxu1  ;;  %v7781_v31 = vpop.f32.mrb[33].mxu0 }
 0x1fd   : > { %v7782_v33 = vadd.f32 %v7781_v31, %v7780_v27  ;;  %v7803_v34 = vpop.f32.mrb[33].mxu1  ;;  %v7783_v37 = vpop.f32.mrb[34].mxu0  ;;  %8083 = vmatpush3.bf16.msra.mxu0 %v8690_v43 }
 0x1fe   : > { %v7804_v36 = vadd.f32 %v7803_v34, %v7802_v29  ;;  %v7805_v39 = vpop.f32.mrb[34].mxu1  ;;  %v7784_v42 = vpop.f32.mrb[35].mxu0  ;;  %8105 = vmatpush3.bf16.msra.mxu1 %v8691_v45  ;;  %8084 = vmatprep.subr.bf16.mxu0 %v8692_v46 }
 0x1ff   : > { %v7806_v44 = vpop.f32.mrb[35].mxu1  ;;  %8106 = vmatprep.subr.bf16.mxu1 %v8693_v47 }
 0x200   : > { %v4234_v40 = vadd.f32 %v7804_v36, %v7782_v33 }
 0x201   : > { %8085 = vmatpush3.bf16.msra.mxu0 %v8694_v48 }
 0x202   : > { %8107 = vmatpush3.bf16.msra.mxu1 %v8695_v50  ;;  %8086 = vmatprep.subr.bf16.mxu0 %v8696_v51 }
 0x203   : > { %8108 = vmatprep.subr.bf16.mxu1 %v8697_v52 }
 0x205   : > { %8087 = vmatpush3.bf16.msra.mxu0 %v8698_v53 }
 0x206   : > { %8109 = vmatpush3.bf16.msra.mxu1 %v8699_v54 }
 0x208   : > { %5890 = vmatmul.mubr.bf16.vlgmr.msra.gmra.mrb[60].mxu0 %v4829_v63 }
 0x209   : > { %5930 = vmatmul.mubr.bf16.vlgmr.msra.gmra.mrb[60].mxu1 %v4831_v1 }
 0x21b   : > { %v7824_v3 = vpop.f32.mrb[36].mxu0 }
 0x21c   : > { %v7846_v4 = vpop.f32.mrb[36].mxu1  ;;  %v7825_v5 = vpop.f32.mrb[37].mxu0 }
 0x21d   : > { %v7847_v6 = vpop.f32.mrb[37].mxu1  ;;  %v7826_v7 = vadd.f32 %v7825_v5, %v7824_v3  ;;  %v7827_v9 = vpop.f32.mrb[38].mxu0 }
 0x21e   : > { %v7848_v8 = vadd.f32 %v7847_v6, %v7846_v4  ;;  %v7849_v10 = vpop.f32.mrb[38].mxu1  ;;  %v7828_v11 = vpop.f32.mrb[39].mxu0 }
 0x21f   : > { %v7850_v12 = vpop.f32.mrb[39].mxu1  ;;  %v4274_v13 = vadd.f32 %v7826_v7, %v4234_v40 }
 0x221   : > { %v4314_v14 = vadd.f32 %v7848_v8, %v4274_v13 }
 0x23b   : > { %v7868_v15 = vpop.f32.mrb[40].mxu0 }
 0x23c   : > { %v7890_v16 = vpop.f32.mrb[40].mxu1  ;;  %v7869_v17 = vpop.f32.mrb[41].mxu0 }
 0x23d   : > { %v7870_v18 = vadd.f32 %v7869_v17, %v7868_v15  ;;  %v7891_v19 = vpop.f32.mrb[41].mxu1  ;;  %v7871_v20 = vpop.f32.mrb[42].mxu0 }
 0x23e   : > { %v7892_v21 = vadd.f32 %v7891_v19, %v7890_v16  ;;  %v7893_v22 = vpop.f32.mrb[42].mxu1  ;;  %v7872_v23 = vpop.f32.mrb[43].mxu0 }
 0x23f   : > { %v4354_v24 = vadd.f32 %v7870_v18, %v4314_v14  ;;  %v7894_v25 = vpop.f32.mrb[43].mxu1  ;;  %v7407_v23 = vld [vmem:[%s10396_s2] ss:$0 sm:$0xff] }
 0x241   : > { %v4394_v26 = vadd.f32 %v7892_v21, %v4354_v24 }
 0x25b   : > { %v7912_v27 = vpop.f32.mrb[44].mxu0 }
 0x25c   : > { %v7934_v28 = vpop.f32.mrb[44].mxu1  ;;  %v7913_v29 = vpop.f32.mrb[45].mxu0 }
 0x25d   : > { %v7914_v30 = vadd.f32 %v7913_v29, %v7912_v27  ;;  %v7935_v31 = vpop.f32.mrb[45].mxu1  ;;  %v7915_v32 = vpop.f32.mrb[46].mxu0 }
 0x25e   : > { %v7936_v33 = vadd.f32 %v7935_v31, %v7934_v28  ;;  %v7937_v34 = vpop.f32.mrb[46].mxu1  ;;  %v7916_v35 = vpop.f32.mrb[47].mxu0 }
 0x25f   : > { %v4434_v36 = vadd.f32 %v7914_v30, %v4394_v26  ;;  %v7938_v37 = vpop.f32.mrb[47].mxu1 }
 0x261   : > { %v4474_v38 = vadd.f32 %v7936_v33, %v4434_v36 }
 0x263   : > { %v4479_v39 = vadd.f32 %v4474_v38, %v10235_v49 }
 0x27b   : > { %v7956_v40 = vpop.f32.mrb[48].mxu0 }
 0x27c   : > { %v7978_v41 = vpop.f32.mrb[48].mxu1  ;;  %v7957_v42 = vpop.f32.mrb[49].mxu0 }
 0x27d   : > { %v7979_v43 = vpop.f32.mrb[49].mxu1  ;;  %v7958_v44 = vadd.f32 %v7957_v42, %v7956_v40  ;;  %v7959_v46 = vpop.f32.mrb[50].mxu0 }
 0x27e   : > { %v7980_v45 = vadd.f32 %v7979_v43, %v7978_v41  ;;  %v7981_v47 = vpop.f32.mrb[50].mxu1  ;;  %v7960_v48 = vpop.f32.mrb[51].mxu0 }
 0x27f   : > { %v7982_v50 = vpop.f32.mrb[51].mxu1 }
 0x280   : > { %v5692_v51 = vadd.f32 %v7980_v45, %v7958_v44 }
 0x29b   : > { %v8000_v52 = vpop.f32.mrb[52].mxu0 }
 0x29c   : > { %v8022_v53 = vpop.f32.mrb[52].mxu1  ;;  %v8001_v54 = vpop.f32.mrb[53].mxu0 }
 0x29d   : > { %v8002_v55 = vadd.f32 %v8001_v54, %v8000_v52  ;;  %v8023_v56 = vpop.f32.mrb[53].mxu1  ;;  %v8003_v57 = vpop.f32.mrb[54].mxu0 }
 0x29e   : > { %v8024_v58 = vadd.f32 %v8023_v56, %v8022_v53  ;;  %v8025_v59 = vpop.f32.mrb[54].mxu1  ;;  %v8004_v49 = vpop.f32.mrb[55].mxu0 }
 0x29f   : > { %v5732_v60 = vadd.f32 %v8002_v55, %v5692_v51  ;;  %v8026_v61 = vpop.f32.mrb[55].mxu1 }
 0x2a1   : > { %v5772_v62 = vadd.f32 %v8024_v58, %v5732_v60 }
 0x2bb   : > { %v8044_v63 = vpop.f32.mrb[56].mxu0 }
 0x2bc   : > { %v8066_v0 = vpop.f32.mrb[56].mxu1  ;;  %v8045_v1 = vpop.f32.mrb[57].mxu0 }
 0x2bd   : > { %v8046_v2 = vadd.f32 %v8045_v1, %v8044_v63  ;;  %v8067_v3 = vpop.f32.mrb[57].mxu1  ;;  %v8047_v4 = vpop.f32.mrb[58].mxu0 }
 0x2be   : > { %v8068_v5 = vadd.f32 %v8067_v3, %v8066_v0  ;;  %v8069_v6 = vpop.f32.mrb[58].mxu1  ;;  %v8048_v7 = vpop.f32.mrb[59].mxu0 }
 0x2bf   : > { %v5812_v8 = vadd.f32 %v8046_v2, %v5772_v62  ;;  %v8070_v9 = vpop.f32.mrb[59].mxu1 }
 0x2c1   : > { %v5852_v10 = vadd.f32 %v8068_v5, %v5812_v8 }
 0x2db   : > { %v8088_v11 = vpop.f32.mrb[60].mxu0 }
 0x2dc   : > { %v8110_v12 = vpop.f32.mrb[60].mxu1  ;;  %v8089_v13 = vpop.f32.mrb[61].mxu0 }
 0x2dd   : > { %v8090_v14 = vadd.f32 %v8089_v13, %v8088_v11  ;;  %v8111_v15 = vpop.f32.mrb[61].mxu1  ;;  %v8091_v16 = vpop.f32.mrb[62].mxu0 }
 0x2de   : > { %v8112_v17 = vadd.f32 %v8111_v15, %v8110_v12  ;;  %v8113_v18 = vpop.f32.mrb[62].mxu1  ;;  %v8092_v19 = vpop.f32.mrb[63].mxu0 }
 0x2df   : > { %v5892_v20 = vadd.f32 %v8090_v14, %v5852_v10  ;;  %v8114_v21 = vpop.f32.mrb[63].mxu1 }
 0x2e1   : > { %v5932_v22 = vadd.f32 %v8112_v17, %v5892_v20 }
 0x2e3   : > { %v5937_v24 = vadd.f32 %v5932_v22, %v4479_v39 }
 0x2e5   : > { %v5945_v25 = vadd.f32 %v7407_v23, %v5937_v24 }
 0x2e7   : > { %v7408_v26 = vmul.f32 -1.442695, %v5945_v25 }
 0x2e9   : > { %8700 = vpow2.f32 %v7408_v26 }
 0x2f3   : > { %v8701_v27 = vpop.eup %8700 }
 0x2f4   : > { %v5949_v28 = vadd.f32 1.0, %v8701_v27 }
 0x2f6   : > { %8702 = vrcp.f32 %v5949_v28 }
 0x300   : > { %v8703_v29 = vpop.eup %8702 }
 0x301   : > { %5953 = vst.msk [vmem:[%s219_s7] sm:$0xf] %vm5952_vm0, %v8703_v29 }
 0x302 PF: > { %s13_s14 = sadd.s32 1, %s8726_s14   ;;  %s10398_s12 = smov %s8722_s13 }
 0x303   : > { %p10_p5 = scmp.ge.s32.totalorder %s13_s14, 4   ;;  %s10399_s13 = smov %s10401_s15 }
 0x305   :  { %12 = sbr.rel (!%p10_p5) target bundleno = 2 (0x2), region = 71 }

</bundles_post_ra>
